<compile_context>
chip_gen: v7x
topology: tpu7x:2x2x1
jax: 0.10.0
libtpu: 0.0.40
codegen_flags: <defaults>
</compile_context>

<pallas_src>
import numpy as np

import jax
import jax.numpy as jnp
from jax.experimental import pallas as pl
from jax.experimental.pallas import tpu as pltpu


# ----------------------------------------------------------------------------
# The single fused kernel
# ----------------------------------------------------------------------------
def _cnn_fused_kernel(x_ref, wconv_ref, vecs_ref, consts_ref,
                      sel1_ref, sel3_ref, wfc_ref, out_ref):
    f32 = jnp.float32
    bf16 = jnp.bfloat16
    B = x_ref.shape[1] // 1024      # per-sample stride of the input layer

    # ---- helpers ------------------------------------------------------------
    def conv_relu(x, w, bias, k, pad, wp):
        # x: [Cin, B*stride] f32 (zero ring per sample), stride is a multiple
        # of 128 and >= wp*wp.  w: [Cout, k*k*Cin] bf16 (taps folded into K).
        # One MXU matmul per layer; cross-sample bleed of the lane shifts only
        # lands on ring/gap outputs, which are wiped downstream.
        cin, m = x.shape
        g = pad * wp + pad
        xb = x.astype(bf16)
        z = jnp.zeros((cin, g), bf16)
        xg = jnp.concatenate([z, xb, z], axis=1)
        pieces = []
        for di in range(k):
            for dj in range(k):
                s = (di - pad) * wp + (dj - pad)
                pieces.append(xg[:, g + s:g + s + m])
        im2col = jnp.concatenate(pieces, axis=0)                # [k*k*Cin, m]
        y = jnp.dot(w, im2col, preferred_element_type=f32)      # [Cout, m]
        return jnp.maximum(y + bias, 0.0)

    def pool_relayout(x, wp, stride_in, sel):
        # 2x2/2 max-pool of the valid region + scatter into the next layer's
        # zero-ring / zero-gap padded flat layout via one 0/1 selection matmul
        # per sample (shared sel, no batch broadcast).
        xb = x.astype(bf16)
        cm = jnp.maximum(xb[:, :-1], xb[:, 1:])
        rm = jnp.maximum(cm[:, :-wp], cm[:, wp:])
        nsrc = sel.shape[0]
        outs = [jnp.dot(rm[:, b * stride_in:b * stride_in + nsrc], sel,
                        preferred_element_type=f32) for b in range(B)]
        return jnp.concatenate(outs, axis=1)

    def batchnorm(x, gamma, beta, count, mask, eps=1e-5):
        # Training-mode batch statistics (the module's default state), one
        # pass.  Ring/gap lanes of x are exactly zero, so plain lane sums give
        # the valid-region sums; `count` is the number of valid elements.
        s = jnp.sum(x, axis=1, keepdims=True)                   # [C, 1]
        sq = jnp.sum(x * x, axis=1, keepdims=True)
        mean = s / count
        var = jnp.maximum(sq / count - mean * mean, 0.0)
        inv = jax.lax.rsqrt(var + eps)
        scale = gamma * inv                                     # [C, 1]
        shift = beta - mean * scale                             # [C, 1]
        # y = x*scale + mask*shift keeps ring/gap lanes exactly zero.
        return x * scale + mask * shift

    # ---- unpack the coalesced parameter buffers -----------------------------
    w1 = wconv_ref[0:8, 0:25];      b1 = vecs_ref[0:8, 0:1]
    w2 = wconv_ref[0:16, 128:328];  b2 = vecs_ref[0:16, 1:2]
    w3 = wconv_ref[0:32, 384:528];  b3 = vecs_ref[0:32, 2:3]
    w4 = wconv_ref[0:32, 640:928];  b4 = vecs_ref[0:32, 3:4]
    g1 = vecs_ref[0:8, 4:5];        be1 = vecs_ref[0:8, 5:6]
    g3 = vecs_ref[0:32, 6:7];       be3 = vecs_ref[0:32, 7:8]
    m18 = jnp.concatenate([consts_ref[0:1, 0:384]] * B, axis=1)   # [1, B*384]
    m9 = jnp.concatenate([consts_ref[1:2, 0:128]] * B, axis=1)    # [1, B*128]
    bfc = consts_ref[2:3, 0:10]                                    # [1, 10]

    # ---- network ------------------------------------------------------------
    x0 = x_ref[...]                                    # [1,  B*1024] (32x32)
    a1 = conv_relu(x0, w1, b1, 5, 2, 32)               # [8,  B*1024]
    p1 = pool_relayout(a1, 32, 1024, sel1_ref[...])    # [8,  B*384]  18x18 grid
    p1 = batchnorm(p1, g1, be1, B * 196.0, m18)
    a2 = conv_relu(p1, w2, b2, 5, 2, 18)               # [16, B*384]
    a2 = a2 * m18                                      # exact zero ring -> conv3 padding
    a3 = conv_relu(a2, w3, b3, 3, 1, 18)               # [32, B*384]
    p3 = pool_relayout(a3, 18, 384, sel3_ref[...])     # [32, B*128]  9x9 grid
    p3 = batchnorm(p3, g3, be3, B * 49.0, m9)
    a4 = conv_relu(p3, w4, b4, 3, 1, 9)                # [32, B*128]

    # ---- FC: lane-aligned flatten + one NT matmul ---------------------------
    a4b = a4.astype(bf16)
    flat = jnp.concatenate(
        [a4b[:, b * 128:(b + 1) * 128].reshape(1, 32 * 128) for b in range(B)],
        axis=0)                                        # [B, 4096]
    logits = jax.lax.dot_general(flat, wfc_ref[...],
                                 (((1,), (1,)), ((), ())),
                                 preferred_element_type=f32)      # [B, 10]
    out_ref[...] = logits + bfc


# ----------------------------------------------------------------------------
# Wrapper: one pallas_call for the whole network
# ----------------------------------------------------------------------------
def cnn_forward(x_nchw, kp):
    B = x_nchw.shape[0]
    # TODO(synk): fold this zero-padding into the kernel (DMA the raw 28x28
    # rows into a pre-zeroed VMEM buffer) to avoid one extra HBM round-trip.
    x = jnp.pad(x_nchw.astype(jnp.float32), ((0, 0), (0, 0), (2, 2), (2, 2)))
    x = x.reshape(1, B * 32 * 32)

    args = (x, kp["wconv"], kp["vecs"], kp["consts"],
            kp["sel1"], kp["sel3"], kp["wfc"])
    vmem = pl.BlockSpec(memory_space=pltpu.MemorySpace.VMEM)
    return pl.pallas_call(
        _cnn_fused_kernel,
        out_shape=jax.ShapeDtypeStruct((B, 10), jnp.float32),
        in_specs=[vmem] * len(args),
        out_specs=vmem,
        compiler_params=pltpu.CompilerParams(
            # right-sized (working set is a few MiB); well below v7x's 64 MiB.
            vmem_limit_bytes=32 * 1024 * 1024),
    )(*args)


# ----------------------------------------------------------------------------
# Host-side constant / parameter re-layout
# ----------------------------------------------------------------------------
def _pool_sel(wp_in, pad_in, hw_out, wp_out, pad_out, ncols):
    # rows index the "rm" array (flat 2x2-max of the input grid); columns index
    # the destination layer's zero-ring padded flat layout (stride ncols).
    nsrc = wp_in * wp_in - 1 - wp_in
    sel = np.zeros((nsrc, ncols), np.float32)
    for i in range(hw_out):
        for j in range(hw_out):
            src = (2 * i + pad_in) * wp_in + (2 * j + pad_in)
            dst = (i + pad_out) * wp_out + (j + pad_out)
            sel[src, dst] = 1.0
    return jnp.asarray(sel).astype(jnp.bfloat16)


def prepare_kernel_params(p):
    bf16 = jnp.bfloat16

    def taps(w):  # [Cout, Cin, k, k] -> [Cout, k*k*Cin]  (tap-major, cin-minor)
        cout, cin, k, _ = w.shape
        return jnp.transpose(w, (0, 2, 3, 1)).reshape(cout, k * k * cin)

    kp = {}

    # conv weights packed into one lane-aligned buffer (offsets 0/128/384/640)
    wconv = jnp.zeros((32, 928), jnp.float32)
    wconv = wconv.at[0:8, 0:25].set(taps(p["w1"]))
    wconv = wconv.at[0:16, 128:328].set(taps(p["w2"]))
    wconv = wconv.at[0:32, 384:528].set(taps(p["w3"]))
    wconv = wconv.at[0:32, 640:928].set(taps(p["w4"]))
    kp["wconv"] = wconv.astype(bf16)

    # all per-channel vectors packed into one [32, 8] f32 array (column slices)
    vecs = jnp.zeros((32, 8), jnp.float32)
    vecs = vecs.at[0:8, 0].set(p["b1"]).at[0:16, 1].set(p["b2"])
    vecs = vecs.at[0:32, 2].set(p["b3"]).at[0:32, 3].set(p["b4"])
    vecs = vecs.at[0:8, 4].set(p["g1"]).at[0:8, 5].set(p["be1"])
    vecs = vecs.at[0:32, 6].set(p["g3"]).at[0:32, 7].set(p["be3"])
    kp["vecs"] = vecs

    # valid-region masks (18x18 / 9x9 grids) + FC bias packed into one buffer
    consts = np.zeros((3, 384), np.float32)
    for i in range(14):
        for j in range(14):
            consts[0, (i + 2) * 18 + (j + 2)] = 1.0
    for i in range(7):
        for j in range(7):
            consts[1, (i + 1) * 9 + (j + 1)] = 1.0
    kp["consts"] = jnp.asarray(consts).at[2, 0:10].set(p["bout"])

    # pool1: 32x32 (ring 2) -> 18x18 grid at stride 384
    kp["sel1"] = _pool_sel(32, 2, 14, 18, 2, 384)
    # pool3: 18x18 (ring 2) -> 9x9 grid at stride 128
    kp["sel3"] = _pool_sel(18, 2, 7, 9, 1, 128)

    # FC weight: PyTorch Linear [10, 32*7*7] (NCHW flatten c*49+i*7+j) mapped
    # onto the kernel's flatten order c*128 + (i+1)*9 + (j+1); ring/gap columns
    # are exactly zero so conv4's ring garbage never leaks.
    idx = np.zeros((4096,), np.int32)
    valid = np.zeros((1, 4096), np.float32)
    for c in range(32):
        for i in range(7):
            for j in range(7):
                col = c * 128 + (i + 1) * 9 + (j + 1)
                idx[col] = c * 49 + i * 7 + j
                valid[0, col] = 1.0
    wfc = p["wout"][:, jnp.asarray(idx)] * jnp.asarray(valid)      # [10, 4096]
    kp["wfc"] = wfc.astype(bf16)
    return kp


# ----------------------------------------------------------------------------
# Deterministic PyTorch-layout parameters + pure-JAX reference
# ----------------------------------------------------------------------------
def init_params(key):
    ks = jax.random.split(key, 10)

    def conv_w(k, cout, cin, ksz):
        fan_in = cin * ksz * ksz
        w = jax.random.normal(k, (cout, cin, ksz, ksz), jnp.float32)
        return w / jnp.sqrt(float(fan_in))

    p = {}
    p["w1"] = conv_w(ks[0], 8, 1, 5)
    p["b1"] = jax.random.normal(ks[1], (8,), jnp.float32) * 0.01
    p["w2"] = conv_w(ks[2], 16, 8, 5)
    p["b2"] = jax.random.normal(ks[3], (16,), jnp.float32) * 0.01
    p["w3"] = conv_w(ks[4], 32, 16, 3)
    p["b3"] = jax.random.normal(ks[5], (32,), jnp.float32) * 0.01
    p["w4"] = conv_w(ks[6], 32, 32, 3)
    p["b4"] = jax.random.normal(ks[7], (32,), jnp.float32) * 0.01
    p["g1"] = jnp.ones((8,), jnp.float32); p["be1"] = jnp.zeros((8,), jnp.float32)
    p["g3"] = jnp.ones((32,), jnp.float32); p["be3"] = jnp.zeros((32,), jnp.float32)
    p["wout"] = (jax.random.normal(ks[8], (10, 32 * 7 * 7), jnp.float32)
                 / jnp.sqrt(1568.0))
    p["bout"] = jax.random.normal(ks[9], (10,), jnp.float32) * 0.01
    return p


def cnn_reference(x, p):
    def conv(x, w, b):
        pad = (w.shape[2] - 1) // 2
        y = jax.lax.conv_general_dilated(
            x, w, (1, 1), [(pad, pad), (pad, pad)],
            dimension_numbers=("NCHW", "OIHW", "NCHW"))
        return jnp.maximum(y + b[None, :, None, None], 0.0)

    def pool(x):
        B, C, H, W = x.shape
        return x.reshape(B, C, H // 2, 2, W // 2, 2).max(axis=(3, 5))

    def bn(x, g, b, eps=1e-5):
        mean = x.mean(axis=(0, 2, 3), keepdims=True)
        var = ((x - mean) ** 2).mean(axis=(0, 2, 3), keepdims=True)
        return ((x - mean) * jax.lax.rsqrt(var + eps) * g[None, :, None, None]
                + b[None, :, None, None])

    x = conv(x, p["w1"], p["b1"]); x = pool(x); x = bn(x, p["g1"], p["be1"])
    x = conv(x, p["w2"], p["b2"])
    x = conv(x, p["w3"], p["b3"]); x = pool(x); x = bn(x, p["g3"], p["be3"])
    x = conv(x, p["w4"], p["b4"])
    B = x.shape[0]
    return x.reshape(B, -1) @ p["wout"].T + p["bout"]


if __name__ == "__main__":
    key = jax.random.PRNGKey(0)
    kparam, kx = jax.random.split(key)
    params = init_params(kparam)
    kp = prepare_kernel_params(params)

    # The module's 32*7*7 flatten implies 28x28 single-channel input.
    x = jax.random.normal(kx, (2, 1, 28, 28), jnp.float32)

    out = jax.jit(cnn_forward)(x, kp)
    jax.block_until_ready(out)
    assert out.shape == (2, 10)

    ref = cnn_reference(x, params)
    err = jnp.max(jnp.abs(out - ref))
    # bf16 MXU operands (f32 accumulation) drift slightly vs the f32 reference.
    assert jnp.allclose(out, ref, rtol=3e-2, atol=3e-2), f"max abs err {err}"

    print("KERNEL_OK")
</pallas_src>

<mosaic_0001>
module attributes {stable_mosaic.version = 11 : i64} {
  func.func @_cnn_fused_kernel(%arg0: memref<1x2048xf32, #tpu.memory_space<vmem>>, %arg1: memref<32x928xbf16, #tpu.memory_space<vmem>>, %arg2: memref<32x8xf32, #tpu.memory_space<vmem>>, %arg3: memref<3x384xf32, #tpu.memory_space<vmem>>, %arg4: memref<991x384xbf16, #tpu.memory_space<vmem>>, %arg5: memref<305x128xbf16, #tpu.memory_space<vmem>>, %arg6: memref<10x4096xbf16, #tpu.memory_space<vmem>>, %arg7: memref<2x10xf32, #tpu.memory_space<vmem>>) attributes {dimension_semantics = [], scalar_prefetch = 0 : i64, scratch_operands = 0 : i64, tpu.core_type = #tpu.core_type<tc>} {
    %c0 = arith.constant 0 : index
    %c0_0 = arith.constant 0 : index
    %0 = vector.load %arg1[%c0, %c0_0] : memref<32x928xbf16, #tpu.memory_space<vmem>>, vector<8x25xbf16>
    %c0_1 = arith.constant 0 : index
    %c0_2 = arith.constant 0 : index
    %1 = vector.load %arg2[%c0_1, %c0_2] : memref<32x8xf32, #tpu.memory_space<vmem>>, vector<8x1xf32>
    %c0_3 = arith.constant 0 : index
    %c128 = arith.constant 128 : index
    %2 = vector.load %arg1[%c0_3, %c128] : memref<32x928xbf16, #tpu.memory_space<vmem>>, vector<16x200xbf16>
    %c0_4 = arith.constant 0 : index
    %c1 = arith.constant 1 : index
    %3 = vector.load %arg2[%c0_4, %c1] : memref<32x8xf32, #tpu.memory_space<vmem>>, vector<16x1xf32>
    %c0_5 = arith.constant 0 : index
    %c384 = arith.constant 384 : index
    %4 = vector.load %arg1[%c0_5, %c384] : memref<32x928xbf16, #tpu.memory_space<vmem>>, vector<32x144xbf16>
    %c0_6 = arith.constant 0 : index
    %c2 = arith.constant 2 : index
    %5 = vector.load %arg2[%c0_6, %c2] : memref<32x8xf32, #tpu.memory_space<vmem>>, vector<32x1xf32>
    %c0_7 = arith.constant 0 : index
    %c640 = arith.constant 640 : index
    %6 = vector.load %arg1[%c0_7, %c640] : memref<32x928xbf16, #tpu.memory_space<vmem>>, vector<32x288xbf16>
    %c0_8 = arith.constant 0 : index
    %c3 = arith.constant 3 : index
    %7 = vector.load %arg2[%c0_8, %c3] : memref<32x8xf32, #tpu.memory_space<vmem>>, vector<32x1xf32>
    %c0_9 = arith.constant 0 : index
    %c4 = arith.constant 4 : index
    %8 = vector.load %arg2[%c0_9, %c4] : memref<32x8xf32, #tpu.memory_space<vmem>>, vector<8x1xf32>
    %c0_10 = arith.constant 0 : index
    %c5 = arith.constant 5 : index
    %9 = vector.load %arg2[%c0_10, %c5] : memref<32x8xf32, #tpu.memory_space<vmem>>, vector<8x1xf32>
    %c0_11 = arith.constant 0 : index
    %c6 = arith.constant 6 : index
    %10 = vector.load %arg2[%c0_11, %c6] : memref<32x8xf32, #tpu.memory_space<vmem>>, vector<32x1xf32>
    %c0_12 = arith.constant 0 : index
    %c7 = arith.constant 7 : index
    %11 = vector.load %arg2[%c0_12, %c7] : memref<32x8xf32, #tpu.memory_space<vmem>>, vector<32x1xf32>
    %c0_13 = arith.constant 0 : index
    %c0_14 = arith.constant 0 : index
    %12 = vector.load %arg3[%c0_13, %c0_14] : memref<3x384xf32, #tpu.memory_space<vmem>>, vector<1x384xf32>
    %13 = tpu.concatenate %12, %12 in 1 : vector<1x384xf32>, vector<1x384xf32> -> vector<1x768xf32>
    %c1_15 = arith.constant 1 : index
    %c0_16 = arith.constant 0 : index
    %14 = vector.load %arg3[%c1_15, %c0_16] : memref<3x384xf32, #tpu.memory_space<vmem>>, vector<1x128xf32>
    %15 = tpu.concatenate %14, %14 in 1 : vector<1x128xf32>, vector<1x128xf32> -> vector<1x256xf32>
    %c2_17 = arith.constant 2 : index
    %c0_18 = arith.constant 0 : index
    %16 = vector.load %arg3[%c2_17, %c0_18] : memref<3x384xf32, #tpu.memory_space<vmem>>, vector<1x10xf32>
    %c0_19 = arith.constant 0 : index
    %c0_20 = arith.constant 0 : index
    %17 = vector.load %arg0[%c0_19, %c0_20] : memref<1x2048xf32, #tpu.memory_space<vmem>>, vector<1x2048xf32>
    %18 = arith.truncf %17 : vector<1x2048xf32> to vector<1x2048xbf16>
    %cst = arith.constant 0.000000e+00 : bf16
    %19 = vector.broadcast %cst : bf16 to vector<1x66xbf16>
    %20 = tpu.concatenate %19, %18, %19 in 1 : vector<1x66xbf16>, vector<1x2048xbf16>, vector<1x66xbf16> -> vector<1x2180xbf16>
    %21 = vector.extract_strided_slice %20 {offsets = [0, 0], sizes = [1, 2048], strides = [1, 1]} : vector<1x2180xbf16> to vector<1x2048xbf16>
    %22 = vector.extract_strided_slice %20 {offsets = [0, 1], sizes = [1, 2048], strides = [1, 1]} : vector<1x2180xbf16> to vector<1x2048xbf16>
    %23 = vector.extract_strided_slice %20 {offsets = [0, 2], sizes = [1, 2048], strides = [1, 1]} : vector<1x2180xbf16> to vector<1x2048xbf16>
    %24 = vector.extract_strided_slice %20 {offsets = [0, 3], sizes = [1, 2048], strides = [1, 1]} : vector<1x2180xbf16> to vector<1x2048xbf16>
    %25 = vector.extract_strided_slice %20 {offsets = [0, 4], sizes = [1, 2048], strides = [1, 1]} : vector<1x2180xbf16> to vector<1x2048xbf16>
    %26 = vector.extract_strided_slice %20 {offsets = [0, 32], sizes = [1, 2048], strides = [1, 1]} : vector<1x2180xbf16> to vector<1x2048xbf16>
    %27 = vector.extract_strided_slice %20 {offsets = [0, 33], sizes = [1, 2048], strides = [1, 1]} : vector<1x2180xbf16> to vector<1x2048xbf16>
    %28 = vector.extract_strided_slice %20 {offsets = [0, 34], sizes = [1, 2048], strides = [1, 1]} : vector<1x2180xbf16> to vector<1x2048xbf16>
    %29 = vector.extract_strided_slice %20 {offsets = [0, 35], sizes = [1, 2048], strides = [1, 1]} : vector<1x2180xbf16> to vector<1x2048xbf16>
    %30 = vector.extract_strided_slice %20 {offsets = [0, 36], sizes = [1, 2048], strides = [1, 1]} : vector<1x2180xbf16> to vector<1x2048xbf16>
    %31 = vector.extract_strided_slice %20 {offsets = [0, 64], sizes = [1, 2048], strides = [1, 1]} : vector<1x2180xbf16> to vector<1x2048xbf16>
    %32 = vector.extract_strided_slice %20 {offsets = [0, 65], sizes = [1, 2048], strides = [1, 1]} : vector<1x2180xbf16> to vector<1x2048xbf16>
    %33 = vector.extract_strided_slice %20 {offsets = [0, 66], sizes = [1, 2048], strides = [1, 1]} : vector<1x2180xbf16> to vector<1x2048xbf16>
    %34 = vector.extract_strided_slice %20 {offsets = [0, 67], sizes = [1, 2048], strides = [1, 1]} : vector<1x2180xbf16> to vector<1x2048xbf16>
    %35 = vector.extract_strided_slice %20 {offsets = [0, 68], sizes = [1, 2048], strides = [1, 1]} : vector<1x2180xbf16> to vector<1x2048xbf16>
    %36 = vector.extract_strided_slice %20 {offsets = [0, 96], sizes = [1, 2048], strides = [1, 1]} : vector<1x2180xbf16> to vector<1x2048xbf16>
    %37 = vector.extract_strided_slice %20 {offsets = [0, 97], sizes = [1, 2048], strides = [1, 1]} : vector<1x2180xbf16> to vector<1x2048xbf16>
    %38 = vector.extract_strided_slice %20 {offsets = [0, 98], sizes = [1, 2048], strides = [1, 1]} : vector<1x2180xbf16> to vector<1x2048xbf16>
    %39 = vector.extract_strided_slice %20 {offsets = [0, 99], sizes = [1, 2048], strides = [1, 1]} : vector<1x2180xbf16> to vector<1x2048xbf16>
    %40 = vector.extract_strided_slice %20 {offsets = [0, 100], sizes = [1, 2048], strides = [1, 1]} : vector<1x2180xbf16> to vector<1x2048xbf16>
    %41 = vector.extract_strided_slice %20 {offsets = [0, 128], sizes = [1, 2048], strides = [1, 1]} : vector<1x2180xbf16> to vector<1x2048xbf16>
    %42 = vector.extract_strided_slice %20 {offsets = [0, 129], sizes = [1, 2048], strides = [1, 1]} : vector<1x2180xbf16> to vector<1x2048xbf16>
    %43 = vector.extract_strided_slice %20 {offsets = [0, 130], sizes = [1, 2048], strides = [1, 1]} : vector<1x2180xbf16> to vector<1x2048xbf16>
    %44 = vector.extract_strided_slice %20 {offsets = [0, 131], sizes = [1, 2048], strides = [1, 1]} : vector<1x2180xbf16> to vector<1x2048xbf16>
    %45 = vector.extract_strided_slice %20 {offsets = [0, 132], sizes = [1, 2048], strides = [1, 1]} : vector<1x2180xbf16> to vector<1x2048xbf16>
    %46 = tpu.concatenate %21, %22, %23, %24, %25, %26, %27, %28, %29, %30, %31, %32, %33, %34, %35, %36 in 0 : vector<1x2048xbf16>, vector<1x2048xbf16>, vector<1x2048xbf16>, vector<1x2048xbf16>, vector<1x2048xbf16>, vector<1x2048xbf16>, vector<1x2048xbf16>, vector<1x2048xbf16>, vector<1x2048xbf16>, vector<1x2048xbf16>, vector<1x2048xbf16>, vector<1x2048xbf16>, vector<1x2048xbf16>, vector<1x2048xbf16>, vector<1x2048xbf16>, vector<1x2048xbf16> -> vector<16x2048xbf16>
    %47 = tpu.concatenate %37, %38, %39, %40, %41, %42, %43, %44, %45 in 0 : vector<1x2048xbf16>, vector<1x2048xbf16>, vector<1x2048xbf16>, vector<1x2048xbf16>, vector<1x2048xbf16>, vector<1x2048xbf16>, vector<1x2048xbf16>, vector<1x2048xbf16>, vector<1x2048xbf16> -> vector<9x2048xbf16>
    %48 = tpu.concatenate %46, %47 in 0 : vector<16x2048xbf16>, vector<9x2048xbf16> -> vector<25x2048xbf16>
    %cst_21 = arith.constant dense<0.000000e+00> : vector<8x2048xf32>
    %49 = tpu.matmul %0, %48, %cst_21 {dimension_numbers = #tpu.dot_dimension_numbers<[1], [0], [0], [1], [0, 0, 1, 1], [], []>} : vector<8x25xbf16>, vector<25x2048xbf16>, vector<8x2048xf32> -> vector<8x2048xf32>
    %50 = vector.broadcast %1 : vector<8x1xf32> to vector<8x2048xf32>
    %51 = arith.addf %49, %50 : vector<8x2048xf32>
    %cst_22 = arith.constant 0.000000e+00 : f32
    %52 = vector.broadcast %cst_22 : f32 to vector<8x2048xf32>
    %53 = arith.maximumf %51, %52 : vector<8x2048xf32>
    %c0_23 = arith.constant 0 : index
    %c0_24 = arith.constant 0 : index
    %54 = vector.load %arg4[%c0_23, %c0_24] : memref<991x384xbf16, #tpu.memory_space<vmem>>, vector<991x384xbf16>
    %55 = arith.truncf %53 : vector<8x2048xf32> to vector<8x2048xbf16>
    %56 = vector.extract_strided_slice %55 {offsets = [0, 0], sizes = [8, 2047], strides = [1, 1]} : vector<8x2048xbf16> to vector<8x2047xbf16>
    %57 = vector.extract_strided_slice %55 {offsets = [0, 1], sizes = [8, 2047], strides = [1, 1]} : vector<8x2048xbf16> to vector<8x2047xbf16>
    %58 = arith.maximumf %56, %57 : vector<8x2047xbf16>
    %59 = vector.extract_strided_slice %58 {offsets = [0, 0], sizes = [8, 2015], strides = [1, 1]} : vector<8x2047xbf16> to vector<8x2015xbf16>
    %60 = vector.extract_strided_slice %58 {offsets = [0, 32], sizes = [8, 2015], strides = [1, 1]} : vector<8x2047xbf16> to vector<8x2015xbf16>
    %61 = arith.maximumf %59, %60 : vector<8x2015xbf16>
    %62 = vector.extract_strided_slice %61 {offsets = [0, 0], sizes = [8, 991], strides = [1, 1]} : vector<8x2015xbf16> to vector<8x991xbf16>
    %cst_25 = arith.constant dense<0.000000e+00> : vector<8x384xf32>
    %63 = tpu.matmul %62, %54, %cst_25 {dimension_numbers = #tpu.dot_dimension_numbers<[1], [0], [0], [1], [0, 0, 1, 1], [], []>} : vector<8x991xbf16>, vector<991x384xbf16>, vector<8x384xf32> -> vector<8x384xf32>
    %64 = vector.extract_strided_slice %61 {offsets = [0, 1024], sizes = [8, 991], strides = [1, 1]} : vector<8x2015xbf16> to vector<8x991xbf16>
    %cst_26 = arith.constant dense<0.000000e+00> : vector<8x384xf32>
    %65 = tpu.matmul %64, %54, %cst_26 {dimension_numbers = #tpu.dot_dimension_numbers<[1], [0], [0], [1], [0, 0, 1, 1], [], []>} : vector<8x991xbf16>, vector<991x384xbf16>, vector<8x384xf32> -> vector<8x384xf32>
    %66 = tpu.concatenate %63, %65 in 1 : vector<8x384xf32>, vector<8x384xf32> -> vector<8x768xf32>
    %cst_27 = arith.constant dense<0.000000e+00> : vector<8xf32>
    %67 = vector.multi_reduction <add>, %66, %cst_27 [1] : vector<8x768xf32> to vector<8xf32>
    %68 = vector.shape_cast %67 : vector<8xf32> to vector<8x1xf32>
    %69 = arith.mulf %66, %66 : vector<8x768xf32>
    %cst_28 = arith.constant dense<0.000000e+00> : vector<8xf32>
    %70 = vector.multi_reduction <add>, %69, %cst_28 [1] : vector<8x768xf32> to vector<8xf32>
    %71 = vector.shape_cast %70 : vector<8xf32> to vector<8x1xf32>
    %cst_29 = arith.constant 3.920000e+02 : f32
    %72 = vector.broadcast %cst_29 : f32 to vector<8x1xf32>
    %73 = arith.divf %68, %72 : vector<8x1xf32>
    %cst_30 = arith.constant 3.920000e+02 : f32
    %74 = vector.broadcast %cst_30 : f32 to vector<8x1xf32>
    %75 = arith.divf %71, %74 : vector<8x1xf32>
    %76 = arith.mulf %73, %73 : vector<8x1xf32>
    %77 = arith.subf %75, %76 : vector<8x1xf32>
    %cst_31 = arith.constant 0.000000e+00 : f32
    %78 = vector.broadcast %cst_31 : f32 to vector<8x1xf32>
    %79 = arith.maximumf %77, %78 : vector<8x1xf32>
    %cst_32 = arith.constant 9.99999974E-6 : f32
    %80 = vector.broadcast %cst_32 : f32 to vector<8x1xf32>
    %81 = arith.addf %79, %80 : vector<8x1xf32>
    %82 = math.rsqrt %81 : vector<8x1xf32>
    %83 = arith.mulf %8, %82 : vector<8x1xf32>
    %84 = arith.mulf %73, %83 : vector<8x1xf32>
    %85 = arith.subf %9, %84 : vector<8x1xf32>
    %86 = vector.broadcast %83 : vector<8x1xf32> to vector<8x768xf32>
    %87 = arith.mulf %66, %86 : vector<8x768xf32>
    %88 = vector.broadcast %13 : vector<1x768xf32> to vector<8x768xf32>
    %89 = vector.broadcast %85 : vector<8x1xf32> to vector<8x768xf32>
    %90 = arith.mulf %88, %89 : vector<8x768xf32>
    %91 = arith.addf %87, %90 : vector<8x768xf32>
    %92 = arith.truncf %91 : vector<8x768xf32> to vector<8x768xbf16>
    %cst_33 = arith.constant 0.000000e+00 : bf16
    %93 = vector.broadcast %cst_33 : bf16 to vector<8x38xbf16>
    %94 = tpu.concatenate %93, %92, %93 in 1 : vector<8x38xbf16>, vector<8x768xbf16>, vector<8x38xbf16> -> vector<8x844xbf16>
    %95 = vector.extract_strided_slice %94 {offsets = [0, 0], sizes = [8, 768], strides = [1, 1]} : vector<8x844xbf16> to vector<8x768xbf16>
    %96 = vector.extract_strided_slice %94 {offsets = [0, 1], sizes = [8, 768], strides = [1, 1]} : vector<8x844xbf16> to vector<8x768xbf16>
    %97 = vector.extract_strided_slice %94 {offsets = [0, 2], sizes = [8, 768], strides = [1, 1]} : vector<8x844xbf16> to vector<8x768xbf16>
    %98 = vector.extract_strided_slice %94 {offsets = [0, 3], sizes = [8, 768], strides = [1, 1]} : vector<8x844xbf16> to vector<8x768xbf16>
    %99 = vector.extract_strided_slice %94 {offsets = [0, 4], sizes = [8, 768], strides = [1, 1]} : vector<8x844xbf16> to vector<8x768xbf16>
    %100 = vector.extract_strided_slice %94 {offsets = [0, 18], sizes = [8, 768], strides = [1, 1]} : vector<8x844xbf16> to vector<8x768xbf16>
    %101 = vector.extract_strided_slice %94 {offsets = [0, 19], sizes = [8, 768], strides = [1, 1]} : vector<8x844xbf16> to vector<8x768xbf16>
    %102 = vector.extract_strided_slice %94 {offsets = [0, 20], sizes = [8, 768], strides = [1, 1]} : vector<8x844xbf16> to vector<8x768xbf16>
    %103 = vector.extract_strided_slice %94 {offsets = [0, 21], sizes = [8, 768], strides = [1, 1]} : vector<8x844xbf16> to vector<8x768xbf16>
    %104 = vector.extract_strided_slice %94 {offsets = [0, 22], sizes = [8, 768], strides = [1, 1]} : vector<8x844xbf16> to vector<8x768xbf16>
    %105 = vector.extract_strided_slice %94 {offsets = [0, 36], sizes = [8, 768], strides = [1, 1]} : vector<8x844xbf16> to vector<8x768xbf16>
    %106 = vector.extract_strided_slice %94 {offsets = [0, 37], sizes = [8, 768], strides = [1, 1]} : vector<8x844xbf16> to vector<8x768xbf16>
    %107 = vector.extract_strided_slice %94 {offsets = [0, 38], sizes = [8, 768], strides = [1, 1]} : vector<8x844xbf16> to vector<8x768xbf16>
    %108 = vector.extract_strided_slice %94 {offsets = [0, 39], sizes = [8, 768], strides = [1, 1]} : vector<8x844xbf16> to vector<8x768xbf16>
    %109 = vector.extract_strided_slice %94 {offsets = [0, 40], sizes = [8, 768], strides = [1, 1]} : vector<8x844xbf16> to vector<8x768xbf16>
    %110 = vector.extract_strided_slice %94 {offsets = [0, 54], sizes = [8, 768], strides = [1, 1]} : vector<8x844xbf16> to vector<8x768xbf16>
    %111 = vector.extract_strided_slice %94 {offsets = [0, 55], sizes = [8, 768], strides = [1, 1]} : vector<8x844xbf16> to vector<8x768xbf16>
    %112 = vector.extract_strided_slice %94 {offsets = [0, 56], sizes = [8, 768], strides = [1, 1]} : vector<8x844xbf16> to vector<8x768xbf16>
    %113 = vector.extract_strided_slice %94 {offsets = [0, 57], sizes = [8, 768], strides = [1, 1]} : vector<8x844xbf16> to vector<8x768xbf16>
    %114 = vector.extract_strided_slice %94 {offsets = [0, 58], sizes = [8, 768], strides = [1, 1]} : vector<8x844xbf16> to vector<8x768xbf16>
    %115 = vector.extract_strided_slice %94 {offsets = [0, 72], sizes = [8, 768], strides = [1, 1]} : vector<8x844xbf16> to vector<8x768xbf16>
    %116 = vector.extract_strided_slice %94 {offsets = [0, 73], sizes = [8, 768], strides = [1, 1]} : vector<8x844xbf16> to vector<8x768xbf16>
    %117 = vector.extract_strided_slice %94 {offsets = [0, 74], sizes = [8, 768], strides = [1, 1]} : vector<8x844xbf16> to vector<8x768xbf16>
    %118 = vector.extract_strided_slice %94 {offsets = [0, 75], sizes = [8, 768], strides = [1, 1]} : vector<8x844xbf16> to vector<8x768xbf16>
    %119 = vector.extract_strided_slice %94 {offsets = [0, 76], sizes = [8, 768], strides = [1, 1]} : vector<8x844xbf16> to vector<8x768xbf16>
    %120 = tpu.concatenate %95, %96, %97, %98, %99, %100, %101, %102, %103, %104, %105, %106, %107, %108, %109, %110 in 0 : vector<8x768xbf16>, vector<8x768xbf16>, vector<8x768xbf16>, vector<8x768xbf16>, vector<8x768xbf16>, vector<8x768xbf16>, vector<8x768xbf16>, vector<8x768xbf16>, vector<8x768xbf16>, vector<8x768xbf16>, vector<8x768xbf16>, vector<8x768xbf16>, vector<8x768xbf16>, vector<8x768xbf16>, vector<8x768xbf16>, vector<8x768xbf16> -> vector<128x768xbf16>
    %121 = tpu.concatenate %111, %112, %113, %114, %115, %116, %117, %118, %119 in 0 : vector<8x768xbf16>, vector<8x768xbf16>, vector<8x768xbf16>, vector<8x768xbf16>, vector<8x768xbf16>, vector<8x768xbf16>, vector<8x768xbf16>, vector<8x768xbf16>, vector<8x768xbf16> -> vector<72x768xbf16>
    %122 = tpu.concatenate %120, %121 in 0 : vector<128x768xbf16>, vector<72x768xbf16> -> vector<200x768xbf16>
    %cst_34 = arith.constant dense<0.000000e+00> : vector<16x768xf32>
    %123 = tpu.matmul %2, %122, %cst_34 {dimension_numbers = #tpu.dot_dimension_numbers<[1], [0], [0], [1], [0, 0, 1, 1], [], []>} : vector<16x200xbf16>, vector<200x768xbf16>, vector<16x768xf32> -> vector<16x768xf32>
    %124 = vector.broadcast %3 : vector<16x1xf32> to vector<16x768xf32>
    %125 = arith.addf %123, %124 : vector<16x768xf32>
    %cst_35 = arith.constant 0.000000e+00 : f32
    %126 = vector.broadcast %cst_35 : f32 to vector<16x768xf32>
    %127 = arith.maximumf %125, %126 : vector<16x768xf32>
    %128 = vector.broadcast %13 : vector<1x768xf32> to vector<16x768xf32>
    %129 = arith.mulf %127, %128 : vector<16x768xf32>
    %130 = arith.truncf %129 : vector<16x768xf32> to vector<16x768xbf16>
    %cst_36 = arith.constant 0.000000e+00 : bf16
    %131 = vector.broadcast %cst_36 : bf16 to vector<16x19xbf16>
    %132 = tpu.concatenate %131, %130, %131 in 1 : vector<16x19xbf16>, vector<16x768xbf16>, vector<16x19xbf16> -> vector<16x806xbf16>
    %133 = vector.extract_strided_slice %132 {offsets = [0, 0], sizes = [16, 768], strides = [1, 1]} : vector<16x806xbf16> to vector<16x768xbf16>
    %134 = vector.extract_strided_slice %132 {offsets = [0, 1], sizes = [16, 768], strides = [1, 1]} : vector<16x806xbf16> to vector<16x768xbf16>
    %135 = vector.extract_strided_slice %132 {offsets = [0, 2], sizes = [16, 768], strides = [1, 1]} : vector<16x806xbf16> to vector<16x768xbf16>
    %136 = vector.extract_strided_slice %132 {offsets = [0, 18], sizes = [16, 768], strides = [1, 1]} : vector<16x806xbf16> to vector<16x768xbf16>
    %137 = vector.extract_strided_slice %132 {offsets = [0, 19], sizes = [16, 768], strides = [1, 1]} : vector<16x806xbf16> to vector<16x768xbf16>
    %138 = vector.extract_strided_slice %132 {offsets = [0, 20], sizes = [16, 768], strides = [1, 1]} : vector<16x806xbf16> to vector<16x768xbf16>
    %139 = vector.extract_strided_slice %132 {offsets = [0, 36], sizes = [16, 768], strides = [1, 1]} : vector<16x806xbf16> to vector<16x768xbf16>
    %140 = vector.extract_strided_slice %132 {offsets = [0, 37], sizes = [16, 768], strides = [1, 1]} : vector<16x806xbf16> to vector<16x768xbf16>
    %141 = vector.extract_strided_slice %132 {offsets = [0, 38], sizes = [16, 768], strides = [1, 1]} : vector<16x806xbf16> to vector<16x768xbf16>
    %142 = tpu.concatenate %133, %134, %135, %136, %137, %138, %139, %140, %141 in 0 : vector<16x768xbf16>, vector<16x768xbf16>, vector<16x768xbf16>, vector<16x768xbf16>, vector<16x768xbf16>, vector<16x768xbf16>, vector<16x768xbf16>, vector<16x768xbf16>, vector<16x768xbf16> -> vector<144x768xbf16>
    %cst_37 = arith.constant dense<0.000000e+00> : vector<32x768xf32>
    %143 = tpu.matmul %4, %142, %cst_37 {dimension_numbers = #tpu.dot_dimension_numbers<[1], [0], [0], [1], [0, 0, 1, 1], [], []>} : vector<32x144xbf16>, vector<144x768xbf16>, vector<32x768xf32> -> vector<32x768xf32>
    %144 = vector.broadcast %5 : vector<32x1xf32> to vector<32x768xf32>
    %145 = arith.addf %143, %144 : vector<32x768xf32>
    %cst_38 = arith.constant 0.000000e+00 : f32
    %146 = vector.broadcast %cst_38 : f32 to vector<32x768xf32>
    %147 = arith.maximumf %145, %146 : vector<32x768xf32>
    %c0_39 = arith.constant 0 : index
    %c0_40 = arith.constant 0 : index
    %148 = vector.load %arg5[%c0_39, %c0_40] : memref<305x128xbf16, #tpu.memory_space<vmem>>, vector<305x128xbf16>
    %149 = arith.truncf %147 : vector<32x768xf32> to vector<32x768xbf16>
    %150 = vector.extract_strided_slice %149 {offsets = [0, 0], sizes = [32, 767], strides = [1, 1]} : vector<32x768xbf16> to vector<32x767xbf16>
    %151 = vector.extract_strided_slice %149 {offsets = [0, 1], sizes = [32, 767], strides = [1, 1]} : vector<32x768xbf16> to vector<32x767xbf16>
    %152 = arith.maximumf %150, %151 : vector<32x767xbf16>
    %153 = vector.extract_strided_slice %152 {offsets = [0, 0], sizes = [32, 749], strides = [1, 1]} : vector<32x767xbf16> to vector<32x749xbf16>
    %154 = vector.extract_strided_slice %152 {offsets = [0, 18], sizes = [32, 749], strides = [1, 1]} : vector<32x767xbf16> to vector<32x749xbf16>
    %155 = arith.maximumf %153, %154 : vector<32x749xbf16>
    %156 = vector.extract_strided_slice %155 {offsets = [0, 0], sizes = [32, 305], strides = [1, 1]} : vector<32x749xbf16> to vector<32x305xbf16>
    %cst_41 = arith.constant dense<0.000000e+00> : vector<32x128xf32>
    %157 = tpu.matmul %156, %148, %cst_41 {dimension_numbers = #tpu.dot_dimension_numbers<[1], [0], [0], [1], [0, 0, 1, 1], [], []>} : vector<32x305xbf16>, vector<305x128xbf16>, vector<32x128xf32> -> vector<32x128xf32>
    %158 = vector.extract_strided_slice %155 {offsets = [0, 384], sizes = [32, 305], strides = [1, 1]} : vector<32x749xbf16> to vector<32x305xbf16>
    %cst_42 = arith.constant dense<0.000000e+00> : vector<32x128xf32>
    %159 = tpu.matmul %158, %148, %cst_42 {dimension_numbers = #tpu.dot_dimension_numbers<[1], [0], [0], [1], [0, 0, 1, 1], [], []>} : vector<32x305xbf16>, vector<305x128xbf16>, vector<32x128xf32> -> vector<32x128xf32>
    %160 = tpu.concatenate %157, %159 in 1 : vector<32x128xf32>, vector<32x128xf32> -> vector<32x256xf32>
    %cst_43 = arith.constant dense<0.000000e+00> : vector<32xf32>
    %161 = vector.multi_reduction <add>, %160, %cst_43 [1] : vector<32x256xf32> to vector<32xf32>
    %162 = vector.shape_cast %161 : vector<32xf32> to vector<32x1xf32>
    %163 = arith.mulf %160, %160 : vector<32x256xf32>
    %cst_44 = arith.constant dense<0.000000e+00> : vector<32xf32>
    %164 = vector.multi_reduction <add>, %163, %cst_44 [1] : vector<32x256xf32> to vector<32xf32>
    %165 = vector.shape_cast %164 : vector<32xf32> to vector<32x1xf32>
    %cst_45 = arith.constant 9.800000e+01 : f32
    %166 = vector.broadcast %cst_45 : f32 to vector<32x1xf32>
    %167 = arith.divf %162, %166 : vector<32x1xf32>
    %cst_46 = arith.constant 9.800000e+01 : f32
    %168 = vector.broadcast %cst_46 : f32 to vector<32x1xf32>
    %169 = arith.divf %165, %168 : vector<32x1xf32>
    %170 = arith.mulf %167, %167 : vector<32x1xf32>
    %171 = arith.subf %169, %170 : vector<32x1xf32>
    %cst_47 = arith.constant 0.000000e+00 : f32
    %172 = vector.broadcast %cst_47 : f32 to vector<32x1xf32>
    %173 = arith.maximumf %171, %172 : vector<32x1xf32>
    %cst_48 = arith.constant 9.99999974E-6 : f32
    %174 = vector.broadcast %cst_48 : f32 to vector<32x1xf32>
    %175 = arith.addf %173, %174 : vector<32x1xf32>
    %176 = math.rsqrt %175 : vector<32x1xf32>
    %177 = arith.mulf %10, %176 : vector<32x1xf32>
    %178 = arith.mulf %167, %177 : vector<32x1xf32>
    %179 = arith.subf %11, %178 : vector<32x1xf32>
    %180 = vector.broadcast %177 : vector<32x1xf32> to vector<32x256xf32>
    %181 = arith.mulf %160, %180 : vector<32x256xf32>
    %182 = vector.broadcast %15 : vector<1x256xf32> to vector<32x256xf32>
    %183 = vector.broadcast %179 : vector<32x1xf32> to vector<32x256xf32>
    %184 = arith.mulf %182, %183 : vector<32x256xf32>
    %185 = arith.addf %181, %184 : vector<32x256xf32>
    %186 = arith.truncf %185 : vector<32x256xf32> to vector<32x256xbf16>
    %cst_49 = arith.constant 0.000000e+00 : bf16
    %187 = vector.broadcast %cst_49 : bf16 to vector<32x10xbf16>
    %188 = tpu.concatenate %187, %186, %187 in 1 : vector<32x10xbf16>, vector<32x256xbf16>, vector<32x10xbf16> -> vector<32x276xbf16>
    %189 = vector.extract_strided_slice %188 {offsets = [0, 0], sizes = [32, 256], strides = [1, 1]} : vector<32x276xbf16> to vector<32x256xbf16>
    %190 = vector.extract_strided_slice %188 {offsets = [0, 1], sizes = [32, 256], strides = [1, 1]} : vector<32x276xbf16> to vector<32x256xbf16>
    %191 = vector.extract_strided_slice %188 {offsets = [0, 2], sizes = [32, 256], strides = [1, 1]} : vector<32x276xbf16> to vector<32x256xbf16>
    %192 = vector.extract_strided_slice %188 {offsets = [0, 9], sizes = [32, 256], strides = [1, 1]} : vector<32x276xbf16> to vector<32x256xbf16>
    %193 = vector.extract_strided_slice %188 {offsets = [0, 10], sizes = [32, 256], strides = [1, 1]} : vector<32x276xbf16> to vector<32x256xbf16>
    %194 = vector.extract_strided_slice %188 {offsets = [0, 11], sizes = [32, 256], strides = [1, 1]} : vector<32x276xbf16> to vector<32x256xbf16>
    %195 = vector.extract_strided_slice %188 {offsets = [0, 18], sizes = [32, 256], strides = [1, 1]} : vector<32x276xbf16> to vector<32x256xbf16>
    %196 = vector.extract_strided_slice %188 {offsets = [0, 19], sizes = [32, 256], strides = [1, 1]} : vector<32x276xbf16> to vector<32x256xbf16>
    %197 = vector.extract_strided_slice %188 {offsets = [0, 20], sizes = [32, 256], strides = [1, 1]} : vector<32x276xbf16> to vector<32x256xbf16>
    %198 = tpu.concatenate %189, %190, %191, %192, %193, %194, %195, %196, %197 in 0 : vector<32x256xbf16>, vector<32x256xbf16>, vector<32x256xbf16>, vector<32x256xbf16>, vector<32x256xbf16>, vector<32x256xbf16>, vector<32x256xbf16>, vector<32x256xbf16>, vector<32x256xbf16> -> vector<288x256xbf16>
    %cst_50 = arith.constant dense<0.000000e+00> : vector<32x256xf32>
    %199 = tpu.matmul %6, %198, %cst_50 {dimension_numbers = #tpu.dot_dimension_numbers<[1], [0], [0], [1], [0, 0, 1, 1], [], []>} : vector<32x288xbf16>, vector<288x256xbf16>, vector<32x256xf32> -> vector<32x256xf32>
    %200 = vector.broadcast %7 : vector<32x1xf32> to vector<32x256xf32>
    %201 = arith.addf %199, %200 : vector<32x256xf32>
    %cst_51 = arith.constant 0.000000e+00 : f32
    %202 = vector.broadcast %cst_51 : f32 to vector<32x256xf32>
    %203 = arith.maximumf %201, %202 : vector<32x256xf32>
    %204 = arith.truncf %203 : vector<32x256xf32> to vector<32x256xbf16>
    %205 = vector.extract_strided_slice %204 {offsets = [0, 0], sizes = [32, 128], strides = [1, 1]} : vector<32x256xbf16> to vector<32x128xbf16>
    %206 = vector.shape_cast %205 : vector<32x128xbf16> to vector<1x4096xbf16>
    %207 = vector.extract_strided_slice %204 {offsets = [0, 128], sizes = [32, 128], strides = [1, 1]} : vector<32x256xbf16> to vector<32x128xbf16>
    %208 = vector.shape_cast %207 : vector<32x128xbf16> to vector<1x4096xbf16>
    %209 = tpu.concatenate %206, %208 in 0 : vector<1x4096xbf16>, vector<1x4096xbf16> -> vector<2x4096xbf16>
    %c0_52 = arith.constant 0 : index
    %c0_53 = arith.constant 0 : index
    %210 = vector.load %arg6[%c0_52, %c0_53] : memref<10x4096xbf16, #tpu.memory_space<vmem>>, vector<10x4096xbf16>
    %cst_54 = arith.constant dense<0.000000e+00> : vector<2x10xf32>
    %211 = tpu.matmul %209, %210, %cst_54 {dimension_numbers = #tpu.dot_dimension_numbers<[1], [1], [0], [0], [0, 0, 1, 0], [], []>} : vector<2x4096xbf16>, vector<10x4096xbf16>, vector<2x10xf32> -> vector<2x10xf32>
    %212 = vector.broadcast %16 : vector<1x10xf32> to vector<2x10xf32>
    %213 = arith.addf %211, %212 : vector<2x10xf32>
    %c0_55 = arith.constant 0 : index
    %c0_56 = arith.constant 0 : index
    %214 = vector.load %arg7[%c0_55, %c0_56] : memref<2x10xf32, #tpu.memory_space<vmem>>, vector<2x10xf32>
    tpu.vector_store %arg7[%c0_55, %c0_56], %213 {strides = array<i32>} : memref<2x10xf32, #tpu.memory_space<vmem>>, vector<2x10xf32>,
    return
  }
}

</mosaic_0001>

<bundles_post_ra>
// kernel: cnn_forward.1
= control target key start
LH: loop header
LB: loop body
LE: loop exit
PB: predicated region body
PF: predicated region fallthrough
CT: control target
= control target key end

     0   :  { %12 = vsyncpa [#allocation3], 0  ;;  %s15963_s0 = inlined_call_operand.vmem [shape: f32[1,2048], index: 0, kind: input, shape index: {}]   ;;  %s15964_s1 = inlined_call_operand.hbm [shape: bf16[32,928], index: 1, kind: input, shape index: {}]   ;;  %s15965_s2 = inlined_call_operand.vmem [shape: f32[32,8], index: 2, kind: input, shape index: {}]   ;;  %s15966_s3 = inlined_call_operand.vmem [shape: f32[3,384], index: 3, kind: input, shape index: {}]   ;;  %s15967_s4 = inlined_call_operand.hbm [shape: bf16[991,384], index: 4, kind: input, shape index: {}]   ;;  %s15968_s5 = inlined_call_operand.vmem [shape: bf16[305,128], index: 5, kind: input, shape index: {}]   ;;  %s15969_s6 = inlined_call_operand.hbm [shape: bf16[10,4096], index: 6, kind: input, shape index: {}]   ;;  %s15970_s7 = inlined_call_operand.hbm [shape: f32[2,10], index: 7, kind: output, shape index: {}]  }
   0x1   :  { %13 = vsyncpa [#allocation6], 0 }
   0x2   :  { %14 = vsyncpa [#allocation4], 0  ;;  %s10113_s24 = smov [#allocation5]   ;;  %s10019_s28 = scalar_lea.hbm %s15967_s4, 23808 }
   0x3   :  { %s38_s25 = sshll.u32 %s10113_s24, 4  ;;  %p10020_p0 = scmp.ne.s32.totalorder %s15967_s4, %s10019_s28  ;;  %s39_s25 = int_to_ptr.vmem [resolvable:$true] %s38_s25 }
   0x4   :  { %p10023_p1 = scmp.lt.u32.totalorder %s10019_s28, %s15967_s4 }
   0x6   :  { %p10025_p2 = pnand %p10023_p1, %p10020_p0 }
   0x8   :  { %10028 = shalt.err (!%p10025_p2)
}
   0x9   :  { %s10029_s10 = scalar_lea.vmem %s39_s25, 23808  ;;  %p10034_p4 = scmp.lt.s32.totalorder %s39_s25, %s39_s25 }
   0xa   :  { %p10030_p3 = scmp.ne.s32.totalorder %s39_s25, %s10029_s10  ;;  %p10035_p5 = scmp.lt.s32.totalorder %s10029_s10, %s10029_s10 }
   0xc   :  { %p10036_p6 = por %p10035_p5, %p10034_p4 }
   0xe   :  { %p10037_p7 = pnand %p10036_p6, %p10030_p3 }
  0x10   :  { %10040 = shalt.err (!%p10037_p7)
}
  0x11   :  { %s10114_s11 = smov 192   ;;  %s10115_s12 = smov 12  }
  0x12   :  { %44 = dma.hbm_to_vmem [thread:$0]  %s15967_s4, 23808, %s39_s25, [#allocation6], %s10114_s11, %s10114_s11, %s10115_s12  }
  0x13   :  { %s10116_s15 = smov [#allocation2]   ;;  %s10041_s19 = scalar_lea.hbm %s15964_s1, 2048 }
  0x14   :  { %s22_s16 = sshll.u32 %s10116_s15, 4  ;;  %p10042_p8 = scmp.ne.s32.totalorder %s15964_s1, %s10041_s19  ;;  %s23_s16 = int_to_ptr.vmem [resolvable:$true] %s22_s16 }
  0x15   :  { %p10045_p9 = scmp.lt.u32.totalorder %s10041_s19, %s15964_s1 }
  0x17   :  { %p10047_p10 = pnand %p10045_p9, %p10042_p8 }
  0x19   :  { %10050 = shalt.err (!%p10047_p10)
}
  0x1a   :  { %s10051_s24 = scalar_lea.vmem %s23_s16, 2048  ;;  %p10056_p12 = scmp.lt.s32.totalorder %s23_s16, %s23_s16 }
  0x1b   :  { %p10052_p11 = scmp.ne.s32.totalorder %s23_s16, %s10051_s24  ;;  %p10057_p13 = scmp.lt.s32.totalorder %s10051_s24, %s10051_s24 }
  0x1d   :  { %p10058_p0 = por %p10057_p13, %p10056_p12 }
  0x1f   :  { %p10059_p1 = pnand %p10058_p0, %p10052_p11 }
  0x21   :  { %10062 = shalt.err (!%p10059_p1)
}
  0x22   :  { %s10117_s4 = smov 512   ;;  %s10118_s25 = smov 32  }
  0x23   :  { %28 = dma.hbm_to_vmem [thread:$0]  %s15964_s1, 2048, %s23_s16, [#allocation3], %s10117_s4, %s10117_s4, %s10118_s25  }
  0x24   :  { %s10119_s28 = smov [#allocation7]   ;;  %s10063_s9 = scalar_lea.hbm %s15969_s6, 4096 }
  0x25   :  { %s52_s29 = sshll.u32 %s10119_s28, 4  ;;  %p10064_p2 = scmp.ne.s32.totalorder %s15969_s6, %s10063_s9  ;;  %s53_s29 = int_to_ptr.vmem [resolvable:$true] %s52_s29 }
  0x26   :  { %p10067_p3 = scmp.lt.u32.totalorder %s10063_s9, %s15969_s6 }
  0x28   :  { %p10069_p4 = pnand %p10067_p3, %p10064_p2 }
  0x2a   :  { %10072 = shalt.err (!%p10069_p4)
}
  0x2b   :  { %s10073_s14 = scalar_lea.vmem %s53_s29, 4096  ;;  %p10078_p6 = scmp.lt.s32.totalorder %s53_s29, %s53_s29 }
  0x2c   :  { %p10074_p5 = scmp.ne.s32.totalorder %s53_s29, %s10073_s14  ;;  %p10079_p7 = scmp.lt.s32.totalorder %s10073_s14, %s10073_s14 }
  0x2e   :  { %p10080_p8 = por %p10079_p7, %p10078_p6 }
  0x30   :  { %p10081_p9 = pnand %p10080_p8, %p10074_p5 }
  0x32   :  { %10084 = shalt.err (!%p10081_p9)
}
  0x33   :  { %s10120_s1 = smov 2048   ;;  %s10121_s15 = smov 128  }
  0x34   :  { %58 = dma.hbm_to_vmem [thread:$0]  %s15969_s6, 4096, %s53_s29, [#allocation6], %s10120_s1, %s10120_s1, %s10121_s15  }
  0x35   :  { %10107 = dma.done.wait [#allocation3], 2048  }
  0x36   :  { %10108 = vsyncadd [#allocation3], 4294965248 }
  0x37   :  { %10109 = dma.done.wait [#allocation6], 27904  }
  0x38   :  { %10110 = vsyncadd [#allocation6], 4294939392  ;;  %v90_v0 = vlaneseq  ;;  %v107_v6 = vld [vmem:[%s15963_s0] sm:$0xff]  ;;  %s10122_s6 = smov 66   ;;  %v108_v22 = vld [vmem:[%s15963_s0 + $0x8] sm:$0xff]  ;;  %vm16005_vm0 = vcmask 539648  }
  0x39   :  { %s10123_s22 = smov 127   ;;  %s10124_s23 = smov 126   ;;  %vm16042_vm1 = vcmask 1039360   ;;  %vm16039_vm2 = vcmask 1040384   ;;  %vm1477_vm3 = vsmask.f32 256 }
  0x3a   :  { %v91_v1 = vshrl.u32 %v90_v0, 7  ;;  %s10125_s24 = smov 97   ;;  %s10126_s4 = smov 95   ;;  %vm16041_vm4 = vcmask 1031168   ;;  %vm16006_vm5 = vcmask 793600   ;;  %vm10806_vm6 = vmand %vm16039_vm2, %vm1477_vm3  ;;  %vm16040_vm7 = vcmask 1022976  }
  0x3b   :  { %s10127_s26 = smov 93   ;;  %s10128_s27 = smov 124   ;;  %vm16045_vm8 = vcmask 1041408   ;;  %vm16047_vm9 = vcmask 777216   ;;  %vm1561_vm10 = vsmask.f32 1280 }
  0x3c   :  { %v10245_v2 = vsub.s32 2, %v91_v1  ;;  %v10247_v3 = vsub.s32 0, %v91_v1  ;;  %v10249_v4 = vsub.s32 3, %v91_v1  ;;  %v10251_v5 = vsub.s32 1, %v91_v1  ;;  %s10129_s28 = smov 64   ;;  %s10130_s29 = smov 125   ;;  %vm10859_vm14 = vmand %vm16045_vm8, %vm1561_vm10 }
  0x3d   :  { %v10256_v7 = vsub.s32 5, %v91_v1  ;;  %v10258_v8 = vsub.s32 4, %v91_v1  ;;  %v10265_v16 = vsub.s32 7, %v91_v1  ;;  %v10270_v20 = vsub.s32 6, %v91_v1  ;;  %s10131_s30 = smov 96   ;;  %s10132_s8 = smov 94  }
  0x3e   :  { %16229 = vst [vmem:[#allocation12_spill] sm:$0xff] %v10245_v2  ;;  %16230 = vst [vmem:[#allocation13_spill] sm:$0xff] %v10247_v3  ;;  %v122_v9 = vrot.slane %v107_v6, %v10245_v2  ;;  %v114_v10 = vrot.slane %v107_v6, %v10247_v3  ;;  %v126_v11 = vrot.slane %v107_v6, %v10249_v4  ;;  %s10133_s9 = smov 92   ;;  %s10134_s10 = smov 63   ;;  %vm16046_vm11 = vcmask 785408  }
  0x3f   :  { %16231 = vst [vmem:[#allocation14_spill] sm:$0xff] %v10249_v4  ;;  %16232 = vst [vmem:[#allocation15_spill] sm:$0xff] %v10251_v5  ;;  %v118_v12 = vrot.slane %v107_v6, %v10251_v5  ;;  %v134_v15 = vrot.slane %v107_v6, %v10256_v7  ;;  %v130_v19 = vrot.slane %v107_v6, %v10258_v8  ;;  %s10135_s11 = smov 62   ;;  %s10136_s12 = smov 61   ;;  %vm16049_vm12 = vcmask 1042432  }
  0x40   :  { %16233 = vst [vmem:[#allocation16_spill] sm:$0xff] %v10256_v7  ;;  %16234 = vst [vmem:[#allocation17_spill] sm:$0xff] %v10258_v8  ;;  %v193_v13 = vpack.c.bf16 %v122_v9, %v122_v9  ;;  %v191_v14 = vpack.c.bf16 %v114_v10, %v114_v10  ;;  %v194_v17 = vpack.c.bf16 %v126_v11, %v126_v11  ;;  %s10137_s13 = smov 60   ;;  %vm1645_vm13 = vsmask.f32 2304  ;;  %s10138_s14 = smov 31  }
  0x41   :  { %16235 = vst [vmem:[#allocation18_spill] sm:$0xff] %v10265_v16  ;;  %v192_v18 = vpack.c.bf16 %v118_v12, %v118_v12  ;;  %16236 = vst [vmem:[#allocation19_spill] sm:$0xff] %v10270_v20  ;;  %v142_v21 = vrot.slane %v107_v6, %v10265_v16  ;;  %v196_v23 = vpack.c.bf16 %v134_v15, %v134_v15  ;;  %vm16055_vm15 = vcmask 1043456   ;;  %s10143_s18 = smov 1   ;;  %s10144_s20 = smov 38  }
  0x42   :  { %227 = vrot.lane.b32.xlu1 %v193_v13, %s10122_s6  ;;  %223 = vrot.lane.b32.xlu0 %v191_v14, %s10122_s6  ;;  %v195_v24 = vpack.c.bf16 %v130_v19, %v130_v19  ;;  %v138_v25 = vrot.slane %v107_v6, %v10270_v20  ;;  %v150_v28 = vrot.slane %v108_v22, %v10251_v5  ;;  %vm1729_vm3 = vsmask.f32 3328  ;;  %s10145_s21 = smov 111   ;;  %s10158_s1 = smov 19  }
  0x43   :  { %v198_v26 = vpack.c.bf16 %v142_v21, %v142_v21  ;;  %v146_v29 = vrot.slane %v108_v22, %v10247_v3  ;;  %v158_v30 = vrot.slane %v108_v22, %v10249_v4  ;;  %v154_v33 = vrot.slane %v108_v22, %v10245_v2 }
  0x44   :  { %v197_v27 = vpack.c.bf16 %v138_v25, %v138_v25  ;;  %v200_v31 = vpack.c.bf16 %v150_v28, %v150_v28  ;;  %vm16048_vm10 = vcmask 769024  }
  0x45   :  { %v199_v32 = vpack.c.bf16 %v146_v29, %v146_v29  ;;  %v202_v34 = vpack.c.bf16 %v158_v30, %v158_v30  ;;  %v201_v35 = vpack.c.bf16 %v154_v33, %v154_v33 }
  0x46   :  { %229 = vrot.lane.b32.xlu1 %v194_v17, %s10122_s6  ;;  %225 = vrot.lane.b32.xlu0 %v192_v18, %s10122_s6 }
  0x4a   :  { %233 = vrot.lane.b32.xlu1 %v196_v23, %s10122_s6  ;;  %231 = vrot.lane.b32.xlu0 %v195_v24, %s10122_s6 }
  0x4e   :  { %237 = vrot.lane.b32.xlu1 %v198_v26, %s10122_s6  ;;  %235 = vrot.lane.b32.xlu0 %v197_v27, %s10122_s6 }
  0x52   :  { %241 = vrot.lane.b32.xlu1 %v200_v31, %s10122_s6  ;;  %239 = vrot.lane.b32.xlu0 %v199_v32, %s10122_s6 }
  0x56   :  { %245 = vrot.lane.b32.xlu1 %v202_v34, %s10122_s6  ;;  %243 = vrot.lane.b32.xlu0 %v201_v35, %s10122_s6 }
  0xb4   :  { %v228_v36 = vpop.permute.xlu1 %227  ;;  %v224_v37 = vpop.permute.xlu0 %223 }
  0xb5   :  { %v10304_v44 = vsel %vm16005_vm0, 0, %v224_v37 }
  0xb6   :  { %v10321_v51 = vshll.u32 %v10304_v44, 16  ;;  %v412_v25 = vrot.slane %v10304_v44, 7 }
  0xb8   :  { %v230_v38 = vpop.permute.xlu1 %229  ;;  %v226_v39 = vpop.permute.xlu0 %225  ;;  %v480_v61 = vrot.slane %v10321_v51, 7  ;;  %v936_v30 = vrot.slane %v10321_v51, 4 }
  0xb9   :  { %v10292_v40 = vsel %vm16005_vm0, %v224_v37, %v226_v39  ;;  %v10295_v41 = vsel %vm16005_vm0, %v226_v39, %v228_v36  ;;  %v10307_v45 = vsel %vm16005_vm0, %v228_v36, %v230_v38 }
  0xba   :  { %v10298_v42 = vshll.u32 %v10292_v40, 16  ;;  %v10301_v43 = vshll.u32 %v10295_v41, 16  ;;  %v10324_v52 = vshll.u32 %v10307_v45, 16  ;;  %v414_v57 = vrot.slane %v10295_v41, 7 }
  0xbb   :  { %v413_v58 = vrot.slane %v10292_v40, 7  ;;  %v415_v63 = vrot.slane %v10307_v45, 7  ;;  %v15975_v32 = vrot.slane %v10292_v40, 6  ;;  %v15973_v34 = vrot.slane %v10295_v41, 6 }
  0xbc   :  { %v10309_v46 = vpop.permute.xlu1 %233  ;;  %v232_v47 = vpop.permute.xlu0 %231  ;;  %v9349_v48 = vpack.i.bf16 %v10301_v43, %v10298_v42  ;;  %v483_v59 = vrot.slane %v10324_v52, 7  ;;  %v481_v0 = vrot.slane %v10298_v42, 7  ;;  %v482_v1 = vrot.slane %v10301_v43, 7 }
  0xbd   :  { %v10314_v49 = vsel %vm16005_vm0, %v230_v38, %v232_v47  ;;  %v10318_v50 = vsel %vm16005_vm0, %v232_v47, %v10309_v46  ;;  %v635_v9 = vrot.slane %v10324_v52, 6  ;;  %v787_v13 = vrot.slane %v10324_v52, 5 }
  0xbe   :  { %v10327_v53 = vshll.u32 %v10314_v49, 16  ;;  %v10330_v54 = vshll.u32 %v10318_v50, 16  ;;  %9350 = vrot.lane.b32.xlu0 %v9349_v48, %s10123_s22  ;;  %v416_v62 = vrot.slane %v10314_v49, 7  ;;  %v10355_v12 = vpack.i.bf16 %v482_v1, %v481_v0 }
  0xbf   :  { %v633_v15 = vrot.slane %v10298_v42, 6  ;;  %v634_v19 = vrot.slane %v10301_v43, 6  ;;  %v785_v23 = vrot.slane %v10298_v42, 5  ;;  %v786_v24 = vrot.slane %v10301_v43, 5 }
  0xc0   :  { %v9359_v55 = vpack.i.bf16 %v10321_v51, %v10330_v54  ;;  %v9354_v56 = vpack.i.bf16 %v10327_v53, %v10324_v52  ;;  %v484_v60 = vrot.slane %v10327_v53, 7  ;;  %v636_v10 = vrot.slane %v10327_v53, 6 }
  0xc1   :  { %v485_v11 = vrot.slane %v10330_v54, 7  ;;  %v788_v14 = vrot.slane %v10327_v53, 5  ;;  %v10369_v22 = vpack.i.bf16 %v634_v19, %v633_v15  ;;  %v417_v26 = vrot.slane %v10318_v50, 7 }
  0xc2   :  { %9360 = vrot.lane.b32.xlu0 %v9359_v55, %s10123_s22  ;;  %9355 = vrot.lane.b32.xlu1 %v9354_v56, %s10123_s22  ;;  %v10350_v6 = vpack.i.bf16 %v484_v60, %v483_v59  ;;  %v10360_v17 = vpack.i.bf16 %v636_v10, %v635_v9  ;;  %v10375_v27 = vpack.i.bf16 %v786_v24, %v785_v23  ;;  %v937_v28 = vrot.slane %v10298_v42, 4  ;;  %v238_v10 = vpop.permute.xlu1 %237 }
  0xc3   :  { %v10362_v18 = vpack.i.bf16 %v480_v61, %v485_v11  ;;  %v10367_v21 = vpack.i.bf16 %v788_v14, %v787_v13  ;;  %v938_v29 = vrot.slane %v10301_v43, 4  ;;  %v941_v31 = vrot.slane %v10330_v54, 4  ;;  %v236_v11 = vpop.permute.xlu0 %235 }
  0xc4   :  { %v939_v36 = vrot.slane %v10324_v52, 4  ;;  %v940_v37 = vrot.slane %v10327_v53, 4  ;;  %v1089_v38 = vrot.slane %v10298_v42, 3  ;;  %v1090_v47 = vrot.slane %v10301_v43, 3 }
  0xc5   :  { %v10384_v33 = vpack.i.bf16 %v938_v29, %v937_v28  ;;  %v10387_v35 = vpack.i.bf16 %v941_v31, %v936_v30  ;;  %v1091_v48 = vrot.slane %v10324_v52, 3  ;;  %v1092_v55 = vrot.slane %v10327_v53, 3 }
  0xc6   :  { %433 = vrot.lane.b32.xlu0 %v414_v57, %s10124_s23  ;;  %431 = vrot.lane.b32.xlu1 %v413_v58, %s10124_s23  ;;  %v10398_v39 = vpack.i.bf16 %v940_v37, %v939_v36  ;;  %v1088_v56 = vrot.slane %v10321_v51, 3  ;;  %v1093_v57 = vrot.slane %v10330_v54, 3  ;;  %v15974_v58 = vrot.slane %v10307_v45, 6  ;;  %v242_v37 = vpop.permute.xlu1 %241 }
  0xc7   :  { %v15972_v59 = vrot.slane %v10314_v49, 6  ;;  %v10407_v60 = vpack.i.bf16 %v1090_v47, %v1089_v38  ;;  %v10409_v61 = vpack.i.bf16 %v1092_v55, %v1091_v48  ;;  %v1242_v0 = vrot.slane %v10301_v43, 2  ;;  %v240_v38 = vpop.permute.xlu0 %239 }
  0xc8   :  { %v1243_v1 = vrot.slane %v10324_v52, 2  ;;  %v1244_v9 = vrot.slane %v10327_v53, 2  ;;  %v1240_v13 = vrot.slane %v10321_v51, 2  ;;  %v1245_v14 = vrot.slane %v10330_v54, 2 }
  0xc9   :  { %v15971_v15 = vrot.slane %v10318_v50, 6  ;;  %v718_v19 = vrot.slane %v10295_v41, 5  ;;  %v1396_v28 = vrot.slane %v10327_v53, 1  ;;  %v1393_v29 = vrot.slane %v10298_v42, 1 }
  0xca   :  { %437 = vrot.lane.b32.xlu0 %v416_v62, %s10124_s23  ;;  %435 = vrot.lane.b32.xlu1 %v415_v63, %s10124_s23  ;;  %v10411_v62 = vpack.i.bf16 %v1093_v57, %v1088_v56  ;;  %v1241_v63 = vrot.slane %v10298_v42, 2  ;;  %v10429_v24 = vpack.i.bf16 %v1244_v9, %v1243_v1  ;;  %v1394_v30 = vrot.slane %v10301_v43, 1 }
  0xcb   :  { %v10443_v31 = vsel %vm16005_vm0, %v10309_v46, %v236_v11  ;;  %v10446_v36 = vsel %vm16005_vm0, %v236_v11, %v238_v10  ;;  %v1392_v47 = vrot.slane %v10321_v51, 1  ;;  %v1397_v48 = vrot.slane %v10330_v54, 1 }
  0xcc   :  { %v10427_v23 = vpack.i.bf16 %v1242_v0, %v1241_v63  ;;  %v720_v53 = vrot.slane %v10314_v49, 5  ;;  %v10454_v43 = vpack.i.bf16 %v1394_v30, %v1393_v29  ;;  %v10459_v46 = vshll.u32 %v10443_v31, 16  ;;  %v10490_v30 = vpop.permute.xlu0 %243 }
  0xcd   :  { %v10456_v55 = vpack.i.bf16 %v1397_v48, %v1392_v47  ;;  %v10462_v56 = vshll.u32 %v10446_v36, 16  ;;  %v10467_v57 = vsel %vm16005_vm0, %v238_v10, %v240_v38  ;;  %v10470_v63 = vsel %vm16005_vm0, %v240_v38, %v242_v37 }
  0xce   :  { %429 = vrot.lane.b32.xlu0 %v412_v25, %s10124_s23  ;;  %439 = vrot.lane.b32.xlu1 %v417_v26, %s10124_s23  ;;  %v10431_v25 = vpack.i.bf16 %v1245_v14, %v1240_v13  ;;  %v1395_v26 = vrot.slane %v10324_v52, 1  ;;  %v717_v52 = vrot.slane %v10292_v40, 5  ;;  %16237 = vst [vmem:[#allocation20_spill] sm:$0xff] %v10470_v63  ;;  %v719_v0 = vrot.slane %v10307_v45, 5 }
  0xcf   :  { %v870_v1 = vrot.slane %v10295_v41, 4  ;;  %v942_v9 = vrot.slane %v10459_v46, 4  ;;  %v943_v11 = vrot.slane %v10462_v56, 4  ;;  %v10477_v13 = vshll.u32 %v10467_v57, 16 }
  0xd0   :  { %v10452_v42 = vpack.i.bf16 %v1396_v28, %v1395_v26  ;;  %v10480_v14 = vshll.u32 %v10470_v63, 16  ;;  %v1094_v10 = vrot.slane %v10459_v46, 3  ;;  %v1095_v26 = vrot.slane %v10462_v56, 3 }
  0xd1   :  { %16238 = vst [vmem:[#allocation21_spill] sm:$0xff] %v10477_v13  ;;  %v1246_v28 = vrot.slane %v10459_v46, 2  ;;  %v1247_v29 = vrot.slane %v10462_v56, 2  ;;  %v721_v38 = vrot.slane %v10318_v50, 5  ;;  %v872_v47 = vrot.slane %v10314_v49, 4 }
  0xd2   :  { %2085 = vrot.lane.b32.xlu0 %v15975_v32, %s10125_s24  ;;  %2087 = vrot.lane.b32.xlu1 %v15973_v34, %s10125_s24  ;;  %v10494_v48 = vpack.i.bf16 %v1095_v26, %v1094_v10  ;;  %v15990_v5 = vrot.slane %v10467_v57, 6  ;;  %v641_v3 = vrot.slane %v10480_v14, 6 }
  0xd6   :  { %2089 = vrot.lane.b32.xlu0 %v15974_v58, %s10125_s24  ;;  %2091 = vrot.lane.b32.xlu1 %v15972_v59, %s10125_s24  ;;  %v1401_v59 = vrot.slane %v10480_v14, 1 }
  0xda   :  { %2093 = vrot.lane.b32.xlu0 %v15971_v15, %s10125_s24  ;;  %737 = vrot.lane.b32.xlu1 %v718_v19, %s10126_s4  ;;  %v10485_v19 = vpack.i.bf16 %v943_v11, %v942_v9  ;;  %v869_v9 = vrot.slane %v10292_v40, 4  ;;  %v9364_v11 = vpack.i.bf16 %v10462_v56, %v10459_v46 }
  0xde   :  { %735 = vrot.lane.b32.xlu0 %v717_v52, %s10126_s4  ;;  %741 = vrot.lane.b32.xlu1 %v720_v53, %s10126_s4  ;;  %v10496_v52 = vpack.i.bf16 %v1247_v29, %v1246_v28  ;;  %v10502_v53 = vsel %vm16005_vm0, %v242_v37, %v10490_v30  ;;  %v1399_v37 = vrot.slane %v10462_v56, 1  ;;  %v1400_v28 = vrot.slane %v10477_v13, 1 }
  0xdf   :  { %v10512_v26 = vshll.u32 %v10502_v53, 16  ;;  %v871_v29 = vrot.slane %v10307_v45, 4  ;;  %vm16043_vm0 = vcmask 760832  }
  0xe1   :  { %16240 = vst [vmem:[#allocation23_spill] sm:$0xff] %v10512_v26  ;;  %v1402_v34 = vrot.slane %v10512_v26, 1 }
  0xe2   :  { %739 = vrot.lane.b32.xlu0 %v719_v0, %s10126_s4  ;;  %889 = vrot.lane.b32.xlu1 %v870_v1, %s10127_s26  ;;  %v944_v0 = vrot.slane %v10477_v13, 4  ;;  %v945_v1 = vrot.slane %v10480_v14, 4 }
  0xe3   :  { %v10536_v32 = vpack.i.bf16 %v1402_v34, %v1401_v59  ;;  %v722_v34 = vrot.slane %v10443_v31, 5  ;;  %v16245_v59 = vrot.slane %v10292_v40, 6 }
  0xe4   :  { %v10509_v10 = vpack.i.bf16 %v945_v1, %v944_v0  ;;  %v1097_v0 = vrot.slane %v10480_v14, 3  ;;  %v1098_v1 = vrot.slane %v10512_v26, 3 }
  0xe5   :  { %16244 = vst [vmem:[#allocation27_spill] sm:$0xff] %v10536_v32  ;;  %v876_v32 = vrot.slane %v10467_v57, 4 }
  0xe6   :  { %743 = vrot.lane.b32.xlu0 %v721_v38, %s10126_s4  ;;  %893 = vrot.lane.b32.xlu1 %v872_v47, %s10127_s26  ;;  %16239 = vst [vmem:[#allocation22_spill] sm:$0xff] %v10509_v10  ;;  %v419_v38 = vrot.slane %v10446_v36, 7  ;;  %v10520_v47 = vpack.i.bf16 %v1400_v28, %v1399_v37  ;;  %v10528_v15 = vpack.i.bf16 %v1098_v1, %v1097_v0  ;;  %v873_v37 = vrot.slane %v10318_v50, 4 }
  0xe7   :  { %v15977_v28 = vrot.slane %v10443_v31, 6  ;;  %v15976_v0 = vrot.slane %v10446_v36, 6  ;;  %v874_v1 = vrot.slane %v10443_v31, 4 }
  0xe8   :  { %16241 = vst [vmem:[#allocation24_spill] sm:$0xff] %v10520_v47  ;;  %16242 = vst [vmem:[#allocation25_spill] sm:$0xff] %v10528_v15 }
  0xea   :  { %887 = vrot.lane.b32.xlu0 %v869_v9, %s10127_s26  ;;  %9365 = vrot.lane.b32.xlu1 %v9364_v11, %s10123_s22  ;;  %v1249_v9 = vrot.slane %v10480_v14, 2  ;;  %v1250_v11 = vrot.slane %v10512_v26, 2 }
  0xec   :  { %v10534_v58 = vpack.i.bf16 %v1250_v11, %v1249_v9  ;;  %v875_v9 = vrot.slane %v10446_v36, 4  ;;  %v16246_v11 = vrot.slane %v10307_v45, 6 }
  0xee   :  { %891 = vrot.lane.b32.xlu0 %v871_v29, %s10127_s26  ;;  %443 = vrot.lane.b32.xlu1 %v419_v38, %s10124_s23  ;;  %16243 = vst [vmem:[#allocation26_spill] sm:$0xff] %v10534_v58  ;;  %v418_v29 = vrot.slane %v10443_v31, 7  ;;  %v723_v38 = vrot.slane %v10446_v36, 5  ;;  %v793_v58 = vrot.slane %v10480_v14, 5 }
  0xf2   :  { %895 = vrot.lane.b32.xlu0 %v873_v37, %s10127_s26  ;;  %2095 = vrot.lane.b32.xlu1 %v15977_v28, %s10125_s24  ;;  %v564_v37 = vrot.slane %v10304_v44, 6 }
  0xf6   :  { %441 = vrot.lane.b32.xlu0 %v418_v29, %s10124_s23  ;;  %747 = vrot.lane.b32.xlu1 %v723_v38, %s10126_s4  ;;  %v16247_v29 = vrot.slane %v10295_v41, 6  ;;  %v868_v38 = vrot.slane %v10304_v44, 4 }
  0xfa   :  { %2097 = vrot.lane.b32.xlu0 %v15976_v0, %s10125_s24  ;;  %897 = vrot.lane.b32.xlu1 %v874_v1, %s10127_s26  ;;  %v16248_v1 = vrot.slane %v10314_v49, 6  ;;  %v489_v0 = vrot.slane %v10480_v14, 7 }
  0xfe   :  { %745 = vrot.lane.b32.xlu0 %v722_v34, %s10126_s4  ;;  %583 = vrot.lane.b32.xlu1 %v16245_v59, %s10128_s27  ;;  %v716_v34 = vrot.slane %v10304_v44, 5  ;;  %v1021_v59 = vrot.slane %v10292_v40, 3 }
 0x102   :  { %899 = vrot.lane.b32.xlu0 %v875_v9, %s10127_s26  ;;  %587 = vrot.lane.b32.xlu1 %v16246_v11, %s10128_s27  ;;  %v638_v9 = vrot.slane %v10459_v46, 6  ;;  %v486_v11 = vrot.slane %v10459_v46, 7 }
 0x106   :  { %585 = vrot.lane.b32.xlu0 %v16247_v29, %s10128_s27  ;;  %581 = vrot.lane.b32.xlu1 %v564_v37, %s10128_s27  ;;  %v487_v37 = vrot.slane %v10462_v56, 7  ;;  %v791_v29 = vrot.slane %v10462_v56, 5 }
 0x10a   :  { %589 = vrot.lane.b32.xlu0 %v16248_v1, %s10128_s27  ;;  %885 = vrot.lane.b32.xlu1 %v868_v38, %s10127_s26  ;;  %v790_v1 = vrot.slane %v10459_v46, 5 }
 0x10e   :  { %733 = vrot.lane.b32.xlu0 %v716_v34, %s10126_s4  ;;  %1039 = vrot.lane.b32.xlu1 %v1021_v59, %s10129_s28  ;;  %v639_v34 = vrot.slane %v10462_v56, 6  ;;  %v632_v59 = vrot.slane %v10321_v51, 6 }
 0x112   :  { %9375 = vrot.lane.b32.xlu0 %v10350_v6, %s10130_s29  ;;  %9370 = vrot.lane.b32.xlu1 %v10355_v12, %s10130_s29  ;;  %v637_v6 = vrot.slane %v10330_v54, 6 }
 0x114   :  { %v9394_v12 = vpack.i.bf16 %v638_v9, %v637_v6  ;;  %v9419_v9 = vpack.i.bf16 %v632_v59, %v639_v34 }
 0x116   :  { %9390 = vrot.lane.b32.xlu0 %v10360_v17, %s10131_s30  ;;  %9380 = vrot.lane.b32.xlu1 %v10362_v18, %s10130_s29  ;;  %v9414_v17 = vpack.i.bf16 %v487_v37, %v486_v11  ;;  %v784_v18 = vrot.slane %v10321_v51, 5  ;;  %v1024_v51 = vrot.slane %v10314_v49, 3 }
 0x118   :  { %v9424_v38 = vpack.i.bf16 %v784_v18, %v791_v29  ;;  %v1173_v29 = vrot.slane %v10292_v40, 2  ;;  %v1174_v18 = vrot.slane %v10295_v41, 2 }
 0x11a   :  { %9405 = vrot.lane.b32.xlu0 %v10367_v21, %s10132_s8  ;;  %9385 = vrot.lane.b32.xlu1 %v10369_v22, %s10131_s30  ;;  %v789_v21 = vrot.slane %v10330_v54, 5  ;;  %v10613_v54 = vpop.permute.xlu1 %245 }
 0x11b   :  { %16249 = vst [vmem:[#allocation28_spill] sm:$0xff] %v10613_v54 }
 0x11c   :  { %v9409_v22 = vpack.i.bf16 %v790_v1, %v789_v21 }
 0x11e   :  { %9395 = vrot.lane.b32.xlu1 %v9394_v12, %s10131_s30  ;;  %9415 = vrot.lane.b32.xlu0 %v9414_v17, %s10130_s29 }
 0x122   :  { %9400 = vrot.lane.b32.xlu1 %v10375_v27, %s10132_s8  ;;  %9425 = vrot.lane.b32.xlu0 %v9424_v38, %s10132_s8  ;;  %v1022_v27 = vrot.slane %v10295_v41, 3 }
 0x126   :  { %9410 = vrot.lane.b32.xlu1 %v9409_v22, %s10132_s8  ;;  %9430 = vrot.lane.b32.xlu0 %v10384_v33, %s10133_s9  ;;  %v1023_v33 = vrot.slane %v10307_v45, 3  ;;  %v1172_v22 = vrot.slane %v10304_v44, 2 }
 0x12a   :  { %9420 = vrot.lane.b32.xlu1 %v9419_v9, %s10131_s30  ;;  %9440 = vrot.lane.b32.xlu0 %v10387_v35, %s10133_s9 }
 0x12e   :  { %9435 = vrot.lane.b32.xlu1 %v10398_v39, %s10133_s9  ;;  %1041 = vrot.lane.b32.xlu0 %v1022_v27, %s10129_s28  ;;  %v1020_v39 = vrot.slane %v10304_v44, 3 }
 0x130   :  { %v10615_v56 = vpop.permute.xlu0 %9350 }
 0x132   :  { %1043 = vrot.lane.b32.xlu1 %v1023_v33, %s10129_s28  ;;  %1045 = vrot.lane.b32.xlu0 %v1024_v51, %s10129_s28  ;;  %v1325_v33 = vrot.slane %v10292_v40, 1  ;;  %v1326_v51 = vrot.slane %v10295_v41, 1 }
 0x134   :  { %v10621_v35 = vpop.permute.xlu1 %9355  ;;  %v10623_v11 = vpop.permute.xlu0 %9360 }
 0x135   :  { %v16267_v7 = vunpack.i.l.bf16 %v10623_v11 }
 0x136   :  { %1037 = vrot.lane.b32.xlu1 %v1020_v39, %s10129_s28  ;;  %9445 = vrot.lane.b32.xlu0 %v10407_v60, %s10134_s10 }
 0x138   :  { %v10629_v37 = vpop.permute.xlu1 %431  ;;  %v10631_v6 = vpop.permute.xlu0 %433 }
 0x13a   :  { %9450 = vrot.lane.b32.xlu1 %v10409_v61, %s10134_s10  ;;  %9455 = vrot.lane.b32.xlu0 %v10411_v62, %s10134_s10  ;;  %v1175_v61 = vrot.slane %v10307_v45, 2  ;;  %v1176_v62 = vrot.slane %v10314_v49, 2 }
 0x13c   :  { %v10637_v12 = vpop.permute.xlu1 %435  ;;  %v10639_v17 = vpop.permute.xlu0 %437 }
 0x13e   :  { %1191 = vrot.lane.b32.xlu1 %v1173_v29, %s10135_s11  ;;  %1193 = vrot.lane.b32.xlu0 %v1174_v18, %s10135_s11 }
 0x140   :  { %v10645_v60 = vpop.permute.xlu1 %439  ;;  %v10647_v38 = vpop.permute.xlu0 %429 }
 0x142   :  { %1195 = vrot.lane.b32.xlu1 %v1175_v61, %s10135_s11  ;;  %1197 = vrot.lane.b32.xlu0 %v1176_v62, %s10135_s11  ;;  %v1324_v61 = vrot.slane %v10304_v44, 1  ;;  %v9474_v62 = vpack.i.bf16 %v10480_v14, %v10477_v13  ;;  %v877_v14 = vrot.slane %v10470_v63, 4 }
 0x144   :  { %v10653_v1 = vpop.permute.xlu1 %2087  ;;  %v10655_v21 = vpop.permute.xlu0 %2085 }
 0x146   :  { %1189 = vrot.lane.b32.xlu1 %v1172_v22, %s10135_s11  ;;  %9460 = vrot.lane.b32.xlu0 %v10427_v23, %s10136_s12 }
 0x148   :  { %v10661_v34 = vpop.permute.xlu1 %2091  ;;  %v10663_v59 = vpop.permute.xlu0 %2089 }
 0x14a   :  { %9465 = vrot.lane.b32.xlu1 %v10429_v24, %s10136_s12  ;;  %9470 = vrot.lane.b32.xlu0 %v10431_v25, %s10136_s12  ;;  %v1327_v24 = vrot.slane %v10307_v45, 1  ;;  %v1328_v25 = vrot.slane %v10314_v49, 1 }
 0x14c   :  { %v10669_v9 = vpop.permute.xlu1 %737  ;;  %v10671_v27 = vpop.permute.xlu0 %2093 }
 0x14e   :  { %1343 = vrot.lane.b32.xlu1 %v1325_v33, %s10137_s13  ;;  %1345 = vrot.lane.b32.xlu0 %v1326_v51, %s10137_s13 }
 0x150   :  { %v10677_v23 = vpop.permute.xlu1 %741  ;;  %v10679_v39 = vpop.permute.xlu0 %735 }
 0x152   :  { %1347 = vrot.lane.b32.xlu1 %v1327_v24, %s10137_s13  ;;  %1349 = vrot.lane.b32.xlu0 %v1328_v25, %s10137_s13  ;;  %v421_v25 = vrot.slane %v10470_v63, 7 }
 0x154   :  { %v10685_v29 = vpop.permute.xlu1 %889  ;;  %v10687_v18 = vpop.permute.xlu0 %739 }
 0x156   :  { %1341 = vrot.lane.b32.xlu0 %v1324_v61, %s10137_s13  ;;  %9475 = vrot.lane.b32.xlu1 %v9474_v62, %s10123_s22  ;;  %v420_v61 = vrot.slane %v10467_v57, 7  ;;  %v488_v62 = vrot.slane %v10477_v13, 7 }
 0x158   :  { %v10694_v22 = vpop.permute.xlu1 %893  ;;  %v10696_v33 = vpop.permute.xlu0 %743 }
 0x15a   :  { %9485 = vrot.lane.b32.xlu0 %v10452_v42, %s10118_s25  ;;  %9480 = vrot.lane.b32.xlu1 %v10454_v43, %s10118_s25  ;;  %v9494_v43 = vpack.i.bf16 %v489_v0, %v488_v62 }
 0x15c   :  { %v10702_v51 = vpop.permute.xlu1 %9365  ;;  %v10704_v24 = vpop.permute.xlu0 %887 }
 0x15e   :  { %447 = vrot.lane.b32.xlu0 %v421_v25, %s10124_s23  ;;  %445 = vrot.lane.b32.xlu1 %v420_v61, %s10124_s23  ;;  %v15991_v25 = vrot.slane %v10470_v63, 6  ;;  %v640_v61 = vrot.slane %v10477_v13, 6 }
 0x160   :  { %v10712_v42 = vpop.permute.xlu1 %443  ;;  %v10714_v28 = vpop.permute.xlu0 %891  ;;  %v9499_v62 = vpack.i.bf16 %v641_v3, %v640_v61 }
 0x161   :  { %16250 = vst [vmem:[#allocation29_spill] sm:$0xff] %v10712_v42 }
 0x162   :  { %9490 = vrot.lane.b32.xlu1 %v10456_v55, %s10118_s25  ;;  %9495 = vrot.lane.b32.xlu0 %v9494_v43, %s10130_s29  ;;  %v725_v43 = vrot.slane %v10470_v63, 5 }
 0x164   :  { %v10719_v4 = vpop.permute.xlu1 %2095  ;;  %v10721_v2 = vpop.permute.xlu0 %895 }
 0x166   :  { %2099 = vrot.lane.b32.xlu1 %v15990_v5, %s10125_s24  ;;  %2101 = vrot.lane.b32.xlu0 %v15991_v25, %s10125_s24  ;;  %v724_v5 = vrot.slane %v10467_v57, 5  ;;  %v792_v25 = vrot.slane %v10477_v13, 5 }
 0x168   :  { %v10733_v55 = vpop.permute.xlu1 %747  ;;  %v10735_v0 = vpop.permute.xlu0 %441 }
 0x169   :  { %16251 = vst [vmem:[#allocation30_spill] sm:$0xff] %v10733_v55 }
 0x16a   :  { %9500 = vrot.lane.b32.xlu1 %v9499_v62, %s10131_s30  ;;  %751 = vrot.lane.b32.xlu0 %v725_v43, %s10126_s4  ;;  %v9504_v62 = vpack.i.bf16 %v793_v58, %v792_v25  ;;  %v16254_v43 = vrot.slane %v10318_v50, 6  ;;  %v1026_v58 = vrot.slane %v10443_v31, 3  ;;  %v16259_v25 = vrot.slane %v10443_v31, 6 }
 0x16c   :  { %v10740_v16 = vpop.permute.xlu1 %897  ;;  %v10742_v20 = vpop.permute.xlu0 %2097 }
 0x16d   :  { %16252 = vst [vmem:[#allocation31_spill] sm:$0xff] %v10740_v16 }
 0x16e   :  { %749 = vrot.lane.b32.xlu1 %v724_v5, %s10126_s4  ;;  %901 = vrot.lane.b32.xlu0 %v876_v32, %s10127_s26 }
 0x170   :  { %v10750_v3 = vpop.permute.xlu1 %583  ;;  %v10752_v61 = vpop.permute.xlu0 %745 }
 0x171   :  { %16253 = vst [vmem:[#allocation32_spill] sm:$0xff] %v10750_v3 }
 0x172   :  { %9505 = vrot.lane.b32.xlu1 %v9504_v62, %s10132_s8  ;;  %591 = vrot.lane.b32.xlu0 %v16254_v43, %s10128_s27 }
 0x174   :  { %v10758_v15 = vpop.permute.xlu1 %587  ;;  %v10760_v47 = vpop.permute.xlu0 %899 }
 0x175   :  { %16255 = vst [vmem:[#allocation33_spill] sm:$0xff] %v10758_v15  ;;  %16256 = vst [vmem:[#allocation34_spill] sm:$0xff] %v10760_v47  ;;  %v467_v47 = vsel %vm16041_vm4, %v10637_v12, %v10639_v17 }
 0x176   :  { %903 = vrot.lane.b32.xlu1 %v877_v14, %s10127_s26  ;;  %9510 = vrot.lane.b32.xlu0 %v10485_v19, %s10133_s9  ;;  %v1025_v14 = vrot.slane %v10318_v50, 3  ;;  %v1177_v19 = vrot.slane %v10318_v50, 2 }
 0x178   :  { %v10766_v5 = vpop.permute.xlu1 %581  ;;  %v10768_v32 = vpop.permute.xlu0 %585 }
 0x179   :  { %16257 = vst [vmem:[#allocation35_spill] sm:$0xff] %v10766_v5  ;;  %16258 = vst [vmem:[#allocation36_spill] sm:$0xff] %v10768_v32 }
 0x17a   :  { %593 = vrot.lane.b32.xlu1 %v16259_v25, %s10128_s27  ;;  %1049 = vrot.lane.b32.xlu0 %v1026_v58, %s10129_s28  ;;  %v9353_v25 = vunpack.i.h.bf16 %v10615_v56  ;;  %v9352_v58 = vunpack.i.l.bf16 %v10615_v56  ;;  %v1178_v56 = vrot.slane %v10443_v31, 2 }
 0x17c   :  { %v10775_v62 = vpop.permute.xlu1 %885  ;;  %v10777_v43 = vpop.permute.xlu0 %589 }
 0x17d   :  { %16260 = vst [vmem:[#allocation37_spill] sm:$0xff] %v10775_v62  ;;  %16261 = vst [vmem:[#allocation38_spill] sm:$0xff] %v10777_v43  ;;  %v9357_v62 = vunpack.i.l.bf16 %v10621_v35  ;;  %v379_v43 = vsel %vm16042_vm1, %v9352_v58, %v9353_v25 }
 0x17e   :  { %1047 = vrot.lane.b32.xlu1 %v1025_v14, %s10129_s28  ;;  %1199 = vrot.lane.b32.xlu0 %v1177_v19, %s10135_s11  ;;  %v9358_v14 = vunpack.i.h.bf16 %v10621_v35  ;;  %v9363_v19 = vunpack.i.h.bf16 %v10623_v11  ;;  %v16264_v35 = vmov 0 }
 0x17f   :  { %v16265_v35 = vsel %vm10806_vm6, 4294967295, %v16264_v35 }
 0x180   :  { %v10783_v63 = vpop.permute.xlu1 %1039  ;;  %v10785_v10 = vpop.permute.xlu0 %733  ;;  %16266 = vst [vmem:[#allocation41_spill] sm:$0xff] %v16265_v35  ;;  %v378_v15 = vsel %vm16042_vm1, %v9363_v19, %v9352_v58  ;;  %v382_v3 = vsel %vm16042_vm1, %v9358_v14, %v16267_v7  ;;  %v1480_v7 = vsel %vm10806_vm6, %v10292_v40, %v379_v43  ;;  %v466_v58 = vsel %vm16041_vm4, %v10631_v6, %v10637_v12  ;;  %v13408_v35 = vld [vmem:[#allocation5 + $0x2bc] ss:$12 sps:$4 sm:$0xff]  }
 0x181   :  { %16262 = vst [vmem:[#allocation39_spill] sm:$0xff] %v10783_v63  ;;  %16263 = vst [vmem:[#allocation40_spill] sm:$0xff] %v10785_v10  ;;  %v381_v63 = vsel %vm16042_vm1, %v9357_v62, %v9358_v14  ;;  %v1483_v40 = vsel %vm10806_vm6, %v10314_v49, %v382_v3 }
 0x182   :  { %9515 = vrot.lane.b32.xlu1 %v10494_v48, %s10134_s10  ;;  %9520 = vrot.lane.b32.xlu0 %v10496_v52, %s10136_s12  ;;  %v1329_v48 = vrot.slane %v10318_v50, 1  ;;  %v380_v52 = vsel %vm16042_vm1, %v9353_v25, %v9357_v62  ;;  %v465_v25 = vsel %vm16041_vm4, %v10629_v37, %v10631_v6  ;;  %v1479_v6 = vsel %vm10806_vm6, %v10304_v44, %v378_v15 }
 0x183   :  { %v1481_v14 = vsel %vm10806_vm6, %v10295_v41, %v380_v52  ;;  %v1502_v41 = vsel %vm16039_vm2, %v1480_v7, %v465_v25  ;;  %v2118_v7 = vsel %vm16006_vm5, %v10655_v21, %v10653_v1 }
 0x184   :  { %v10797_v10 = vpop.permute.xlu1 %9370  ;;  %v10799_v5 = vpop.permute.xlu0 %9375  ;;  %v1506_v49 = vsel %vm16039_vm2, %v1481_v14, %v466_v58  ;;  %v2119_v58 = vsel %vm16006_vm5, %v10653_v1, %v10663_v59 }
 0x185   :  { %v9373_v32 = vunpack.i.h.bf16 %v10797_v10  ;;  %v9377_v13 = vunpack.i.l.bf16 %v10799_v5  ;;  %v9372_v19 = vunpack.i.l.bf16 %v10797_v10  ;;  %v9378_v10 = vunpack.i.h.bf16 %v10799_v5 }
 0x186   :  { %1201 = vrot.lane.b32.xlu1 %v1178_v56, %s10135_s11  ;;  %v1482_v56 = vsel %vm10806_vm6, %v10307_v45, %v381_v63  ;;  %v468_v45 = vsel %vm16041_vm4, %v10639_v17, %v10645_v60  ;;  %v464_v63 = vsel %vm16041_vm4, %v10647_v38, %v10629_v37 }
 0x187   :  { %v534_v15 = vsel %vm16040_vm7, %v9373_v32, %v9377_v13  ;;  %v1510_v37 = vsel %vm16039_vm2, %v1482_v56, %v467_v47  ;;  %v533_v38 = vsel %vm16040_vm7, %v9372_v19, %v9373_v32  ;;  %v1514_v52 = vsel %vm16039_vm2, %v1483_v40, %v468_v45 }
 0x188   :  { %v10821_v16 = vpop.permute.xlu1 %9380  ;;  %v10823_v62 = vpop.permute.xlu0 %9390  ;;  %v1498_v25 = vsel %vm16039_vm2, %v1479_v6, %v464_v63  ;;  %v535_v47 = vsel %vm16040_vm7, %v9377_v13, %v9378_v10  ;;  %v10883_v32 = vsel %vm10859_vm14, %v1506_v49, %v534_v15  ;;  %v2120_v40 = vsel %vm16006_vm5, %v10663_v59, %v10661_v34 }
 0x189   :  { %v9383_v12 = vunpack.i.h.bf16 %v10821_v16  ;;  %v16007_v17 = vunpack.i.l.bf16 %v10821_v16  ;;  %v9393_v14 = vunpack.i.h.bf16 %v10823_v62  ;;  %v9392_v56 = vunpack.i.l.bf16 %v10823_v62 }
 0x18a   :  { %1351 = vrot.lane.b32.xlu1 %v1329_v48, %s10137_s13  ;;  %v10892_v6 = vsel %vm10859_vm14, %v1502_v41, %v533_v38  ;;  %v2121_v62 = vsel %vm16006_vm5, %v10661_v34, %v10671_v27  ;;  %v10921_v49 = vsel %vm16047_vm9, %v10669_v9, %v10687_v18  ;;  %v10925_v34 = vsel %vm10859_vm14, %v1510_v37, %v535_v47  ;;  %vm10939_vm5 = vmand %vm16049_vm12, %vm1645_vm13 }
 0x18b   :  { %v532_v1 = vsel %vm16040_vm7, %v9383_v12, %v9372_v19  ;;  %v536_v13 = vsel %vm16040_vm7, %v9378_v10, %v16007_v17  ;;  %v10916_v10 = vsel %vm16047_vm9, %v10679_v39, %v10669_v9  ;;  %v2169_v15 = vsel %vm16045_vm8, %v10883_v32, %v2119_v58  ;;  %vm10985_vm13 = vmand %vm16055_vm15, %vm1729_vm3 }
 0x18c   :  { %v9386_v3 = vpop.permute.xlu1 %9385  ;;  %v10866_v43 = vpop.permute.xlu0 %9405  ;;  %v10931_v12 = vsel %vm10859_vm14, %v1498_v25, %v532_v1  ;;  %v10944_v37 = vsel %vm16046_vm11, %v9392_v56, %v9393_v14  ;;  %v2166_v38 = vsel %vm16045_vm8, %v10892_v6, %v2118_v7  ;;  %v10970_v17 = vsel %vm16047_vm9, %v10687_v18, %v10677_v23 }
 0x18d   :  { %v9388_v5 = vunpack.i.h.bf16 %v9386_v3  ;;  %v10870_v48 = vunpack.i.l.bf16 %v9386_v3  ;;  %16271 = vst [vmem:[#allocation43_spill] sm:$0xff] %v10931_v12  ;;  %v10935_v3 = vsel %vm10859_vm14, %v1514_v52, %v536_v13  ;;  %v9407_v25 = vunpack.i.l.bf16 %v10866_v43 }
 0x18e   :  { %16272 = vst [vmem:[#allocation44_spill] sm:$0xff] %v10935_v3  ;;  %vm16284_vm3 = vcmask 539648  }
 0x18f   :  { %v10907_v59 = vsel %vm16046_vm11, %v10870_v48, %v9388_v5  ;;  %v10910_v41 = vsel %vm16046_vm11, %v9388_v5, %v9392_v56  ;;  %v9408_v5 = vunpack.i.h.bf16 %v10866_v43  ;;  %v2172_v43 = vsel %vm16045_vm8, %v10925_v34, %v2120_v40  ;;  %v9716_v40 = vld [vmem:[#allocation5 + $0xc0] ss:$12 sps:$4 sm:$0xff]  }
 0x190   :  { %v10898_v45 = vpop.permute.xlu1 %9395  ;;  %v10900_v63 = vpop.permute.xlu0 %9415  ;;  %v2216_v52 = vsel %vm10939_vm5, %v2169_v15, %v10910_v41  ;;  %v2215_v1 = vsel %vm10939_vm5, %v2166_v38, %v10907_v59  ;;  %v2163_v15 = vsel %vm16045_vm8, %v10931_v12, %v10655_v21  ;;  %v2175_v38 = vsel %vm16045_vm8, %v10935_v3, %v2121_v62 }
 0x191   :  { %16270 = vst [vmem:[#allocation42_spill] sm:$0xff] %v10900_v63  ;;  %v16008_v19 = vunpack.i.l.bf16 %v10898_v45  ;;  %v2239_v18 = vsel %vm16049_vm12, %v2216_v52, %v10921_v49  ;;  %v2236_v62 = vsel %vm16049_vm12, %v2215_v1, %v10916_v10  ;;  %v11016_v1 = vsel %vm16047_vm9, %v10677_v23, %v10696_v33 }
 0x192   :  { %16279 = vst [vmem:[#allocation47_spill] sm:$0xff] %v11016_v1 }
 0x193   :  { %v10961_v56 = vsel %vm16046_vm11, %v9393_v14, %v16008_v19  ;;  %v2217_v14 = vsel %vm10939_vm5, %v2172_v43, %v10944_v37 }
 0x194   :  { %v9401_v58 = vpop.permute.xlu1 %9400  ;;  %v10950_v47 = vpop.permute.xlu0 %9425  ;;  %16275 = vst [vmem:[#allocation45_spill] sm:$0xff] %v10961_v56  ;;  %v2218_v52 = vsel %vm10939_vm5, %v2175_v38, %v10961_v56  ;;  %v2242_v56 = vsel %vm16049_vm12, %v2217_v14, %v10970_v17  ;;  %v9367_v14 = vunpack.i.l.bf16 %v10702_v51 }
 0x195   :  { %v9403_v7 = vunpack.i.h.bf16 %v9401_v58  ;;  %v10963_v13 = vunpack.i.l.bf16 %v9401_v58 }
 0x197   :  { %v10981_v58 = vsel %vm16048_vm10, %v9403_v7, %v9407_v25  ;;  %v10993_v21 = vsel %vm16048_vm10, %v10963_v13, %v9403_v7  ;;  %v11011_v7 = vsel %vm16048_vm10, %v9407_v25, %v9408_v5  ;;  %v2214_v25 = vsel %vm10939_vm5, %v2163_v15, %v10870_v48 }
 0x198   :  { %16276 = vst [vmem:[#allocation46_spill] sm:$0xff] %v10981_v58  ;;  %v10997_v43 = vpop.permute.xlu1 %9410  ;;  %v10999_v19 = vpop.permute.xlu0 %9430  ;;  %v2286_v3 = vsel %vm10985_vm13, %v2239_v18, %v10981_v58  ;;  %v2285_v12 = vsel %vm10985_vm13, %v2236_v62, %v10993_v21  ;;  %v11021_v18 = vsel %vm16043_vm0, %v10685_v29, %v10714_v28  ;;  %v11027_v62 = vsel %vm16043_vm0, %v10704_v24, %v10685_v29 }
 0x199   :  { %16280 = vst [vmem:[#allocation48_spill] sm:$0xff] %v11021_v18  ;;  %v16014_v58 = vunpack.i.l.bf16 %v10997_v43  ;;  %v2307_v23 = vsel %vm16055_vm15, %v2286_v3, %v11021_v18  ;;  %v2305_v38 = vsel %vm16055_vm15, %v2285_v12, %v11027_v62  ;;  %v2245_v15 = vsel %vm16049_vm12, %v2218_v52, %v11016_v1 }
 0x19a   :  { %2358 = vrot.lane.b32.xlu0 %v2307_v23, %s10138_s14  ;;  %2356 = vrot.lane.b32.xlu1 %v2305_v38, %s10138_s14  ;;  %v2287_v12 = vsel %vm10985_vm13, %v2242_v56, %v11011_v7  ;;  %v11062_v52 = vsel %vm16043_vm0, %v10714_v28, %v10694_v22  ;;  %v11067_v56 = vsel %vm16043_vm0, %v10694_v22, %v10721_v2  ;;  %v16283_v22 = vunpack.i.h.bf16 %v10702_v51 }
 0x19b   :  { %v11043_v29 = vsel %vm16048_vm10, %v9408_v5, %v16014_v58  ;;  %16282 = vst [vmem:[#allocation50_spill] sm:$0xff] %v11067_v56  ;;  %v9417_v58 = vunpack.i.l.bf16 %v10900_v63 }
 0x19c   :  { %16281 = vst [vmem:[#allocation49_spill] sm:$0xff] %v11043_v29  ;;  %v11052_v18 = vpop.permute.xlu1 %9420  ;;  %v11054_v23 = vpop.permute.xlu0 %9440  ;;  %v2288_v5 = vsel %vm10985_vm13, %v2245_v15, %v11043_v29  ;;  %v2309_v15 = vsel %vm16055_vm15, %v2287_v12, %v11062_v52  ;;  %v2233_v29 = vsel %vm16049_vm12, %v2214_v25, %v10679_v39  ;;  %v384_v38 = vsel %vm16042_vm1, %v9367_v14, %v16283_v22 }
 0x19d   :  { %v2311_v3 = vsel %vm16055_vm15, %v2288_v5, %v11067_v56  ;;  %v2284_v28 = vsel %vm10985_vm13, %v2233_v29, %v10963_v13  ;;  %v470_v25 = vsel %vm16041_vm4, %v10735_v0, %v10712_v42  ;;  %v1398_v12 = vrot.slane %v10459_v46, 1 }
 0x19e   :  { %2362 = vrot.lane.b32.xlu0 %v2311_v3, %s10138_s14  ;;  %2360 = vrot.lane.b32.xlu1 %v2309_v15, %s10138_s14  ;;  %v11096_v3 = vsel %vm16284_vm3, %v10490_v30, %v10613_v54  ;;  %v16285_v29 = vunpack.i.h.bf16 %v10900_v63  ;;  %v2303_v56 = vsel %vm16055_vm15, %v2284_v28, %v10704_v24  ;;  %v1485_v42 = vsel %vm10806_vm6, %v10443_v31, %v384_v38 }
 0x19f   :  { %v1522_v46 = vsel %vm16039_vm2, %v1485_v42, %v470_v25  ;;  %v9398_v30 = vunpack.i.h.bf16 %v10898_v45  ;;  %v11116_v22 = vshll.u32 %v11096_v3, 16  ;;  %v16287_v28 = vunpack.i.l.bf16 %v10623_v11 }
 0x1a0   :  { %v11085_v1 = vpop.permute.xlu1 %9435  ;;  %v11087_v5 = vpop.permute.xlu0 %1041  ;;  %v538_v15 = vsel %vm16040_vm7, %v9417_v58, %v16285_v29  ;;  %v469_v42 = vsel %vm16041_vm4, %v10645_v60, %v10735_v0  ;;  %v16289_v25 = vunpack.i.l.bf16 %v11052_v18  ;;  %vm16291_vm3 = vcmask 793600  }
 0x1a1   :  { %16286 = vst [vmem:[#allocation51_spill] sm:$0xff] %v11116_v22  ;;  %v383_v63 = vsel %vm16042_vm1, %v16287_v28, %v9367_v14  ;;  %v11123_v38 = vsel %vm10859_vm14, %v1522_v46, %v538_v15  ;;  %v2123_v11 = vsel %vm16291_vm3, %v10719_v4, %v10742_v20  ;;  %v16292_v14 = vunpack.i.l.bf16 %v10821_v16 }
 0x1a2   :  { %1421 = vrot.lane.b32.xlu1 %v1398_v12, %s10118_s25  ;;  %2354 = vrot.lane.b32.xlu0 %v2303_v56, %s10138_s14  ;;  %16288 = vst [vmem:[#allocation52_spill] sm:$0xff] %v11123_v38  ;;  %v1330_v56 = vrot.slane %v10443_v31, 1  ;;  %v11132_v12 = vsel %vm16046_vm11, %v9398_v30, %v16289_v25  ;;  %v16293_v31 = vrot.slane %v10467_v57, 6  ;;  %v1484_v60 = vsel %vm10806_vm6, %v10318_v50, %v383_v63 }
 0x1a3   :  { %16290 = vst [vmem:[#allocation53_spill] sm:$0xff] %v11132_v12  ;;  %v537_v15 = vsel %vm16040_vm7, %v16292_v14, %v9417_v58  ;;  %v422_v28 = vrot.slane %v10502_v53, 7  ;;  %v2181_v16 = vsel %vm16045_vm8, %v11123_v38, %v2123_v11  ;;  %v16021_v58 = vmov 0  }
 0x1a4   :  { %v11111_v54 = vpop.permute.xlu1 %1043  ;;  %v11113_v29 = vpop.permute.xlu0 %1045  ;;  %2496 = vmatprep.mubr.bf16.mxu0 %v16021_v58  ;;  %2537 = vmatprep.mubr.bf16.mxu1 %v16021_v58  ;;  %v490_v25 = vrot.slane %v10512_v26, 7  ;;  %v491_v50 = vrot.slane %v11116_v22, 7  ;;  %v2220_v63 = vsel %vm10939_vm5, %v2181_v16, %v11132_v12  ;;  %v9413_v14 = vunpack.i.h.bf16 %v10997_v43 }
 0x1a5   :  { %9629 = vset.pattern.permute.xlu0 %v16021_v58  ;;  %vm16057_vm4 = vcmask 1044480   ;;  %vm1813_vm1 = vsmask.f32 4352  ;;  %vm1981_vm7 = vsmask.f32 6400 }
 0x1a6   :  { %597 = vrot.lane.b32.xlu1 %v16293_v31, %s10128_s27  ;;  %1353 = vrot.lane.b32.xlu0 %v1330_v56, %s10137_s13  ;;  %v1518_v56 = vsel %vm16039_vm2, %v1484_v60, %v469_v42  ;;  %v11171_v42 = vsel %vm16047_vm9, %v10752_v61, %v10733_v55  ;;  %v16296_v31 = vrot.slane %v10446_v36, 6  ;;  %v2122_v60 = vsel %vm16291_vm3, %v10671_v27, %v10719_v4  ;;  %v16308_v55 = vld [vmem:[#allocation32_spill] sm:$0xff] }
 0x1a7   :  { %v11165_v11 = vsel %vm10859_vm14, %v1518_v56, %v537_v15  ;;  %16295 = vst [vmem:[#allocation55_spill] sm:$0xff] %v11171_v42  ;;  %v16025_v15 = vunpack.i.l.bf16 %v10950_v47  ;;  %v2251_v58 = vsel %vm16049_vm12, %v2220_v63, %v11171_v42  ;;  %v9529_v12 = vpack.i.bf16 %v491_v50, %v490_v25  ;;  %v11208_v50 = vld [vmem:[%s15963_s0 + $0x8] sm:$0xff] }
 0x1a8   :  { %v11147_v0 = vpop.permute.xlu1 %1037  ;;  %v11149_v46 = vpop.permute.xlu0 %9445  ;;  %16294 = vst [vmem:[#allocation54_spill] sm:$0xff] %v11165_v11  ;;  %v16298_v27 = vunpack.i.l.bf16 %v10898_v45  ;;  %v162_v63 = vrot.slane %v11208_v50, %v10258_v8  ;;  %v642_v42 = vrot.slane %v10512_v26, 6  ;;  %vm16044_vm3 = vcmask 1014784  }
 0x1a9   :  { %v11194_v4 = vsel %vm16048_vm10, %v9413_v14, %v16025_v15  ;;  %v423_v15 = vrot.slane %v11096_v3, 7  ;;  %vm16050_vm2 = vcmask 752640  }
 0x1aa   :  { %449 = vrot.lane.b32.xlu1 %v422_v28, %s10124_s23  ;;  %595 = vrot.lane.b32.xlu0 %v16296_v31, %s10128_s27  ;;  %v2178_v28 = vsel %vm16045_vm8, %v11165_v11, %v2122_v60  ;;  %v9524_v31 = vpack.i.bf16 %v11116_v22, %v10512_v26  ;;  %16297 = vst [vmem:[#allocation56_spill] sm:$0xff] %v11194_v4  ;;  %v16300_v60 = vld [vmem:[#allocation34_spill] sm:$0xff] }
 0x1ab   :  { %v11199_v38 = vsel %vm16046_vm11, %v16298_v27, %v9398_v30  ;;  %v2290_v25 = vsel %vm10985_vm13, %v2251_v58, %v11194_v4  ;;  %v16301_v58 = vld [vmem:[#allocation31_spill] sm:$0xff]  ;;  %v16303_v4 = vunpack.i.l.bf16 %v10997_v43  ;;  %v203_v11 = vpack.c.bf16 %v162_v63, %v162_v63 }
 0x1ac   :  { %v11181_v16 = vpop.permute.xlu1 %9450  ;;  %v11183_v56 = vpop.permute.xlu0 %9455  ;;  %16299 = vst [vmem:[#allocation57_spill] sm:$0xff] %v11199_v38  ;;  %v11223_v27 = vsel %vm16043_vm0, %v16301_v58, %v16300_v60  ;;  %v794_v63 = vrot.slane %v10512_v26, 5  ;;  %v9423_v60 = vunpack.i.h.bf16 %v11052_v18  ;;  %v16310_v26 = vld [vmem:[#allocation33_spill] sm:$0xff] }
 0x1ad   :  { %16302 = vst [vmem:[#allocation31_spill] sm:$0xff] %v11223_v27  ;;  %v11229_v8 = vsel %vm16048_vm10, %v16303_v4, %v9413_v14  ;;  %v1027_v14 = vrot.slane %v10446_v36, 3  ;;  %v16309_v4 = vld [vmem:[#allocation16_spill] sm:$0xff] }
 0x1ae   :  { %9530 = vrot.lane.b32.xlu1 %v9529_v12, %s10130_s29  ;;  %9525 = vrot.lane.b32.xlu0 %v9524_v31, %s10123_s22  ;;  %v2219_v12 = vsel %vm10939_vm5, %v2178_v28, %v11199_v38  ;;  %16304 = vst [vmem:[#allocation58_spill] sm:$0xff] %v11229_v8  ;;  %v11234_v31 = vsel %vm16047_vm9, %v10696_v33, %v10752_v61  ;;  %v643_v38 = vrot.slane %v11116_v22, 6 }
 0x1af   :  { %16305 = vst [vmem:[#allocation59_spill] sm:$0xff] %v11234_v31  ;;  %v2315_v28 = vsel %vm16055_vm15, %v2290_v25, %v11223_v27  ;;  %v2248_v43 = vsel %vm16049_vm12, %v2219_v12, %v11234_v31  ;;  %v11262_v31 = vsel %vm16043_vm0, %v10721_v2, %v16301_v58  ;;  %v166_v27 = vrot.slane %v11208_v50, %v16309_v4  ;;  %v16311_v4 = vld [vmem:[#allocation38_spill] sm:$0xff] }
 0x1b0   :  { %v11213_v45 = vpop.permute.xlu1 %1191  ;;  %v11215_v30 = vpop.permute.xlu0 %1193  ;;  %v2289_v25 = vsel %vm10985_vm13, %v2248_v43, %v11229_v8  ;;  %v11265_v43 = vpack.i.bf16 %v643_v38, %v642_v42  ;;  %v16306_v8 = vld [vmem:[#allocation21_spill] sm:$0xff]  ;;  %v619_v2 = vsel %vm16044_vm3, %v16310_v26, %v16311_v4  ;;  %vm1139_vm0 = vcmask 515072  }
 0x1b2   :  { %2366 = vrot.lane.b32.xlu1 %v2315_v28, %s10138_s14  ;;  %451 = vrot.lane.b32.xlu0 %v423_v15, %s10124_s23  ;;  %v795_v28 = vrot.slane %v11116_v22, 5  ;;  %v16307_v22 = vld [vmem:[#allocation36_spill] sm:$0xff]  ;;  %v2313_v15 = vsel %vm16055_vm15, %v2289_v25, %v11262_v31 }
 0x1b3   :  { %v617_v12 = vsel %vm16044_vm3, %v16308_v55, %v16307_v22  ;;  %v618_v25 = vsel %vm16044_vm3, %v16307_v22, %v16310_v26  ;;  %v16312_v22 = vld [vmem:[#allocation35_spill] sm:$0xff] }
 0x1b4   :  { %v11246_v33 = vpop.permute.xlu1 %1195  ;;  %v11248_v61 = vpop.permute.xlu0 %1197  ;;  %v1586_v38 = vsel %vm16045_vm8, %v10892_v6, %v617_v12  ;;  %v1594_v12 = vsel %vm16045_vm8, %v10925_v34, %v619_v2  ;;  %v9433_v34 = vunpack.i.h.bf16 %v10999_v19 }
 0x1b5   :  { %v1648_v6 = vsel %vm10939_vm5, %v1586_v38, %v10907_v59  ;;  %v1650_v26 = vsel %vm10939_vm5, %v1594_v12, %v10944_v37  ;;  %v16314_v37 = vld [vmem:[#allocation22_spill] sm:$0xff] }
 0x1b6   :  { %247 = vrot.lane.b32.xlu1 %v203_v11, %s10122_s6  ;;  %2364 = vrot.lane.b32.xlu0 %v2313_v15, %s10138_s14  ;;  %v11284_v11 = vpack.i.bf16 %v795_v28, %v794_v63  ;;  %v1590_v63 = vsel %vm16045_vm8, %v10883_v32, %v618_v25  ;;  %v684_v28 = vsel %vm16046_vm11, %v9423_v60, %v10870_v48  ;;  %v9428_v48 = vunpack.i.h.bf16 %v10950_v47  ;;  %v16313_v60 = vld [vmem:[#allocation43_spill] sm:$0xff] }
 0x1b7   :  { %v616_v15 = vsel %vm16044_vm3, %v16312_v22, %v16308_v55  ;;  %v1649_v59 = vsel %vm10939_vm5, %v1590_v63, %v10910_v41  ;;  %v204_v32 = vpack.c.bf16 %v166_v27, %v166_v27  ;;  %v1670_v55 = vsel %vm16049_vm12, %v1648_v6, %v10916_v10  ;;  %v16315_v22 = vld [vmem:[#allocation40_spill] sm:$0xff] }
 0x1b8   :  { %v11280_v42 = vpop.permute.xlu1 %1189  ;;  %v11282_v58 = vpop.permute.xlu0 %9460  ;;  %v1582_v2 = vsel %vm16045_vm8, %v16313_v60, %v616_v15  ;;  %v16052_v27 = vunpack.i.l.bf16 %v10999_v19  ;;  %v16051_v25 = vunpack.i.h.bf16 %v11085_v1  ;;  %v9437_v10 = vunpack.i.l.bf16 %v11085_v1 }
 0x1b9   :  { %v1674_v6 = vsel %vm16049_vm12, %v1649_v59, %v10921_v49  ;;  %v1732_v12 = vsel %vm10985_vm13, %v1670_v55, %v10993_v21  ;;  %v1678_v63 = vsel %vm16049_vm12, %v1650_v26, %v10970_v17  ;;  %vm1897_vm8 = vsmask.f32 5376 }
 0x1ba   :  { %1051 = vrot.lane.b32.xlu1 %v1027_v14, %s10129_s28  ;;  %9535 = vrot.lane.b32.xlu0 %v16314_v37, %s10133_s9  ;;  %v1647_v14 = vsel %vm10939_vm5, %v1582_v2, %v684_v28  ;;  %v768_v15 = vsel %vm16047_vm9, %v16315_v22, %v10679_v39  ;;  %v16316_v28 = vld [vmem:[#allocation46_spill] sm:$0xff]  ;;  %v1734_v49 = vsel %vm10985_vm13, %v1678_v63, %v11011_v7  ;;  %vm1291_vm11 = vcmask 498688   ;;  %vm11372_vm9 = vmand %vm16057_vm4, %vm1813_vm1 }
 0x1bb   :  { %v1733_v60 = vsel %vm10985_vm13, %v1674_v6, %v16316_v28  ;;  %v16317_v21 = vrot.slane %v10502_v53, 6  ;;  %v836_v17 = vsel %vm16048_vm10, %v9428_v48, %v10963_v13  ;;  %v1666_v26 = vsel %vm16049_vm12, %v1647_v14, %v768_v15  ;;  %v16318_v48 = vld [vmem:[#allocation48_spill] sm:$0xff] }
 0x1bc   :  { %v11319_v41 = vpop.permute.xlu1 %9465  ;;  %v11321_v38 = vpop.permute.xlu0 %9470  ;;  %vm16072_vm3 = vcmask 1046528   ;;  %v989_v7 = vsel %vm16050_vm2, %v16052_v27, %v9433_v34  ;;  %v1754_v55 = vsel %vm16055_vm15, %v1732_v12, %v11027_v62  ;;  %v990_v13 = vsel %vm16050_vm2, %v9433_v34, %v9437_v10  ;;  %v16321_v34 = vld [vmem:[#allocation39_spill] sm:$0xff] }
 0x1bd   :  { %v1758_v2 = vsel %vm16055_vm15, %v1733_v60, %v16318_v48  ;;  %v1762_v37 = vsel %vm16055_vm15, %v1734_v49, %v11062_v52  ;;  %v9448_v14 = vunpack.i.h.bf16 %v11149_v46  ;;  %v16053_v6 = vunpack.i.l.bf16 %v11149_v46 }
 0x1be   :  { %2103 = vrot.lane.b32.xlu1 %v16317_v21, %s10125_s24  ;;  %249 = vrot.lane.b32.xlu0 %v204_v32, %s10122_s6  ;;  %v991_v32 = vsel %vm16050_vm2, %v9437_v10, %v16051_v25  ;;  %vm2065_vm12 = vsmask.f32 7424  ;;  %vm16322_vm2 = vcmask 523264   ;;  %v1731_v12 = vsel %vm10985_vm13, %v1666_v26, %v836_v17 }
 0x1bf   :  { %v1073_v10 = vsel %vm16322_vm2, %v16321_v34, %v11087_v5  ;;  %v16054_v52 = vunpack.i.h.bf16 %v11181_v16  ;;  %v9452_v63 = vunpack.i.l.bf16 %v11181_v16  ;;  %vm16323_vm1 = vmmov %vm16322_vm2  ;;  %v1817_v15 = vsel %vm11372_vm9, %v1758_v2, %v990_v13 }
 0x1c0   :  { %v11351_v39 = vpop.permute.xlu1 %1343  ;;  %v11353_v59 = vpop.permute.xlu0 %1345  ;;  %v1074_v22 = vsel %vm16323_vm1, %v11087_v5, %v11111_v54  ;;  %vm16324_vm2 = vmmov %vm16323_vm1  ;;  %v1818_v60 = vsel %vm11372_vm9, %v1762_v37, %v991_v32  ;;  %v16325_v49 = vrot.slane %v10467_v57, 3  ;;  %v9463_v5 = vunpack.i.h.bf16 %v11282_v58 }
 0x1c1   :  { %v1075_v28 = vsel %vm16324_vm2, %v11111_v54, %v11113_v29  ;;  %v9462_v17 = vunpack.i.l.bf16 %v11282_v58  ;;  %v16056_v26 = vunpack.i.h.bf16 %v11319_v41  ;;  %v9467_v13 = vunpack.i.l.bf16 %v11319_v41  ;;  %v16326_v54 = vld [vmem:[#allocation37_spill] sm:$0xff] }
 0x1c2   :  { %9540 = vrot.lane.b32.xlu1 %v11265_v43, %s10131_s30  ;;  %1053 = vrot.lane.b32.xlu0 %v16325_v49, %s10129_s28  ;;  %vm16327_vm1 = vcmask 760832   ;;  %v9442_v48 = vunpack.i.l.bf16 %v11054_v23  ;;  %v1816_v2 = vsel %vm11372_vm9, %v1754_v55, %v989_v7  ;;  %v1141_v37 = vsel %vm1139_vm0, %v16053_v6, %v9448_v14 }
 0x1c3   :  { %v920_v32 = vsel %vm16327_vm1, %v16326_v54, %v10704_v24  ;;  %vm16328_vm2 = vcmask 1045504   ;;  %v1838_v25 = vsel %vm16057_vm4, %v1816_v2, %v1073_v10  ;;  %v1142_v27 = vsel %vm1139_vm0, %v9448_v14, %v9452_v63 }
 0x1c4   :  { %v1348_v21 = vpop.permute.xlu1 %1347  ;;  %v11398_v43 = vpop.permute.xlu0 %1349  ;;  %vm11415_vm10 = vmand %vm16328_vm2, %vm1897_vm8  ;;  %v1143_v24 = vsel %vm1139_vm0, %v9452_v63, %v16054_v52  ;;  %vm16331_vm1 = vcmask 506880   ;;  %v16332_v55 = vrot.slane %v10502_v53, 5  ;;  %v1842_v54 = vsel %vm16057_vm4, %v1817_v15, %v1074_v22 }
 0x1c5   :  { %v1225_v7 = vsel %vm16331_vm1, %v11213_v45, %v11215_v30  ;;  %v1846_v6 = vsel %vm16057_vm4, %v1818_v60, %v1075_v28  ;;  %v1750_v10 = vsel %vm16055_vm15, %v1731_v12, %v920_v32  ;;  %vm16333_vm8 = vmmov %vm16331_vm1  ;;  %v16334_v63 = vrot.slane %v11096_v3, 6 }
 0x1c6   :  { %753 = vrot.lane.b32.xlu1 %v16332_v55, %s10126_s4  ;;  %v1227_v14 = vsel %vm16333_vm8, %v11246_v33, %v11248_v61  ;;  %v1900_v55 = vsel %vm11415_vm10, %v1838_v25, %v1141_v37  ;;  %vm16335_vm2 = vmmov %vm16331_vm1  ;;  %v1293_v12 = vsel %vm1291_vm11, %v9462_v17, %v9463_v5  ;;  %v1295_v28 = vsel %vm1291_vm11, %v9467_v13, %v16056_v26 }
 0x1c7   :  { %2105 = vrot.lane.b32.xlu0 %v16334_v63, %s10125_s24  ;;  %v1226_v22 = vsel %vm16335_vm2, %v11215_v30, %v11246_v33  ;;  %vm11451_vm1 = vmand %vm16072_vm3, %vm1981_vm7  ;;  %v9457_v25 = vunpack.i.l.bf16 %v11183_v56  ;;  %vm16338_vm8 = vcmask 1045504   ;;  %v1901_v30 = vsel %vm11415_vm10, %v1842_v54, %v1142_v27 }
 0x1c8   :  { %v11439_v2 = vpop.permute.xlu1 %9475  ;;  %v1342_v52 = vpop.permute.xlu0 %1341  ;;  %v1922_v60 = vsel %vm16338_vm8, %v1900_v55, %v1225_v7  ;;  %v1902_v33 = vsel %vm11415_vm10, %v1846_v6, %v1143_v24  ;;  %vm16339_vm2 = vmmov %vm16338_vm8  ;;  %vm16340_vm7 = vcmask 490496   ;;  %v16342_v26 = vrot.slane %v10446_v36, 2 }
 0x1c9   :  { %v1930_v32 = vsel %vm16339_vm2, %v1902_v33, %v1227_v14  ;;  %v1377_v37 = vsel %vm16340_vm7, %v11351_v39, %v11353_v59  ;;  %vm16341_vm15 = vmmov %vm16340_vm7  ;;  %v1294_v7 = vsel %vm1291_vm11, %v9463_v5, %v9467_v13  ;;  %v16345_v24 = vrot.slane %v16306_v8, 3 }
 0x1ca   :  { %v1379_v63 = vsel %vm16341_vm15, %v1348_v21, %v11398_v43  ;;  %1203 = vrot.lane.b32.xlu1 %v16342_v26, %s10135_s11  ;;  %vm16343_vm8 = vmmov %vm16339_vm2  ;;  %v1984_v55 = vsel %vm11451_vm1, %v1922_v60, %v1293_v12  ;;  %v1986_v26 = vsel %vm11451_vm1, %v1930_v32, %v1295_v28  ;;  %vm16349_vm2 = vcmask 261120  }
 0x1cb   :  { %v1926_v27 = vsel %vm16343_vm8, %v1901_v30, %v1226_v22  ;;  %vm16344_vm4 = vmmov %vm16340_vm7  ;;  %1121 = vrot.lane.b32.xlu0 %v16345_v24, %s10134_s10  ;;  %v2006_v30 = vsel %vm16072_vm3, %v1984_v55, %v1377_v37  ;;  %v2014_v12 = vsel %vm16072_vm3, %v1986_v26, %v1379_v63  ;;  %vm16352_vm8 = vcmask 523264  }
 0x1cc   :  { %v1378_v6 = vsel %vm16344_vm4, %v11353_v59, %v1348_v21  ;;  %v9481_v54 = vpop.permute.xlu1 %9480  ;;  %v11480_v14 = vpop.permute.xlu0 %9485  ;;  %vm16346_vm4 = vcmask 1047552   ;;  %v9472_v21 = vunpack.i.l.bf16 %v11321_v38  ;;  %v1985_v28 = vsel %vm11451_vm1, %v1926_v27, %v1294_v7  ;;  %vm16351_vm7 = vmmov %vm16349_vm2  ;;  %v13212_v59 = vld [vmem:[#allocation5 + $0x150] ss:$12 sps:$4 sm:$0xff]  }
 0x1cd   :  { %v9483_v33 = vunpack.i.h.bf16 %v9481_v54  ;;  %v9482_v5 = vunpack.i.l.bf16 %v9481_v54  ;;  %v9488_v13 = vunpack.i.h.bf16 %v11480_v14  ;;  %v9487_v22 = vunpack.i.l.bf16 %v11480_v14  ;;  %vm11490_vm15 = vmand %vm16346_vm4, %vm2065_vm12  ;;  %v16425_v14 = vld [vmem:[#allocation57_spill] sm:$0xff] }
 0x1ce   :  { %9545 = vrot.lane.b32.xlu1 %v11284_v11, %s10132_s8  ;;  %vm16350_vm12 = vmmov %vm16349_vm2  ;;  %v2010_v54 = vsel %vm16072_vm3, %v1985_v28, %v1378_v6  ;;  %v1072_v37 = vsel %vm16352_vm8, %v11147_v0, %v16321_v34  ;;  %v16353_v63 = vrot.slane %v11096_v3, 5  ;;  %v16354_v26 = vunpack.i.l.bf16 %v10999_v19 }
 0x1cf   :  { %v1445_v60 = vsel %vm16349_vm2, %v9482_v5, %v9483_v33  ;;  %v1447_v32 = vsel %vm16350_vm12, %v9487_v22, %v9488_v13  ;;  %v1446_v24 = vsel %vm16351_vm7, %v9483_v33, %v9487_v22  ;;  %vm16355_vm4 = vcmask 752640  }
 0x1d0   :  { %755 = vrot.lane.b32.xlu0 %v16353_v63, %s10126_s4  ;;  %v446_v7 = vpop.permute.xlu1 %445  ;;  %v11513_v11 = vpop.permute.xlu0 %447  ;;  %v2068_v27 = vsel %vm11490_vm15, %v2006_v30, %v1445_v60  ;;  %v2070_v55 = vsel %vm11490_vm15, %v2014_v12, %v1447_v32  ;;  %v2069_v6 = vsel %vm11490_vm15, %v2010_v54, %v1446_v24  ;;  %v988_v0 = vsel %vm16355_vm4, %v9442_v48, %v16354_v26 }
 0x1d1   :  { %v16356_v34 = vunpack.i.l.bf16 %v11149_v46  ;;  %2464 = vmatprep.subr.bf16.mxu0 %v2068_v27  ;;  %2505 = vmatprep.subr.bf16.mxu1 %v2070_v55  ;;  %v878_v22 = vrot.slane %v10502_v53, 4  ;;  %v1815_v30 = vsel %vm11372_vm9, %v1750_v10, %v988_v0  ;;  %vm16357_vm2 = vcmask 506880   ;;  %v16365_v0 = vld [vmem:[#allocation29_spill] sm:$0xff] }
 0x1d2   :  { %v1224_v12 = vsel %vm16357_vm2, %v11280_v42, %v11213_v45  ;;  %2506 = vmatpush1.bf16.msra.mxu1 %v2069_v6  ;;  %v1180_v19 = vrot.slane %v10467_v57, 2  ;;  %vm16358_vm12 = vcmask 1044480   ;;  %v1292_v46 = vsel %vm1291_vm11, %v9472_v21, %v9462_v17 }
 0x1d3   :  { %v1140_v33 = vsel %vm1139_vm0, %v9457_v25, %v16356_v34  ;;  %v1834_v48 = vsel %vm16358_vm12, %v1815_v30, %v1072_v37  ;;  %905 = vrot.lane.b32.xlu1 %v878_v22, %s10127_s26  ;;  %vm16359_vm7 = vcmask 490496   ;;  %vm16360_vm8 = vcmask 1045504   ;;  %v16369_v30 = vld [vmem:[#allocation42_spill] sm:$0xff] }
 0x1d4   :  { %v1899_v25 = vsel %vm11415_vm10, %v1834_v48, %v1140_v33  ;;  %v1376_v10 = vsel %vm16359_vm7, %v1342_v52, %v11351_v39  ;;  %1205 = vrot.lane.b32.xlu0 %v1180_v19, %s10135_s11  ;;  %v11544_v45 = vpop.permute.xlu1 %9490  ;;  %v11546_v42 = vpop.permute.xlu0 %9495  ;;  %v1331_v58 = vrot.slane %v10446_v36, 1  ;;  %v9477_v17 = vunpack.i.l.bf16 %v11439_v2  ;;  %v16367_v33 = vld [vmem:[#allocation24_spill] sm:$0xff] }
 0x1d5   :  { %v1918_v28 = vsel %vm16360_vm8, %v1899_v25, %v1224_v12  ;;  %v9492_v60 = vunpack.i.l.bf16 %v11544_v45  ;;  %v1248_v21 = vrot.slane %v16306_v8, 2  ;;  %v9478_v39 = vunpack.i.h.bf16 %v11439_v2 }
 0x1d6   :  { %v1983_v32 = vsel %vm11451_vm1, %v1918_v28, %v1292_v46  ;;  %vm16361_vm4 = vcmask 261120   ;;  %v9497_v54 = vunpack.i.l.bf16 %v11546_v42  ;;  %v16064_v27 = vunpack.i.h.bf16 %v11546_v42 }
 0x1d7   :  { %1355 = vrot.lane.b32.xlu1 %v1331_v58, %s10137_s13  ;;  %v1444_v52 = vsel %vm16361_vm4, %v9492_v60, %v9482_v5  ;;  %v2002_v24 = vsel %vm16072_vm3, %v1983_v32, %v1376_v10  ;;  %v16362_v55 = vunpack.i.h.bf16 %v10702_v51  ;;  %vm16363_vm2 = vcmask 1039360  }
 0x1d8   :  { %1273 = vrot.lane.b32.xlu0 %v1248_v21, %s10136_s12  ;;  %v2100_v37 = vpop.permute.xlu1 %2099  ;;  %v11561_v63 = vpop.permute.xlu0 %2101  ;;  %v2067_v8 = vsel %vm11490_vm15, %v2002_v24, %v1444_v52  ;;  %v879_v5 = vrot.slane %v11096_v3, 4  ;;  %vm16364_vm12 = vmmov %vm16363_vm2  ;;  %vm16366_vm7 = vcmask 1031168   ;;  %v16370_v12 = vunpack.i.h.bf16 %v16369_v30 }
 0x1d9   :  { %2465 = vmatpush1.bf16.msra.mxu0 %v2067_v8  ;;  %v385_v6 = vsel %vm16363_vm2, %v16362_v55, %v9477_v17  ;;  %v386_v26 = vsel %vm16364_vm12, %v9477_v17, %v9478_v39  ;;  %v471_v34 = vsel %vm16366_vm7, %v16365_v0, %v446_v7  ;;  %vm16368_vm8 = vmmov %vm16366_vm7  ;;  %vm16371_vm4 = vcmask 1022976  }
 0x1da   :  { %v472_v22 = vsel %vm16368_vm8, %v446_v7, %v11513_v11  ;;  %v539_v51 = vsel %vm16371_vm4, %v16370_v12, %v9497_v54  ;;  %v1486_v46 = vsel %vm10806_vm6, %v10446_v36, %v385_v6  ;;  %vm16372_vm2 = vmmov %vm16371_vm4  ;;  %vm16373_vm12 = vcmask 1040384   ;;  %v16382_v6 = vld [vmem:[#allocation30_spill] sm:$0xff] }
 0x1db   :  { %9550 = vrot.lane.b32.xlu1 %v16367_v33, %s10118_s25  ;;  %v540_v25 = vsel %vm16372_vm2, %v9497_v54, %v16064_v27  ;;  %v1526_v28 = vsel %vm16373_vm12, %v1486_v46, %v471_v34  ;;  %v1487_v60 = vsel %vm10806_vm6, %v10467_v57, %v386_v26  ;;  %v1332_v58 = vrot.slane %v10467_v57, 1  ;;  %vm16374_vm7 = vmmov %vm16373_vm12  ;;  %v16388_v46 = vld [vmem:[#allocation44_spill] sm:$0xff] }
 0x1dc   :  { %907 = vrot.lane.b32.xlu0 %v879_v5, %s10127_s26  ;;  %v11583_v19 = vpop.permute.xlu1 %9500  ;;  %v11585_v48 = vpop.permute.xlu0 %751  ;;  %v1530_v17 = vsel %vm16374_vm7, %v1487_v60, %v472_v22  ;;  %v11603_v36 = vsel %vm10859_vm14, %v1526_v28, %v539_v51  ;;  %vm16375_vm8 = vcmask 793600   ;;  %v16377_v24 = vunpack.i.l.bf16 %v11052_v18  ;;  %v16390_v28 = vld [vmem:[#allocation45_spill] sm:$0xff]  ;;  %v16451_v27 = vld [vmem:[#allocation52_spill] sm:$0xff] }
 0x1dd   :  { %v16060_v7 = vunpack.i.h.bf16 %v11583_v19  ;;  %v9502_v10 = vunpack.i.l.bf16 %v11583_v19  ;;  %v2124_v21 = vsel %vm16375_vm8, %v10742_v20, %v2100_v37  ;;  %v11609_v32 = vsel %vm10859_vm14, %v1530_v17, %v540_v25  ;;  %vm16376_vm4 = vmmov %vm16375_vm8 }
 0x1de   :  { %v2125_v52 = vsel %vm16376_vm4, %v2100_v37, %v11561_v63  ;;  %vm16378_vm2 = vcmask 785408   ;;  %vm16380_vm7 = vcmask 1041408   ;;  %vm16383_vm4 = vcmask 777216  }
 0x1df   :  { %v11616_v57 = vsel %vm16378_vm2, %v16377_v24, %v9502_v10  ;;  %vm16379_vm12 = vmmov %vm16378_vm2  ;;  %v2184_v55 = vsel %vm16380_vm7, %v11603_v36, %v2124_v21  ;;  %v16395_v21 = vld [vmem:[#allocation34_spill] sm:$0xff]  ;;  %v16397_v24 = vld [vmem:[#allocation47_spill] sm:$0xff] }
 0x1e0   :  { %1357 = vrot.lane.b32.xlu0 %v1332_v58, %s10137_s13  ;;  %v750_v54 = vpop.permute.xlu1 %749  ;;  %v902_v8 = vpop.permute.xlu0 %901  ;;  %v11622_v20 = vsel %vm16379_vm12, %v9502_v10, %v16060_v7  ;;  %vm16381_vm8 = vmmov %vm16380_vm7  ;;  %v2221_v5 = vsel %vm10939_vm5, %v2184_v55, %v11616_v57  ;;  %vm16386_vm12 = vcmask 1014784   ;;  %vm16387_vm7 = vcmask 1042432  }
 0x1e1   :  { %v2187_v37 = vsel %vm16381_vm8, %v11609_v32, %v2125_v52  ;;  %v11630_v18 = vsel %vm16383_vm4, %v16382_v6, %v750_v54  ;;  %vm16384_vm2 = vmmov %vm16383_vm4  ;;  %v16391_v58 = vunpack.i.l.bf16 %v10950_v47 }
 0x1e2   :  { %v11637_v26 = vsel %vm16384_vm2, %v750_v54, %v11585_v48  ;;  %v2222_v0 = vsel %vm10939_vm5, %v2187_v37, %v11622_v20  ;;  %v2254_v51 = vsel %vm16387_vm7, %v2221_v5, %v11630_v18  ;;  %vm16389_vm4 = vmmov %vm16387_vm7  ;;  %vm16392_vm2 = vcmask 769024  }
 0x1e3   :  { %16385 = vst [vmem:[#allocation21_spill] sm:$0xff] %v11637_v26  ;;  %v2257_v10 = vsel %vm16389_vm4, %v2222_v0, %v11637_v26  ;;  %vm16396_vm7 = vcmask 760832   ;;  %v16465_v26 = vld [vmem:[#allocation55_spill] sm:$0xff] }
 0x1e4   :  { %v11642_v34 = vpop.permute.xlu1 %9505  ;;  %v592_v33 = vpop.permute.xlu0 %591  ;;  %v11669_v52 = vsel %vm16396_vm7, %v16395_v21, %v902_v8 }
 0x1e5   :  { %v16059_v22 = vunpack.i.h.bf16 %v11642_v34  ;;  %v9507_v30 = vunpack.i.l.bf16 %v11642_v34  ;;  %v620_v12 = vsel %vm16386_vm12, %v16311_v4, %v592_v33  ;;  %vm16393_vm12 = vmmov %vm16392_vm2 }
 0x1e6   :  { %v1598_v25 = vsel %vm16381_vm8, %v16388_v46, %v620_v12  ;;  %vm16398_vm8 = vmmov %vm16389_vm4  ;;  %v16403_v12 = vld [vmem:[#allocation49_spill] sm:$0xff] }
 0x1e7   :  { %v1651_v60 = vsel %vm10939_vm5, %v1598_v25, %v16390_v28  ;;  %v11660_v17 = vsel %vm16392_vm2, %v16391_v58, %v9507_v30  ;;  %v11665_v4 = vsel %vm16393_vm12, %v9507_v30, %v16059_v22  ;;  %vm16399_vm4 = vmmov %vm16396_vm7  ;;  %vm16401_vm2 = vcmask 1043456   ;;  %v16404_v28 = vld [vmem:[#allocation20_spill] sm:$0xff]  ;;  %v16406_v58 = vld [vmem:[#allocation50_spill] sm:$0xff] }
 0x1e8   :  { %16394 = vst [vmem:[#allocation36_spill] sm:$0xff] %v11665_v4  ;;  %v1682_v54 = vsel %vm16398_vm8, %v1651_v60, %v16397_v24  ;;  %v11673_v55 = vpop.permute.xlu1 %903  ;;  %v11675_v37 = vpop.permute.xlu0 %9510  ;;  %v2291_v47 = vsel %vm10985_vm13, %v2254_v51, %v11660_v17  ;;  %v2292_v6 = vsel %vm10985_vm13, %v2257_v10, %v11665_v4  ;;  %vm16402_vm12 = vmmov %vm16401_vm2  ;;  %v9458_v10 = vunpack.i.h.bf16 %v11183_v56 }
 0x1e9   :  { %v11685_v5 = vsel %vm16399_vm4, %v902_v8, %v11673_v55  ;;  %v2317_v0 = vsel %vm16401_vm2, %v2291_v47, %v11669_v52  ;;  %v1735_v51 = vsel %vm10985_vm13, %v1682_v54, %v16403_v12  ;;  %v9443_v8 = vunpack.i.h.bf16 %v11054_v23  ;;  %vm16407_vm7 = vmmov %vm16401_vm2  ;;  %v16411_v23 = vld [vmem:[#allocation23_spill] sm:$0xff] }
 0x1ea   :  { %16400 = vst [vmem:[#allocation32_spill] sm:$0xff] %v11685_v5  ;;  %2368 = vrot.lane.b32.xlu0 %v2317_v0, %s10138_s14  ;;  %v2319_v30 = vsel %vm16402_vm12, %v2292_v6, %v11685_v5  ;;  %v16405_v60 = vrot.slane %v16404_v28, 6  ;;  %v1766_v21 = vsel %vm16407_vm7, %v1735_v51, %v16406_v58  ;;  %v16408_v24 = vrot.slane %v10502_v53, 6 }
 0x1eb   :  { %2370 = vrot.lane.b32.xlu1 %v2319_v30, %s10138_s14  ;;  %v16409_v54 = vunpack.i.h.bf16 %v11085_v1  ;;  %vm16410_vm8 = vcmask 752640   ;;  %v946_v56 = vrot.slane %v16411_v23, 4  ;;  %v9473_v30 = vunpack.i.h.bf16 %v11321_v38 }
 0x1ec   :  { %v11696_v46 = vpop.permute.xlu1 %593  ;;  %v11698_v25 = vpop.permute.xlu0 %1049  ;;  %vm16412_vm4 = vcmask 523264   ;;  %v16413_v58 = vunpack.i.h.bf16 %v11181_v16  ;;  %vm16414_vm2 = vcmask 1044480   ;;  %vm16415_vm12 = vcmask 506880  }
 0x1ed   :  { %v992_v47 = vsel %vm16410_vm8, %v16409_v54, %v9443_v8  ;;  %vm16416_vm7 = vcmask 1045504   ;;  %v1030_v16 = vrot.slane %v10502_v53, 3  ;;  %v16417_v23 = vunpack.i.h.bf16 %v11319_v41 }
 0x1ee   :  { %599 = vrot.lane.b32.xlu0 %v16405_v60, %s10128_s27  ;;  %v1819_v51 = vsel %vm11372_vm9, %v1766_v21, %v992_v47  ;;  %v1029_v60 = vrot.slane %v16404_v28, 3  ;;  %v1144_v1 = vsel %vm1139_vm0, %v16413_v58, %v9458_v10  ;;  %v1182_v58 = vrot.slane %v10502_v53, 2 }
 0x1ef   :  { %601 = vrot.lane.b32.xlu1 %v16408_v24, %s10128_s27  ;;  %vm16419_vm8 = vcmask 490496  }
 0x1f0   :  { %v1048_v6 = vpop.permute.xlu1 %1047  ;;  %v11713_v0 = vpop.permute.xlu0 %1199 }
 0x1f1   :  { %v1076_v12 = vsel %vm16412_vm4, %v11113_v29, %v1048_v6  ;;  %v1228_v54 = vsel %vm16415_vm12, %v11248_v61, %v11713_v0  ;;  %vm16420_vm4 = vcmask 1014784   ;;  %vm16424_vm12 = vcmask 1041408  }
 0x1f2   :  { %v1850_v24 = vsel %vm16414_vm2, %v1819_v51, %v1076_v12  ;;  %973 = vrot.lane.b32.xlu0 %v946_v56, %s10133_s9  ;;  %v1296_v56 = vsel %vm1291_vm11, %v16417_v23, %v9473_v30  ;;  %v16418_v12 = vld [vmem:[#allocation25_spill] sm:$0xff]  ;;  %vm16422_vm2 = vcmask 261120  }
 0x1f3   :  { %v1903_v29 = vsel %vm11415_vm10, %v1850_v24, %v1144_v1  ;;  %1055 = vrot.lane.b32.xlu1 %v1029_v60, %s10129_s28  ;;  %v1181_v60 = vrot.slane %v16404_v28, 2  ;;  %v9493_v1 = vunpack.i.h.bf16 %v11544_v45 }
 0x1f4   :  { %v1934_v21 = vsel %vm16416_vm7, %v1903_v29, %v1228_v54  ;;  %v11734_v47 = vpop.permute.xlu1 %9515  ;;  %v1333_v54 = vrot.slane %v16404_v28, 1  ;;  %v621_v29 = vsel %vm16420_vm4, %v592_v33, %v11696_v46  ;;  %v1334_v33 = vrot.slane %v10502_v53, 1 }
 0x1f5   :  { %v1987_v61 = vsel %vm11451_vm1, %v1934_v21, %v1296_v56  ;;  %v16421_v21 = vld [vmem:[#allocation26_spill] sm:$0xff]  ;;  %vm16428_vm7 = vcmask 1042432   ;;  %vm16071_vm4 = vcmask 252928  }
 0x1f6   :  { %1057 = vrot.lane.b32.xlu0 %v1030_v16, %s10129_s28  ;;  %v11766_v16 = vsel %vm16422_vm2, %v9488_v13, %v9493_v1  ;;  %v16423_v56 = vld [vmem:[#allocation54_spill] sm:$0xff]  ;;  %vm16431_vm2 = vcmask 1044480  }
 0x1f7   :  { %9555 = vrot.lane.b32.xlu1 %v16418_v12, %s10134_s10  ;;  %v1602_v12 = vsel %vm16424_vm12, %v16423_v56, %v621_v29 }
 0x1f8   :  { %v11747_v51 = vpop.permute.xlu1 %1201  ;;  %v1652_v13 = vsel %vm10939_vm5, %v1602_v12, %v16425_v14  ;;  %v16062_v12 = vunpack.i.l.bf16 %v11734_v47 }
 0x1fa   :  { %1207 = vrot.lane.b32.xlu0 %v1181_v60, %s10135_s11  ;;  %v16427_v60 = vld [vmem:[#allocation59_spill] sm:$0xff] }
 0x1fb   :  { %1209 = vrot.lane.b32.xlu1 %v1182_v58, %s10135_s11  ;;  %v1686_v58 = vsel %vm16428_vm7, %v1652_v13, %v16427_v60  ;;  %vm16433_vm7 = vcmask 752640  }
 0x1fc   :  { %v1352_v41 = vpop.permute.xlu1 %1351 }
 0x1fd   :  { %v1380_v24 = vsel %vm16419_vm8, %v11398_v43, %v1352_v41  ;;  %vm16429_vm8 = vcmask 1043456  }
 0x1fe   :  { %9560 = vrot.lane.b32.xlu0 %v16421_v21, %s10136_s12  ;;  %v11769_v23 = vsel %vm16072_vm3, %v1987_v61, %v1380_v24  ;;  %v16426_v61 = vld [vmem:[#allocation27_spill] sm:$0xff]  ;;  %v11787_v24 = vpop.permute.xlu0 %9520  ;;  %vm16432_vm12 = vmmov %vm16429_vm8 }
 0x1ff   :  { %1359 = vrot.lane.b32.xlu1 %v1333_v54, %s10137_s13  ;;  %v2071_v43 = vsel %vm11490_vm15, %v11769_v23, %v11766_v16  ;;  %v16058_v54 = vmov 65535   ;;  %v16430_v16 = vld [vmem:[#allocation58_spill] sm:$0xff]  ;;  %v16063_v23 = vunpack.i.l.bf16 %v11675_v37 }
 0x200   :  { %v2414_v21 = vsel %vm16429_vm8, 4294967295, %v16058_v54  ;;  %v1736_v29 = vsel %vm10985_vm13, %v1686_v58, %v16430_v16  ;;  %vm16434_vm8 = vcmask 523264  }
 0x201   :  { %v1770_v56 = vsel %vm16432_vm12, %v1736_v29, %v11262_v31  ;;  %v993_v60 = vsel %vm16433_vm7, %v9443_v8, %v16063_v23  ;;  %v1077_v54 = vsel %vm16434_vm8, %v1048_v6, %v11698_v25  ;;  %vm16435_vm12 = vcmask 506880  }
 0x202   :  { %1361 = vrot.lane.b32.xlu0 %v1334_v33, %s10137_s13  ;;  %v11796_v33 = vsel %vm16431_vm2, %v2414_v21, 0  ;;  %v1820_v16 = vsel %vm11372_vm9, %v1770_v56, %v993_v60  ;;  %v1145_v21 = vsel %vm1139_vm0, %v9458_v10, %v16062_v12  ;;  %v1229_v10 = vsel %vm16435_vm12, %v11713_v0, %v11747_v51 }
 0x203   :  { %v1854_v8 = vsel %vm16431_vm2, %v1820_v16, %v1077_v54  ;;  %vm16436_vm7 = vcmask 1045504   ;;  %v11829_v54 = vld [vmem:[#allocation2] sm:$0xf]  ;;  %vm16068_vm8 = vcmask 203776   ;;  %vm16437_vm2 = vcmask 490496  }
 0x204   :  { %v1904_v60 = vsel %vm11415_vm10, %v1854_v8, %v1145_v21  ;;  %vm16439_vm12 = vcmask 261120  }
 0x206   :  { %9570 = vrot.lane.b32.xlu0 %v16426_v61, %s10118_s25 }
 0x20c   :  { %v2359_v14 = vpop.permute.xlu0 %2358  ;;  %v2357_v13 = vpop.permute.xlu1 %2356 }
 0x20d   :  { %v2390_v61 = vsel %vm16071_vm4, %v2357_v13, %v2359_v14 }
 0x20e   :  { %v2420_v58 = vand.u32 %v11796_v33, %v2390_v61 }
 0x210   :  { %v2363_v31 = vpop.permute.xlu0 %2362  ;;  %v2361_v29 = vpop.permute.xlu1 %2360  ;;  %2466 = vmatprep.subr.bf16.mxu0 %v2420_v58  ;;  %v16061_v58 = vunpack.i.l.bf16 %v11787_v24 }
 0x211   :  { %v2391_v22 = vsel %vm16071_vm4, %v2359_v14, %v2361_v29  ;;  %v2392_v7 = vsel %vm16071_vm4, %v2361_v29, %v2363_v31 }
 0x212   :  { %v2426_v61 = vand.u32 %v11796_v33, %v2392_v7  ;;  %v2423_v56 = vand.u32 %v11796_v33, %v2391_v22  ;;  %v1938_v7 = vsel %vm16436_vm7, %v1904_v60, %v1229_v10  ;;  %v1297_v0 = vsel %vm1291_vm11, %v9473_v30, %v16061_v58 }
 0x213   :  { %v1988_v8 = vsel %vm11451_vm1, %v1938_v7, %v1297_v0  ;;  %vm16440_vm7 = vcmask 1014784  }
 0x214   :  { %2507 = vmatprep.subr.bf16.mxu1 %v2426_v61  ;;  %v11824_v6 = vpop.permute.xlu1 %1421  ;;  %v2355_v14 = vpop.permute.xlu0 %2354  ;;  %v16438_v61 = vmov 0  }
 0x215   :  { %v2389_v29 = vsel %vm16071_vm4, %v2355_v14, %v2357_v13  ;;  %2508 = vmatpush1.bf16.msra.mxu1 %v2423_v56  ;;  %v1449_v38 = vsel %vm16439_vm12, %v9493_v1, %v11824_v6  ;;  %vm16442_vm12 = vcmask 1042432  }
 0x216   :  { %v2417_v22 = vand.u32 %v11796_v33, %v2389_v29 }
 0x218   :  { %v11836_v16 = vpop.permute.xlu1 %597  ;;  %v11838_v21 = vpop.permute.xlu0 %1353  ;;  %2467 = vmatpush1.bf16.msra.mxu0 %v2417_v22  ;;  %8674 = vmatmul.mubr.msk.bf16.vlgmr.msra.gmra.mrb[0].mxu1 %vm16068_vm8, %v11829_v54 }
 0x219   :  { %v1381_v13 = vsel %vm16437_vm2, %v1352_v41, %v11838_v21  ;;  %2619 = vmatprep.mubr.bf16.mxu1 %v16438_v61  ;;  %vm16441_vm2 = vcmask 1041408  }
 0x21a   :  { %v2022_v30 = vsel %vm16072_vm3, %v1988_v8, %v1381_v13  ;;  %vm16480_vm3 = vcmask 1043456  }
 0x21b   :  { %v2072_v56 = vsel %vm11490_vm15, %v2022_v30, %v1449_v38  ;;  %8673 = vmatmul.mubr.msk.bf16.vlgmr.msra.gmra.mrb[0].mxu0 %vm16068_vm8, %v11829_v54 }
 0x21c   :  { %v11856_v10 = vpop.permute.xlu1 %449  ;;  %v596_v41 = vpop.permute.xlu0 %595  ;;  %2546 = vmatprep.subr.bf16.mxu0 %v2072_v56  ;;  %2578 = vmatprep.mubr.bf16.mxu0 %v16438_v61 }
 0x21d   :  { %v623_v60 = vsel %vm16440_vm7, %v596_v41, %v11836_v16  ;;  %2547 = vmatpush1.bf16.msra.mxu0 %v2071_v43  ;;  %vm16443_vm7 = vcmask 1043456  }
 0x21e   :  { %v1610_v45 = vsel %vm16441_vm2, %v11603_v36, %v623_v60  ;;  %vm16445_vm2 = vcmask 539648  }
 0x21f   :  { %v1654_v1 = vsel %vm10939_vm5, %v1610_v45, %v11616_v57 }
 0x220   :  { %v1694_v14 = vsel %vm16442_vm12, %v1654_v1, %v11630_v18  ;;  %v11868_v29 = vpop.permute.xlu1 %9530  ;;  %v11870_v7 = vpop.permute.xlu0 %9525  ;;  %vm16448_vm12 = vmmov %vm16445_vm2 }
 0x221   :  { %v1738_v22 = vsel %vm10985_vm13, %v1694_v14, %v11660_v17  ;;  %v16447_v14 = vld [vmem:[#allocation19_spill] sm:$0xff] }
 0x222   :  { %v11877_v43 = vsel %vm16443_vm7, %v1738_v22, %v11669_v52  ;;  %v16444_v52 = vld [vmem:[#allocation28_spill] sm:$0xff]  ;;  %v170_v22 = vrot.slane %v11208_v50, %v16447_v14  ;;  %vm16449_vm7 = vcmask 1014784  }
 0x223   :  { %16776 = vst [vmem:[#allocation28_spill] sm:$0xff] %v13408_v35 }
 0x224   :  { %v11879_v36 = vpop.permute.xlu1 %2366  ;;  %v11881_v0 = vpop.permute.xlu0 %451  ;;  %v205_v23 = vpack.c.bf16 %v170_v22, %v170_v22 }
 0x228   :  { %v248_v57 = vpop.permute.xlu1 %247  ;;  %v2365_v13 = vpop.permute.xlu0 %2364 }
 0x229   :  { %v2393_v18 = vsel %vm16071_vm4, %v2363_v31, %v2365_v13  ;;  %v2394_v8 = vsel %vm16071_vm4, %v2365_v13, %v11879_v36  ;;  %v11894_v60 = vsel %vm16445_vm2, %v16444_v52, %v248_v57  ;;  %v9527_v31 = vunpack.i.l.bf16 %v11870_v7 }
 0x22a   :  { %v2429_v38 = vand.u32 %v11796_v33, %v2393_v18  ;;  %v2432_v30 = vand.u32 %v11796_v33, %v2394_v8  ;;  %v11911_v18 = vshll.u32 %v11894_v60, 16  ;;  %v622_v52 = vsel %vm16449_vm7, %v11696_v46, %v596_v41 }
 0x22b   :  { %vm16450_vm2 = vcmask 1039360   ;;  %vm16453_vm7 = vcmask 1031168   ;;  %vm16478_vm4 = vcmask 1022976  }
 0x22c   :  { %v11888_v17 = vpop.permute.xlu1 %1051  ;;  %v11890_v56 = vpop.permute.xlu0 %9535  ;;  %2548 = vmatprep.subr.bf16.mxu0 %v2432_v30  ;;  %v492_v5 = vrot.slane %v11911_v18, 7 }
 0x22d   :  { %2549 = vmatpush1.bf16.msra.mxu0 %v2429_v38 }
 0x230   :  { %v11896_v45 = vpop.permute.xlu1 %2103  ;;  %v11899_v1 = vpop.permute.xlu0 %249  ;;  %8675 = vmatmul.mubr.msk.bf16.vlgmr.msra.gmra.mrb[4].mxu0 %vm16068_vm8, %v11829_v54  ;;  %vm16461_vm8 = vcmask 1039360  }
 0x231   :  { %16446 = vst [vmem:[#allocation33_spill] sm:$0xff] %v11899_v1  ;;  %v11907_v13 = vsel %vm16448_vm12, %v248_v57, %v11899_v1  ;;  %2660 = vmatprep.mubr.bf16.mxu0 %v16438_v61  ;;  %v387_v57 = vsel %vm16450_vm2, %v9478_v39, %v9527_v31  ;;  %vm16452_vm12 = vcmask 1041408   ;;  %v9532_v1 = vunpack.i.l.bf16 %v11868_v29 }
 0x232   :  { %v11914_v8 = vshll.u32 %v11907_v13, 16  ;;  %v425_v38 = vrot.slane %v11907_v13, 7  ;;  %v1606_v14 = vsel %vm16452_vm12, %v16451_v27, %v622_v52  ;;  %v1488_v2 = vsel %vm10806_vm6, %v16404_v28, %v387_v57  ;;  %v16454_v52 = vld [vmem:[#allocation18_spill] sm:$0xff]  ;;  %v16455_v57 = vld [vmem:[#allocation53_spill] sm:$0xff] }
 0x233   :  { %v174_v28 = vrot.slane %v11208_v50, %v16454_v52  ;;  %v1653_v46 = vsel %vm10939_vm5, %v1606_v14, %v16455_v57  ;;  %vm16456_vm2 = vcmask 1040384   ;;  %vm16457_vm12 = vcmask 793600  }
 0x234   :  { %v11917_v30 = vpop.permute.xlu1 %9540  ;;  %455 = vrot.lane.b32.xlu0 %v425_v38, %s10124_s23  ;;  %v11925_v58 = vpop.permute.xlu0 %1053  ;;  %v9564_v12 = vpack.i.bf16 %v11914_v8, %v11911_v18  ;;  %v493_v27 = vrot.slane %v11914_v8, 7  ;;  %v473_v38 = vsel %vm16453_vm7, %v11513_v11, %v11856_v10  ;;  %v2126_v4 = vsel %vm16457_vm12, %v11561_v63, %v11896_v45 }
 0x235   :  { %v1534_v41 = vsel %vm16456_vm2, %v1488_v2, %v473_v38  ;;  %v16458_v50 = vunpack.i.h.bf16 %v11546_v42  ;;  %vm16459_vm7 = vcmask 1022976   ;;  %v16460_v14 = vunpack.i.h.bf16 %v11870_v7 }
 0x236   :  { %9565 = vrot.lane.b32.xlu1 %v9564_v12, %s10123_s22  ;;  %v424_v12 = vrot.slane %v11894_v60, 7  ;;  %v16463_v38 = vunpack.i.h.bf16 %v11583_v19  ;;  %vm16464_vm2 = vcmask 785408   ;;  %v9574_v42 = vpack.i.bf16 %v493_v27, %v492_v5  ;;  %v16470_v27 = vld [vmem:[#allocation56_spill] sm:$0xff] }
 0x237   :  { %v541_v52 = vsel %vm16459_vm7, %v16458_v50, %v9532_v1  ;;  %v388_v2 = vsel %vm16461_vm8, %v9527_v31, %v16460_v14  ;;  %vm16466_vm12 = vcmask 1042432   ;;  %v9513_v14 = vunpack.i.h.bf16 %v11675_v37 }
 0x238   :  { %v11936_v39 = vpop.permute.xlu1 %753  ;;  %251 = vrot.lane.b32.xlu0 %v205_v23, %s10122_s6  ;;  %v16070_v23 = vrot.slane %v11894_v60, 6  ;;  %v1690_v50 = vsel %vm16466_vm12, %v1653_v46, %v16465_v26  ;;  %v11984_v31 = vsel %vm10859_vm14, %v1534_v41, %v541_v52  ;;  %v16073_v19 = vunpack.i.h.bf16 %v11868_v29 }
 0x239   :  { %v11941_v22 = vpop.permute.xlu0 %2105  ;;  %vm16467_vm8 = vcmask 1041408   ;;  %vm16468_vm7 = vcmask 1031168   ;;  %v1489_v26 = vsel %vm10806_vm6, %v10502_v53, %v388_v2  ;;  %v1737_v52 = vsel %vm10985_vm13, %v1690_v50, %v16470_v27  ;;  %v16479_v27 = vld [vmem:[#allocation31_spill] sm:$0xff] }
 0x23a   :  { %453 = vrot.lane.b32.xlu1 %v424_v12, %s10124_s23  ;;  %v16462_v12 = vunpack.i.l.bf16 %v11917_v30  ;;  %v474_v5 = vsel %vm16468_vm7, %v11856_v10, %v11881_v0  ;;  %v16472_v53 = vunpack.i.l.bf16 %v11675_v37  ;;  %vm16473_vm12 = vcmask 752640  }
 0x23b   :  { %vm16475_vm7 = vcmask 1042432   ;;  %v542_v50 = vsel %vm16478_vm4, %v9532_v1, %v16073_v19  ;;  %v1774_v37 = vsel %vm16480_vm3, %v1737_v52, %v16479_v27  ;;  %v16074_v1 = vrot.slane %v11907_v13, 6 }
 0x23c   :  { %v11960_v11 = vpop.permute.xlu1 %1203  ;;  %v11973_v57 = vsel %vm16464_vm2, %v16463_v38, %v16462_v12  ;;  %2107 = vrot.lane.b32.xlu0 %v16070_v23, %s10125_s24  ;;  %v2190_v12 = vsel %vm16467_vm8, %v11984_v31, %v2126_v4  ;;  %v206_v38 = vpack.c.bf16 %v174_v28, %v174_v28  ;;  %vm16469_vm2 = vcmask 777216  }
 0x23d   :  { %v11978_v63 = vpop.permute.xlu0 %1121  ;;  %v12000_v46 = vsel %vm16469_vm2, %v11585_v48, %v11936_v39  ;;  %v2223_v4 = vsel %vm10939_vm5, %v2190_v12, %v11973_v57  ;;  %v994_v2 = vsel %vm16473_vm12, %v16472_v53, %v9513_v14  ;;  %vm16474_vm8 = vcmask 1040384  }
 0x23e   :  { %9575 = vrot.lane.b32.xlu1 %v9574_v42, %s10130_s29  ;;  %v1538_v48 = vsel %vm16474_vm8, %v1489_v26, %v474_v5  ;;  %v2260_v42 = vsel %vm16475_vm7, %v2223_v4, %v12000_v46  ;;  %v16476_v12 = vunpack.i.h.bf16 %v11642_v34  ;;  %vm16477_vm2 = vcmask 769024  }
 0x23f   :  { %vm16481_vm12 = vcmask 793600   ;;  %vm16482_vm8 = vcmask 760832   ;;  %v645_v52 = vrot.slane %v11914_v8, 6  ;;  %vm16483_vm3 = vcmask 523264  }
 0x240   :  { %v12005_v41 = vpop.permute.xlu1 %9545  ;;  %v2127_v5 = vsel %vm16481_vm12, %v11896_v45, %v11941_v22  ;;  %v1078_v45 = vsel %vm16483_vm3, %v11698_v25, %v11888_v17  ;;  %vm16485_vm4 = vcmask 1043456   ;;  %v9518_v27 = vunpack.i.h.bf16 %v11734_v47 }
 0x241   :  { %v9547_v10 = vunpack.i.l.bf16 %v12005_v41  ;;  %vm16486_vm7 = vcmask 1041408   ;;  %v644_v25 = vrot.slane %v11911_v18, 6  ;;  %vm16488_vm12 = vcmask 1044480  }
 0x242   :  { %v12011_v28 = vpop.permute.xlu0 %755  ;;  %253 = vrot.lane.b32.xlu1 %v206_v38, %s10122_s6  ;;  %v16489_v34 = vunpack.i.h.bf16 %v11917_v30  ;;  %vm16493_vm3 = vcmask 752640  }
 0x243   :  { %16471 = vst [vmem:[#allocation38_spill] sm:$0xff] %v12011_v28  ;;  %v12023_v23 = vsel %vm16477_vm2, %v16476_v12, %v9547_v10  ;;  %vm16487_vm2 = vcmask 777216   ;;  %v16490_v12 = vunpack.i.l.bf16 %v11917_v30 }
 0x244   :  { %v2293_v38 = vsel %vm10985_vm13, %v2260_v42, %v12023_v23  ;;  %v12051_v42 = vsel %vm10859_vm14, %v1538_v48, %v542_v50  ;;  %v1821_v48 = vsel %vm11372_vm9, %v1774_v37, %v994_v2  ;;  %v12069_v50 = vsel %vm16487_vm2, %v11936_v39, %v12011_v28 }
 0x245   :  { %v906_v26 = vpop.permute.xlu1 %905  ;;  %16484 = vst [vmem:[#allocation35_spill] sm:$0xff] %v12051_v42  ;;  %v2193_v19 = vsel %vm16486_vm7, %v12051_v42, %v2127_v5  ;;  %v1858_v5 = vsel %vm16488_vm12, %v1821_v48, %v1078_v45  ;;  %v9579_v42 = vpack.i.bf16 %v645_v52, %v644_v25  ;;  %v16492_v2 = vunpack.i.l.bf16 %v11890_v56 }
 0x246   :  { %v12039_v4 = vsel %vm16482_vm8, %v11673_v55, %v906_v26  ;;  %v12041_v53 = vpop.permute.xlu0 %1205  ;;  %2109 = vrot.lane.b32.xlu1 %v16074_v1, %s10125_s24  ;;  %vm16491_vm8 = vcmask 785408   ;;  %v16494_v45 = vunpack.i.l.bf16 %v11734_v47  ;;  %vm16497_vm7 = vcmask 769024  }
 0x247   :  { %v2321_v55 = vsel %vm16485_vm4, %v2293_v38, %v12039_v4  ;;  %v12077_v1 = vsel %vm16491_vm8, %v16490_v12, %v16489_v34  ;;  %v995_v37 = vsel %vm16493_vm3, %v9513_v14, %v16492_v2  ;;  %vm16495_vm4 = vcmask 1042432  }
 0x248   :  { %2372 = vrot.lane.b32.xlu0 %v2321_v55, %s10138_s14  ;;  %v2224_v39 = vsel %vm10939_vm5, %v2193_v19, %v12077_v1  ;;  %v1146_v48 = vsel %vm1139_vm0, %v16494_v45, %v9518_v27  ;;  %v16496_v34 = vunpack.i.h.bf16 %v12005_v41  ;;  %v9523_v14 = vunpack.i.h.bf16 %v11787_v24 }
 0x249   :  { %v1356_v38 = vpop.permute.xlu1 %1355  ;;  %v2263_v28 = vsel %vm16495_vm4, %v2224_v39, %v12069_v50  ;;  %vm16498_vm2 = vcmask 523264   ;;  %v1905_v47 = vsel %vm11415_vm10, %v1858_v5, %v1146_v48  ;;  %vm16499_vm12 = vcmask 506880  }
 0x24a   :  { %v12079_v55 = vpop.permute.xlu0 %1273  ;;  %v12096_v52 = vsel %vm16497_vm7, %v9547_v10, %v16496_v34  ;;  %v1079_v19 = vsel %vm16498_vm2, %v11888_v17, %v11925_v58  ;;  %v1230_v10 = vsel %vm16499_vm12, %v11747_v51, %v11960_v11  ;;  %v1147_v25 = vsel %vm1139_vm0, %v9518_v27, %v11978_v63  ;;  %vm16500_vm8 = vmmov %vm16499_vm12 }
 0x24b   :  { %v729_v17 = vrot.slane %v11907_v13, 5  ;;  %v1231_v5 = vsel %vm16500_vm8, %v11960_v11, %v12041_v53  ;;  %vm16501_vm3 = vcmask 760832   ;;  %v2294_v51 = vsel %vm10985_vm13, %v2263_v28, %v12096_v52 }
 0x24c   :  { %9580 = vrot.lane.b32.xlu0 %v9579_v42, %s10131_s30  ;;  %v1822_v42 = vsel %vm11372_vm9, %v11877_v43, %v995_v37  ;;  %vm16502_vm4 = vcmask 1044480   ;;  %v1299_v37 = vsel %vm1291_vm11, %v9523_v14, %v12079_v55  ;;  %vm16503_vm7 = vcmask 1043456  }
 0x24d   :  { %v12104_v12 = vpop.permute.xlu1 %9550  ;;  %v1862_v27 = vsel %vm16502_vm4, %v1822_v42, %v1079_v19  ;;  %v16504_v48 = vunpack.i.l.bf16 %v11787_v24  ;;  %vm16505_vm2 = vcmask 1045504   ;;  %vm16507_vm8 = vcmask 490496  }
 0x24e   :  { %v12114_v2 = vpop.permute.xlu0 %907  ;;  %v9552_v39 = vunpack.i.l.bf16 %v12104_v12  ;;  %v1942_v34 = vsel %vm16505_vm2, %v1905_v47, %v1230_v10  ;;  %v1906_v28 = vsel %vm11415_vm10, %v1862_v27, %v1147_v25  ;;  %vm16506_vm12 = vmmov %vm16505_vm2  ;;  %v1382_v42 = vsel %vm16507_vm8, %v11838_v21, %v1356_v38 }
 0x24f   :  { %v12123_v43 = vsel %vm16501_vm3, %v906_v26, %v12114_v2  ;;  %v1298_v26 = vsel %vm1291_vm11, %v16504_v48, %v9523_v14  ;;  %v1946_v19 = vsel %vm16506_vm12, %v1906_v28, %v1231_v5  ;;  %v880_v24 = vrot.slane %v11894_v60, 4  ;;  %vm16508_vm3 = vmmov %vm16507_vm8 }
 0x250   :  { %v2323_v11 = vsel %vm16503_vm7, %v2294_v51, %v12123_v43  ;;  %759 = vrot.lane.b32.xlu0 %v729_v17, %s10126_s4  ;;  %v728_v17 = vrot.slane %v11894_v60, 5  ;;  %v1990_v14 = vsel %vm11451_vm1, %v1946_v19, %v1299_v37  ;;  %vm16509_vm4 = vcmask 261120  }
 0x251   :  { %2374 = vrot.lane.b32.xlu1 %v2323_v11, %s10138_s14  ;;  %v1450_v10 = vsel %vm16509_vm4, %v11824_v6, %v9552_v39  ;;  %v797_v25 = vrot.slane %v11914_v8, 5  ;;  %v16510_v21 = vunpack.i.h.bf16 %v12104_v12  ;;  %vm16511_vm7 = vmmov %vm16509_vm4  ;;  %vm16512_vm2 = vcmask 1046528  }
 0x252   :  { %v12145_v45 = vpop.permute.xlu0 %1357  ;;  %v1989_v27 = vsel %vm11451_vm1, %v1942_v34, %v1298_v26  ;;  %vm16513_vm12 = vmmov %vm16512_vm2  ;;  %v796_v37 = vrot.slane %v11911_v18, 5  ;;  %v16514_v26 = vrot.slane %v11096_v3, 6  ;;  %v16515_v34 = vld [vmem:[#allocation51_spill] sm:$0xff]  ;;  %vm16516_vm8 = vcmask 252928  }
 0x253   :  { %v1383_v47 = vsel %vm16508_vm3, %v1356_v38, %v12145_v45  ;;  %v1451_v5 = vsel %vm16511_vm7, %v9552_v39, %v16510_v21  ;;  %v2026_v6 = vsel %vm16513_vm12, %v1989_v27, %v1382_v42  ;;  %v948_v39 = vrot.slane %v11911_v18, 4  ;;  %vm16517_vm3 = vmmov %vm16516_vm8 }
 0x254   :  { %909 = vrot.lane.b32.xlu0 %v880_v24, %s10127_s26  ;;  %v2030_v51 = vsel %vm16512_vm2, %v1990_v14, %v1383_v47  ;;  %v2073_v11 = vsel %vm11490_vm15, %v2026_v6, %v1450_v10  ;;  %v9584_v48 = vpack.i.bf16 %v797_v25, %v796_v37  ;;  %v947_v28 = vrot.slane %v16515_v34, 4 }
 0x255   :  { %757 = vrot.lane.b32.xlu1 %v728_v17, %s10126_s4  ;;  %v2074_v38 = vsel %vm11490_vm15, %v2030_v51, %v1451_v5  ;;  %v881_v42 = vrot.slane %v11907_v13, 4  ;;  %v1032_v10 = vrot.slane %v11894_v60, 3  ;;  %v16518_v51 = vrot.slane %v11894_v60, 6 }
 0x256   :  { %2587 = vmatprep.subr.bf16.mxu1 %v2074_v38  ;;  %v9589_v19 = vpack.i.bf16 %v948_v39, %v947_v28  ;;  %vm16519_vm4 = vcmask 1014784   ;;  %vm16520_vm7 = vcmask 1041408   ;;  %v1183_v37 = vrot.slane %v11096_v3, 2 }
 0x257   :  { %2588 = vmatpush1.bf16.msra.mxu1 %v2073_v11  ;;  %vm16521_vm2 = vmmov %vm16519_vm4  ;;  %v1252_v11 = vrot.slane %v11911_v18, 2 }
 0x258   :  { %603 = vrot.lane.b32.xlu0 %v16514_v26, %s10128_s27  ;;  %vm16522_vm12 = vmmov %vm16520_vm7 }
 0x259   :  { %9585 = vrot.lane.b32.xlu1 %v9584_v48, %s10132_s8  ;;  %v1031_v48 = vrot.slane %v11096_v3, 3 }
 0x25c   :  { %9590 = vrot.lane.b32.xlu0 %v9589_v19, %s10133_s9  ;;  %v2369_v17 = vpop.permute.xlu0 %2368  ;;  %v1251_v19 = vrot.slane %v16515_v34, 2 }
 0x25d   :  { %911 = vrot.lane.b32.xlu1 %v881_v42, %s10127_s26  ;;  %v2395_v24 = vsel %vm16516_vm8, %v11879_v36, %v2369_v17  ;;  %v12181_v14 = vpop.permute.xlu1 %2370  ;;  %v1099_v42 = vrot.slane %v16515_v34, 3  ;;  %vm16523_vm8 = vcmask 203776  }
 0x25e   :  { %v2396_v47 = vsel %vm16517_vm3, %v2369_v17, %v12181_v14  ;;  %v2435_v21 = vand.u32 %v11796_v33, %v2395_v24  ;;  %v9599_v17 = vpack.i.bf16 %v1252_v11, %v1251_v19  ;;  %vm16525_vm3 = vcmask 1042432  }
 0x25f   :  { %v2438_v25 = vand.u32 %v11796_v33, %v2396_v47  ;;  %v1403_v11 = vrot.slane %v16515_v34, 1 }
 0x260   :  { %1061 = vrot.lane.b32.xlu0 %v1032_v10, %s10129_s28  ;;  %v600_v5 = vpop.permute.xlu0 %599 }
 0x261   :  { %605 = vrot.lane.b32.xlu1 %v16518_v51, %s10128_s27  ;;  %v624_v36 = vsel %vm16519_vm4, %v11836_v16, %v600_v5  ;;  %v12194_v27 = vpop.permute.xlu1 %601  ;;  %2589 = vmatprep.subr.bf16.mxu1 %v2438_v25  ;;  %v1100_v16 = vrot.slane %v11911_v18, 3  ;;  %vm16526_vm4 = vmmov %vm16525_vm3 }
 0x262   :  { %v1614_v38 = vsel %vm16520_vm7, %v11609_v32, %v624_v36  ;;  %v625_v6 = vsel %vm16521_vm2, %v600_v5, %v12194_v27  ;;  %2590 = vmatpush1.bf16.msra.mxu1 %v2435_v21  ;;  %v16527_v21 = vld [vmem:[#allocation36_spill] sm:$0xff]  ;;  %v1336_v36 = vrot.slane %v11894_v60, 1  ;;  %vm16528_vm7 = vcmask 1043456  }
 0x263   :  { %v1618_v39 = vsel %vm16522_vm12, %v11984_v31, %v625_v6  ;;  %v1655_v26 = vsel %vm10939_vm5, %v1614_v38, %v11622_v20  ;;  %v16524_v20 = vld [vmem:[#allocation21_spill] sm:$0xff]  ;;  %v9594_v47 = vpack.i.bf16 %v1100_v16, %v1099_v42  ;;  %v9538_v38 = vunpack.i.h.bf16 %v11890_v56  ;;  %vm16530_vm2 = vmmov %vm16528_vm7 }
 0x264   :  { %v1656_v32 = vsel %vm10939_vm5, %v1618_v39, %v11973_v57  ;;  %1211 = vrot.lane.b32.xlu0 %v1183_v37, %s10135_s11  ;;  %v12213_v28 = vpop.permute.xlu0 %973  ;;  %v1698_v57 = vsel %vm16525_vm3, %v1655_v26, %v16524_v20  ;;  %v1184_v6 = vrot.slane %v11894_v60, 2  ;;  %v16529_v39 = vld [vmem:[#allocation32_spill] sm:$0xff]  ;;  %vm16532_vm12 = vcmask 752640  }
 0x265   :  { %1059 = vrot.lane.b32.xlu1 %v1031_v48, %s10129_s28  ;;  %v1056_v31 = vpop.permute.xlu1 %1055  ;;  %8676 = vmatmul.mubr.msk.bf16.vlgmr.msra.gmra.mrb[4].mxu1 %vm16523_vm8, %v11829_v54  ;;  %v1702_v24 = vsel %vm16526_vm4, %v1656_v32, %v12000_v46  ;;  %v1739_v5 = vsel %vm10985_vm13, %v1698_v57, %v16527_v21  ;;  %v1404_v46 = vrot.slane %v11911_v18, 1  ;;  %v16531_v32 = vunpack.i.l.bf16 %v11890_v56  ;;  %vm16533_vm8 = vmmov %vm16532_vm12 }
 0x266   :  { %2701 = vmatprep.mubr.bf16.mxu1 %v16438_v61  ;;  %v1740_v25 = vsel %vm10985_vm13, %v1702_v24, %v12023_v23  ;;  %v1782_v48 = vsel %vm16530_vm2, %v1739_v5, %v16529_v39  ;;  %v997_v34 = vsel %vm16533_vm8, %v9538_v38, %v12213_v28  ;;  %v1335_v42 = vrot.slane %v11096_v3, 1 }
 0x267   :  { %v1786_v23 = vsel %vm16528_vm7, %v1740_v25, %v12039_v4  ;;  %v9609_v18 = vpack.i.bf16 %v1404_v46, %v1403_v11  ;;  %v996_v19 = vsel %vm16532_vm12, %v16531_v32, %v9538_v38  ;;  %vm16534_vm3 = vcmask 523264  }
 0x268   :  { %9600 = vrot.lane.b32.xlu0 %v9599_v17, %s10136_s12  ;;  %v12226_v10 = vpop.permute.xlu0 %1057  ;;  %v1824_v4 = vsel %vm11372_vm9, %v1786_v23, %v997_v34  ;;  %v1080_v17 = vsel %vm16534_vm3, %v11925_v58, %v1056_v31  ;;  %v1823_v20 = vsel %vm11372_vm9, %v1782_v48, %v996_v19  ;;  %vm16535_vm4 = vmmov %vm16534_vm3  ;;  %vm16536_vm7 = vcmask 1044480  }
 0x269   :  { %9595 = vrot.lane.b32.xlu1 %v9594_v47, %s10134_s10  ;;  %v12235_v51 = vpop.permute.xlu1 %9555  ;;  %v1081_v57 = vsel %vm16535_vm4, %v1056_v31, %v12226_v10  ;;  %v1866_v31 = vsel %vm16536_vm7, %v1823_v20, %v1080_v17  ;;  %vm16537_vm2 = vmmov %vm16536_vm7  ;;  %vm16538_vm12 = vcmask 506880   ;;  %vm16540_vm3 = vcmask 1045504  }
 0x26a   :  { %v16080_v16 = vunpack.i.h.bf16 %v12235_v51  ;;  %v9557_v26 = vunpack.i.l.bf16 %v12235_v51  ;;  %v1870_v5 = vsel %vm16537_vm2, %v1824_v4, %v1081_v57  ;;  %vm16539_vm8 = vmmov %vm16538_vm12  ;;  %vm16542_vm7 = vcmask 490496  }
 0x26b   :  { %vm16541_vm4 = vmmov %vm16540_vm3  ;;  %v16546_v17 = vunpack.i.h.bf16 %v12104_v12 }
 0x26c   :  { %1365 = vrot.lane.b32.xlu0 %v1336_v36, %s10137_s13  ;;  %v1208_v37 = vpop.permute.xlu0 %1207  ;;  %v1148_v24 = vsel %vm1139_vm0, %v11978_v63, %v9557_v26  ;;  %v1149_v47 = vsel %vm1139_vm0, %v9557_v26, %v16080_v16  ;;  %vm16543_vm2 = vmmov %vm16542_vm7 }
 0x26d   :  { %1213 = vrot.lane.b32.xlu1 %v1184_v6, %s10135_s11  ;;  %v12272_v25 = vpop.permute.xlu1 %1209  ;;  %v1232_v36 = vsel %vm16538_vm12, %v12041_v53, %v1208_v37  ;;  %v1907_v63 = vsel %vm11415_vm10, %v1866_v31, %v1148_v24  ;;  %v1908_v38 = vsel %vm11415_vm10, %v1870_v5, %v1149_v47  ;;  %vm16544_vm12 = vcmask 261120   ;;  %v16550_v5 = vld [vmem:[#allocation33_spill] sm:$0xff] }
 0x26e   :  { %v1233_v46 = vsel %vm16539_vm8, %v1208_v37, %v12272_v25  ;;  %v1950_v53 = vsel %vm16540_vm3, %v1907_v63, %v1232_v36  ;;  %vm16545_vm8 = vcmask 1046528   ;;  %vm16547_vm3 = vmmov %vm16544_vm12 }
 0x26f   :  { %v1954_v39 = vsel %vm16541_vm4, %v1908_v38, %v1233_v46  ;;  %vm16548_vm4 = vmmov %vm16545_vm8  ;;  %v1405_v38 = vrot.slane %v11914_v8, 1 }
 0x270   :  { %9610 = vrot.lane.b32.xlu0 %v9609_v18, %s10118_s25  ;;  %v12265_v56 = vpop.permute.xlu0 %9560 }
 0x271   :  { %1363 = vrot.lane.b32.xlu1 %v1335_v42, %s10137_s13  ;;  %v16079_v58 = vunpack.i.h.bf16 %v12265_v56  ;;  %v9562_v21 = vunpack.i.l.bf16 %v12265_v56  ;;  %v1360_v48 = vpop.permute.xlu1 %1359 }
 0x272   :  { %v1384_v34 = vsel %vm16543_vm2, %v12145_v45, %v1360_v48 }
 0x273   :  { %v1300_v11 = vsel %vm1291_vm11, %v12079_v55, %v9562_v21  ;;  %v1301_v23 = vsel %vm1291_vm11, %v9562_v21, %v16079_v58 }
 0x274   :  { %v12287_v6 = vpop.permute.xlu0 %1361  ;;  %v1992_v18 = vsel %vm11451_vm1, %v1954_v39, %v1301_v23  ;;  %v1991_v55 = vsel %vm11451_vm1, %v1950_v53, %v1300_v11 }
 0x275   :  { %v1385_v37 = vsel %vm16542_vm7, %v1360_v48, %v12287_v6  ;;  %v2034_v57 = vsel %vm16548_vm4, %v1991_v55, %v1384_v34  ;;  %vm16551_vm7 = vcmask 539648   ;;  %vm16562_vm4 = vcmask 252928  }
 0x276   :  { %v2038_v4 = vsel %vm16545_vm8, %v1992_v18, %v1385_v37  ;;  %vm16553_vm2 = vmmov %vm16551_vm7  ;;  %vm16558_vm8 = vcmask 1039360  }
 0x278   :  { %v12298_v26 = vpop.permute.xlu0 %9570 }
 0x279   :  { %v16078_v32 = vunpack.i.h.bf16 %v12298_v26  ;;  %v9572_v19 = vunpack.i.l.bf16 %v12298_v26 }
 0x27b   :  { %v1453_v42 = vsel %vm16544_vm12, %v9572_v19, %v16078_v32  ;;  %v1452_v20 = vsel %vm16547_vm3, %v16546_v17, %v9572_v19  ;;  %vm16554_vm12 = vmmov %vm16553_vm2 }
 0x27c   :  { %v2076_v24 = vsel %vm11490_vm15, %v2038_v4, %v1453_v42  ;;  %v2075_v47 = vsel %vm11490_vm15, %v2034_v57, %v1452_v20  ;;  %vm16560_vm3 = vmmov %vm16558_vm8 }
 0x27d   :  { %2628 = vmatprep.subr.bf16.mxu0 %v2076_v24 }
 0x27e   :  { %2629 = vmatpush1.bf16.msra.mxu0 %v2075_v47 }
 0x2a6   :  { %v12320_v45 = vpop.permute.xlu0 %455 }
 0x2a8   :  { %v12322_v21 = vpop.permute.xlu1 %9565 }
 0x2a9   :  { %16549 = vst [vmem:[#allocation43_spill] sm:$0xff] %v12322_v21  ;;  %v9567_v4 = vunpack.i.l.bf16 %v12322_v21  ;;  %v16084_v20 = vunpack.i.h.bf16 %v12322_v21 }
 0x2aa   :  { %v252_v31 = vpop.permute.xlu0 %251 }
 0x2ab   :  { %v12326_v12 = vsel %vm16551_vm7, %v16550_v5, %v252_v31  ;;  %vm16563_vm7 = vcmask 1031168  }
 0x2ac   :  { %v454_v36 = vpop.permute.xlu1 %453  ;;  %v12329_v63 = vshll.u32 %v12326_v12, 16  ;;  %v16077_v17 = vrot.slane %v12326_v12, 6  ;;  %v426_v24 = vrot.slane %v12326_v12, 7 }
 0x2ae   :  { %v1406_v11 = vrot.slane %v12329_v63, 1  ;;  %v12337_v53 = vpop.permute.xlu0 %2107 }
 0x2b0   :  { %v12331_v46 = vpop.permute.xlu1 %9575  ;;  %v12335_v23 = vpack.i.bf16 %v1406_v11, %v1405_v38  ;;  %v16557_v38 = vunpack.i.h.bf16 %v11870_v7  ;;  %v390_v7 = vsel %vm16560_vm3, %v9567_v4, %v16084_v20  ;;  %vm16568_vm3 = vcmask 1040384  }
 0x2b1   :  { %v9577_v58 = vunpack.i.l.bf16 %v12331_v46 }
 0x2b2   :  { %16552 = vst [vmem:[#allocation22_spill] sm:$0xff] %v12335_v23  ;;  %v389_v11 = vsel %vm16558_vm8, %v16557_v38, %v9567_v4  ;;  %vm16567_vm8 = vmmov %vm16563_vm7 }
 0x2b4   :  { %v254_v39 = vpop.permute.xlu1 %253 }
 0x2b5   :  { %v12340_v48 = vsel %vm16553_vm2, %v252_v31, %v254_v39  ;;  %v12343_v37 = vsel %vm16554_vm12, %v254_v39, 0  ;;  %vm16564_vm2 = vmmov %vm16562_vm4  ;;  %vm16566_vm12 = vcmask 1022976  }
 0x2b6   :  { %16555 = vst [vmem:[#allocation40_spill] sm:$0xff] %v12343_v37  ;;  %v12346_v18 = vshll.u32 %v12340_v48, 16  ;;  %v427_v55 = vrot.slane %v12340_v48, 7  ;;  %v12350_v19 = vshll.u32 %v12343_v37, 16 }
 0x2b8   :  { %16556 = vst [vmem:[#allocation46_spill] sm:$0xff] %v12350_v19  ;;  %459 = vrot.lane.b32.xlu0 %v427_v55, %s10124_s23  ;;  %v9604_v42 = vpack.i.bf16 %v12346_v18, %v12329_v63  ;;  %v495_v47 = vrot.slane %v12346_v18, 7  ;;  %v951_v31 = vrot.slane %v12346_v18, 4  ;;  %v952_v5 = vrot.slane %v12350_v19, 4  ;;  %v12371_v39 = vpop.permute.xlu1 %2109 }
 0x2b9   :  { %v494_v55 = vrot.slane %v12329_v63, 7  ;;  %v1104_v32 = vrot.slane %v12350_v19, 3  ;;  %v1255_v16 = vrot.slane %v12346_v18, 2  ;;  %v1407_v21 = vrot.slane %v12346_v18, 1 }
 0x2ba   :  { %v2373_v34 = vpop.permute.xlu0 %2372  ;;  %9605 = vrot.lane.b32.xlu1 %v9604_v42, %s10123_s22  ;;  %v12375_v42 = vpack.i.bf16 %v952_v5, %v951_v31  ;;  %v1256_v31 = vrot.slane %v12350_v19, 2  ;;  %v1490_v5 = vsel %vm10806_vm6, %v11096_v3, %v389_v11  ;;  %v1408_v4 = vrot.slane %v12350_v19, 1 }
 0x2bb   :  { %v9614_v23 = vpack.i.bf16 %v495_v47, %v494_v55  ;;  %v475_v47 = vsel %vm16563_vm7, %v11881_v0, %v454_v36  ;;  %vm16571_vm7 = vcmask 793600  }
 0x2bc   :  { %2111 = vrot.lane.b32.xlu0 %v16077_v17, %s10125_s24  ;;  %16559 = vst [vmem:[#allocation48_spill] sm:$0xff] %v12375_v42  ;;  %v1103_v17 = vrot.slane %v12346_v18, 3  ;;  %v2397_v42 = vsel %vm16562_vm4, %v12181_v14, %v2373_v34  ;;  %v12404_v3 = vpack.i.bf16 %v1256_v31, %v1255_v16  ;;  %v16565_v14 = vunpack.i.h.bf16 %v11868_v29  ;;  %vm16570_vm4 = vmmov %vm16566_vm12 }
 0x2bd   :  { %v2441_v0 = vand.u32 %v11796_v33, %v2397_v42  ;;  %v476_v16 = vsel %vm16567_vm8, %v454_v36, %v12320_v45  ;;  %v1491_v29 = vsel %vm10806_vm6, %v11894_v60, %v390_v7  ;;  %v2129_v60 = vsel %vm16571_vm7, %v12337_v53, %v12371_v39  ;;  %vm16575_vm8 = vmmov %vm16571_vm7 }
 0x2be   :  { %v12362_v57 = vpop.permute.xlu0 %9580  ;;  %457 = vrot.lane.b32.xlu1 %v426_v24, %s10124_s23  ;;  %v12386_v24 = vpack.i.bf16 %v1104_v32, %v1103_v17  ;;  %v543_v11 = vsel %vm16566_vm12, %v16565_v14, %v9577_v58  ;;  %v16572_v36 = vunpack.i.h.bf16 %v11917_v30  ;;  %vm16574_vm12 = vmmov %vm16568_vm3  ;;  %vm16579_vm7 = vcmask 1041408  }
 0x2bf   :  { %v9582_v55 = vunpack.i.l.bf16 %v12362_v57  ;;  %v9583_v32 = vunpack.i.h.bf16 %v12362_v57  ;;  %v1546_v7 = vsel %vm16574_vm12, %v1491_v29, %v476_v16  ;;  %vm16581_vm12 = vcmask 1014784  }
 0x2c0   :  { %16561 = vst [vmem:[#allocation39_spill] sm:$0xff] %v12386_v24  ;;  %v12411_v24 = vpack.i.bf16 %v1408_v4, %v1407_v21  ;;  %v16569_v21 = vunpack.i.h.bf16 %v12331_v46 }
 0x2c2   :  { %v12384_v38 = vpop.permute.xlu0 %759  ;;  %9615 = vrot.lane.b32.xlu1 %v9614_v23, %s10130_s29  ;;  %v1542_v23 = vsel %vm16568_vm3, %v1490_v5, %v475_v47  ;;  %v544_v42 = vsel %vm16570_vm4, %v9577_v58, %v16569_v21  ;;  %v2128_v58 = vsel %vm16575_vm8, %v11941_v22, %v12337_v53  ;;  %v16577_v47 = vld [vmem:[#allocation38_spill] sm:$0xff]  ;;  %vm16578_vm4 = vcmask 777216   ;;  %v16586_v21 = vld [vmem:[#allocation35_spill] sm:$0xff] }
 0x2c3   :  { %v12394_v37 = vpop.permute.xlu1 %2374  ;;  %v1574_v4 = vsel %vm10859_vm14, %v1542_v23, %v543_v11  ;;  %v12449_v30 = vsel %vm10859_vm14, %v1546_v7, %v544_v42  ;;  %vm16582_vm8 = vcmask 203776  }
 0x2c4   :  { %v2398_v17 = vsel %vm16564_vm2, %v2373_v34, %v12394_v37  ;;  %v16091_v34 = vrot.slane %v12340_v48, 6  ;;  %vm16573_vm2 = vcmask 785408   ;;  %v2196_v11 = vsel %vm16579_vm7, %v1574_v4, %v2128_v58 }
 0x2c5   :  { %v2444_v20 = vand.u32 %v11796_v33, %v2398_v17  ;;  %vm16576_vm3 = vmmov %vm16573_vm2 }
 0x2c6   :  { %v910_v19 = vpop.permute.xlu0 %909  ;;  %2113 = vrot.lane.b32.xlu1 %v16091_v34, %s10125_s24  ;;  %v12443_v5 = vsel %vm16576_vm3, %v9582_v55, %v9583_v32  ;;  %vm16583_vm3 = vmmov %vm16579_vm7 }
 0x2c7   :  { %v758_v31 = vpop.permute.xlu1 %757  ;;  %2630 = vmatprep.subr.bf16.mxu0 %v2444_v20  ;;  %v695_v20 = vsel %vm16573_vm2, %v16572_v36, %v9582_v55  ;;  %vm16580_vm2 = vmmov %vm16578_vm4  ;;  %v2199_v55 = vsel %vm16583_vm3, %v12449_v30, %v2129_v60  ;;  %v16588_v36 = vunpack.i.h.bf16 %v12005_v41  ;;  %v647_v41 = vrot.slane %v12346_v18, 6 }
 0x2c8   :  { %2631 = vmatpush1.bf16.msra.mxu0 %v2441_v0  ;;  %v779_v17 = vsel %vm16578_vm4, %v16577_v47, %v758_v31  ;;  %v12454_v0 = vsel %vm16580_vm2, %v758_v31, %v12384_v38  ;;  %v2225_v16 = vsel %vm10939_vm5, %v2196_v11, %v695_v20  ;;  %v2226_v31 = vsel %vm10939_vm5, %v2199_v55, %v12443_v5  ;;  %vm16587_vm2 = vmmov %vm16583_vm3 }
 0x2c9   :  { %vm16584_vm4 = vcmask 1042432   ;;  %vm16591_vm3 = vcmask 760832  }
 0x2ca   :  { %v604_v14 = vpop.permute.xlu0 %603  ;;  %vm16585_vm7 = vmmov %vm16584_vm4  ;;  %v931_v47 = vsel %vm16591_vm3, %v12114_v2, %v910_v19 }
 0x2cb   :  { %v12456_v22 = vpop.permute.xlu1 %9585  ;;  %v626_v53 = vsel %vm16581_vm12, %v12194_v27, %v604_v14  ;;  %8677 = vmatmul.mubr.msk.bf16.vlgmr.msra.gmra.mrb[8].mxu0 %vm16582_vm8, %v11829_v54  ;;  %v2266_v27 = vsel %vm16584_vm4, %v2225_v16, %v779_v17  ;;  %v2269_v54 = vsel %vm16585_vm7, %v2226_v31, %v12454_v0  ;;  %vm16589_vm12 = vcmask 769024   ;;  %vm16592_vm4 = vmmov %vm16591_vm3 }
 0x2cc   :  { %v16093_v29 = vunpack.i.h.bf16 %v12456_v22  ;;  %v9587_v23 = vunpack.i.l.bf16 %v12456_v22  ;;  %2742 = vmatprep.mubr.bf16.mxu0 %v16438_v61  ;;  %v1622_v42 = vsel %vm16587_vm2, %v16586_v21, %v626_v53  ;;  %vm16590_vm8 = vmmov %vm16589_vm12  ;;  %vm16593_vm7 = vcmask 1043456  }
 0x2cd   :  { %v1657_v2 = vsel %vm10939_vm5, %v1622_v42, %v12077_v1  ;;  %vm16594_vm2 = vmmov %vm16593_vm7  ;;  %v730_v42 = vrot.slane %v12326_v12, 5  ;;  %vm16597_vm3 = vcmask 1041408  }
 0x2ce   :  { %v12477_v60 = vpop.permute.xlu0 %9590  ;;  %v847_v7 = vsel %vm16589_vm12, %v16588_v36, %v9587_v23  ;;  %v12485_v58 = vsel %vm16590_vm8, %v9587_v23, %v16093_v29  ;;  %vm16595_vm12 = vcmask 1042432   ;;  %vm16596_vm8 = vcmask 1014784  }
 0x2cf   :  { %v12489_v11 = vpop.permute.xlu1 %911  ;;  %v2295_v55 = vsel %vm10985_vm13, %v2266_v27, %v847_v7  ;;  %v2296_v53 = vsel %vm10985_vm13, %v2269_v54, %v12485_v58  ;;  %v646_v27 = vrot.slane %v12329_v63, 6  ;;  %v1706_v36 = vsel %vm16595_vm12, %v1657_v2, %v12069_v50 }
 0x2d0   :  { %v12499_v16 = vsel %vm16592_vm4, %v910_v19, %v12489_v11  ;;  %v2325_v23 = vsel %vm16593_vm7, %v2295_v55, %v931_v47  ;;  %v799_v55 = vrot.slane %v12346_v18, 5  ;;  %vm16598_vm4 = vmmov %vm16595_vm12  ;;  %v1741_v18 = vsel %vm10985_vm13, %v1706_v36, %v12096_v52 }
 0x2d1   :  { %2376 = vrot.lane.b32.xlu0 %v2325_v23, %s10138_s14  ;;  %v2327_v31 = vsel %vm16594_vm2, %v2296_v53, %v12499_v16  ;;  %v9619_v19 = vpack.i.bf16 %v647_v41, %v646_v27  ;;  %v16092_v23 = vunpack.i.h.bf16 %v12477_v60  ;;  %vm16599_vm7 = vmmov %vm16594_vm2  ;;  %vm16600_vm2 = vcmask 752640  }
 0x2d2   :  { %2378 = vrot.lane.b32.xlu1 %v2327_v31, %s10138_s14  ;;  %v12510_v54 = vpop.permute.xlu0 %1061  ;;  %v9592_v31 = vunpack.i.l.bf16 %v12477_v60  ;;  %vm16601_vm12 = vmmov %vm16600_vm2  ;;  %v16632_v29 = vunpack.i.h.bf16 %v12331_v46 }
 0x2d3   :  { %v12512_v21 = vpop.permute.xlu1 %605 }
 0x2d4   :  { %v627_v1 = vsel %vm16596_vm8, %v604_v14, %v12512_v21  ;;  %v798_v14 = vrot.slane %v12329_v63, 5  ;;  %vm16602_vm8 = vmmov %vm16599_vm7 }
 0x2d5   :  { %v1626_v53 = vsel %vm16597_vm3, %v1574_v4, %v627_v1  ;;  %9620 = vrot.lane.b32.xlu0 %v9619_v19, %s10131_s30  ;;  %v731_v4 = vrot.slane %v12340_v48, 5  ;;  %v1790_v52 = vsel %vm16602_vm8, %v1741_v18, %v12123_v43  ;;  %vm16603_vm3 = vcmask 523264  }
 0x2d6   :  { %v1658_v41 = vsel %vm10939_vm5, %v1626_v53, %v695_v20  ;;  %761 = vrot.lane.b32.xlu1 %v730_v42, %s10126_s4  ;;  %v1212_v50 = vpop.permute.xlu0 %1211  ;;  %v9624_v1 = vpack.i.bf16 %v799_v55, %v798_v14  ;;  %v998_v42 = vsel %vm16600_vm2, %v12213_v28, %v9592_v31  ;;  %v882_v28 = vrot.slane %v12326_v12, 4 }
 0x2d7   :  { %v1710_v2 = vsel %vm16598_vm4, %v1658_v41, %v779_v17  ;;  %v1060_v27 = vpop.permute.xlu1 %1059  ;;  %v999_v17 = vsel %vm16601_vm12, %v9592_v31, %v16092_v23  ;;  %v883_v43 = vrot.slane %v12340_v48, 4  ;;  %vm16604_vm4 = vmmov %vm16603_vm3  ;;  %v1825_v14 = vsel %vm11372_vm9, %v1790_v52, %v998_v42 }
 0x2d8   :  { %v1742_v19 = vsel %vm10985_vm13, %v1710_v2, %v847_v7  ;;  %v1082_v7 = vsel %vm16603_vm3, %v12226_v10, %v1060_v27  ;;  %v1083_v41 = vsel %vm16604_vm4, %v1060_v27, %v12510_v54  ;;  %v950_v10 = vrot.slane %v12329_v63, 4 }
 0x2d9   :  { %v1794_v20 = vsel %vm16599_vm7, %v1742_v19, %v931_v47  ;;  %763 = vrot.lane.b32.xlu0 %v731_v4, %s10126_s4  ;;  %vm16605_vm7 = vcmask 1044480   ;;  %v16607_v4 = vunpack.i.h.bf16 %v12235_v51  ;;  %vm16608_vm12 = vcmask 506880  }
 0x2da   :  { %9625 = vrot.lane.b32.xlu1 %v9624_v1, %s10132_s8  ;;  %v12545_v36 = vpop.permute.xlu0 %9600  ;;  %v1826_v47 = vsel %vm11372_vm9, %v1794_v20, %v999_v17  ;;  %v1874_v2 = vsel %vm16605_vm7, %v1825_v14, %v1082_v7  ;;  %vm16606_vm2 = vmmov %vm16605_vm7  ;;  %v70_v20 = vld [vmem:[%s15965_s2] sm:$0xff]  ;;  %vm16610_vm3 = vcmask 1045504   ;;  %v16612_v14 = vrot.slane %v11907_v13, 6 }
 0x2db   :  { %v12551_v55 = vpop.permute.xlu1 %9595  ;;  %v1878_v18 = vsel %vm16606_vm2, %v1826_v47, %v1083_v41  ;;  %v16088_v17 = vunpack.i.h.bf16 %v12545_v36  ;;  %v9602_v51 = vunpack.i.l.bf16 %v12545_v36  ;;  %v1234_v47 = vsel %vm16608_vm12, %v12272_v25, %v1212_v50  ;;  %vm16609_vm8 = vmmov %vm16608_vm12 }
 0x2dc   :  { %v16089_v53 = vunpack.i.h.bf16 %v12551_v55  ;;  %v9597_v31 = vunpack.i.l.bf16 %v12551_v55  ;;  %vm16611_vm4 = vmmov %vm16610_vm3  ;;  %vm16614_vm7 = vcmask 490496   ;;  %vm16616_vm12 = vcmask 261120  }
 0x2dd   :  { %913 = vrot.lane.b32.xlu0 %v882_v28, %s10127_s26  ;;  %vm16615_vm2 = vmmov %vm16614_vm7 }
 0x2de   :  { %v1150_v19 = vsel %vm1139_vm0, %v16607_v4, %v9597_v31  ;;  %v1151_v1 = vsel %vm1139_vm0, %v9597_v31, %v16089_v53  ;;  %915 = vrot.lane.b32.xlu1 %v883_v43, %s10127_s26  ;;  %v12572_v27 = vpop.permute.xlu0 %1365  ;;  %v949_v31 = vrot.slane %v11914_v8, 4  ;;  %v16613_v4 = vunpack.i.h.bf16 %v12265_v56 }
 0x2df   :  { %v1909_v42 = vsel %vm11415_vm10, %v1874_v2, %v1150_v19  ;;  %v12581_v52 = vpop.permute.xlu1 %1213  ;;  %v1910_v7 = vsel %vm11415_vm10, %v1878_v18, %v1151_v1 }
 0x2e0   :  { %v1235_v28 = vsel %vm16609_vm8, %v1212_v50, %v12581_v52  ;;  %v1958_v41 = vsel %vm16611_vm4, %v1909_v42, %v1234_v47  ;;  %v9630_v18 = vpack.i.bf16 %v950_v10, %v949_v31  ;;  %v1302_v25 = vsel %vm1291_vm11, %v16613_v4, %v9602_v51 }
 0x2e1   :  { %v1962_v43 = vsel %vm16610_vm3, %v1910_v7, %v1235_v28  ;;  %2407 = vperm.xlu0 %9629, %v70_v20   ;;  %v1303_v50 = vsel %vm1291_vm11, %v9602_v51, %v16088_v17  ;;  %v1993_v10 = vsel %vm11451_vm1, %v1958_v41, %v1302_v25  ;;  %vm16617_vm8 = vcmask 1046528   ;;  %vm16619_vm3 = vmmov %vm16616_vm12 }
 0x2e2   :  { %607 = vrot.lane.b32.xlu1 %v16612_v14, %s10128_s27  ;;  %v12595_v2 = vpop.permute.xlu0 %9610  ;;  %v1994_v56 = vsel %vm11451_vm1, %v1962_v43, %v1303_v50  ;;  %v16618_v28 = vunpack.i.h.bf16 %v12298_v26  ;;  %vm16620_vm4 = vmmov %vm16617_vm8  ;;  %v16621_v43 = vrot.slane %v12326_v12, 6  ;;  %v1033_v26 = vrot.slane %v11907_v13, 3 }
 0x2e3   :  { %v1364_v19 = vpop.permute.xlu1 %1363  ;;  %v16087_v1 = vunpack.i.h.bf16 %v12595_v2  ;;  %v9612_v20 = vunpack.i.l.bf16 %v12595_v2  ;;  %v1102_v4 = vrot.slane %v12329_v63, 3  ;;  %v1101_v25 = vrot.slane %v11914_v8, 3 }
 0x2e4   :  { %v1386_v42 = vsel %vm16614_vm7, %v12287_v6, %v1364_v19  ;;  %v1387_v7 = vsel %vm16615_vm2, %v1364_v19, %v12572_v27  ;;  %vm16628_vm7 = vcmask 1039360  }
 0x2e5   :  { %9631 = vrot.lane.b32.xlu0 %v9630_v18, %s10133_s9  ;;  %v1455_v51 = vsel %vm16616_vm12, %v9612_v20, %v16087_v1  ;;  %v2046_v47 = vsel %vm16617_vm8, %v1994_v56, %v1387_v7  ;;  %v1454_v6 = vsel %vm16619_vm3, %v16618_v28, %v9612_v20  ;;  %v2042_v31 = vsel %vm16620_vm4, %v1993_v10, %v1386_v42  ;;  %v16622_v20 = vld [vmem:[#allocation46_spill] sm:$0xff]  ;;  %vm16629_vm2 = vmmov %vm16628_vm7 }
 0x2e6   :  { %609 = vrot.lane.b32.xlu1 %v16621_v43, %s10128_s27  ;;  %v2078_v41 = vsel %vm11490_vm15, %v2046_v47, %v1455_v51  ;;  %v2077_v14 = vsel %vm11490_vm15, %v2042_v31, %v1454_v6  ;;  %v1034_v18 = vrot.slane %v12326_v12, 3  ;;  %v9635_v50 = vpack.i.bf16 %v1102_v4, %v1101_v25 }
 0x2e7   :  { %2669 = vmatprep.subr.bf16.mxu1 %v2078_v41  ;;  %v1186_v56 = vrot.slane %v12326_v12, 2  ;;  %v1254_v10 = vrot.slane %v12329_v63, 2  ;;  %v1185_v28 = vrot.slane %v11907_v13, 2  ;;  %v1253_v31 = vrot.slane %v11914_v8, 2 }
 0x2e8   :  { %2670 = vmatpush1.bf16.msra.mxu1 %v2077_v14  ;;  %v1337_v63 = vrot.slane %v11907_v13, 1  ;;  %v496_v4 = vrot.slane %v16622_v20, 7  ;;  %v648_v8 = vrot.slane %v16622_v20, 6  ;;  %v2135_v25 = vrot.slane %v16438_v61, 6 }
 0x2e9   :  { %1065 = vrot.lane.b32.xlu0 %v1034_v18, %s10129_s28  ;;  %v9640_v14 = vpack.i.bf16 %v1254_v10, %v1253_v31  ;;  %v16623_v18 = vld [vmem:[#allocation40_spill] sm:$0xff]  ;;  %v800_v31 = vrot.slane %v16622_v20, 5  ;;  %vm16630_vm12 = vcmask 1031168   ;;  %vm16633_vm3 = vcmask 1022976  }
 0x2ea   :  { %1063 = vrot.lane.b32.xlu1 %v1033_v26, %s10129_s28  ;;  %v428_v26 = vrot.slane %v16623_v18, 7  ;;  %v16090_v10 = vrot.slane %v16623_v18, 6  ;;  %vm16631_vm8 = vmmov %vm16630_vm12  ;;  %vm16634_vm4 = vcmask 252928  }
 0x2eb   :  { %v12635_v19 = vpop.f32.mrb[0].mxu1 }
 0x2ec   :  { %v12639_v42 = vpop.f32.mrb[1].mxu1 }
 0x2ed   :  { %375 = vrot.lane.b32.xlu0 %v16622_v20, %s10123_s22  ;;  %v2543_v7 = vpop.f32.mrb[2].mxu1 }
 0x2ee   :  { %9636 = vrot.lane.b32.xlu1 %v9635_v50, %s10134_s10  ;;  %v12644_v51 = vpop.f32.mrb[0].mxu0  ;;  %v2544_v47 = vpop.f32.mrb[3].mxu1  ;;  %v1338_v50 = vrot.slane %v12326_v12, 1  ;;  %v16624_v7 = vld [vmem:[#allocation22_spill] sm:$0xff] }
 0x2ef   :  { %v12647_v6 = vpop.f32.mrb[1].mxu0  ;;  %v2142_v47 = vrot.slane %v16438_v61, 5 }
 0x2f0   :  { %v2502_v43 = vpop.f32.mrb[2].mxu0 }
 0x2f1   :  { %1217 = vrot.lane.b32.xlu0 %v1186_v56, %s10135_s11  ;;  %v2503_v41 = vpop.f32.mrb[3].mxu0  ;;  %v9650_v56 = vpack.i.bf16 %v2135_v25, %v648_v8 }
 0x2f2   :  { %1215 = vrot.lane.b32.xlu1 %v1185_v28, %s10135_s11  ;;  %v732_v28 = vrot.slane %v16623_v18, 5 }
 0x2f5   :  { %9641 = vrot.lane.b32.xlu0 %v9640_v14, %s10136_s12  ;;  %v9655_v14 = vpack.i.bf16 %v2142_v47, %v800_v31 }
 0x2f6   :  { %461 = vrot.lane.b32.xlu1 %v428_v26, %s10124_s23 }
 0x2f9   :  { %1367 = vrot.lane.b32.xlu0 %v1337_v63, %s10137_s13 }
 0x2fa   :  { %529 = vrot.lane.b32.xlu1 %v496_v4, %s10130_s29 }
 0x2fd   :  { %9646 = vrot.lane.b32.xlu0 %v16624_v7, %s10118_s25 }
 0x2fe   :  { %1369 = vrot.lane.b32.xlu1 %v1338_v50, %s10137_s13 }
 0x301   :  { %9651 = vrot.lane.b32.xlu0 %v9650_v56, %s10131_s30 }
 0x302   :  { %2115 = vrot.lane.b32.xlu1 %v16090_v10, %s10125_s24  ;;  %s10146_s24 = smov 109  }
 0x303   :  { %v12675_v43 = vpop.f32.mrb[4].mxu0 }
 0x304   :  { %v12677_v41 = vpop.f32.mrb[5].mxu0 }
 0x305   :  { %2143 = vrot.lane.b32.xlu0 %v2142_v47, %s10126_s4  ;;  %v2584_v26 = vpop.f32.mrb[6].mxu0 }
 0x306   :  { %765 = vrot.lane.b32.xlu1 %v732_v28, %s10126_s4  ;;  %v2585_v63 = vpop.f32.mrb[7].mxu0  ;;  %v16626_v26 = vld [vmem:[#allocation43_spill] sm:$0xff]  ;;  %s10147_s4 = smov 107  }
 0x30a   :  { %9656 = vrot.lane.b32.xlu1 %v9655_v14, %s10132_s8  ;;  %v16627_v14 = vunpack.i.h.bf16 %v16626_v26  ;;  %s10152_s8 = smov 106  }
 0x32a   :  { %v12684_v50 = vpop.permute.xlu0 %459 }
 0x32c   :  { %v12680_v4 = vpop.permute.xlu1 %9605 }
 0x32d   :  { %v9607_v1 = vunpack.i.l.bf16 %v12680_v4  ;;  %v16094_v47 = vunpack.i.h.bf16 %v12680_v4 }
 0x32e   :  { %v2112_v31 = vpop.permute.xlu0 %2111 }
 0x32f   :  { %v391_v63 = vsel %vm16628_vm7, %v16627_v14, %v9607_v1  ;;  %v392_v10 = vsel %vm16629_vm2, %v9607_v1, %v16094_v47  ;;  %vm16635_vm7 = vmmov %vm16633_vm3 }
 0x330   :  { %v458_v8 = vpop.permute.xlu1 %457  ;;  %v1492_v34 = vsel %vm10806_vm6, %v11907_v13, %v391_v63  ;;  %v1493_v23 = vsel %vm10806_vm6, %v12326_v12, %v392_v10  ;;  %vm16636_vm2 = vmmov %vm16634_vm4 }
 0x331   :  { %v478_v14 = vsel %vm16631_vm8, %v458_v8, %v12684_v50 }
 0x334   :  { %v12688_v7 = vpop.permute.xlu1 %9615 }
 0x335   :  { %v9617_v17 = vunpack.i.l.bf16 %v12688_v7 }
 0x337   :  { %v545_v1 = vsel %vm16633_vm3, %v16632_v29, %v9617_v17  ;;  %vm16640_vm3 = vcmask 793600  }
 0x338   :  { %v12682_v25 = vpop.f32.mrb[4].mxu1  ;;  %v12696_v53 = vpop.permute.xlu1 %2113 }
 0x339   :  { %v12686_v20 = vpop.f32.mrb[5].mxu1 }
 0x33a   :  { %16625 = vst [vmem:[#allocation37_spill] sm:$0xff] %v12686_v20  ;;  %v2625_v56 = vpop.f32.mrb[6].mxu1 }
 0x33b   :  { %v2626_v28 = vpop.f32.mrb[7].mxu1  ;;  %v16096_v56 = vunpack.i.h.bf16 %v12688_v7 }
 0x33c   :  { %v477_v28 = vsel %vm16630_vm12, %v12320_v45, %v458_v8  ;;  %vm16637_vm12 = vcmask 1040384  }
 0x33d   :  { %v546_v13 = vsel %vm16635_vm7, %v9617_v17, %v16096_v56  ;;  %v1550_v63 = vsel %vm16637_vm12, %v1492_v34, %v477_v28  ;;  %vm16638_vm8 = vmmov %vm16637_vm12  ;;  %vm16642_vm7 = vcmask 785408   ;;  %vm16645_vm12 = vcmask 1041408  }
 0x33e   :  { %v1554_v46 = vsel %vm16638_vm8, %v1493_v23, %v478_v14  ;;  %v12729_v29 = vsel %vm10859_vm14, %v1550_v63, %v545_v1  ;;  %vm16646_vm8 = vmmov %vm16645_vm12 }
 0x33f   :  { %v12736_v17 = vsel %vm10859_vm14, %v1554_v46, %v546_v13 }
 0x340   :  { %16639 = vst [vmem:[#allocation29_spill] sm:$0xff] %v12736_v17 }
 0x343   :  { %v2377_v26 = vpop.permute.xlu0 %2376 }
 0x344   :  { %v2399_v47 = vsel %vm16634_vm4, %v12394_v37, %v2377_v26  ;;  %v12717_v45 = vpop.permute.xlu1 %2378  ;;  %vm16641_vm4 = vmmov %vm16640_vm3 }
 0x345   :  { %v2400_v8 = vsel %vm16636_vm2, %v2377_v26, %v12717_v45  ;;  %v2447_v37 = vand.u32 %v11796_v33, %v2399_v47  ;;  %v2131_v26 = vsel %vm16640_vm3, %v2112_v31, %v12696_v53  ;;  %v2130_v14 = vsel %vm16641_vm4, %v12371_v39, %v2112_v31  ;;  %vm16643_vm2 = vmmov %vm16642_vm7 }
 0x346   :  { %v2450_v12 = vand.u32 %v11796_v33, %v2400_v8  ;;  %v2205_v13 = vsel %vm16645_vm12, %v12736_v17, %v2131_v26  ;;  %v2202_v8 = vsel %vm16646_vm8, %v12729_v29, %v2130_v14  ;;  %vm16647_vm3 = vcmask 777216  }
 0x347   :  { %v12732_v10 = vpop.permute.xlu0 %9620  ;;  %vm16649_vm4 = vcmask 203776   ;;  %vm16654_vm8 = vcmask 769024  }
 0x348   :  { %v16095_v34 = vunpack.i.h.bf16 %v12732_v10  ;;  %v9622_v28 = vunpack.i.l.bf16 %v12732_v10  ;;  %v762_v23 = vpop.permute.xlu1 %761  ;;  %2671 = vmatprep.subr.bf16.mxu1 %v2450_v12  ;;  %v12772_v12 = vld [vmem:[#allocation2] sm:$0xf] }
 0x349   :  { %2672 = vmatpush1.bf16.msra.mxu1 %v2447_v37 }
 0x34a   :  { %v12747_v47 = vsel %vm16642_vm7, %v9583_v32, %v9622_v28  ;;  %v12752_v1 = vsel %vm16643_vm2, %v9622_v28, %v16095_v34  ;;  %vm16650_vm7 = vmmov %vm16647_vm3  ;;  %vm16651_vm2 = vcmask 1042432  }
 0x34b   :  { %16644 = vst [vmem:[#allocation24_spill] sm:$0xff] %v12752_v1  ;;  %v12758_v63 = vpop.permute.xlu0 %763  ;;  %v2227_v57 = vsel %vm10939_vm5, %v2202_v8, %v12747_v47  ;;  %v2228_v32 = vsel %vm10939_vm5, %v2205_v13, %v12752_v1  ;;  %v781_v26 = vsel %vm16650_vm7, %v12384_v38, %v762_v23  ;;  %vm16652_vm12 = vmmov %vm16651_vm2  ;;  %v16653_v8 = vunpack.i.h.bf16 %v12456_v22 }
 0x34c   :  { %v12765_v39 = vsel %vm16647_vm3, %v762_v23, %v12758_v63  ;;  %v12770_v31 = vpop.permute.xlu1 %9625  ;;  %8678 = vmatmul.mubr.msk.bf16.vlgmr.msra.gmra.mrb[8].mxu1 %vm16649_vm4, %v12772_v12  ;;  %v2272_v28 = vsel %vm16651_vm2, %v2227_v57, %v781_v26  ;;  %vm16655_vm3 = vmmov %vm16654_vm8  ;;  %vm16657_vm4 = vcmask 760832   ;;  %vm16660_vm2 = vcmask 1043456  }
 0x34d   :  { %16648 = vst [vmem:[#allocation42_spill] sm:$0xff] %v12765_v39  ;;  %v16098_v46 = vunpack.i.h.bf16 %v12770_v31  ;;  %v9627_v37 = vunpack.i.l.bf16 %v12770_v31  ;;  %2783 = vmatprep.mubr.bf16.mxu1 %v16438_v61  ;;  %v2275_v14 = vsel %vm16652_vm12, %v2228_v32, %v12765_v39  ;;  %vm16658_vm7 = vmmov %vm16657_vm4 }
 0x34e   :  { %vm16661_vm12 = vmmov %vm16660_vm2 }
 0x34f   :  { %v914_v13 = vpop.permute.xlu0 %913  ;;  %v12787_v34 = vsel %vm16654_vm8, %v16653_v8, %v9627_v37  ;;  %v12792_v56 = vsel %vm16655_vm3, %v9627_v37, %v16098_v46  ;;  %v2152_v37 = vrot.slane %v16438_v61, 4  ;;  %v884_v8 = vrot.slane %v16623_v18, 4 }
 0x350   :  { %16656 = vst [vmem:[#allocation30_spill] sm:$0xff] %v12792_v56  ;;  %v12796_v1 = vsel %vm16657_vm4, %v12489_v11, %v914_v13  ;;  %v12798_v38 = vpop.permute.xlu1 %915  ;;  %v2297_v23 = vsel %vm10985_vm13, %v2272_v28, %v12787_v34  ;;  %v2298_v22 = vsel %vm10985_vm13, %v2275_v14, %v12792_v56  ;;  %vm16663_vm8 = vcmask 1014784  }
 0x351   :  { %v12808_v57 = vsel %vm16658_vm7, %v914_v13, %v12798_v38  ;;  %v2329_v32 = vsel %vm16660_vm2, %v2297_v23, %v12796_v1  ;;  %vm16664_vm3 = vmmov %vm16663_vm8  ;;  %vm16665_vm4 = vcmask 1041408   ;;  %vm16667_vm2 = vcmask 1042432  }
 0x352   :  { %16659 = vst [vmem:[#allocation44_spill] sm:$0xff] %v12808_v57  ;;  %2380 = vrot.lane.b32.xlu0 %v2329_v32, %s10138_s14  ;;  %v2331_v11 = vsel %vm16661_vm12, %v2298_v22, %v12808_v57  ;;  %vm16666_vm7 = vmmov %vm16665_vm4 }
 0x353   :  { %2382 = vrot.lane.b32.xlu1 %v2331_v11, %s10138_s14  ;;  %vm16668_vm12 = vmmov %vm16667_vm2 }
 0x354   :  { %v608_v28 = vpop.permute.xlu1 %607 }
 0x355   :  { %v628_v46 = vsel %vm16663_vm8, %v12512_v21, %v608_v28  ;;  %vm16670_vm8 = vcmask 1039360  }
 0x356   :  { %917 = vrot.lane.b32.xlu0 %v884_v8, %s10127_s26  ;;  %v1630_v21 = vsel %vm16665_vm4, %v12449_v30, %v628_v46  ;;  %vm16673_vm4 = vcmask 752640  }
 0x357   :  { %2153 = vrot.lane.b32.xlu1 %v2152_v37, %s10127_s26  ;;  %v16734_v9 = vld [vmem:[#allocation30_spill] sm:$0xff]  ;;  %s10148_s26 = smov 90  }
 0x358   :  { %v12820_v14 = vpop.permute.xlu1 %609 }
 0x359   :  { %16662 = vst [vmem:[#allocation45_spill] sm:$0xff] %v12820_v14  ;;  %v629_v8 = vsel %vm16664_vm3, %v608_v28, %v12820_v14  ;;  %vm16671_vm3 = vcmask 1031168  }
 0x35a   :  { %v1634_v28 = vsel %vm16666_vm7, %v12729_v29, %v629_v8  ;;  %vm16675_vm7 = vcmask 1022976  }
 0x35b   :  { %v1660_v30 = vsel %vm10939_vm5, %v1634_v28, %v12747_v47  ;;  %v16674_v28 = vunpack.i.h.bf16 %v12688_v7 }
 0x35c   :  { %v1064_v13 = vpop.permute.xlu1 %1063  ;;  %v1718_v46 = vsel %vm16668_vm12, %v1660_v30, %v781_v26  ;;  %vm16679_vm12 = vmmov %vm16673_vm4 }
 0x360   :  { %v12822_v23 = vpop.permute.xlu1 %9636  ;;  %v12824_v32 = vpop.permute.xlu0 %2407 }
 0x361   :  { %v2501_v22 = vadd.f32 %v12647_v6, %v12824_v32  ;;  %v2540_v11 = vadd.f32 %v12635_v19, %v12824_v32  ;;  %v2542_v37 = vadd.f32 %v12639_v42, %v12824_v32  ;;  %v2499_v61 = vadd.f32 %v12644_v51, %v12824_v32 }
 0x362   :  { %v2583_v44 = vadd.f32 %v12677_v41, %v12824_v32 }
 0x363   :  { %v2793_v57 = vmax.f32 %v2501_v22, 0.0  ;;  %v2794_v56 = vmax.f32 %v2540_v11, 0.0  ;;  %v2795_v17 = vmax.f32 %v2542_v37, 0.0  ;;  %v2792_v19 = vmax.f32 %v2499_v61, 0.0 }
 0x364   :  { %v12838_v39 = vpop.permute.xlu1 %1215  ;;  %v12840_v6 = vpop.permute.xlu0 %9631  ;;  %v1659_v61 = vsel %vm10939_vm5, %v1630_v21, %v12443_v5  ;;  %v16669_v11 = vunpack.i.h.bf16 %v12680_v4  ;;  %v1744_v37 = vsel %vm10985_vm13, %v1718_v46, %v12787_v34  ;;  %v16672_v4 = vunpack.i.h.bf16 %v12477_v60 }
 0x365   :  { %v12846_v14 = vpack.c.bf16 %v2793_v57, %v2793_v57  ;;  %v12848_v42 = vpack.c.bf16 %v2794_v56, %v2794_v56  ;;  %v12850_v20 = vpack.c.bf16 %v2795_v17, %v2795_v17  ;;  %v12856_v51 = vpack.c.bf16 %v2792_v19, %v2792_v19 }
 0x366   :  { %v1714_v17 = vsel %vm16667_vm2, %v1659_v61, %v12454_v0  ;;  %v9633_v57 = vunpack.i.l.bf16 %v12840_v6  ;;  %v9634_v5 = vunpack.i.h.bf16 %v12840_v6  ;;  %vm16676_vm2 = vcmask 1040384  }
 0x367   :  { %3092 = vrot.lane.b32.xlu1 %v12848_v42, %s10123_s22  ;;  %3090 = vrot.lane.b32.xlu0 %v12846_v14, %s10123_s22  ;;  %v1743_v26 = vsel %vm10985_vm13, %v1714_v17, %v12485_v58  ;;  %v16678_v34 = vrot.slane %v16623_v18, 6 }
 0x368   :  { %v12864_v56 = vpop.permute.xlu1 %461  ;;  %v12866_v29 = vpop.permute.xlu0 %1065  ;;  %v1000_v21 = vsel %vm16673_vm4, %v16672_v4, %v9633_v57  ;;  %v1001_v60 = vsel %vm16679_vm12, %v9633_v57, %v9634_v5  ;;  %v9638_v57 = vunpack.i.l.bf16 %v12822_v23  ;;  %vm16682_vm4 = vcmask 523264  }
 0x369   :  { %v479_v8 = vsel %vm16671_vm3, %v12684_v50, %v12864_v56  ;;  %v16677_v50 = vrot.slane %v12340_v48, 6 }
 0x36b   :  { %3094 = vrot.lane.b32.xlu0 %v12850_v20, %s10123_s22  ;;  %3088 = vrot.lane.b32.xlu1 %v12856_v51, %s10123_s22 }
 0x36c   :  { %v12877_v47 = vpop.permute.xlu1 %529  ;;  %v12879_v22 = vpop.permute.xlu0 %375 }
 0x36d   :  { %v393_v0 = vsel %vm16670_vm8, %v16669_v11, %v12879_v22  ;;  %v547_v58 = vsel %vm16675_vm7, %v16674_v28, %v12877_v47  ;;  %vm16680_vm8 = vcmask 1043456   ;;  %v1035_v11 = vrot.slane %v12340_v48, 3  ;;  %v16683_v28 = vld [vmem:[#allocation48_spill] sm:$0xff]  ;;  %vm16684_vm7 = vmmov %vm16682_vm4 }
 0x36e   :  { %v1494_v19 = vsel %vm10806_vm6, %v12340_v48, %v393_v0  ;;  %v1798_v46 = vsel %vm16680_vm8, %v1743_v26, %v12499_v16  ;;  %vm16681_vm3 = vmmov %vm16680_vm8  ;;  %v1084_v16 = vsel %vm16684_vm7, %v12510_v54, %v1064_v13  ;;  %v9639_v26 = vunpack.i.h.bf16 %v12822_v23 }
 0x36f   :  { %v1558_v61 = vsel %vm16676_vm2, %v1494_v19, %v479_v8  ;;  %611 = vrot.lane.b32.xlu0 %v16677_v50, %s10128_s27  ;;  %613 = vrot.lane.b32.xlu1 %v16678_v34, %s10128_s27  ;;  %v1827_v0 = vsel %vm11372_vm9, %v1798_v46, %v1000_v21  ;;  %v1802_v8 = vsel %vm16681_vm3, %v1744_v37, %v12796_v1  ;;  %vm16685_vm2 = vcmask 1044480   ;;  %v16689_v46 = vld [vmem:[#allocation39_spill] sm:$0xff] }
 0x370   :  { %v12914_v30 = vpop.permute.xlu1 %1369  ;;  %v12916_v17 = vpop.permute.xlu0 %1217  ;;  %v12920_v7 = vsel %vm10859_vm14, %v1558_v61, %v547_v58  ;;  %v1085_v19 = vsel %vm16682_vm4, %v1064_v13, %v12866_v29  ;;  %v1828_v4 = vsel %vm11372_vm9, %v1802_v8, %v1001_v60  ;;  %v1882_v37 = vsel %vm16685_vm2, %v1827_v0, %v1084_v16  ;;  %vm16686_vm12 = vmmov %vm16685_vm2 }
 0x371   :  { %v1036_v50 = vrot.slane %v16623_v18, 3  ;;  %v1886_v34 = vsel %vm16686_vm12, %v1828_v4, %v1085_v19  ;;  %v16687_v60 = vunpack.i.h.bf16 %v12551_v55  ;;  %vm16688_vm8 = vcmask 506880  }
 0x372   :  { %v1237_v13 = vsel %vm16688_vm8, %v12838_v39, %v12916_v17  ;;  %vm16691_vm3 = vmmov %vm16688_vm8  ;;  %vm16692_vm4 = vcmask 1045504   ;;  %vm16693_vm7 = vcmask 490496   ;;  %vm16696_vm8 = vcmask 1046528  }
 0x373   :  { %9661 = vrot.lane.b32.xlu0 %v16683_v28, %s10133_s9  ;;  %1067 = vrot.lane.b32.xlu1 %v1035_v11, %s10129_s28  ;;  %v1152_v54 = vsel %vm1139_vm0, %v16687_v60, %v9638_v57  ;;  %v1153_v11 = vsel %vm1139_vm0, %v9638_v57, %v9639_v26  ;;  %v16690_v28 = vunpack.i.h.bf16 %v12545_v36  ;;  %v1188_v57 = vrot.slane %v16623_v18, 2  ;;  %vm16694_vm2 = vmmov %vm16692_vm4 }
 0x374   :  { %v12940_v21 = vpop.permute.xlu1 %2115  ;;  %v12942_v1 = vpop.permute.xlu0 %9641  ;;  %v1911_v19 = vsel %vm11415_vm10, %v1882_v37, %v1152_v54  ;;  %v1912_v4 = vsel %vm11415_vm10, %v1886_v34, %v1153_v11  ;;  %v1236_v60 = vsel %vm16691_vm3, %v12581_v52, %v12838_v39  ;;  %vm16695_vm12 = vmmov %vm16693_vm7  ;;  %v1339_v11 = vrot.slane %v12340_v48, 1 }
 0x375   :  { %v9644_v58 = vunpack.i.h.bf16 %v12942_v1  ;;  %v9643_v61 = vunpack.i.l.bf16 %v12942_v1  ;;  %vm16697_vm3 = vcmask 261120  }
 0x377   :  { %1069 = vrot.lane.b32.xlu0 %v1036_v50, %s10129_s28  ;;  %9666 = vrot.lane.b32.xlu1 %v16689_v46, %s10134_s10  ;;  %v1305_v0 = vsel %vm1291_vm11, %v9643_v61, %v9644_v58  ;;  %v1304_v16 = vsel %vm1291_vm11, %v16690_v28, %v9643_v61  ;;  %v1187_v50 = vrot.slane %v12340_v48, 2  ;;  %v1970_v46 = vsel %vm16692_vm4, %v1912_v4, %v1237_v13  ;;  %vm16699_vm4 = vmmov %vm16697_vm3  ;;  %s10149_s28 = smov 88   ;;  %s10153_s10 = smov 91  }
 0x378   :  { %v766_v55 = vpop.permute.xlu1 %765  ;;  %v1368_v8 = vpop.permute.xlu0 %1367  ;;  %v1996_v36 = vsel %vm11451_vm1, %v1970_v46, %v1305_v0  ;;  %v1966_v61 = vsel %vm16694_vm2, %v1911_v19, %v1236_v60  ;;  %v16698_v0 = vunpack.i.h.bf16 %v12595_v2  ;;  %vm16701_vm2 = vcmask 793600  }
 0x379   :  { %v1389_v37 = vsel %vm16693_vm7, %v1368_v8, %v12914_v30  ;;  %v1388_v34 = vsel %vm16695_vm12, %v12572_v27, %v1368_v8  ;;  %v1995_v52 = vsel %vm11451_vm1, %v1966_v61, %v1304_v16  ;;  %vm16700_vm7 = vmmov %vm16696_vm8  ;;  %v2132_v48 = vsel %vm16701_vm2, %v12696_v53, %v12940_v21 }
 0x37a   :  { %v2054_v28 = vsel %vm16696_vm8, %v1996_v36, %v1389_v37  ;;  %v2050_v19 = vsel %vm16700_vm7, %v1995_v52, %v1388_v34  ;;  %v1340_v2 = vrot.slane %v16623_v18, 1  ;;  %vm16702_vm12 = vcmask 1041408  }
 0x37b   :  { %1219 = vrot.lane.b32.xlu0 %v1187_v50, %s10135_s11  ;;  %1221 = vrot.lane.b32.xlu1 %v1188_v57, %s10135_s11  ;;  %v2208_v46 = vsel %vm16702_vm12, %v12920_v7, %v2132_v48  ;;  %v16703_v37 = vunpack.i.h.bf16 %v12732_v10  ;;  %vm16704_vm8 = vcmask 785408   ;;  %v16706_v34 = vunpack.i.h.bf16 %v12770_v31  ;;  %s10154_s11 = smov 89  }
 0x37c   :  { %v12986_v54 = vpop.permute.xlu0 %9646  ;;  %v9657_v4 = vpop.permute.xlu1 %9656  ;;  %vm16708_vm7 = vcmask 1042432   ;;  %v2156_v31 = vsel %vm10806_vm6, %v16623_v18, %v12879_v22  ;;  %vm16709_vm2 = vcmask 1040384   ;;  %vm16710_vm12 = vmmov %vm16704_vm8 }
 0x37d   :  { %v9649_v39 = vunpack.i.h.bf16 %v12986_v54  ;;  %v9648_v13 = vunpack.i.l.bf16 %v12986_v54  ;;  %v9658_v57 = vunpack.i.l.bf16 %v9657_v4  ;;  %v9659_v22 = vunpack.i.h.bf16 %v9657_v4  ;;  %v13206_v54 = vld [vmem:[#allocation5 + $0x138] ss:$12 sps:$4 sm:$0xff]  }
 0x37f   :  { %9671 = vrot.lane.b32.xlu0 %v12404_v3, %s10136_s12  ;;  %1371 = vrot.lane.b32.xlu1 %v1339_v11, %s10137_s13  ;;  %v1457_v27 = vsel %vm16697_vm3, %v9648_v13, %v9649_v39  ;;  %v1456_v8 = vsel %vm16699_vm4, %v16698_v0, %v9648_v13  ;;  %vm16705_vm3 = vcmask 777216   ;;  %vm16707_vm4 = vcmask 769024   ;;  %s10155_s12 = smov 74  }
 0x380   :  { %v9652_v16 = vpop.permute.xlu0 %9651  ;;  %v2080_v3 = vsel %vm11490_vm15, %v2054_v28, %v1457_v27  ;;  %v2079_v50 = vsel %vm11490_vm15, %v2050_v19, %v1456_v8  ;;  %v13024_v36 = vsel %vm16705_vm3, %v12758_v63, %v766_v55  ;;  %v13032_v10 = vsel %vm16707_vm4, %v16706_v34, %v9658_v57 }
 0x381   :  { %v9653_v60 = vunpack.i.l.bf16 %v9652_v16  ;;  %2710 = vmatprep.subr.bf16.mxu0 %v2080_v3  ;;  %v9654_v27 = vunpack.i.h.bf16 %v9652_v16  ;;  %v2159_v0 = vsel %vm16709_vm2, %v2156_v31, %v12864_v56  ;;  %v2581_v56 = vadd.f32 %v12675_v43, %v12824_v32  ;;  %v9692_v31 = vld [vmem:[#allocation5] ss:$12 sps:$4 sm:$0xff]  }
 0x382   :  { %2711 = vmatpush1.bf16.msra.mxu0 %v2079_v50  ;;  %v2161_v48 = vsel %vm10859_vm14, %v2159_v0, %v12877_v47  ;;  %vm16712_vm4 = vcmask 252928   ;;  %vm16714_vm2 = vcmask 760832   ;;  %v2797_v34 = vmax.f32 %v2583_v44, 0.0  ;;  %v16721_v44 = vld [vmem:[#allocation37_spill] sm:$0xff] }
 0x383   :  { %v13017_v53 = vsel %vm16704_vm8, %v16703_v37, %v9653_v60  ;;  %1373 = vrot.lane.b32.xlu0 %v1340_v2, %s10137_s13  ;;  %9676 = vrot.lane.b32.xlu1 %v12411_v24, %s10118_s25  ;;  %v2138_v19 = vsel %vm16710_vm12, %v9653_v60, %v9654_v27  ;;  %vm16711_vm8 = vcmask 1041408   ;;  %vm16713_vm14 = vmmov %vm16712_vm4  ;;  %v2796_v43 = vmax.f32 %v2581_v56, 0.0  ;;  %v9697_v27 = vld [vmem:[#allocation5 + $0x1c] ss:$12 sps:$4 sm:$0xff]   ;;  %v9704_v56 = vld [vmem:[#allocation5 + $0x60] ss:$12 sps:$4 sm:$0xff]  }
 0x384   :  { %v2229_v61 = vsel %vm10939_vm5, %v2208_v46, %v13017_v53  ;;  %v2144_v8 = vpop.permute.xlu0 %2143  ;;  %v2212_v3 = vsel %vm16711_vm8, %v2161_v48, %v12940_v21  ;;  %v9694_v46 = vld [vmem:[#allocation5 + $0x4] ss:$12 sps:$4 sm:$0xff]   ;;  %vm16715_vm12 = vcmask 769024   ;;  %vm16716_vm8 = vmmov %vm16714_vm2  ;;  %v13088_v0 = vpack.c.bf16 %v2797_v34, %v2797_v34  ;;  %v9703_v48 = vld [vmem:[#allocation5 + $0x4c] ss:$12 sps:$4 sm:$0xff]  }
 0x385   :  { %v2278_v52 = vsel %vm16708_vm7, %v2229_v61, %v13024_v36  ;;  %v2145_v50 = vsel %vm16705_vm3, %v766_v55, %v2144_v8  ;;  %v2230_v2 = vsel %vm10939_vm5, %v2212_v3, %v2138_v19  ;;  %v2149_v41 = vsel %vm16715_vm12, %v9658_v57, %v9659_v22  ;;  %v9700_v8 = vld [vmem:[#allocation5 + $0x34] ss:$12 sps:$4 sm:$0xff]   ;;  %v9698_v19 = vld [vmem:[#allocation5 + $0x30] ss:$12 sps:$4 sm:$0xff]  }
 0x386   :  { %v2299_v24 = vsel %vm10985_vm13, %v2278_v52, %v13032_v10  ;;  %v2282_v21 = vsel %vm16708_vm7, %v2230_v2, %v2145_v50  ;;  %vm16717_vm3 = vcmask 1043456   ;;  %v13084_v57 = vpack.c.bf16 %v2796_v43, %v2796_v43  ;;  %v9701_v3 = vld [vmem:[#allocation5 + $0x48] ss:$12 sps:$4 sm:$0xff]   ;;  %v9706_v50 = vld [vmem:[#allocation5 + $0x64] ss:$12 sps:$4 sm:$0xff]  }
 0x387   :  { %vm16720_vm7 = vcmask 1039360  }
 0x39e   :  { %v13039_v13 = vpop.f32.mrb[8].mxu0 }
 0x39f   :  { %v13041_v63 = vpop.f32.mrb[9].mxu0 }
 0x3a0   :  { %v2666_v11 = vpop.f32.mrb[10].mxu0 }
 0x3a1   :  { %v2667_v28 = vpop.f32.mrb[11].mxu0 }
 0x3a2   :  { %v2300_v28 = vsel %vm10985_vm13, %v2282_v21, %v2149_v41 }
 0x3c4   :  { %v2381_v18 = vpop.permute.xlu0 %2380 }
 0x3c5   :  { %v2401_v16 = vsel %vm16712_vm4, %v12717_v45, %v2381_v18  ;;  %v13062_v60 = vpop.permute.xlu1 %2382  ;;  %vm16718_vm4 = vmmov %vm16717_vm3 }
 0x3c6   :  { %v2402_v47 = vsel %vm16713_vm14, %v2381_v18, %v13062_v60  ;;  %v2453_v4 = vand.u32 %v11796_v33, %v2401_v16  ;;  %vm16719_vm14 = vcmask 203776   ;;  %v2622_v16 = vadd.f32 %v12682_v25, %v12824_v32  ;;  %v9707_v25 = vld [vmem:[#allocation5 + $0x78] ss:$12 sps:$4 sm:$0xff]  }
 0x3c7   :  { %v2456_v55 = vand.u32 %v11796_v33, %v2402_v47  ;;  %v2624_v47 = vadd.f32 %v16721_v44, %v12824_v32 }
 0x3c8   :  { %v918_v37 = vpop.permute.xlu0 %917 }
 0x3c9   :  { %v13073_v45 = vsel %vm16714_vm2, %v12798_v38, %v918_v37  ;;  %v2154_v61 = vpop.permute.xlu1 %2153  ;;  %2712 = vmatprep.subr.bf16.mxu0 %v2456_v55  ;;  %v9709_v55 = vld [vmem:[#allocation5 + $0x7c] ss:$12 sps:$4 sm:$0xff]   ;;  %vm16722_vm2 = vmmov %vm16720_vm7  ;;  %v2799_v41 = vmax.f32 %v2624_v47, 0.0 }
 0x3ca   :  { %v2155_v52 = vsel %vm16716_vm8, %v918_v37, %v2154_v61  ;;  %2713 = vmatpush1.bf16.msra.mxu0 %v2453_v4  ;;  %v2333_v11 = vsel %vm16717_vm3, %v2299_v24, %v13073_v45  ;;  %v9695_v24 = vld [vmem:[#allocation5 + $0x18] ss:$12 sps:$4 sm:$0xff]   ;;  %vm16723_vm12 = vmmov %vm16722_vm2  ;;  %v2798_v61 = vmax.f32 %v2622_v16, 0.0  ;;  %vm16725_vm8 = vcmask 1014784  }
 0x3cb   :  { %2384 = vrot.lane.b32.xlu0 %v2333_v11, %s10138_s14  ;;  %v2336_v38 = vsel %vm16718_vm4, %v2300_v28, %v2155_v52  ;;  %4267 = vmatprep.subr.bf16.mxu0 %v9694_v46  ;;  %v9712_v52 = vld [vmem:[#allocation5 + $0x94] ss:$12 sps:$4 sm:$0xff]   ;;  %vm16726_vm3 = vmmov %vm16725_vm8  ;;  %vm16728_vm4 = vcmask 1041408  }
 0x3cc   :  { %2386 = vrot.lane.b32.xlu1 %v2336_v38, %s10138_s14 }
 0x3cd   :  { %8679 = vmatmul.mubr.msk.bf16.vlgmr.msra.gmra.mrb[12].mxu0 %vm16719_vm14, %v12772_v12  ;;  %vm16729_vm14 = vmmov %vm16728_vm4 }
 0x3ce   :  { %4268 = vmatpush1.bf16.msra.mxu0 %v9692_v31  ;;  %v16724_v31 = vld [vmem:[#allocation45_spill] sm:$0xff] }
 0x3cf   :  { %3096 = vrot.lane.b32.xlu0 %v13084_v57, %s10123_s22  ;;  %4269 = vmatprep.subr.bf16.mxu0 %v9697_v27 }
 0x3d0   :  { %3098 = vrot.lane.b32.xlu1 %v13088_v0, %s10123_s22 }
 0x3d2   :  { %4270 = vmatpush1.bf16.msra.mxu0 %v9695_v24  ;;  %v13122_v24 = vpack.c.bf16 %v2798_v61, %v2798_v61 }
 0x3d3   :  { %4271 = vmatprep.subr.bf16.mxu0 %v9700_v8  ;;  %v16727_v8 = vld [vmem:[#allocation29_spill] sm:$0xff] }
 0x3d6   :  { %4272 = vmatpush1.bf16.msra.mxu0 %v9698_v19 }
 0x3d7   :  { %4273 = vmatprep.subr.bf16.mxu0 %v9703_v48 }
 0x3d9   :  { %v3093_v2 = vpop.permute.xlu1 %3092  ;;  %v3091_v18 = vpop.permute.xlu0 %3090 }
 0x3da   :  { %v3121_v22 = vsel %vm16720_vm7, %v3091_v18, %v3093_v2  ;;  %4274 = vmatpush1.bf16.msra.mxu0 %v9701_v3  ;;  %v9715_v3 = vld [vmem:[#allocation5 + $0xac] ss:$12 sps:$4 sm:$0xff]   ;;  %vm16732_vm7 = vcmask 1042432  }
 0x3db   :  { %v13100_v21 = vmax.bf16 %v3121_v22, %v12846_v14  ;;  %4275 = vmatprep.subr.bf16.mxu0 %v9706_v50  ;;  %v16730_v50 = vld [vmem:[#allocation24_spill] sm:$0xff]  ;;  %v16731_v22 = vld [vmem:[#allocation42_spill] sm:$0xff] }
 0x3dd   :  { %3185 = vrot.lane.b32.xlu0 %v13100_v21, %s10131_s30  ;;  %v13104_v46 = vpop.permute.xlu0 %3094  ;;  %v3089_v4 = vpop.permute.xlu1 %3088 }
 0x3de   :  { %v3122_v37 = vsel %vm16722_vm2, %v3093_v2, %v13104_v46  ;;  %v3120_v43 = vsel %vm16723_vm12, %v3089_v4, %v3091_v18  ;;  %4276 = vmatpush1.bf16.msra.mxu0 %v9704_v56  ;;  %vm16733_vm2 = vmmov %vm16732_vm7  ;;  %v9713_v4 = vld [vmem:[#allocation5 + $0xa8] ss:$12 sps:$4 sm:$0xff]   ;;  %vm16736_vm12 = vcmask 1043456  }
 0x3df   :  { %v13110_v14 = vmax.bf16 %v3122_v37, %v12848_v42  ;;  %v13113_v34 = vmax.bf16 %v3120_v43, %v12856_v51  ;;  %4277 = vmatprep.subr.bf16.mxu0 %v9709_v55  ;;  %v9710_v42 = vld [vmem:[#allocation5 + $0x90] ss:$12 sps:$4 sm:$0xff]   ;;  %v13124_v51 = vpack.c.bf16 %v2799_v41, %v2799_v41 }
 0x3e0   :  { %v9718_v37 = vld [vmem:[#allocation5 + $0xc4] ss:$12 sps:$4 sm:$0xff]  }
 0x3e1   :  { %v612_v11 = vpop.permute.xlu0 %611  ;;  %3187 = vrot.lane.b32.xlu1 %v13110_v14, %s10131_s30  ;;  %3183 = vrot.lane.b32.xlu0 %v13113_v34, %s10131_s30  ;;  %v614_v28 = vpop.permute.xlu1 %613 }
 0x3e2   :  { %v630_v38 = vsel %vm16725_vm8, %v16724_v31, %v612_v11  ;;  %v631_v27 = vsel %vm16726_vm3, %v612_v11, %v614_v28  ;;  %4278 = vmatpush1.bf16.msra.mxu0 %v9707_v25  ;;  %v16738_v11 = vld [vmem:[#allocation44_spill] sm:$0xff]  ;;  %vm16739_vm3 = vmmov %vm16736_vm12 }
 0x3e3   :  { %v1638_v19 = vsel %vm16728_vm4, %v16727_v8, %v630_v38  ;;  %v1642_v48 = vsel %vm16729_vm14, %v12920_v7, %v631_v27  ;;  %4279 = vmatprep.subr.bf16.mxu0 %v9712_v52  ;;  %vm16741_vm4 = vcmask 1044480  }
 0x3e4   :  { %v1661_v2 = vsel %vm10939_vm5, %v1638_v19, %v16730_v50  ;;  %v1662_v18 = vsel %vm10939_vm5, %v1642_v48, %v13017_v53  ;;  %vm16735_vm5 = vcmask 752640  }
 0x3e5   :  { %v1722_v56 = vsel %vm16732_vm7, %v1661_v2, %v16731_v22  ;;  %v1726_v16 = vsel %vm16733_vm2, %v1662_v18, %v13024_v36  ;;  %v9662_v44 = vpop.permute.xlu0 %9661  ;;  %3100 = vrot.lane.b32.xlu1 %v13122_v24, %s10123_s22  ;;  %3102 = vrot.lane.b32.xlu0 %v13124_v51, %s10123_s22  ;;  %v1068_v7 = vpop.permute.xlu1 %1067  ;;  %vm16737_vm8 = vmmov %vm16735_vm5  ;;  %v9724_v2 = vld [vmem:[#allocation5 + $0xf4] ss:$12 sps:$4 sm:$0xff]  }
 0x3e6   :  { %v9664_v47 = vunpack.i.h.bf16 %v9662_v44  ;;  %v9663_v55 = vunpack.i.l.bf16 %v9662_v44  ;;  %4280 = vmatpush1.bf16.msra.mxu0 %v9710_v42  ;;  %v1745_v53 = vsel %vm10985_vm13, %v1722_v56, %v16734_v9  ;;  %v1746_v36 = vsel %vm10985_vm13, %v1726_v16, %v13032_v10  ;;  %vm16743_vm7 = vmmov %vm16741_vm4 }
 0x3e7   :  { %4281 = vmatprep.subr.bf16.mxu0 %v9715_v3  ;;  %v1810_v25 = vsel %vm16736_vm12, %v1746_v36, %v13073_v45  ;;  %v1806_v28 = vsel %vm16739_vm3, %v1745_v53, %v16738_v11  ;;  %vm16740_vm13 = vcmask 523264   ;;  %v9721_v45 = vld [vmem:[#allocation5 + $0xdc] ss:$12 sps:$4 sm:$0xff]   ;;  %v9719_v3 = vld [vmem:[#allocation5 + $0xd8] ss:$12 sps:$4 sm:$0xff]  }
 0x3e8   :  { %v1003_v43 = vsel %vm16735_vm5, %v9663_v55, %v9664_v47  ;;  %v1002_v52 = vsel %vm16737_vm8, %v9634_v5, %v9663_v55  ;;  %vm16742_vm14 = vmmov %vm16740_vm13  ;;  %vm16750_vm8 = vcmask 1046528  }
 0x3e9   :  { %v1070_v61 = vpop.permute.xlu0 %1069  ;;  %v9667_v41 = vpop.permute.xlu1 %9666  ;;  %v1830_v27 = vsel %vm11372_vm9, %v1810_v25, %v1003_v43  ;;  %v1829_v42 = vsel %vm11372_vm9, %v1806_v28, %v1002_v52  ;;  %v1086_v50 = vsel %vm16742_vm14, %v12866_v29, %v1068_v7  ;;  %vm16744_vm9 = vcmask 506880   ;;  %v9722_v29 = vld [vmem:[#allocation5 + $0xf0] ss:$12 sps:$4 sm:$0xff]  }
 0x3ea   :  { %v9669_v31 = vunpack.i.h.bf16 %v9667_v41  ;;  %v9668_v38 = vunpack.i.l.bf16 %v9667_v41  ;;  %4282 = vmatpush1.bf16.msra.mxu0 %v9713_v4  ;;  %v1087_v10 = vsel %vm16740_vm13, %v1068_v7, %v1070_v61  ;;  %v1890_v62 = vsel %vm16743_vm7, %v1829_v42, %v1086_v50  ;;  %vm16745_vm2 = vmmov %vm16744_vm9  ;;  %v9727_v7 = vld [vmem:[#allocation5 + $0x10c] ss:$12 sps:$4 sm:$0xff]   ;;  %v9725_v41 = vld [vmem:[#allocation5 + $0x108] ss:$12 sps:$4 sm:$0xff]  }
 0x3eb   :  { %4283 = vmatprep.subr.bf16.mxu0 %v9718_v37  ;;  %v1894_v5 = vsel %vm16741_vm4, %v1830_v27, %v1087_v10  ;;  %v9732_v52 = vld [vmem:[#allocation5 + $0x124] ss:$12 sps:$4 sm:$0xff]   ;;  %v13215_v10 = vld [vmem:[#allocation5 + $0x16c] ss:$12 sps:$4 sm:$0xff]   ;;  %v13218_v27 = vld [vmem:[#allocation5 + $0x168] ss:$12 sps:$4 sm:$0xff]   ;;  %v2663_v50 = vadd.f32 %v13039_v13, %v12824_v32 }
 0x3ec   :  { %v1154_v19 = vsel %vm1139_vm0, %v9639_v26, %v9668_v38  ;;  %v1155_v48 = vsel %vm1139_vm0, %v9668_v38, %v9669_v31  ;;  %vm16746_vm0 = vcmask 1045504   ;;  %vm16756_vm4 = vcmask 1039360  }
 0x3ed   :  { %v1220_v6 = vpop.permute.xlu0 %1219  ;;  %v1222_v8 = vpop.permute.xlu1 %1221  ;;  %v1913_v22 = vsel %vm11415_vm10, %v1890_v62, %v1154_v19  ;;  %v1914_v26 = vsel %vm11415_vm10, %v1894_v5, %v1155_v48  ;;  %vm16747_vm5 = vmmov %vm16746_vm0  ;;  %vm16748_vm10 = vcmask 490496   ;;  %v2665_v62 = vadd.f32 %v13041_v63, %v12824_v32 }
 0x3ee   :  { %4284 = vmatpush1.bf16.msra.mxu0 %v9716_v40  ;;  %v1238_v18 = vsel %vm16744_vm9, %v12916_v17, %v1220_v6  ;;  %v1239_v23 = vsel %vm16745_vm2, %v1220_v6, %v1222_v8  ;;  %vm16749_vm12 = vmmov %vm16748_vm10  ;;  %v13203_v40 = vld [vmem:[#allocation5 + $0x13c] ss:$12 sps:$4 sm:$0xff]   ;;  %vm16758_vm7 = vcmask 203776   ;;  %vm16759_vm9 = vcmask 785408  }
 0x3ef   :  { %4285 = vmatprep.subr.bf16.mxu0 %v9721_v45  ;;  %v1974_v55 = vsel %vm16746_vm0, %v1913_v22, %v1238_v18  ;;  %v1978_v17 = vsel %vm16747_vm5, %v1914_v26, %v1239_v23  ;;  %v13221_v45 = vld [vmem:[#allocation5 + $0x184] ss:$12 sps:$4 sm:$0xff]   ;;  %v9728_v22 = vld [vmem:[#allocation5 + $0xc8] ss:$12 sps:$4 sm:$0xff]   ;;  %vm16757_vm14 = vmmov %vm16756_vm4  ;;  %v2801_v63 = vmax.f32 %v2665_v62, 0.0 }
 0x3f0   :  { %vm16760_vm2 = vmmov %vm16759_vm9  ;;  %v13305_v62 = vld [vmem:[#allocation5 + $0x1e4] ss:$12 sps:$4 sm:$0xff]  }
 0x3f1   :  { %v9672_v56 = vpop.permute.xlu0 %9671  ;;  %v1372_v16 = vpop.permute.xlu1 %1371  ;;  %vm16761_vm0 = vmmov %vm16756_vm4 }
 0x3f2   :  { %v9674_v44 = vunpack.i.h.bf16 %v9672_v56  ;;  %v9673_v47 = vunpack.i.l.bf16 %v9672_v56  ;;  %4286 = vmatpush1.bf16.msra.mxu0 %v9719_v3  ;;  %v1390_v1 = vsel %vm16749_vm12, %v12914_v30, %v1372_v16  ;;  %v13201_v30 = vld [vmem:[#allocation5 + $0x120] ss:$12 sps:$4 sm:$0xff]   ;;  %vm16762_vm5 = vmmov %vm16761_vm0 }
 0x3f3   :  { %4287 = vmatprep.subr.bf16.mxu0 %v9724_v2  ;;  %vm16784_vm12 = vmmov %vm16760_vm2 }
 0x3f4   :  { %v1306_v4 = vsel %vm1291_vm11, %v9644_v58, %v9673_v47  ;;  %v1307_v9 = vsel %vm1291_vm11, %v9673_v47, %v9674_v44  ;;  %vm16751_vm11 = vcmask 261120   ;;  %v9729_v47 = vld [vmem:[#allocation5 + $0x8] ss:$12 sps:$4 sm:$0xff]  }
 0x3f5   :  { %v1374_v49 = vpop.permute.xlu0 %1373  ;;  %v9677_v53 = vpop.permute.xlu1 %9676  ;;  %v1998_v36 = vsel %vm11451_vm1, %v1978_v17, %v1307_v9  ;;  %v1997_v37 = vsel %vm11451_vm1, %v1974_v55, %v1306_v4  ;;  %vm16752_vm3 = vmmov %vm16751_vm11  ;;  %v9739_v55 = vld [vmem:[#allocation5 + $0x38] ss:$12 sps:$4 sm:$0xff]   ;;  %v9743_v17 = vld [vmem:[#allocation5 + $0x110] ss:$12 sps:$4 sm:$0xff]  }
 0x3f6   :  { %v1391_v43 = vsel %vm16748_vm10, %v1372_v16, %v1374_v49  ;;  %v9679_v25 = vunpack.i.h.bf16 %v9677_v53  ;;  %v9678_v61 = vunpack.i.l.bf16 %v9677_v53  ;;  %4288 = vmatpush1.bf16.msra.mxu0 %v9722_v29  ;;  %vm16753_vm1 = vmmov %vm16750_vm8  ;;  %v9748_v9 = vld [vmem:[#allocation5 + $0x128] ss:$12 sps:$4 sm:$0xff]  }
 0x3f7   :  { %v2062_v58 = vsel %vm16750_vm8, %v1998_v36, %v1391_v43  ;;  %4289 = vmatprep.subr.bf16.mxu0 %v9727_v7  ;;  %v2058_v28 = vsel %vm16753_vm1, %v1997_v37, %v1390_v1  ;;  %v13255_v7 = vpack.c.bf16 %v2801_v63, %v2801_v63  ;;  %v9749_v36 = vld [vmem:[#allocation5 + $0x68] ss:$12 sps:$4 sm:$0xff]   ;;  %v13268_v1 = vld [vmem:[#allocation5 + $0x180] ss:$12 sps:$4 sm:$0xff]   ;;  %v13334_v63 = vld [vmem:[#allocation5 + $0x210] ss:$12 sps:$4 sm:$0xff]  }
 0x3f8   :  { %v1459_v11 = vsel %vm16751_vm11, %v9678_v61, %v9679_v25  ;;  %v1458_v15 = vsel %vm16752_vm3, %v9649_v39, %v9678_v61  ;;  %v13209_v39 = vld [vmem:[#allocation5 + $0x154] ss:$12 sps:$4 sm:$0xff]   ;;  %16763 = vst [vmem:[#allocation34_spill] sm:$0xff] %v13334_v63  ;;  %vm16783_vm10 = vmmov %vm16760_vm2 }
 0x3f9   :  { %v2082_v31 = vsel %vm11490_vm15, %v2062_v58, %v1459_v11  ;;  %v2081_v38 = vsel %vm11490_vm15, %v2058_v28, %v1458_v15  ;;  %vm16754_vm15 = vcmask 252928   ;;  %v13270_v58 = vld [vmem:[#allocation5 + $0x19c] ss:$12 sps:$4 sm:$0xff]   ;;  %vm16786_vm8 = vmmov %vm16761_vm0 }
 0x3fa   :  { %2751 = vmatprep.subr.bf16.mxu1 %v2082_v31  ;;  %4290 = vmatpush1.bf16.msra.mxu0 %v9725_v41  ;;  %vm16755_vm13 = vmmov %vm16754_vm15  ;;  %v9750_v41 = vld [vmem:[#allocation5 + $0x140] ss:$12 sps:$4 sm:$0xff]  }
 0x3fb   :  { %2752 = vmatpush1.bf16.msra.mxu1 %v2081_v38  ;;  %4291 = vmatprep.subr.bf16.mxu0 %v9732_v52  ;;  %v9752_v38 = vld [vmem:[#allocation5 + $0x158] ss:$12 sps:$4 sm:$0xff]   ;;  %vm16788_vm11 = vmmov %vm16761_vm0 }
 0x3fc   :  { %vm16804_vm3 = vmmov %vm16760_vm2 }
 0x3fd   :  { %vm16816_vm1 = vmmov %vm16760_vm2 }
 0x3fe   :  { %4292 = vmatpush1.bf16.msra.mxu0 %v13201_v30 }
 0x3ff   :  { %4293 = vmatprep.subr.bf16.mxu0 %v13203_v40 }
 0x402   :  { %4294 = vmatpush1.bf16.msra.mxu0 %v13206_v54 }
 0x403   :  { %4295 = vmatprep.subr.bf16.mxu0 %v13209_v39 }
 0x406   :  { %4296 = vmatpush1.bf16.msra.mxu0 %v13212_v59 }
 0x407   :  { %4297 = vmatprep.subr.bf16.mxu0 %v13215_v10 }
 0x40a   :  { %4298 = vmatpush1.bf16.msra.mxu0 %v13218_v27 }
 0x40b   :  { %4308 = vmatprep.subr.bf16.mxu0 %v13221_v45 }
 0x41f   :  { %v13225_v42 = vpop.f32.mrb[8].mxu1 }
 0x420   :  { %v13227_v6 = vpop.f32.mrb[9].mxu1 }
 0x421   :  { %v2707_v8 = vpop.f32.mrb[10].mxu1 }
 0x422   :  { %v2708_v5 = vpop.f32.mrb[11].mxu1  ;;  %v13284_v8 = vld [vmem:[#allocation5 + $0x198] ss:$12 sps:$4 sm:$0xff]  }
 0x423   :  { %v13287_v5 = vld [vmem:[#allocation5 + $0x1b4] ss:$12 sps:$4 sm:$0xff]  }
 0x43d   :  { %v2385_v19 = vpop.permute.xlu0 %2384 }
 0x43e   :  { %v2403_v48 = vsel %vm16754_vm15, %v13062_v60, %v2385_v19  ;;  %v2387_v3 = vpop.permute.xlu1 %2386  ;;  %v2800_v60 = vmax.f32 %v2663_v50, 0.0  ;;  %v13300_v50 = vld [vmem:[#allocation5 + $0x1c8] ss:$12 sps:$4 sm:$0xff]   ;;  %vm16855_vm15 = vcmask 1046528  }
 0x43f   :  { %v2404_v2 = vsel %vm16755_vm13, %v2385_v19, %v2387_v3  ;;  %v2459_v23 = vand.u32 %v11796_v33, %v2403_v48  ;;  %v13294_v19 = vld [vmem:[#allocation5 + $0x1b0] ss:$12 sps:$4 sm:$0xff]   ;;  %v13297_v48 = vld [vmem:[#allocation5 + $0x1cc] ss:$12 sps:$4 sm:$0xff]   ;;  %vm16859_vm13 = vcmask 1047552  }
 0x440   :  { %v2462_v18 = vand.u32 %v11796_v33, %v2404_v2  ;;  %v9733_v33 = vld [vmem:[#allocation5 + $0xe0] ss:$12 sps:$4 sm:$0xff]   ;;  %v9755_v3 = vld [vmem:[#allocation5 + $0xb0] ss:$12 sps:$4 sm:$0xff]   ;;  %v13302_v2 = vld [vmem:[#allocation5 + $0x248] ss:$12 sps:$4 sm:$0xff]  }
 0x441   :  { %v3097_v26 = vpop.permute.xlu0 %3096 }
 0x442   :  { %v3123_v56 = vsel %vm16756_vm4, %v13104_v46, %v3097_v26  ;;  %v3099_v16 = vpop.permute.xlu1 %3098  ;;  %2753 = vmatprep.subr.bf16.mxu1 %v2462_v18  ;;  %v9734_v46 = vld [vmem:[#allocation5 + $0x20] ss:$12 sps:$4 sm:$0xff]   ;;  %v13307_v18 = vld [vmem:[#allocation5 + $0x188] ss:$12 sps:$4 sm:$0xff]   ;;  %vm16877_vm4 = vmmov %vm16816_vm1 }
 0x443   :  { %v13241_v44 = vmax.bf16 %v3123_v56, %v12850_v20  ;;  %v3124_v13 = vsel %vm16757_vm14, %v3097_v26, %v3099_v16  ;;  %2754 = vmatpush1.bf16.msra.mxu1 %v2459_v23  ;;  %v13253_v20 = vpack.c.bf16 %v2800_v60, %v2800_v60  ;;  %v13313_v23 = vld [vmem:[#allocation5 + $0x260] ss:$12 sps:$4 sm:$0xff]   ;;  %v13316_v26 = vld [vmem:[#allocation5 + $0x1fc] ss:$12 sps:$4 sm:$0xff]   ;;  %v13325_v60 = vld [vmem:[#allocation5 + $0x278] ss:$12 sps:$4 sm:$0xff]  }
 0x444   :  { %v13245_v29 = vmax.bf16 %v3124_v13, %v13084_v57  ;;  %8969 = vmatprep.subr.bf16.mxu1 %v9728_v22  ;;  %v9738_v57 = vld [vmem:[#allocation5 + $0xf8] ss:$12 sps:$4 sm:$0xff]   ;;  %v13310_v22 = vld [vmem:[#allocation5 + $0x1e0] ss:$12 sps:$4 sm:$0xff]   ;;  %vm16878_vm14 = vmmov %vm16816_vm1 }
 0x445   :  { %3189 = vrot.lane.b32.xlu1 %v13241_v44, %s10131_s30  ;;  %v13319_v56 = vld [vmem:[#allocation5 + $0x1a0] ss:$12 sps:$4 sm:$0xff]  }
 0x446   :  { %3191 = vrot.lane.b32.xlu0 %v13245_v29, %s10131_s30  ;;  %8680 = vmatmul.mubr.msk.bf16.vlgmr.msra.gmra.mrb[12].mxu1 %vm16758_vm7, %v12772_v12  ;;  %v9744_v12 = vld [vmem:[#allocation5 + $0x50] ss:$12 sps:$4 sm:$0xff]   ;;  %v13328_v13 = vld [vmem:[#allocation5 + $0x214] ss:$12 sps:$4 sm:$0xff]   ;;  %vm16879_vm7 = vmmov %vm16761_vm0 }
 0x447   :  { %8970 = vmatpush3.bf16.msra.mxu1 %v9729_v47  ;;  %v13331_v47 = vld [vmem:[#allocation5 + $0x1b8] ss:$12 sps:$4 sm:$0xff]  }
 0x448   :  { %8971 = vmatprep.subr.bf16.mxu1 %v9733_v33  ;;  %v13337_v33 = vld [vmem:[#allocation5 + $0x290] ss:$12 sps:$4 sm:$0xff]  }
 0x449   :  { %3104 = vrot.lane.b32.xlu1 %v13253_v20, %s10123_s22 }
 0x44a   :  { %3106 = vrot.lane.b32.xlu0 %v13255_v7, %s10123_s22 }
 0x44b   :  { %8972 = vmatpush3.bf16.msra.mxu1 %v9734_v46  ;;  %v13340_v46 = vld [vmem:[#allocation5 + $0x22c] ss:$12 sps:$4 sm:$0xff]  }
 0x44c   :  { %8973 = vmatprep.subr.bf16.mxu1 %v9738_v57  ;;  %16764 = vst [vmem:[#allocation47_spill] sm:$0xff] %v13340_v46  ;;  %v13343_v57 = vld [vmem:[#allocation5 + $0x1d0] ss:$12 sps:$4 sm:$0xff]  }
 0x44f   :  { %v3186_v4 = vpop.permute.xlu0 %3185  ;;  %8974 = vmatpush3.bf16.msra.mxu1 %v9739_v55  ;;  %v13346_v55 = vld [vmem:[#allocation5 + $0x228] ss:$12 sps:$4 sm:$0xff]  }
 0x450   :  { %8975 = vmatprep.subr.bf16.mxu1 %v9743_v17  ;;  %16765 = vst [vmem:[#allocation49_spill] sm:$0xff] %v13346_v55  ;;  %v13349_v17 = vld [vmem:[#allocation5 + $0x2a8] ss:$12 sps:$4 sm:$0xff]  }
 0x453   :  { %v3184_v49 = vpop.permute.xlu0 %3183  ;;  %v13261_v53 = vpop.permute.xlu1 %3187  ;;  %8976 = vmatpush3.bf16.msra.mxu1 %v9744_v12  ;;  %v13355_v12 = vld [vmem:[#allocation5 + $0x1e8] ss:$12 sps:$4 sm:$0xff]  }
 0x454   :  { %v3215_v37 = vsel %vm16759_vm9, %v3184_v49, %v3186_v4  ;;  %v3216_v43 = vsel %vm16760_vm2, %v3186_v4, %v13261_v53  ;;  %8977 = vmatprep.subr.bf16.mxu1 %v9748_v9  ;;  %v13352_v4 = vld [vmem:[#allocation5 + $0x244] ss:$12 sps:$4 sm:$0xff]   ;;  %v13358_v9 = vld [vmem:[#allocation5 + $0x240] ss:$12 sps:$4 sm:$0xff]   ;;  %vm16880_vm9 = vcmask 777216  }
 0x455   :  { %v3246_v25 = vmax.bf16 %v3215_v37, %v13113_v34  ;;  %v3247_v61 = vmax.bf16 %v3216_v43, %v13100_v21  ;;  %v9751_v34 = vld [vmem:[#allocation5 + $0x80] ss:$12 sps:$4 sm:$0xff]   ;;  %16766 = vst [vmem:[#allocation20_spill] sm:$0xff] %v13352_v4  ;;  %16767 = vst [vmem:[#allocation50_spill] sm:$0xff] %v13358_v9  ;;  %v13370_v43 = vld [vmem:[#allocation5 + $0x258] ss:$12 sps:$4 sm:$0xff]  }
 0x456   :  { %v13361_v49 = vld [vmem:[#allocation5 + $0x2c0] ss:$12 sps:$4 sm:$0xff]   ;;  %16769 = vst [vmem:[#allocation25_spill] sm:$0xff] %v13370_v43  ;;  %vm16881_vm2 = vmmov %vm16880_vm9 }
 0x457   :  { %v13272_v52 = vpop.permute.xlu0 %3102  ;;  %4299 = vmatprep.mubr.bf16.mxu0 %v3247_v61  ;;  %v3101_v11 = vpop.permute.xlu1 %3100  ;;  %8978 = vmatpush3.bf16.msra.mxu1 %v9749_v36  ;;  %v13364_v36 = vld [vmem:[#allocation5 + $0x25c] ss:$12 sps:$4 sm:$0xff]   ;;  %v13367_v37 = vld [vmem:[#allocation5 + $0x200] ss:$12 sps:$4 sm:$0xff]  }
 0x458   :  { %v3125_v15 = vsel %vm16761_vm0, %v3099_v16, %v3101_v11  ;;  %v3126_v28 = vsel %vm16762_vm5, %v3101_v11, %v13272_v52  ;;  %4463 = vmatprep.mubr.bf16.mxu1 %v3247_v61  ;;  %4300 = vmatmul.mubr.bf16.vlgmr.msra.gmra.mrb[16].mxu0 %v3246_v25  ;;  %v13322_v16 = vld [vmem:[#allocation5 + $0x1f8] ss:$12 sps:$4 sm:$0xff]   ;;  %16768 = vst [vmem:[#allocation23_spill] sm:$0xff] %v13364_v36  ;;  %v13376_v61 = vld [vmem:[#allocation5 + $0x274] ss:$12 sps:$4 sm:$0xff]   ;;  %vm16882_vm5 = vmmov %vm16816_vm1 }
 0x459   :  { %v13278_v21 = vmax.bf16 %v3125_v15, %v13088_v0  ;;  %v13281_v31 = vmax.bf16 %v3126_v28, %v13122_v24  ;;  %8979 = vmatprep.subr.bf16.mxu1 %v9750_v41  ;;  %4309 = vmatpush1.bf16.msra.mxu0 %v13268_v1  ;;  %v9753_v0 = vld [vmem:[#allocation5 + $0x98] ss:$12 sps:$4 sm:$0xff]   ;;  %v9754_v24 = vld [vmem:[#allocation5 + $0x170] ss:$12 sps:$4 sm:$0xff]   ;;  %16770 = vst [vmem:[#allocation26_spill] sm:$0xff] %v13376_v61 }
 0x45a   :  { %4310 = vmatprep.subr.bf16.mxu0 %v13270_v58  ;;  %v13379_v41 = vld [vmem:[#allocation5 + $0x218] ss:$12 sps:$4 sm:$0xff]   ;;  %v13382_v11 = vld [vmem:[#allocation5 + $0x270] ss:$12 sps:$4 sm:$0xff]  }
 0x45b   :  { %3195 = vrot.lane.b32.xlu0 %v13281_v31, %s10131_s30  ;;  %3193 = vrot.lane.b32.xlu1 %v13278_v21, %s10131_s30  ;;  %16771 = vst [vmem:[#allocation54_spill] sm:$0xff] %v13382_v11  ;;  %v13385_v15 = vld [vmem:[#allocation5 + $0x2f0] ss:$12 sps:$4 sm:$0xff]   ;;  %v13388_v28 = vld [vmem:[#allocation5 + $0x28c] ss:$12 sps:$4 sm:$0xff]  }
 0x45c   :  { %8980 = vmatpush3.bf16.msra.mxu1 %v9751_v34  ;;  %16772 = vst [vmem:[#allocation57_spill] sm:$0xff] %v13388_v28  ;;  %v13391_v34 = vld [vmem:[#allocation5 + $0x230] ss:$12 sps:$4 sm:$0xff]  }
 0x45d   :  { %8981 = vmatprep.subr.bf16.mxu1 %v9752_v38  ;;  %4311 = vmatpush1.bf16.msra.mxu0 %v13284_v8  ;;  %v13394_v38 = vld [vmem:[#allocation5 + $0x288] ss:$12 sps:$4 sm:$0xff]  }
 0x45e   :  { %4312 = vmatprep.subr.bf16.mxu0 %v13287_v5  ;;  %16773 = vst [vmem:[#allocation27_spill] sm:$0xff] %v13394_v38 }
 0x460   :  { %8982 = vmatpush3.bf16.msra.mxu1 %v9753_v0  ;;  %v13397_v0 = vld [vmem:[#allocation5 + $0x3c8] ss:$12 sps:$4 sm:$0xff]  }
 0x461   :  { %8983 = vmatprep.subr.bf16.mxu1 %v9754_v24  ;;  %4313 = vmatpush1.bf16.msra.mxu0 %v13294_v19  ;;  %v13400_v24 = vld [vmem:[#allocation5 + $0x2a4] ss:$12 sps:$4 sm:$0xff]  }
 0x462   :  { %4314 = vmatprep.subr.bf16.mxu0 %v13297_v48  ;;  %16774 = vst [vmem:[#allocation59_spill] sm:$0xff] %v13400_v24 }
 0x464   :  { %8984 = vmatpush3.bf16.msra.mxu1 %v9755_v3  ;;  %v13404_v3 = vld [vmem:[#allocation5 + $0x2a0] ss:$12 sps:$4 sm:$0xff]  }
 0x465   :  { %4315 = vmatpush1.bf16.msra.mxu0 %v13300_v50  ;;  %8991 = vmatprep.subr.bf16.mxu1 %v13302_v2  ;;  %16775 = vst [vmem:[#allocation58_spill] sm:$0xff] %v13404_v3 }
 0x466   :  { %4316 = vmatprep.subr.bf16.mxu0 %v13305_v62 }
 0x467   :  { %4464 = vmatmul.mubr.bf16.vlgmr.msra.gmra.mrb[16].mxu1 %v3246_v25  ;;  %v13373_v25 = vld [vmem:[#allocation5 + $0x2d8] ss:$12 sps:$4 sm:$0xff]  }
 0x468   :  { %8992 = vmatpush3.bf16.msra.mxu1 %v13307_v18 }
 0x469   :  { %4317 = vmatpush1.bf16.msra.mxu0 %v13310_v22  ;;  %8993 = vmatprep.subr.bf16.mxu1 %v13313_v23 }
 0x46a   :  { %4318 = vmatprep.subr.bf16.mxu0 %v13316_v26 }
 0x46c   :  { %8994 = vmatpush3.bf16.msra.mxu1 %v13319_v56 }
 0x46d   :  { %4319 = vmatpush1.bf16.msra.mxu0 %v13322_v16  ;;  %8995 = vmatprep.subr.bf16.mxu1 %v13325_v60 }
 0x46e   :  { %4320 = vmatprep.subr.bf16.mxu0 %v13328_v13 }
 0x470   :  { %8996 = vmatpush3.bf16.msra.mxu1 %v13331_v47 }
 0x471   :  { %4321 = vmatpush1.bf16.msra.mxu0 %v13334_v63  ;;  %8997 = vmatprep.subr.bf16.mxu1 %v13337_v33 }
 0x472   :  { %4322 = vmatprep.subr.bf16.mxu0 %v13340_v46  ;;  %v13450_v46 = vld [vmem:[#allocation5 + $0x31c] ss:$12 sps:$4 sm:$0xff]  }
 0x473   :  { %16785 = vst [vmem:[#allocation21_spill] sm:$0xff] %v13450_v46 }
 0x474   :  { %8998 = vmatpush3.bf16.msra.mxu1 %v13343_v57 }
 0x475   :  { %4323 = vmatpush1.bf16.msra.mxu0 %v13346_v55  ;;  %8999 = vmatprep.subr.bf16.mxu1 %v13349_v17  ;;  %v13445_v55 = vld [vmem:[#allocation5 + $0x300] ss:$12 sps:$4 sm:$0xff]  }
 0x476   :  { %4324 = vmatprep.subr.bf16.mxu0 %v13352_v4 }
 0x478   :  { %9000 = vmatpush3.bf16.msra.mxu1 %v13355_v12 }
 0x479   :  { %4325 = vmatpush1.bf16.msra.mxu0 %v13358_v9  ;;  %9001 = vmatprep.subr.bf16.mxu1 %v13361_v49 }
 0x47a   :  { %4326 = vmatprep.subr.bf16.mxu0 %v13364_v36 }
 0x47c   :  { %9002 = vmatpush3.bf16.msra.mxu1 %v13367_v37 }
 0x47d   :  { %4327 = vmatpush1.bf16.msra.mxu0 %v13370_v43  ;;  %9003 = vmatprep.subr.bf16.mxu1 %v13373_v25 }
 0x47e   :  { %4328 = vmatprep.subr.bf16.mxu0 %v13376_v61  ;;  %v13417_v61 = vld [vmem:[#allocation5 + $0x2d0] ss:$12 sps:$4 sm:$0xff]  }
 0x47f   :  { %16779 = vst [vmem:[#allocation55_spill] sm:$0xff] %v13417_v61 }
 0x480   :  { %9004 = vmatpush3.bf16.msra.mxu1 %v13379_v41 }
 0x481   :  { %4329 = vmatpush1.bf16.msra.mxu0 %v13382_v11  ;;  %9005 = vmatprep.subr.bf16.mxu1 %v13385_v15  ;;  %v13411_v11 = vld [vmem:[#allocation5 + $0x2b8] ss:$12 sps:$4 sm:$0xff]  }
 0x482   :  { %4330 = vmatprep.subr.bf16.mxu0 %v13388_v28  ;;  %16777 = vst [vmem:[#allocation52_spill] sm:$0xff] %v13411_v11  ;;  %v13414_v28 = vld [vmem:[#allocation5 + $0x2d4] ss:$12 sps:$4 sm:$0xff]  }
 0x483   :  { %16778 = vst [vmem:[#allocation53_spill] sm:$0xff] %v13414_v28 }
 0x484   :  { %9006 = vmatpush3.bf16.msra.mxu1 %v13391_v34 }
 0x485   :  { %4331 = vmatpush1.bf16.msra.mxu0 %v13394_v38  ;;  %9013 = vmatprep.subr.bf16.mxu1 %v13397_v0  ;;  %v13420_v38 = vld [vmem:[#allocation5 + $0x2ec] ss:$12 sps:$4 sm:$0xff]  }
 0x486   :  { %4332 = vmatprep.subr.bf16.mxu0 %v13400_v24  ;;  %16780 = vst [vmem:[#allocation56_spill] sm:$0xff] %v13420_v38  ;;  %v13423_v24 = vld [vmem:[#allocation5 + $0x2e8] ss:$12 sps:$4 sm:$0xff]  }
 0x487   :  { %16781 = vst [vmem:[#allocation31_spill] sm:$0xff] %v13423_v24 }
 0x489   :  { %4333 = vmatpush1.bf16.msra.mxu0 %v13404_v3  ;;  %v13426_v3 = vld [vmem:[#allocation5 + $0x304] ss:$12 sps:$4 sm:$0xff]  }
 0x48a   :  { %4334 = vmatprep.subr.bf16.mxu0 %v13408_v35  ;;  %16782 = vst [vmem:[#allocation51_spill] sm:$0xff] %v13426_v3 }
 0x48d   :  { %4335 = vmatpush1.bf16.msra.mxu0 %v13411_v11 }
 0x48e   :  { %4336 = vmatprep.subr.bf16.mxu0 %v13414_v28 }
 0x491   :  { %4337 = vmatpush1.bf16.msra.mxu0 %v13417_v61 }
 0x492   :  { %4338 = vmatprep.subr.bf16.mxu0 %v13420_v38  ;;  %v2704_v38 = vadd.f32 %v13225_v42, %v12824_v32 }
 0x495   :  { %4339 = vmatpush1.bf16.msra.mxu0 %v13423_v24 }
 0x496   :  { %4349 = vmatprep.subr.bf16.mxu0 %v13426_v3  ;;  %v2706_v3 = vadd.f32 %v13227_v6, %v12824_v32  ;;  %v2802_v6 = vmax.f32 %v2704_v38, 0.0 }
 0x498   :  { %v13482_v38 = vpack.c.bf16 %v2802_v6, %v2802_v6  ;;  %v13504_v6 = vld [vmem:[#allocation5 + $0x348] ss:$12 sps:$4 sm:$0xff]  }
 0x499   :  { %16797 = vst [vmem:[#allocation48_spill] sm:$0xff] %v13504_v6 }
 0x4a0   :  { %v13430_v35 = vpop.f32.mrb[12].mxu0 }
 0x4a1   :  { %v13432_v11 = vpop.f32.mrb[13].mxu0 }
 0x4a2   :  { %v2748_v43 = vpop.f32.mrb[14].mxu0 }
 0x4a3   :  { %v2749_v28 = vpop.f32.mrb[15].mxu0  ;;  %v13447_v43 = vld [vmem:[#allocation5 + $0x308] ss:$12 sps:$4 sm:$0xff]  }
 0x4b7   :  { %v3190_v36 = vpop.permute.xlu1 %3189 }
 0x4b8   :  { %v3217_v61 = vsel %vm16783_vm10, %v13261_v53, %v3190_v36  ;;  %v13436_v9 = vpop.permute.xlu0 %3191  ;;  %vm16883_vm10 = vmmov %vm16816_vm1 }
 0x4b9   :  { %v3218_v24 = vsel %vm16784_vm12, %v3190_v36, %v13436_v9  ;;  %v3248_v28 = vmax.bf16 %v3217_v61, %v13110_v14  ;;  %v13456_v36 = vld [vmem:[#allocation5 + $0x3e0] ss:$12 sps:$4 sm:$0xff]   ;;  %v2803_v14 = vmax.f32 %v2706_v3, 0.0  ;;  %vm16884_vm12 = vmmov %vm16761_vm0 }
 0x4ba   :  { %v3249_v4 = vmax.bf16 %v3218_v24, %v13241_v44  ;;  %16787 = vst [vmem:[#allocation36_spill] sm:$0xff] %v13456_v36 }
 0x4bb   :  { %v3105_v53 = vpop.permute.xlu1 %3104  ;;  %v13484_v3 = vpack.c.bf16 %v2803_v14, %v2803_v14  ;;  %v13506_v14 = vld [vmem:[#allocation5 + $0x350] ss:$12 sps:$4 sm:$0xff]  }
 0x4bc   :  { %v3127_v42 = vsel %vm16786_vm8, %v13272_v52, %v3105_v53  ;;  %v13454_v63 = vpop.permute.xlu0 %3106  ;;  %4340 = vmatprep.mubr.bf16.mxu0 %v3249_v4  ;;  %4503 = vmatprep.mubr.bf16.mxu1 %v3249_v4  ;;  %v13468_v52 = vld [vmem:[#allocation5 + $0x318] ss:$12 sps:$4 sm:$0xff]   ;;  %v13470_v4 = vld [vmem:[#allocation5 + $0x320] ss:$12 sps:$4 sm:$0xff]   ;;  %16798 = vst [vmem:[#allocation39_spill] sm:$0xff] %v13506_v14  ;;  %vm16885_vm8 = vmmov %vm16761_vm0 }
 0x4bd   :  { %v13459_v44 = vmax.bf16 %v3127_v42, %v13124_v51  ;;  %v3128_v24 = vsel %vm16788_vm11, %v3105_v53, %v13454_v63  ;;  %4341 = vmatmul.mubr.bf16.vlgmr.msra.gmra.mrb[16].mxu0 %v3248_v28  ;;  %4504 = vmatmul.mubr.bf16.vlgmr.msra.gmra.mrb[20].mxu1 %v3248_v28  ;;  %16789 = vst [vmem:[#allocation32_spill] sm:$0xff] %v13468_v52  ;;  %16790 = vst [vmem:[#allocation33_spill] sm:$0xff] %v13470_v4  ;;  %v13475_v51 = vld [vmem:[#allocation5 + $0x334] ss:$12 sps:$4 sm:$0xff]   ;;  %v13488_v28 = vld [vmem:[#allocation5 + $0x330] ss:$12 sps:$4 sm:$0xff]  }
 0x4be   :  { %v13464_v61 = vmax.bf16 %v3128_v24, %v13253_v20  ;;  %4350 = vmatpush1.bf16.msra.mxu0 %v13445_v55  ;;  %9014 = vmatpush3.bf16.msra.mxu1 %v13447_v43  ;;  %16791 = vst [vmem:[#allocation38_spill] sm:$0xff] %v13475_v51  ;;  %v13480_v20 = vld [vmem:[#allocation5 + $0x3f8] ss:$12 sps:$4 sm:$0xff]   ;;  %16793 = vst [vmem:[#allocation46_spill] sm:$0xff] %v13488_v28  ;;  %v13497_v24 = vld [vmem:[#allocation5 + $0x410] ss:$12 sps:$4 sm:$0xff]  }
 0x4bf   :  { %3197 = vrot.lane.b32.xlu1 %v13459_v44, %s10131_s30  ;;  %4351 = vmatprep.subr.bf16.mxu0 %v13450_v46  ;;  %16792 = vst [vmem:[#allocation35_spill] sm:$0xff] %v13480_v20  ;;  %v13490_v53 = vld [vmem:[#allocation5 + $0x338] ss:$12 sps:$4 sm:$0xff]   ;;  %16796 = vst [vmem:[#allocation43_spill] sm:$0xff] %v13497_v24 }
 0x4c0   :  { %3199 = vrot.lane.b32.xlu0 %v13464_v61, %s10131_s30  ;;  %9015 = vmatprep.subr.bf16.mxu1 %v13456_v36  ;;  %16794 = vst [vmem:[#allocation40_spill] sm:$0xff] %v13490_v53  ;;  %v13495_v42 = vld [vmem:[#allocation5 + $0x34c] ss:$12 sps:$4 sm:$0xff]   ;;  %vm16906_vm11 = vmmov %vm16816_vm1 }
 0x4c1   :  { %16795 = vst [vmem:[#allocation22_spill] sm:$0xff] %v13495_v42  ;;  %v13534_v36 = vld [vmem:[#allocation5 + $0x380] ss:$12 sps:$4 sm:$0xff]   ;;  %v13541_v46 = vld [vmem:[#allocation5 + $0x458] ss:$12 sps:$4 sm:$0xff]  }
 0x4c2   :  { %4352 = vmatpush1.bf16.msra.mxu0 %v13468_v52  ;;  %9016 = vmatpush3.bf16.msra.mxu1 %v13470_v4  ;;  %v13512_v4 = vld [vmem:[#allocation5 + $0x428] ss:$12 sps:$4 sm:$0xff]   ;;  %16806 = vst [vmem:[#allocation44_spill] sm:$0xff] %v13534_v36  ;;  %16808 = vst [vmem:[#allocation61_spill] sm:$0xff] %v13541_v46 }
 0x4c3   :  { %3108 = vrot.lane.b32.xlu1 %v13482_v38, %s10123_s22  ;;  %4353 = vmatprep.subr.bf16.mxu0 %v13475_v51  ;;  %v13510_v51 = vld [vmem:[#allocation5 + $0x364] ss:$12 sps:$4 sm:$0xff]   ;;  %16800 = vst [vmem:[#allocation45_spill] sm:$0xff] %v13512_v4 }
 0x4c4   :  { %3110 = vrot.lane.b32.xlu0 %v13484_v3, %s10123_s22  ;;  %9017 = vmatprep.subr.bf16.mxu1 %v13480_v20  ;;  %16799 = vst [vmem:[#allocation37_spill] sm:$0xff] %v13510_v51  ;;  %v13516_v20 = vld [vmem:[#allocation5 + $0x360] ss:$12 sps:$4 sm:$0xff]  }
 0x4c5   :  { %16801 = vst [vmem:[#allocation29_spill] sm:$0xff] %v13516_v20 }
 0x4c6   :  { %4354 = vmatpush1.bf16.msra.mxu0 %v13488_v28  ;;  %9018 = vmatpush3.bf16.msra.mxu1 %v13490_v53  ;;  %v13518_v28 = vld [vmem:[#allocation5 + $0x368] ss:$12 sps:$4 sm:$0xff]  }
 0x4c7   :  { %4355 = vmatprep.subr.bf16.mxu0 %v13495_v42  ;;  %9019 = vmatprep.subr.bf16.mxu1 %v13497_v24  ;;  %16802 = vst [vmem:[#allocation24_spill] sm:$0xff] %v13518_v28  ;;  %v13522_v53 = vld [vmem:[#allocation5 + $0x37c] ss:$12 sps:$4 sm:$0xff]   ;;  %v13524_v42 = vld [vmem:[#allocation5 + $0x440] ss:$12 sps:$4 sm:$0xff]  }
 0x4c8   :  { %16803 = vst [vmem:[#allocation42_spill] sm:$0xff] %v13524_v42 }
 0x4ca   :  { %4356 = vmatpush1.bf16.msra.mxu0 %v13504_v6  ;;  %9020 = vmatpush3.bf16.msra.mxu1 %v13506_v14  ;;  %v13532_v6 = vld [vmem:[#allocation5 + $0x378] ss:$12 sps:$4 sm:$0xff]  }
 0x4cb   :  { %4357 = vmatprep.subr.bf16.mxu0 %v13510_v51  ;;  %9021 = vmatprep.subr.bf16.mxu1 %v13512_v4  ;;  %16805 = vst [vmem:[#allocation30_spill] sm:$0xff] %v13532_v6  ;;  %v13539_v51 = vld [vmem:[#allocation5 + $0x394] ss:$12 sps:$4 sm:$0xff]  }
 0x4cc   :  { %16807 = vst [vmem:[#allocation60_spill] sm:$0xff] %v13539_v51 }
 0x4cd   :  { %v13526_v24 = vpop.permute.xlu0 %3195  ;;  %v3194_v52 = vpop.permute.xlu1 %3193 }
 0x4ce   :  { %4358 = vmatpush1.bf16.msra.mxu0 %v13516_v20  ;;  %v3220_v14 = vsel %vm16804_vm3, %v3194_v52, %v13526_v24  ;;  %9022 = vmatpush3.bf16.msra.mxu1 %v13518_v28  ;;  %v13545_v28 = vld [vmem:[#allocation5 + $0x390] ss:$12 sps:$4 sm:$0xff]   ;;  %v13547_v20 = vld [vmem:[#allocation5 + $0x398] ss:$12 sps:$4 sm:$0xff]   ;;  %vm16907_vm3 = vmmov %vm16816_vm1 }
 0x4cf   :  { %4359 = vmatprep.subr.bf16.mxu0 %v13522_v53  ;;  %9023 = vmatprep.subr.bf16.mxu1 %v13524_v42  ;;  %v3251_v4 = vmax.bf16 %v3220_v14, %v13278_v21  ;;  %16809 = vst [vmem:[#allocation62_spill] sm:$0xff] %v13545_v28  ;;  %16810 = vst [vmem:[#allocation63_spill] sm:$0xff] %v13547_v20  ;;  %v13551_v42 = vld [vmem:[#allocation5 + $0x3ac] ss:$12 sps:$4 sm:$0xff]   ;;  %v13553_v21 = vld [vmem:[#allocation5 + $0x470] ss:$12 sps:$4 sm:$0xff]  }
 0x4d0   :  { %16811 = vst [vmem:[#allocation64_spill] sm:$0xff] %v13551_v42  ;;  %16812 = vst [vmem:[#allocation65_spill] sm:$0xff] %v13553_v21  ;;  %v13559_v14 = vld [vmem:[#allocation5 + $0x3b0] ss:$12 sps:$4 sm:$0xff]  }
 0x4d1   :  { %4381 = vmatprep.mubr.bf16.mxu0 %v3251_v4  ;;  %4543 = vmatprep.mubr.bf16.mxu1 %v3251_v4  ;;  %v13557_v4 = vld [vmem:[#allocation5 + $0x3a8] ss:$12 sps:$4 sm:$0xff]   ;;  %16814 = vst [vmem:[#allocation67_spill] sm:$0xff] %v13559_v14 }
 0x4d2   :  { %4360 = vmatpush1.bf16.msra.mxu0 %v13532_v6  ;;  %9024 = vmatpush3.bf16.msra.mxu1 %v13534_v36  ;;  %16813 = vst [vmem:[#allocation66_spill] sm:$0xff] %v13557_v4  ;;  %v13563_v36 = vld [vmem:[#allocation5 + $0x3c4] ss:$12 sps:$4 sm:$0xff]  }
 0x4d3   :  { %4361 = vmatprep.subr.bf16.mxu0 %v13539_v51  ;;  %9025 = vmatprep.subr.bf16.mxu1 %v13541_v46  ;;  %16815 = vst [vmem:[#allocation68_spill] sm:$0xff] %v13563_v36  ;;  %v3219_v46 = vsel %vm16816_vm1, %v13436_v9, %v3194_v52  ;;  %v13579_v9 = vld [vmem:[#allocation5 + $0x3d8] ss:$12 sps:$4 sm:$0xff]   ;;  %v13582_v52 = vld [vmem:[#allocation5 + $0x4a0] ss:$12 sps:$4 sm:$0xff]   ;;  %vm16908_vm1 = vmmov %vm16761_vm0 }
 0x4d4   :  { %v3250_v51 = vmax.bf16 %v3219_v46, %v13245_v29  ;;  %16821 = vst [vmem:[#allocation72_spill] sm:$0xff] %v13579_v9  ;;  %16822 = vst [vmem:[#allocation73_spill] sm:$0xff] %v13582_v52  ;;  %v13589_v29 = vld [vmem:[#allocation5 + $0x3f0] ss:$12 sps:$4 sm:$0xff]   ;;  %v13592_v46 = vld [vmem:[#allocation5 + $0x4b8] ss:$12 sps:$4 sm:$0xff]  }
 0x4d5   :  { %16824 = vst [vmem:[#allocation75_spill] sm:$0xff] %v13589_v29  ;;  %16825 = vst [vmem:[#allocation76_spill] sm:$0xff] %v13592_v46 }
 0x4d6   :  { %4362 = vmatpush1.bf16.msra.mxu0 %v13545_v28  ;;  %9026 = vmatpush3.bf16.msra.mxu1 %v13547_v20  ;;  %v13569_v28 = vld [vmem:[#allocation5 + $0x3c0] ss:$12 sps:$4 sm:$0xff]   ;;  %v13571_v20 = vld [vmem:[#allocation5 + $0x488] ss:$12 sps:$4 sm:$0xff]  }
 0x4d7   :  { %4363 = vmatprep.subr.bf16.mxu0 %v13551_v42  ;;  %9027 = vmatprep.subr.bf16.mxu1 %v13553_v21  ;;  %16817 = vst [vmem:[#allocation69_spill] sm:$0xff] %v13569_v28  ;;  %16818 = vst [vmem:[#allocation70_spill] sm:$0xff] %v13571_v20  ;;  %v13575_v42 = vld [vmem:[#allocation5 + $0x3dc] ss:$12 sps:$4 sm:$0xff]   ;;  %v16820_v21 = vmov 0  }
 0x4d8   :  { %16819 = vst [vmem:[#allocation71_spill] sm:$0xff] %v13575_v42 }
 0x4da   :  { %4364 = vmatpush1.bf16.msra.mxu0 %v13557_v4  ;;  %9028 = vmatpush3.bf16.msra.mxu1 %v13559_v14  ;;  %v13585_v14 = vld [vmem:[#allocation5 + $0x3f4] ss:$12 sps:$4 sm:$0xff]   ;;  %v13741_v4 = vld [vmem:[#allocation5 + $0x570] ss:$12 sps:$4 sm:$0xff]  }
 0x4db   :  { %4365 = vmatprep.subr.bf16.mxu0 %v13563_v36  ;;  %4551 = vmatprep.subr.bf16.mxu1 %v16820_v21  ;;  %16823 = vst [vmem:[#allocation74_spill] sm:$0xff] %v13585_v14  ;;  %v13697_v36 = vld [vmem:[#allocation5 + $0x4fc] ss:$12 sps:$4 sm:$0xff]   ;;  %16871 = vst [vmem:[#allocation119_spill] sm:$0xff] %v13741_v4 }
 0x4dc   :  { %16858 = vst [vmem:[#allocation107_spill] sm:$0xff] %v13697_v36 }
 0x4dd   :  { %4544 = vmatmul.mubr.bf16.vlgmr.msra.gmra.mrb[24].mxu1 %v3250_v51 }
 0x4de   :  { %4366 = vmatpush1.bf16.msra.mxu0 %v13569_v28  ;;  %4552 = vmatpush1.bf16.msra.mxu1 %v13571_v20  ;;  %v13595_v28 = vld [vmem:[#allocation5 + $0x40c] ss:$12 sps:$4 sm:$0xff]   ;;  %v13599_v20 = vld [vmem:[#allocation5 + $0x408] ss:$12 sps:$4 sm:$0xff]  }
 0x4df   :  { %4367 = vmatprep.subr.bf16.mxu0 %v13575_v42  ;;  %4553 = vmatprep.subr.bf16.mxu1 %v16820_v21  ;;  %16826 = vst [vmem:[#allocation77_spill] sm:$0xff] %v13595_v28  ;;  %16827 = vst [vmem:[#allocation78_spill] sm:$0xff] %v13599_v20  ;;  %v13602_v42 = vld [vmem:[#allocation5 + $0x4d0] ss:$12 sps:$4 sm:$0xff]  }
 0x4e0   :  { %16828 = vst [vmem:[#allocation79_spill] sm:$0xff] %v13602_v42 }
 0x4e2   :  { %4368 = vmatpush1.bf16.msra.mxu0 %v13579_v9  ;;  %4554 = vmatpush1.bf16.msra.mxu1 %v13582_v52  ;;  %v13605_v9 = vld [vmem:[#allocation5 + $0x424] ss:$12 sps:$4 sm:$0xff]   ;;  %v13609_v52 = vld [vmem:[#allocation5 + $0x420] ss:$12 sps:$4 sm:$0xff]  }
 0x4e3   :  { %4369 = vmatprep.subr.bf16.mxu0 %v13585_v14  ;;  %4555 = vmatprep.subr.bf16.mxu1 %v16820_v21  ;;  %16829 = vst [vmem:[#allocation80_spill] sm:$0xff] %v13605_v9  ;;  %16830 = vst [vmem:[#allocation81_spill] sm:$0xff] %v13609_v52  ;;  %v13612_v14 = vld [vmem:[#allocation5 + $0x4e8] ss:$12 sps:$4 sm:$0xff]  }
 0x4e4   :  { %16831 = vst [vmem:[#allocation82_spill] sm:$0xff] %v13612_v14 }
 0x4e6   :  { %4370 = vmatpush1.bf16.msra.mxu0 %v13589_v29  ;;  %4556 = vmatpush1.bf16.msra.mxu1 %v13592_v46  ;;  %v13615_v29 = vld [vmem:[#allocation5 + $0x43c] ss:$12 sps:$4 sm:$0xff]   ;;  %v13619_v46 = vld [vmem:[#allocation5 + $0x438] ss:$12 sps:$4 sm:$0xff]  }
 0x4e7   :  { %4371 = vmatprep.subr.bf16.mxu0 %v13595_v28  ;;  %4557 = vmatprep.subr.bf16.mxu1 %v16820_v21  ;;  %16832 = vst [vmem:[#allocation83_spill] sm:$0xff] %v13615_v29  ;;  %16833 = vst [vmem:[#allocation84_spill] sm:$0xff] %v13619_v46  ;;  %v13622_v28 = vld [vmem:[#allocation5 + $0x500] ss:$12 sps:$4 sm:$0xff]  }
 0x4e8   :  { %16834 = vst [vmem:[#allocation85_spill] sm:$0xff] %v13622_v28 }
 0x4ea   :  { %4372 = vmatpush1.bf16.msra.mxu0 %v13599_v20  ;;  %4558 = vmatpush1.bf16.msra.mxu1 %v13602_v42  ;;  %v13625_v20 = vld [vmem:[#allocation5 + $0x454] ss:$12 sps:$4 sm:$0xff]   ;;  %v13629_v42 = vld [vmem:[#allocation5 + $0x450] ss:$12 sps:$4 sm:$0xff]  }
 0x4eb   :  { %4373 = vmatprep.subr.bf16.mxu0 %v13605_v9  ;;  %4559 = vmatprep.subr.bf16.mxu1 %v16820_v21  ;;  %16835 = vst [vmem:[#allocation86_spill] sm:$0xff] %v13625_v20  ;;  %16836 = vst [vmem:[#allocation87_spill] sm:$0xff] %v13629_v42  ;;  %v13632_v9 = vld [vmem:[#allocation5 + $0x518] ss:$12 sps:$4 sm:$0xff]  }
 0x4ec   :  { %16837 = vst [vmem:[#allocation88_spill] sm:$0xff] %v13632_v9 }
 0x4ee   :  { %4374 = vmatpush1.bf16.msra.mxu0 %v13609_v52  ;;  %4560 = vmatpush1.bf16.msra.mxu1 %v13612_v14  ;;  %v13635_v52 = vld [vmem:[#allocation5 + $0x46c] ss:$12 sps:$4 sm:$0xff]   ;;  %v13639_v14 = vld [vmem:[#allocation5 + $0x468] ss:$12 sps:$4 sm:$0xff]  }
 0x4ef   :  { %4375 = vmatprep.subr.bf16.mxu0 %v13615_v29  ;;  %4561 = vmatprep.subr.bf16.mxu1 %v16820_v21  ;;  %16838 = vst [vmem:[#allocation89_spill] sm:$0xff] %v13635_v52  ;;  %16839 = vst [vmem:[#allocation90_spill] sm:$0xff] %v13639_v14  ;;  %v13642_v29 = vld [vmem:[#allocation5 + $0x530] ss:$12 sps:$4 sm:$0xff]  }
 0x4f0   :  { %16840 = vst [vmem:[#allocation91_spill] sm:$0xff] %v13642_v29 }
 0x4f2   :  { %4376 = vmatpush1.bf16.msra.mxu0 %v13619_v46  ;;  %4562 = vmatpush1.bf16.msra.mxu1 %v13622_v28  ;;  %v13645_v46 = vld [vmem:[#allocation5 + $0x484] ss:$12 sps:$4 sm:$0xff]   ;;  %v13649_v28 = vld [vmem:[#allocation5 + $0x480] ss:$12 sps:$4 sm:$0xff]  }
 0x4f3   :  { %4377 = vmatprep.subr.bf16.mxu0 %v13625_v20  ;;  %4563 = vmatprep.subr.bf16.mxu1 %v16820_v21  ;;  %16841 = vst [vmem:[#allocation92_spill] sm:$0xff] %v13645_v46  ;;  %16842 = vst [vmem:[#allocation93_spill] sm:$0xff] %v13649_v28  ;;  %v13652_v20 = vld [vmem:[#allocation5 + $0x548] ss:$12 sps:$4 sm:$0xff]  }
 0x4f4   :  { %16843 = vst [vmem:[#allocation94_spill] sm:$0xff] %v13652_v20 }
 0x4f6   :  { %4378 = vmatpush1.bf16.msra.mxu0 %v13629_v42  ;;  %4564 = vmatpush1.bf16.msra.mxu1 %v13632_v9  ;;  %v13655_v42 = vld [vmem:[#allocation5 + $0x49c] ss:$12 sps:$4 sm:$0xff]   ;;  %v13659_v9 = vld [vmem:[#allocation5 + $0x498] ss:$12 sps:$4 sm:$0xff]  }
 0x4f7   :  { %4379 = vmatprep.subr.bf16.mxu0 %v13635_v52  ;;  %4565 = vmatprep.subr.bf16.mxu1 %v16820_v21  ;;  %16844 = vst [vmem:[#allocation95_spill] sm:$0xff] %v13655_v42  ;;  %16845 = vst [vmem:[#allocation96_spill] sm:$0xff] %v13659_v9  ;;  %v13691_v52 = vld [vmem:[#allocation5 + $0x4e0] ss:$12 sps:$4 sm:$0xff]  }
 0x4f8   :  { %16856 = vst [vmem:[#allocation105_spill] sm:$0xff] %v13691_v52 }
 0x4fa   :  { %4380 = vmatpush1.bf16.msra.mxu0 %v13639_v14  ;;  %4566 = vmatpush1.bf16.msra.mxu1 %v13642_v29  ;;  %v13662_v14 = vld [vmem:[#allocation5 + $0x560] ss:$12 sps:$4 sm:$0xff]  }
 0x4fb   :  { %4390 = vmatprep.subr.bf16.mxu0 %v13645_v46  ;;  %4567 = vmatprep.subr.bf16.mxu1 %v16820_v21  ;;  %16846 = vst [vmem:[#allocation97_spill] sm:$0xff] %v13662_v14  ;;  %v13665_v29 = vld [vmem:[#allocation5 + $0x4b4] ss:$12 sps:$4 sm:$0xff]   ;;  %v13669_v46 = vld [vmem:[#allocation5 + $0x4b0] ss:$12 sps:$4 sm:$0xff]  }
 0x4fc   :  { %16847 = vst [vmem:[#allocation98_spill] sm:$0xff] %v13665_v29  ;;  %16848 = vst [vmem:[#allocation99_spill] sm:$0xff] %v13669_v46 }
 0x4fd   :  { %4382 = vmatmul.mubr.bf16.vlgmr.msra.gmra.mrb[16].mxu0 %v3250_v51  ;;  %v13672_v51 = vld [vmem:[#allocation5 + $0x578] ss:$12 sps:$4 sm:$0xff]  }
 0x4fe   :  { %4391 = vmatpush1.bf16.msra.mxu0 %v13649_v28  ;;  %4568 = vmatpush1.bf16.msra.mxu1 %v13652_v20  ;;  %16849 = vst [vmem:[#allocation100_spill] sm:$0xff] %v13672_v51  ;;  %v13675_v28 = vld [vmem:[#allocation5 + $0x4cc] ss:$12 sps:$4 sm:$0xff]   ;;  %v13679_v20 = vld [vmem:[#allocation5 + $0x4c8] ss:$12 sps:$4 sm:$0xff]  }
 0x4ff   :  { %4392 = vmatprep.subr.bf16.mxu0 %v13655_v42  ;;  %4569 = vmatprep.subr.bf16.mxu1 %v16820_v21  ;;  %16850 = vst [vmem:[#allocation101_spill] sm:$0xff] %v13675_v28  ;;  %16851 = vst [vmem:[#allocation102_spill] sm:$0xff] %v13679_v20  ;;  %v13682_v42 = vld [vmem:[#allocation5 + $0x590] ss:$12 sps:$4 sm:$0xff]  }
 0x500   :  { %16852 = vst [vmem:[#allocation103_spill] sm:$0xff] %v13682_v42 }
 0x502   :  { %4393 = vmatpush1.bf16.msra.mxu0 %v13659_v9  ;;  %4570 = vmatpush1.bf16.msra.mxu1 %v13662_v14  ;;  %v13685_v9 = vld [vmem:[#allocation5 + $0x4e4] ss:$12 sps:$4 sm:$0xff]   ;;  %v16854_v14 = vmov 65535  }
 0x503   :  { %4394 = vmatprep.subr.bf16.mxu0 %v13665_v29  ;;  %4571 = vmatprep.subr.bf16.mxu1 %v16820_v21  ;;  %16853 = vst [vmem:[#allocation104_spill] sm:$0xff] %v13685_v9  ;;  %v4256_v29 = vsel %vm16855_vm15, 4294967295, %v16854_v14  ;;  %v13702_v14 = vld [vmem:[#allocation5 + $0x4f8] ss:$12 sps:$4 sm:$0xff]   ;;  %vm16909_vm15 = vmmov %vm16761_vm0 }
 0x504   :  { %16860 = vst [vmem:[#allocation108_spill] sm:$0xff] %v13702_v14 }
 0x506   :  { %4395 = vmatpush1.bf16.msra.mxu0 %v13669_v46  ;;  %4572 = vmatpush1.bf16.msra.mxu1 %v13672_v51  ;;  %v13694_v46 = vld [vmem:[#allocation5 + $0x5a8] ss:$12 sps:$4 sm:$0xff]   ;;  %v9939_v51 = vld [vmem:[#allocation5 + $0x5c0] ss:$12 sps:$4 sm:$0xff]  }
 0x507   :  { %4396 = vmatprep.subr.bf16.mxu0 %v13675_v28  ;;  %4573 = vmatprep.subr.bf16.mxu1 %v16820_v21  ;;  %16857 = vst [vmem:[#allocation106_spill] sm:$0xff] %v13694_v46  ;;  %v4257_v28 = vsel %vm16859_vm13, %v4256_v29, 0  ;;  %v13716_v29 = vld [vmem:[#allocation5 + $0x52c] ss:$12 sps:$4 sm:$0xff]   ;;  %vm16955_vm13 = vmmov %vm16907_vm3 }
 0x508   :  { %16864 = vst [vmem:[#allocation112_spill] sm:$0xff] %v13716_v29 }
 0x50a   :  { %4397 = vmatpush1.bf16.msra.mxu0 %v13679_v20  ;;  %4574 = vmatpush1.bf16.msra.mxu1 %v13682_v42  ;;  %v13705_v20 = vand.u32 %v9939_v51, %v4257_v28  ;;  %v13708_v42 = vld [vmem:[#allocation5 + $0x514] ss:$12 sps:$4 sm:$0xff]  }
 0x50b   :  { %4398 = vmatprep.subr.bf16.mxu0 %v13685_v9  ;;  %4575 = vmatprep.subr.bf16.mxu1 %v16820_v21  ;;  %16862 = vst [vmem:[#allocation110_spill] sm:$0xff] %v13708_v42  ;;  %v13712_v9 = vld [vmem:[#allocation5 + $0x510] ss:$12 sps:$4 sm:$0xff]   ;;  %v13719_v51 = vld [vmem:[#allocation5 + $0x528] ss:$12 sps:$4 sm:$0xff]  }
 0x50c   :  { %16861 = vst [vmem:[#allocation109_spill] sm:$0xff] %v13705_v20  ;;  %16863 = vst [vmem:[#allocation111_spill] sm:$0xff] %v13712_v9 }
 0x50d   :  { %16865 = vst [vmem:[#allocation113_spill] sm:$0xff] %v13719_v51 }
 0x50e   :  { %4399 = vmatpush1.bf16.msra.mxu0 %v13691_v52  ;;  %4576 = vmatpush1.bf16.msra.mxu1 %v13694_v46  ;;  %v9972_v52 = vld [vmem:[#allocation5 + $0x4] ss:$12 sps:$4 sm:$0xff]  }
 0x50f   :  { %4400 = vmatprep.subr.bf16.mxu0 %v13697_v36  ;;  %4577 = vmatprep.subr.bf16.mxu1 %v16820_v21  ;;  %v13722_v46 = vld [vmem:[#allocation5 + $0x544] ss:$12 sps:$4 sm:$0xff]  }
 0x510   :  { %16866 = vst [vmem:[#allocation114_spill] sm:$0xff] %v13722_v46  ;;  %v13735_v21 = vld [vmem:[#allocation5 + $0x558] ss:$12 sps:$4 sm:$0xff]  }
 0x511   :  { %16869 = vst [vmem:[#allocation117_spill] sm:$0xff] %v13735_v21 }
 0x512   :  { %4401 = vmatpush1.bf16.msra.mxu0 %v13702_v14  ;;  %4578 = vmatpush1.bf16.msra.mxu1 %v13705_v20  ;;  %v13729_v20 = vld [vmem:[#allocation5 + $0x540] ss:$12 sps:$4 sm:$0xff]  }
 0x513   :  { %4402 = vmatprep.subr.bf16.mxu0 %v13708_v42  ;;  %4594 = vmatprep.subr.bf16.mxu1 %v9972_v52  ;;  %16867 = vst [vmem:[#allocation115_spill] sm:$0xff] %v13729_v20  ;;  %v13732_v42 = vld [vmem:[#allocation5 + $0x55c] ss:$12 sps:$4 sm:$0xff]  }
 0x514   :  { %16868 = vst [vmem:[#allocation116_spill] sm:$0xff] %v13732_v42 }
 0x516   :  { %4403 = vmatpush1.bf16.msra.mxu0 %v13712_v9 }
 0x517   :  { %4404 = vmatprep.subr.bf16.mxu0 %v13716_v29  ;;  %v13738_v29 = vld [vmem:[#allocation5 + $0x574] ss:$12 sps:$4 sm:$0xff]  }
 0x518   :  { %16870 = vst [vmem:[#allocation118_spill] sm:$0xff] %v13738_v29 }
 0x519   :  { %v13724_v36 = vpop.f32.mrb[12].mxu1 }
 0x51a   :  { %v13726_v14 = vpop.f32.mrb[13].mxu1  ;;  %4405 = vmatpush1.bf16.msra.mxu0 %v13719_v51  ;;  %v13744_v51 = vld [vmem:[#allocation5 + $0x58c] ss:$12 sps:$4 sm:$0xff]  }
 0x51b   :  { %4406 = vmatprep.subr.bf16.mxu0 %v13722_v46  ;;  %v2789_v52 = vpop.f32.mrb[14].mxu1  ;;  %16872 = vst [vmem:[#allocation120_spill] sm:$0xff] %v13744_v51 }
 0x51c   :  { %v2790_v9 = vpop.f32.mrb[15].mxu1  ;;  %v13747_v52 = vld [vmem:[#allocation5 + $0x588] ss:$12 sps:$4 sm:$0xff]  }
 0x51d   :  { %16873 = vst [vmem:[#allocation121_spill] sm:$0xff] %v13747_v52  ;;  %v13750_v9 = vld [vmem:[#allocation5 + $0x5a4] ss:$12 sps:$4 sm:$0xff]  }
 0x51e   :  { %4407 = vmatpush1.bf16.msra.mxu0 %v13729_v20  ;;  %v9938_v20 = vld [vmem:[#allocation5 + $0x5bc] ss:$12 sps:$4 sm:$0xff]  }
 0x51f   :  { %4408 = vmatprep.subr.bf16.mxu0 %v13732_v42  ;;  %v13753_v42 = vld [vmem:[#allocation5 + $0x5a0] ss:$12 sps:$4 sm:$0xff]   ;;  %v13756_v46 = vand.u32 %v9938_v20, %v4257_v28 }
 0x520   :  { %16874 = vst [vmem:[#allocation122_spill] sm:$0xff] %v13753_v42 }
 0x521   :  { %16875 = vst [vmem:[#allocation123_spill] sm:$0xff] %v13756_v46 }
 0x522   :  { %4409 = vmatpush1.bf16.msra.mxu0 %v13735_v21  ;;  %v9936_v21 = vld [vmem:[#allocation5 + $0x5b8] ss:$12 sps:$4 sm:$0xff]  }
 0x523   :  { %4410 = vmatprep.subr.bf16.mxu0 %v13738_v29  ;;  %v13759_v29 = vand.u32 %v9936_v21, %v4257_v28  ;;  %v2747_v28 = vadd.f32 %v13432_v11, %v12824_v32 }
 0x525   :  { %16876 = vst [vmem:[#allocation124_spill] sm:$0xff] %v13759_v29 }
 0x526   :  { %4411 = vmatpush1.bf16.msra.mxu0 %v13741_v4 }
 0x527   :  { %4412 = vmatprep.subr.bf16.mxu0 %v13744_v51 }
 0x52a   :  { %4413 = vmatpush1.bf16.msra.mxu0 %v13747_v52  ;;  %v2745_v52 = vadd.f32 %v13430_v35, %v12824_v32 }
 0x52b   :  { %4414 = vmatprep.subr.bf16.mxu0 %v13750_v9 }
 0x52c   :  { %v2804_v35 = vmax.f32 %v2745_v52, 0.0 }
 0x52e   :  { %4415 = vmatpush1.bf16.msra.mxu0 %v13753_v42 }
 0x52f   :  { %4416 = vmatprep.subr.bf16.mxu0 %v13756_v46 }
 0x531   :  { %v3198_v4 = vpop.permute.xlu1 %3197 }
 0x532   :  { %v3221_v51 = vsel %vm16877_vm4, %v13526_v24, %v3198_v4  ;;  %v13764_v6 = vpop.permute.xlu0 %3199  ;;  %4417 = vmatpush1.bf16.msra.mxu0 %v13759_v29  ;;  %vm16956_vm4 = vmmov %vm16907_vm3 }
 0x533   :  { %v3222_v20 = vsel %vm16878_vm14, %v3198_v4, %v13764_v6  ;;  %9057 = vmatprep.subr.bf16.mxu0 %v13302_v2  ;;  %v3252_v46 = vmax.bf16 %v3221_v51, %v13281_v31  ;;  %v2805_v31 = vmax.f32 %v2747_v28, 0.0  ;;  %v9974_v4 = vld [vmem:[#allocation5 + $0x1c] ss:$12 sps:$4 sm:$0xff]   ;;  %v9976_v28 = vld [vmem:[#allocation5 + $0x34] ss:$12 sps:$4 sm:$0xff]   ;;  %vm16959_vm14 = vmmov %vm16881_vm2 }
 0x534   :  { %v3253_v21 = vmax.bf16 %v3222_v20, %v13459_v44 }
 0x535   :  { %v3109_v24 = vpop.permute.xlu1 %3108 }
 0x536   :  { %v3129_v42 = vsel %vm16879_vm7, %v13454_v63, %v3109_v24  ;;  %v13778_v29 = vpop.permute.xlu0 %3110  ;;  %8867 = vmatprep.mubr.msk.bf16.mxu0 %vm16880_vm9, %v3253_v21  ;;  %8868 = vmatprep.mubr.msk.bf16.mxu1 %vm16881_vm2, %v3253_v21  ;;  %v9973_v63 = vld [vmem:[#allocation5] ss:$12 sps:$4 sm:$0xff]   ;;  %vm16960_vm7 = vmmov %vm16881_vm2  ;;  %vm5014_vm2 = vcmask 310272  }
 0x537   :  { %v13783_v2 = vmax.bf16 %v3129_v42, %v13255_v7  ;;  %v3130_v11 = vsel %vm16761_vm0, %v3109_v24, %v13778_v29  ;;  %4423 = vmatmul.mubr.bf16.vlgmr.msra.gmra.mrb[16].mxu0 %v3252_v46  ;;  %4584 = vmatmul.mubr.bf16.vlgmr.msra.gmra.mrb[28].mxu1 %v3252_v46  ;;  %v13796_v42 = vpack.c.bf16 %v2804_v35, %v2804_v35  ;;  %v9978_v21 = vld [vmem:[#allocation5 + $0x4c] ss:$12 sps:$4 sm:$0xff]   ;;  %v9980_v24 = vld [vmem:[#allocation5 + $0x64] ss:$12 sps:$4 sm:$0xff]   ;;  %vm16997_vm9 = vmmov %vm16907_vm3  ;;  %vm16228_vm0 = vcmask 875520  }
 0x538   :  { %v13788_v44 = vmax.bf16 %v3130_v11, %v13482_v38  ;;  %4595 = vmatpush1.bf16.msra.mxu1 %v9973_v63  ;;  %9058 = vmatpush3.bf16.msra.mxu0 %v13307_v18  ;;  %v13798_v38 = vpack.c.bf16 %v2805_v31, %v2805_v31  ;;  %v9975_v18 = vld [vmem:[#allocation5 + $0x18] ss:$12 sps:$4 sm:$0xff]   ;;  %v9981_v35 = vld [vmem:[#allocation5 + $0x60] ss:$12 sps:$4 sm:$0xff]   ;;  %v9990_v11 = vld [vmem:[#allocation5 + $0xdc] ss:$12 sps:$4 sm:$0xff]  }
 0x539   :  { %3201 = vrot.lane.b32.xlu1 %v13783_v2, %s10131_s30  ;;  %4596 = vmatprep.subr.bf16.mxu1 %v9974_v4  ;;  %v9992_v31 = vld [vmem:[#allocation5 + $0xf4] ss:$12 sps:$4 sm:$0xff]   ;;  %v9994_v63 = vld [vmem:[#allocation5 + $0x10c] ss:$12 sps:$4 sm:$0xff]   ;;  %v9996_v4 = vld [vmem:[#allocation5 + $0x124] ss:$12 sps:$4 sm:$0xff]  }
 0x53a   :  { %v8985_v7 = vpop.f32.mrb[16].mxu1  ;;  %3203 = vrot.lane.b32.xlu0 %v13788_v44, %s10131_s30  ;;  %9059 = vmatprep.subr.bf16.mxu0 %v13313_v23  ;;  %v9977_v23 = vld [vmem:[#allocation5 + $0x30] ss:$12 sps:$4 sm:$0xff]  }
 0x53b   :  { %v8986_v46 = vpop.f32.mrb[17].mxu1 }
 0x53c   :  { %v13800_v51 = vadd.f32 %v8986_v46, %v8985_v7  ;;  %v8988_v52 = vpop.f32.mrb[18].mxu1  ;;  %4597 = vmatpush1.bf16.msra.mxu1 %v9975_v18  ;;  %9060 = vmatpush3.bf16.msra.mxu0 %v13319_v56  ;;  %v9979_v56 = vld [vmem:[#allocation5 + $0x48] ss:$12 sps:$4 sm:$0xff]  }
 0x53d   :  { %v8989_v20 = vpop.f32.mrb[19].mxu1  ;;  %3112 = vrot.lane.b32.xlu1 %v13796_v42, %s10123_s22  ;;  %4598 = vmatprep.subr.bf16.mxu1 %v9976_v28 }
 0x53e   :  { %3114 = vrot.lane.b32.xlu0 %v13798_v38, %s10123_s22  ;;  %9061 = vmatprep.subr.bf16.mxu0 %v13325_v60  ;;  %v9982_v60 = vld [vmem:[#allocation5 + $0x7c] ss:$12 sps:$4 sm:$0xff]  }
 0x540   :  { %4599 = vmatpush1.bf16.msra.mxu1 %v9977_v23  ;;  %9062 = vmatpush3.bf16.msra.mxu0 %v13331_v47  ;;  %v9983_v47 = vld [vmem:[#allocation5 + $0x78] ss:$12 sps:$4 sm:$0xff]  }
 0x541   :  { %4600 = vmatprep.subr.bf16.mxu1 %v9978_v21  ;;  %9063 = vmatprep.subr.bf16.mxu0 %v13337_v33  ;;  %v9984_v33 = vld [vmem:[#allocation5 + $0x94] ss:$12 sps:$4 sm:$0xff]  }
 0x544   :  { %4601 = vmatpush1.bf16.msra.mxu1 %v9979_v56  ;;  %9064 = vmatpush3.bf16.msra.mxu0 %v13343_v57  ;;  %v9985_v57 = vld [vmem:[#allocation5 + $0x90] ss:$12 sps:$4 sm:$0xff]  }
 0x545   :  { %4602 = vmatprep.subr.bf16.mxu1 %v9980_v24  ;;  %9065 = vmatprep.subr.bf16.mxu0 %v13349_v17  ;;  %v9986_v17 = vld [vmem:[#allocation5 + $0xac] ss:$12 sps:$4 sm:$0xff]  }
 0x548   :  { %4603 = vmatpush1.bf16.msra.mxu1 %v9981_v35  ;;  %9066 = vmatpush3.bf16.msra.mxu0 %v13355_v12  ;;  %v9987_v12 = vld [vmem:[#allocation5 + $0xa8] ss:$12 sps:$4 sm:$0xff]  }
 0x549   :  { %4604 = vmatprep.subr.bf16.mxu1 %v9982_v60  ;;  %9067 = vmatprep.subr.bf16.mxu0 %v13361_v49  ;;  %v9988_v49 = vld [vmem:[#allocation5 + $0xc4] ss:$12 sps:$4 sm:$0xff]  }
 0x54a   :  { %v16899_v60 = vld [vmem:[#allocation28_spill] sm:$0xff] }
 0x54c   :  { %4605 = vmatpush1.bf16.msra.mxu1 %v9983_v47  ;;  %9068 = vmatpush3.bf16.msra.mxu0 %v13367_v37  ;;  %v9989_v37 = vld [vmem:[#allocation5 + $0xc0] ss:$12 sps:$4 sm:$0xff]   ;;  %v16900_v47 = vld [vmem:[#allocation52_spill] sm:$0xff] }
 0x54d   :  { %4606 = vmatprep.subr.bf16.mxu1 %v9984_v33  ;;  %9069 = vmatprep.subr.bf16.mxu0 %v13373_v25  ;;  %v9991_v25 = vld [vmem:[#allocation5 + $0xd8] ss:$12 sps:$4 sm:$0xff]  }
 0x54e   :  { %v16901_v33 = vld [vmem:[#allocation53_spill] sm:$0xff] }
 0x550   :  { %4607 = vmatpush1.bf16.msra.mxu1 %v9985_v57  ;;  %9070 = vmatpush3.bf16.msra.mxu0 %v13379_v41  ;;  %v9993_v41 = vld [vmem:[#allocation5 + $0xf0] ss:$12 sps:$4 sm:$0xff]  }
 0x551   :  { %4608 = vmatprep.subr.bf16.mxu1 %v9986_v17  ;;  %9071 = vmatprep.subr.bf16.mxu0 %v13385_v15  ;;  %v9995_v15 = vld [vmem:[#allocation5 + $0x108] ss:$12 sps:$4 sm:$0xff]  }
 0x552   :  { %v16902_v57 = vld [vmem:[#allocation55_spill] sm:$0xff]  ;;  %v16903_v17 = vld [vmem:[#allocation56_spill] sm:$0xff] }
 0x554   :  { %4609 = vmatpush1.bf16.msra.mxu1 %v9987_v12  ;;  %9072 = vmatpush3.bf16.msra.mxu0 %v13391_v34  ;;  %v16904_v12 = vld [vmem:[#allocation31_spill] sm:$0xff] }
 0x555   :  { %4610 = vmatprep.subr.bf16.mxu1 %v9988_v49  ;;  %9079 = vmatprep.subr.bf16.mxu0 %v13397_v0  ;;  %v16905_v49 = vld [vmem:[#allocation51_spill] sm:$0xff] }
 0x558   :  { %4611 = vmatpush1.bf16.msra.mxu1 %v9989_v37 }
 0x559   :  { %4612 = vmatprep.subr.bf16.mxu1 %v9990_v11 }
 0x55c   :  { %4613 = vmatpush1.bf16.msra.mxu1 %v9991_v25 }
 0x55d   :  { %4614 = vmatprep.subr.bf16.mxu1 %v9992_v31 }
 0x560   :  { %4615 = vmatpush1.bf16.msra.mxu1 %v9993_v41 }
 0x561   :  { %4616 = vmatprep.subr.bf16.mxu1 %v9994_v63 }
 0x564   :  { %4617 = vmatpush1.bf16.msra.mxu1 %v9995_v15 }
 0x565   :  { %4618 = vmatprep.subr.bf16.mxu1 %v9996_v4 }
 0x568   :  { %4619 = vmatpush1.bf16.msra.mxu1 %v13201_v30 }
 0x569   :  { %4620 = vmatprep.subr.bf16.mxu1 %v13203_v40 }
 0x56c   :  { %4621 = vmatpush1.bf16.msra.mxu1 %v13206_v54 }
 0x56d   :  { %4622 = vmatprep.subr.bf16.mxu1 %v13209_v39 }
 0x570   :  { %4623 = vmatpush1.bf16.msra.mxu1 %v13212_v59  ;;  %v2786_v59 = vadd.f32 %v13724_v36, %v12824_v32 }
 0x571   :  { %4624 = vmatprep.subr.bf16.mxu1 %v13215_v10 }
 0x572   :  { %v2806_v36 = vmax.f32 %v2786_v59, 0.0 }
 0x574   :  { %4625 = vmatpush1.bf16.msra.mxu1 %v13218_v27  ;;  %v2788_v27 = vadd.f32 %v13726_v14, %v12824_v32  ;;  %v3070_v24 = vpack.c.bf16 %v2806_v36, %v2806_v36 }
 0x575   :  { %4635 = vmatprep.subr.bf16.mxu1 %v13221_v45 }
 0x590   :  { %v9007_v34 = vpop.f32.mrb[20].mxu1 }
 0x591   :  { %v9008_v0 = vpop.f32.mrb[21].mxu1 }
 0x592   :  { %v9009_v7 = vadd.f32 %v9008_v0, %v9007_v34  ;;  %v9010_v46 = vpop.f32.mrb[22].mxu1 }
 0x593   :  { %v9011_v52 = vpop.f32.mrb[23].mxu1 }
 0x594   :  { %v4506_v30 = vadd.f32 %v9009_v7, %v13800_v51 }
 0x5ab   :  { %v3202_v40 = vpop.permute.xlu1 %3201 }
 0x5ac   :  { %v3223_v54 = vsel %vm16882_vm5, %v13764_v6, %v3202_v40  ;;  %v13831_v39 = vpop.permute.xlu0 %3203  ;;  %vm17015_vm5 = vmmov %vm16908_vm1 }
 0x5ad   :  { %v3224_v10 = vsel %vm16883_vm10, %v3202_v40, %v13831_v39  ;;  %v13843_v51 = vmax.bf16 %v3223_v54, %v13464_v61  ;;  %v2807_v61 = vmax.f32 %v2788_v27, 0.0  ;;  %vm17016_vm10 = vmmov %vm16908_vm1 }
 0x5ae   :  { %v13840_v45 = vmax.bf16 %v3224_v10, %v13783_v2 }
 0x5af   :  { %v3113_v18 = vpop.permute.xlu1 %3112  ;;  %v13865_v35 = vpack.c.bf16 %v2807_v61, %v2807_v61  ;;  %v16916_v61 = vld [vmem:[#allocation46_spill] sm:$0xff] }
 0x5b0   :  { %v3131_v6 = vsel %vm16884_vm12, %v13778_v29, %v3113_v18  ;;  %v9029_v20 = vpop.f32.mrb[24].mxu1  ;;  %v13847_v28 = vpop.permute.xlu0 %3114  ;;  %4626 = vmatprep.mubr.bf16.mxu1 %v13840_v45  ;;  %vm17017_vm12 = vcmask 1043456  }
 0x5b1   :  { %v13851_v23 = vmax.bf16 %v3131_v6, %v13484_v3  ;;  %v3132_v32 = vsel %vm16885_vm8, %v3113_v18, %v13847_v28  ;;  %v9030_v14 = vpop.f32.mrb[25].mxu1  ;;  %4627 = vmatmul.mubr.bf16.vlgmr.msra.gmra.mrb[32].mxu1 %v13843_v51  ;;  %vm17018_vm8 = vmmov %vm17017_vm12 }
 0x5b2   :  { %v13857_v2 = vmax.bf16 %v3132_v32, %v13796_v42  ;;  %v9031_v29 = vadd.f32 %v9030_v14, %v9029_v20  ;;  %v9032_v21 = vpop.f32.mrb[26].mxu1  ;;  %4636 = vmatpush1.bf16.msra.mxu1 %v13268_v1  ;;  %v16886_v1 = vld [vmem:[#allocation34_spill] sm:$0xff]  ;;  %v16913_v14 = vld [vmem:[#allocation33_spill] sm:$0xff] }
 0x5b3   :  { %v9033_v56 = vpop.f32.mrb[27].mxu1  ;;  %3205 = vrot.lane.b32.xlu1 %v13851_v23, %s10131_s30  ;;  %4637 = vmatprep.subr.bf16.mxu1 %v13270_v58  ;;  %v16887_v58 = vld [vmem:[#allocation47_spill] sm:$0xff]  ;;  %v16898_v42 = vld [vmem:[#allocation58_spill] sm:$0xff] }
 0x5b4   :  { %3207 = vrot.lane.b32.xlu0 %v13857_v2, %s10131_s30  ;;  %v4546_v3 = vadd.f32 %v9031_v29, %v4506_v30  ;;  %v16917_v29 = vld [vmem:[#allocation40_spill] sm:$0xff]  ;;  %v16918_v21 = vld [vmem:[#allocation22_spill] sm:$0xff]  ;;  %v16919_v56 = vld [vmem:[#allocation43_spill] sm:$0xff] }
 0x5b6   :  { %4638 = vmatpush1.bf16.msra.mxu1 %v13284_v8  ;;  %v16888_v8 = vld [vmem:[#allocation49_spill] sm:$0xff] }
 0x5b7   :  { %3116 = vrot.lane.b32.xlu1 %v3070_v24, %s10123_s22  ;;  %4639 = vmatprep.subr.bf16.mxu1 %v13287_v5  ;;  %v16889_v5 = vld [vmem:[#allocation20_spill] sm:$0xff] }
 0x5b8   :  { %3118 = vrot.lane.b32.xlu0 %v13865_v35, %s10123_s22 }
 0x5ba   :  { %4640 = vmatpush1.bf16.msra.mxu1 %v13294_v19  ;;  %v16890_v19 = vld [vmem:[#allocation50_spill] sm:$0xff] }
 0x5bb   :  { %4641 = vmatprep.subr.bf16.mxu1 %v13297_v48  ;;  %v16891_v48 = vld [vmem:[#allocation23_spill] sm:$0xff] }
 0x5be   :  { %4642 = vmatpush1.bf16.msra.mxu1 %v13300_v50  ;;  %v16892_v50 = vld [vmem:[#allocation25_spill] sm:$0xff] }
 0x5bf   :  { %4643 = vmatprep.subr.bf16.mxu1 %v13305_v62  ;;  %v16893_v62 = vld [vmem:[#allocation26_spill] sm:$0xff] }
 0x5c2   :  { %4644 = vmatpush1.bf16.msra.mxu1 %v13310_v22  ;;  %v16894_v22 = vld [vmem:[#allocation54_spill] sm:$0xff] }
 0x5c3   :  { %4645 = vmatprep.subr.bf16.mxu1 %v13316_v26  ;;  %v16895_v26 = vld [vmem:[#allocation57_spill] sm:$0xff] }
 0x5c6   :  { %4646 = vmatpush1.bf16.msra.mxu1 %v13322_v16  ;;  %v16896_v16 = vld [vmem:[#allocation27_spill] sm:$0xff] }
 0x5c7   :  { %4647 = vmatprep.subr.bf16.mxu1 %v13328_v13  ;;  %v16897_v13 = vld [vmem:[#allocation59_spill] sm:$0xff] }
 0x5ca   :  { %4648 = vmatpush1.bf16.msra.mxu1 %v16886_v1  ;;  %v16923_v1 = vld [vmem:[#allocation45_spill] sm:$0xff] }
 0x5cb   :  { %4649 = vmatprep.subr.bf16.mxu1 %v16887_v58  ;;  %v16924_v58 = vld [vmem:[#allocation29_spill] sm:$0xff] }
 0x5ce   :  { %4650 = vmatpush1.bf16.msra.mxu1 %v16888_v8  ;;  %v16925_v8 = vld [vmem:[#allocation24_spill] sm:$0xff] }
 0x5cf   :  { %4651 = vmatprep.subr.bf16.mxu1 %v16889_v5  ;;  %v16926_v5 = vld [vmem:[#allocation42_spill] sm:$0xff] }
 0x5d2   :  { %4652 = vmatpush1.bf16.msra.mxu1 %v16890_v19  ;;  %v16927_v19 = vld [vmem:[#allocation30_spill] sm:$0xff] }
 0x5d3   :  { %4653 = vmatprep.subr.bf16.mxu1 %v16891_v48  ;;  %v16928_v48 = vld [vmem:[#allocation44_spill] sm:$0xff] }
 0x5d6   :  { %4654 = vmatpush1.bf16.msra.mxu1 %v16892_v50  ;;  %v16929_v50 = vld [vmem:[#allocation60_spill] sm:$0xff] }
 0x5d7   :  { %4655 = vmatprep.subr.bf16.mxu1 %v16893_v62  ;;  %v16930_v62 = vld [vmem:[#allocation61_spill] sm:$0xff] }
 0x5da   :  { %4656 = vmatpush1.bf16.msra.mxu1 %v16894_v22  ;;  %v16931_v22 = vld [vmem:[#allocation62_spill] sm:$0xff] }
 0x5db   :  { %4657 = vmatprep.subr.bf16.mxu1 %v16895_v26  ;;  %v16932_v26 = vld [vmem:[#allocation63_spill] sm:$0xff] }
 0x5de   :  { %4658 = vmatpush1.bf16.msra.mxu1 %v16896_v16  ;;  %v16933_v16 = vld [vmem:[#allocation64_spill] sm:$0xff] }
 0x5df   :  { %4659 = vmatprep.subr.bf16.mxu1 %v16897_v13  ;;  %v16934_v13 = vld [vmem:[#allocation65_spill] sm:$0xff] }
 0x5e2   :  { %4660 = vmatpush1.bf16.msra.mxu1 %v16898_v42  ;;  %v16935_v42 = vld [vmem:[#allocation66_spill] sm:$0xff] }
 0x5e3   :  { %4661 = vmatprep.subr.bf16.mxu1 %v16899_v60  ;;  %v16937_v60 = vld [vmem:[#allocation68_spill] sm:$0xff] }
 0x5e6   :  { %4662 = vmatpush1.bf16.msra.mxu1 %v16900_v47  ;;  %v16938_v47 = vmov 0  }
 0x5e7   :  { %4663 = vmatprep.subr.bf16.mxu1 %v16901_v33  ;;  %v16939_v33 = vld [vmem:[#allocation69_spill] sm:$0xff] }
 0x5ea   :  { %4664 = vmatpush1.bf16.msra.mxu1 %v16902_v57  ;;  %v16940_v57 = vld [vmem:[#allocation71_spill] sm:$0xff] }
 0x5eb   :  { %4665 = vmatprep.subr.bf16.mxu1 %v16903_v17  ;;  %v16941_v17 = vld [vmem:[#allocation72_spill] sm:$0xff] }
 0x5ee   :  { %4666 = vmatpush1.bf16.msra.mxu1 %v16904_v12  ;;  %v16942_v12 = vld [vmem:[#allocation74_spill] sm:$0xff] }
 0x5ef   :  { %4676 = vmatprep.subr.bf16.mxu1 %v16905_v49  ;;  %v16943_v49 = vld [vmem:[#allocation75_spill] sm:$0xff] }
 0x60a   :  { %v13900_v37 = vpop.f32.mrb[16].mxu0  ;;  %v4585_v11 = vpop.f32.mrb[28].mxu1 }
 0x60b   :  { %v4925_v25 = vmul.f32 %v13900_v37, %v13900_v37  ;;  %v13904_v31 = vadd.f32 %v4585_v11, %v4546_v3  ;;  %v13906_v41 = vpop.f32.mrb[17].mxu0  ;;  %v4587_v63 = vpop.f32.mrb[29].mxu1  ;;  %v16920_v3 = vld [vmem:[#allocation48_spill] sm:$0xff]  ;;  %v16944_v11 = vld [vmem:[#allocation77_spill] sm:$0xff] }
 0x60c   :  { %v13910_v15 = vadd.f32 %v13906_v41, %v13900_v37  ;;  %v4926_v4 = vmul.f32 %v13906_v41, %v13906_v41  ;;  %v4428_v34 = vpop.f32.mrb[18].mxu0  ;;  %v4588_v0 = vpop.f32.mrb[30].mxu1  ;;  %v16946_v63 = vld [vmem:[#allocation80_spill] sm:$0xff] }
 0x60d   :  { %v4429_v7 = vpop.f32.mrb[19].mxu0  ;;  %v4589_v46 = vpop.f32.mrb[31].mxu1  ;;  %v16948_v34 = vld [vmem:[#allocation83_spill] sm:$0xff]  ;;  %v16949_v0 = vld [vmem:[#allocation84_spill] sm:$0xff] }
 0x60e   :  { %v13914_v52 = vadd.f32 %v4926_v4, %v4925_v25  ;;  %v16945_v25 = vld [vmem:[#allocation78_spill] sm:$0xff]  ;;  %v16947_v4 = vld [vmem:[#allocation81_spill] sm:$0xff]  ;;  %v16951_v46 = vld [vmem:[#allocation87_spill] sm:$0xff] }
 0x60f   :  { %v16950_v7 = vld [vmem:[#allocation86_spill] sm:$0xff] }
 0x625   :  { %v3206_v30 = vpop.permute.xlu1 %3205 }
 0x626   :  { %v3225_v40 = vsel %vm16906_vm11, %v13831_v39, %v3206_v30  ;;  %v13918_v54 = vpop.permute.xlu0 %3207  ;;  %vm17019_vm11 = vmmov %vm16908_vm1 }
 0x627   :  { %v3226_v59 = vsel %vm16907_vm3, %v3206_v30, %v13918_v54  ;;  %v3256_v27 = vmax.bf16 %v3225_v40, %v13788_v44  ;;  %v16910_v44 = vld [vmem:[#allocation21_spill] sm:$0xff]  ;;  %v16953_v40 = vld [vmem:[#allocation90_spill] sm:$0xff]  ;;  %vm17020_vm3 = vmmov %vm17018_vm8 }
 0x628   :  { %v3257_v10 = vmax.bf16 %v3226_v59, %v13851_v23  ;;  %v16912_v23 = vld [vmem:[#allocation32_spill] sm:$0xff]  ;;  %v16952_v30 = vld [vmem:[#allocation89_spill] sm:$0xff] }
 0x629   :  { %v3117_v18 = vpop.permute.xlu1 %3116  ;;  %v16954_v59 = vld [vmem:[#allocation92_spill] sm:$0xff] }
 0x62a   :  { %v3133_v6 = vsel %vm16908_vm1, %v13847_v28, %v3117_v18  ;;  %4667 = vmatprep.mubr.bf16.mxu1 %v3257_v10  ;;  %4830 = vmatprep.mubr.bf16.mxu0 %v3257_v10  ;;  %v3119_v20 = vpop.permute.xlu0 %3118  ;;  %v16911_v28 = vld [vmem:[#allocation36_spill] sm:$0xff]  ;;  %vm17021_vm1 = vcmask 1031168  }
 0x62b   :  { %v3164_v36 = vmax.bf16 %v3133_v6, %v13798_v38  ;;  %v3134_v39 = vsel %vm16909_vm15, %v3117_v18, %v3119_v20  ;;  %4668 = vmatmul.mubr.bf16.vlgmr.msra.gmra.mrb[32].mxu1 %v3256_v27  ;;  %4831 = vmatmul.mubr.bf16.vlgmr.msra.gmra.mrb[20].mxu0 %v3256_v27  ;;  %v3166_v38 = vmax.bf16 %v3119_v20, %v13865_v35  ;;  %v16922_v35 = vld [vmem:[#allocation37_spill] sm:$0xff]  ;;  %vm17022_vm15 = vmmov %vm17021_vm1 }
 0x62c   :  { %v13928_v32 = vmax.bf16 %v3134_v39, %v3070_v24  ;;  %4677 = vmatpush1.bf16.msra.mxu1 %v13445_v55  ;;  %9080 = vmatpush3.bf16.msra.mxu0 %v13447_v43  ;;  %v16914_v55 = vld [vmem:[#allocation38_spill] sm:$0xff]  ;;  %v16915_v43 = vld [vmem:[#allocation35_spill] sm:$0xff] }
 0x62d   :  { %3209 = vrot.lane.b32.xlu1 %v3164_v36, %s10131_s30  ;;  %4678 = vmatprep.subr.bf16.mxu1 %v16910_v44  ;;  %v16921_v24 = vld [vmem:[#allocation39_spill] sm:$0xff] }
 0x62e   :  { %3211 = vrot.lane.b32.xlu0 %v13928_v32, %s10131_s30  ;;  %9081 = vmatprep.subr.bf16.mxu0 %v16911_v28 }
 0x630   :  { %4679 = vmatpush1.bf16.msra.mxu1 %v16912_v23  ;;  %9082 = vmatpush3.bf16.msra.mxu0 %v16913_v14  ;;  %v16957_v23 = vld [vmem:[#allocation93_spill] sm:$0xff]  ;;  %v16958_v14 = vld [vmem:[#allocation70_spill] sm:$0xff] }
 0x631   :  { %3213 = vrot.lane.b32.xlu1 %v3166_v38, %s10131_s30  ;;  %4680 = vmatprep.subr.bf16.mxu1 %v16914_v55  ;;  %v16965_v55 = vld [vmem:[#allocation99_spill] sm:$0xff]  ;;  %s10151_s30 = smov 108  }
 0x632   :  { %9083 = vmatprep.subr.bf16.mxu0 %v16915_v43  ;;  %v16966_v43 = vld [vmem:[#allocation76_spill] sm:$0xff] }
 0x634   :  { %4681 = vmatpush1.bf16.msra.mxu1 %v16916_v61  ;;  %9084 = vmatpush3.bf16.msra.mxu0 %v16917_v29  ;;  %v16967_v61 = vld [vmem:[#allocation101_spill] sm:$0xff]  ;;  %v16968_v29 = vld [vmem:[#allocation102_spill] sm:$0xff] }
 0x635   :  { %4682 = vmatprep.subr.bf16.mxu1 %v16918_v21  ;;  %9085 = vmatprep.subr.bf16.mxu0 %v16919_v56  ;;  %v16969_v21 = vld [vmem:[#allocation79_spill] sm:$0xff]  ;;  %v16970_v56 = vld [vmem:[#allocation104_spill] sm:$0xff] }
 0x638   :  { %4683 = vmatpush1.bf16.msra.mxu1 %v16920_v3  ;;  %9086 = vmatpush3.bf16.msra.mxu0 %v16921_v24  ;;  %v16971_v3 = vld [vmem:[#allocation105_spill] sm:$0xff]  ;;  %v16972_v24 = vld [vmem:[#allocation82_spill] sm:$0xff] }
 0x639   :  { %4684 = vmatprep.subr.bf16.mxu1 %v16922_v35  ;;  %9087 = vmatprep.subr.bf16.mxu0 %v16923_v1  ;;  %v16973_v35 = vld [vmem:[#allocation107_spill] sm:$0xff]  ;;  %v16974_v1 = vld [vmem:[#allocation108_spill] sm:$0xff] }
 0x63c   :  { %4685 = vmatpush1.bf16.msra.mxu1 %v16924_v58  ;;  %9088 = vmatpush3.bf16.msra.mxu0 %v16925_v8  ;;  %v16975_v58 = vld [vmem:[#allocation85_spill] sm:$0xff]  ;;  %v16976_v8 = vld [vmem:[#allocation110_spill] sm:$0xff] }
 0x63d   :  { %4686 = vmatprep.subr.bf16.mxu1 %v13522_v53  ;;  %9089 = vmatprep.subr.bf16.mxu0 %v16926_v5  ;;  %v16936_v53 = vld [vmem:[#allocation67_spill] sm:$0xff] }
 0x63e   :  { %v16977_v5 = vld [vmem:[#allocation111_spill] sm:$0xff] }
 0x640   :  { %4687 = vmatpush1.bf16.msra.mxu1 %v16927_v19  ;;  %9090 = vmatpush3.bf16.msra.mxu0 %v16928_v48  ;;  %v16978_v19 = vld [vmem:[#allocation88_spill] sm:$0xff] }
 0x641   :  { %4688 = vmatprep.subr.bf16.mxu1 %v16929_v50  ;;  %9091 = vmatprep.subr.bf16.mxu0 %v16930_v62  ;;  %v16979_v48 = vld [vmem:[#allocation112_spill] sm:$0xff]  ;;  %v16980_v50 = vld [vmem:[#allocation113_spill] sm:$0xff]  ;;  %v16981_v62 = vld [vmem:[#allocation91_spill] sm:$0xff] }
 0x644   :  { %4689 = vmatpush1.bf16.msra.mxu1 %v16931_v22  ;;  %9092 = vmatpush3.bf16.msra.mxu0 %v16932_v26  ;;  %v16982_v22 = vld [vmem:[#allocation114_spill] sm:$0xff]  ;;  %v16983_v26 = vld [vmem:[#allocation115_spill] sm:$0xff] }
 0x645   :  { %4690 = vmatprep.subr.bf16.mxu1 %v16933_v16  ;;  %9093 = vmatprep.subr.bf16.mxu0 %v16934_v13  ;;  %v16984_v16 = vld [vmem:[#allocation94_spill] sm:$0xff]  ;;  %v16985_v13 = vld [vmem:[#allocation116_spill] sm:$0xff] }
 0x648   :  { %4691 = vmatpush1.bf16.msra.mxu1 %v16935_v42  ;;  %9094 = vmatpush3.bf16.msra.mxu0 %v16936_v53  ;;  %v16986_v42 = vld [vmem:[#allocation117_spill] sm:$0xff] }
 0x649   :  { %4692 = vmatprep.subr.bf16.mxu1 %v16937_v60  ;;  %4878 = vmatprep.subr.bf16.mxu0 %v16938_v47  ;;  %v16987_v53 = vld [vmem:[#allocation97_spill] sm:$0xff]  ;;  %v16988_v60 = vld [vmem:[#allocation118_spill] sm:$0xff] }
 0x64c   :  { %4693 = vmatpush1.bf16.msra.mxu1 %v16939_v33  ;;  %v16989_v33 = vld [vmem:[#allocation119_spill] sm:$0xff] }
 0x64d   :  { %4694 = vmatprep.subr.bf16.mxu1 %v16940_v57  ;;  %v16990_v57 = vld [vmem:[#allocation100_spill] sm:$0xff] }
 0x650   :  { %4695 = vmatpush1.bf16.msra.mxu1 %v16941_v17  ;;  %v16991_v17 = vld [vmem:[#allocation120_spill] sm:$0xff] }
 0x651   :  { %4696 = vmatprep.subr.bf16.mxu1 %v16942_v12  ;;  %v16992_v12 = vld [vmem:[#allocation121_spill] sm:$0xff] }
 0x654   :  { %4697 = vmatpush1.bf16.msra.mxu1 %v16943_v49  ;;  %v16993_v49 = vld [vmem:[#allocation103_spill] sm:$0xff] }
 0x655   :  { %4698 = vmatprep.subr.bf16.mxu1 %v16944_v11  ;;  %v16994_v11 = vld [vmem:[#allocation122_spill] sm:$0xff] }
 0x658   :  { %4699 = vmatpush1.bf16.msra.mxu1 %v16945_v25  ;;  %v16995_v25 = vld [vmem:[#allocation106_spill] sm:$0xff] }
 0x659   :  { %4700 = vmatprep.subr.bf16.mxu1 %v16946_v63  ;;  %v16996_v63 = vld [vmem:[#allocation123_spill] sm:$0xff] }
 0x65c   :  { %4701 = vmatpush1.bf16.msra.mxu1 %v16947_v4 }
 0x65d   :  { %4702 = vmatprep.subr.bf16.mxu1 %v16948_v34  ;;  %v16998_v34 = vld [vmem:[#allocation124_spill] sm:$0xff] }
 0x660   :  { %4703 = vmatpush1.bf16.msra.mxu1 %v16949_v0  ;;  %v16999_v0 = vld [vmem:[#allocation109_spill] sm:$0xff] }
 0x661   :  { %4704 = vmatprep.subr.bf16.mxu1 %v16950_v7 }
 0x664   :  { %4705 = vmatpush1.bf16.msra.mxu1 %v16951_v46  ;;  %v9998_v46 = vld [vmem:[#allocation5 + $0x8] ss:$12 sps:$4 sm:$0xff]  }
 0x665   :  { %4706 = vmatprep.subr.bf16.mxu1 %v16952_v30  ;;  %v9999_v30 = vld [vmem:[#allocation5 + $0xe0] ss:$12 sps:$4 sm:$0xff]  }
 0x668   :  { %4707 = vmatpush1.bf16.msra.mxu1 %v16953_v40  ;;  %v10000_v40 = vld [vmem:[#allocation5 + $0x20] ss:$12 sps:$4 sm:$0xff]  }
 0x669   :  { %4717 = vmatprep.subr.bf16.mxu1 %v16954_v59  ;;  %v10001_v59 = vld [vmem:[#allocation5 + $0xf8] ss:$12 sps:$4 sm:$0xff]  }
 0x69f   :  { %v3210_v10 = vpop.permute.xlu1 %3209 }
 0x6a0   :  { %v3227_v27 = vsel %vm16955_vm13, %v13918_v54, %v3210_v10  ;;  %v13985_v18 = vpop.permute.xlu0 %3211  ;;  %v16961_v54 = vld [vmem:[#allocation95_spill] sm:$0xff]  ;;  %vm5549_vm13 = vcmask 908288  }
 0x6a1   :  { %v3228_v6 = vsel %vm16956_vm4, %v3210_v10, %v13985_v18  ;;  %v3258_v39 = vmax.bf16 %v3227_v27, %v13857_v2  ;;  %v16963_v2 = vld [vmem:[#allocation73_spill] sm:$0xff]  ;;  %vm17023_vm4 = vmmov %vm17021_vm1 }
 0x6a2   :  { %v3259_v20 = vmax.bf16 %v3228_v6, %v3164_v36  ;;  %v16962_v36 = vld [vmem:[#allocation96_spill] sm:$0xff] }
 0x6a3   :  { %v3214_v44 = vpop.permute.xlu1 %3213  ;;  %v10002_v10 = vld [vmem:[#allocation5 + $0x38] ss:$12 sps:$4 sm:$0xff]   ;;  %v10003_v27 = vld [vmem:[#allocation5 + $0x110] ss:$12 sps:$4 sm:$0xff]   ;;  %v10006_v6 = vld [vmem:[#allocation5 + $0x68] ss:$12 sps:$4 sm:$0xff]  }
 0x6a4   :  { %v3261_v28 = vmax.bf16 %v3214_v44, %v3166_v38  ;;  %4708 = vmatprep.mubr.bf16.mxu1 %v3259_v20  ;;  %4870 = vmatprep.mubr.bf16.mxu0 %v3259_v20  ;;  %v16964_v38 = vld [vmem:[#allocation98_spill] sm:$0xff]  ;;  %v3229_v4 = vsel %vm16997_vm9, %v13985_v18, %v3214_v44  ;;  %v10004_v18 = vld [vmem:[#allocation5 + $0x50] ss:$12 sps:$4 sm:$0xff]  }
 0x6a5   :  { %4709 = vmatmul.mubr.bf16.vlgmr.msra.gmra.mrb[32].mxu1 %v3258_v39  ;;  %4871 = vmatmul.mubr.bf16.vlgmr.msra.gmra.mrb[24].mxu0 %v3258_v39  ;;  %v3260_v7 = vmax.bf16 %v3229_v4, %v13928_v32  ;;  %v10005_v32 = vld [vmem:[#allocation5 + $0x128] ss:$12 sps:$4 sm:$0xff]   ;;  %v10007_v20 = vld [vmem:[#allocation5 + $0x140] ss:$12 sps:$4 sm:$0xff]   ;;  %v10010_v44 = vld [vmem:[#allocation5 + $0x98] ss:$12 sps:$4 sm:$0xff]  }
 0x6a6   :  { %4718 = vmatpush1.bf16.msra.mxu1 %v16957_v23  ;;  %4879 = vmatpush1.bf16.msra.mxu0 %v16958_v14  ;;  %v10008_v39 = vld [vmem:[#allocation5 + $0x80] ss:$12 sps:$4 sm:$0xff]   ;;  %v10012_v23 = vld [vmem:[#allocation5 + $0xb0] ss:$12 sps:$4 sm:$0xff]  }
 0x6a7   :  { %8869 = vmatprep.mubr.msk.bf16.mxu1 %vm16959_vm14, %v3261_v28  ;;  %8870 = vmatprep.mubr.msk.bf16.mxu0 %vm16960_vm7, %v3261_v28  ;;  %v10011_v28 = vld [vmem:[#allocation5 + $0x170] ss:$12 sps:$4 sm:$0xff]   ;;  %vm17024_vm14 = vcmask 1022976  }
 0x6a8   :  { %4719 = vmatprep.subr.bf16.mxu1 %v16961_v54  ;;  %4880 = vmatprep.subr.bf16.mxu0 %v16938_v47  ;;  %vm17025_vm7 = vmmov %vm17024_vm14 }
 0x6a9   :  { %vm17026_vm9 = vmmov %vm17025_vm7 }
 0x6aa   :  { %4720 = vmatpush1.bf16.msra.mxu1 %v16962_v36  ;;  %4881 = vmatpush1.bf16.msra.mxu0 %v16963_v2 }
 0x6ab   :  { %4721 = vmatprep.subr.bf16.mxu1 %v16964_v38  ;;  %4882 = vmatprep.subr.bf16.mxu0 %v16938_v47 }
 0x6ae   :  { %4722 = vmatpush1.bf16.msra.mxu1 %v16965_v55  ;;  %4883 = vmatpush1.bf16.msra.mxu0 %v16966_v43 }
 0x6af   :  { %4723 = vmatprep.subr.bf16.mxu1 %v16967_v61  ;;  %4884 = vmatprep.subr.bf16.mxu0 %v16938_v47 }
 0x6b2   :  { %4724 = vmatpush1.bf16.msra.mxu1 %v16968_v29  ;;  %4885 = vmatpush1.bf16.msra.mxu0 %v16969_v21 }
 0x6b3   :  { %4725 = vmatprep.subr.bf16.mxu1 %v16970_v56  ;;  %4886 = vmatprep.subr.bf16.mxu0 %v16938_v47  ;;  %v4927_v56 = vmul.f32 %v13904_v31, %v13904_v31 }
 0x6b6   :  { %4726 = vmatpush1.bf16.msra.mxu1 %v16971_v3  ;;  %4887 = vmatpush1.bf16.msra.mxu0 %v16972_v24  ;;  %v4919_v3 = vadd.f32 %v13910_v15, %v13904_v31 }
 0x6b7   :  { %4727 = vmatprep.subr.bf16.mxu1 %v16973_v35  ;;  %4888 = vmatprep.subr.bf16.mxu0 %v16938_v47 }
 0x6ba   :  { %4728 = vmatpush1.bf16.msra.mxu1 %v16974_v1  ;;  %4889 = vmatpush1.bf16.msra.mxu0 %v16975_v58  ;;  %v4932_v58 = vadd.f32 %v13914_v52, %v4927_v56 }
 0x6bb   :  { %4729 = vmatprep.subr.bf16.mxu1 %v16976_v8  ;;  %4890 = vmatprep.subr.bf16.mxu0 %v16938_v47 }
 0x6be   :  { %4730 = vmatpush1.bf16.msra.mxu1 %v16977_v5  ;;  %4891 = vmatpush1.bf16.msra.mxu0 %v16978_v19 }
 0x6bf   :  { %4731 = vmatprep.subr.bf16.mxu1 %v16979_v48  ;;  %4892 = vmatprep.subr.bf16.mxu0 %v16938_v47 }
 0x6c2   :  { %4732 = vmatpush1.bf16.msra.mxu1 %v16980_v50  ;;  %4893 = vmatpush1.bf16.msra.mxu0 %v16981_v62 }
 0x6c3   :  { %4733 = vmatprep.subr.bf16.mxu1 %v16982_v22  ;;  %4894 = vmatprep.subr.bf16.mxu0 %v16938_v47 }
 0x6c6   :  { %4734 = vmatpush1.bf16.msra.mxu1 %v16983_v26  ;;  %4895 = vmatpush1.bf16.msra.mxu0 %v16984_v16 }
 0x6c7   :  { %4735 = vmatprep.subr.bf16.mxu1 %v16985_v13  ;;  %4896 = vmatprep.subr.bf16.mxu0 %v16938_v47 }
 0x6ca   :  { %4736 = vmatpush1.bf16.msra.mxu1 %v16986_v42  ;;  %4897 = vmatpush1.bf16.msra.mxu0 %v16987_v53 }
 0x6cb   :  { %4737 = vmatprep.subr.bf16.mxu1 %v16988_v60  ;;  %4898 = vmatprep.subr.bf16.mxu0 %v16938_v47 }
 0x6ce   :  { %4738 = vmatpush1.bf16.msra.mxu1 %v16989_v33  ;;  %4899 = vmatpush1.bf16.msra.mxu0 %v16990_v57 }
 0x6cf   :  { %4739 = vmatprep.subr.bf16.mxu1 %v16991_v17  ;;  %4900 = vmatprep.subr.bf16.mxu0 %v16938_v47 }
 0x6d2   :  { %4740 = vmatpush1.bf16.msra.mxu1 %v16992_v12  ;;  %4901 = vmatpush1.bf16.msra.mxu0 %v16993_v49 }
 0x6d3   :  { %4741 = vmatprep.subr.bf16.mxu1 %v13750_v9  ;;  %4902 = vmatprep.subr.bf16.mxu0 %v16938_v47  ;;  %v9997_v9 = vld [vmem:[#allocation5 + $0xc8] ss:$12 sps:$4 sm:$0xff]  }
 0x6d6   :  { %4742 = vmatpush1.bf16.msra.mxu1 %v16994_v11  ;;  %4903 = vmatpush1.bf16.msra.mxu0 %v16995_v25  ;;  %v10141_v25 = vmov 4  }
 0x6d7   :  { %4743 = vmatprep.subr.bf16.mxu1 %v16996_v63  ;;  %4904 = vmatprep.subr.bf16.mxu0 %v16938_v47 }
 0x6d8   :  { %9680 = vset.pattern.permute.xlu1 %v10141_v25 }
 0x6da   :  { %4744 = vmatpush1.bf16.msra.mxu1 %v16998_v34  ;;  %4905 = vmatpush1.bf16.msra.mxu0 %v16999_v0 }
 0x6db   :  { %9035 = vmatprep.subr.bf16.mxu1 %v9997_v9 }
 0x6dd   :  { %4750 = vmatmul.mubr.bf16.vlgmr.msra.gmra.mrb[32].mxu1 %v3260_v7  ;;  %4911 = vmatmul.mubr.bf16.vlgmr.msra.gmra.mrb[28].mxu0 %v3260_v7 }
 0x6de   :  { %9036 = vmatpush3.bf16.msra.mxu1 %v9998_v46  ;;  %4790 = vmatprep.mubr.bf16.mxu1 %v13840_v45  ;;  %v10009_v45 = vld [vmem:[#allocation5 + $0x158] ss:$12 sps:$4 sm:$0xff]  }
 0x6df   :  { %9037 = vmatprep.subr.bf16.mxu1 %v9999_v30 }
 0x6e2   :  { %9038 = vmatpush3.bf16.msra.mxu1 %v10000_v40  ;;  %v10142_v40 = vmov 5  }
 0x6e3   :  { %9039 = vmatprep.subr.bf16.mxu1 %v10001_v59  ;;  %9681 = vset.pattern.permute.xlu0 %v10142_v40 }
 0x6e6   :  { %9040 = vmatpush3.bf16.msra.mxu1 %v10002_v10  ;;  %v14064_v10 = vld [vmem:[%s15965_s2] sm:$0xff] }
 0x6e7   :  { %9041 = vmatprep.subr.bf16.mxu1 %v10003_v27  ;;  %17000 = vst [vmem:[#allocation34_spill] sm:$0xff] %v14064_v10 }
 0x6ea   :  { %9042 = vmatpush3.bf16.msra.mxu1 %v10004_v18 }
 0x6eb   :  { %9043 = vmatprep.subr.bf16.mxu1 %v10005_v32 }
 0x6ee   :  { %9044 = vmatpush3.bf16.msra.mxu1 %v10006_v6 }
 0x6ef   :  { %9045 = vmatprep.subr.bf16.mxu1 %v10007_v20  ;;  %v88_v20 = vld [vmem:[%s15966_s3] ss:$4 sm:$0x7] }
 0x6f2   :  { %9046 = vmatpush3.bf16.msra.mxu1 %v10008_v39  ;;  %v17001_v39 = vld [vmem:[#allocation13_spill] sm:$0xff] }
 0x6f3   :  { %9047 = vmatprep.subr.bf16.mxu1 %v10009_v45  ;;  %v93_v45 = vrot.slane %v88_v20, %v17001_v39 }
 0x6f6   :  { %9048 = vmatpush3.bf16.msra.mxu1 %v10010_v44  ;;  %v17002_v44 = vld [vmem:[#allocation15_spill] sm:$0xff] }
 0x6f7   :  { %9049 = vmatprep.subr.bf16.mxu1 %v10011_v28  ;;  %v97_v28 = vrot.slane %v88_v20, %v17002_v44 }
 0x6fa   :  { %9050 = vmatpush3.bf16.msra.mxu1 %v10012_v23  ;;  %v17003_v23 = vld [vmem:[#allocation12_spill] sm:$0xff] }
 0x6fd   :  { %4791 = vmatmul.mubr.bf16.vlgmr.msra.gmra.mrb[36].mxu1 %v13843_v51 }
 0x6fe   :  { %v9073_v14 = vpop.f32.mrb[20].mxu0 }
 0x6ff   :  { %v9074_v54 = vpop.f32.mrb[21].mxu0 }
 0x700   :  { %v9075_v36 = vadd.f32 %v9074_v54, %v9073_v14  ;;  %v9076_v2 = vpop.f32.mrb[22].mxu0  ;;  %v101_v14 = vrot.slane %v88_v20, %v17003_v23 }
 0x701   :  { %v9077_v38 = vpop.f32.mrb[23].mxu0  ;;  %v14079_v2 = vrot.slane %v97_v28, %v17001_v39 }
 0x702   :  { %v14082_v38 = vrot.slane %v101_v14, %v17001_v39 }
 0x703   :  { %17005 = vst [vmem:[#allocation49_spill] sm:$0xff] %v14079_v2 }
 0x704   :  { %17006 = vst [vmem:[#allocation20_spill] sm:$0xff] %v14082_v38 }
 0x778   :  { %v9095_v55 = vpop.f32.mrb[24].mxu0 }
 0x779   :  { %v9096_v43 = vpop.f32.mrb[25].mxu0 }
 0x77a   :  { %v9097_v61 = vadd.f32 %v9096_v43, %v9095_v55  ;;  %v9098_v29 = vpop.f32.mrb[26].mxu0 }
 0x77b   :  { %v9099_v21 = vpop.f32.mrb[27].mxu0 }
 0x7b0   :  { %v14055_v24 = vpop.f32.mrb[32].mxu1  ;;  %v4912_v35 = vpop.f32.mrb[28].mxu0 }
 0x7b1   :  { %v4920_v51 = vadd.f32 %v4919_v3, %v14055_v24  ;;  %v4928_v1 = vmul.f32 %v14055_v24, %v14055_v24  ;;  %v4753_v8 = vpop.f32.mrb[33].mxu1  ;;  %v4914_v5 = vpop.f32.mrb[29].mxu0 }
 0x7b2   :  { %v4929_v19 = vmul.f32 %v4753_v8, %v4753_v8  ;;  %v4755_v48 = vpop.f32.mrb[34].mxu1  ;;  %v4915_v50 = vpop.f32.mrb[30].mxu0 }
 0x7b3   :  { %v4933_v62 = vadd.f32 %v4932_v58, %v4928_v1  ;;  %v4921_v22 = vadd.f32 %v4920_v51, %v4753_v8  ;;  %v4756_v26 = vpop.f32.mrb[35].mxu1  ;;  %v4916_v16 = vpop.f32.mrb[31].mxu0 }
 0x7b5   :  { %v4934_v15 = vadd.f32 %v4933_v62, %v4929_v19 }
 0x7d0   :  { %v9051_v13 = vpop.f32.mrb[36].mxu1 }
 0x7d1   :  { %v9052_v42 = vpop.f32.mrb[37].mxu1 }
 0x7d2   :  { %v9053_v53 = vadd.f32 %v9052_v42, %v9051_v13  ;;  %v9054_v60 = vpop.f32.mrb[38].mxu1 }
 0x7d3   :  { %v9055_v33 = vpop.f32.mrb[39].mxu1 }
 0x7d4   :  { %v4833_v57 = vadd.f32 %v9075_v36, %v9053_v53  ;;  %v14076_v36 = vrot.slane %v93_v45, %v17001_v39 }
 0x7d6   :  { %v4873_v17 = vadd.f32 %v9097_v61, %v4833_v57  ;;  %17004 = vst [vmem:[#allocation47_spill] sm:$0xff] %v14076_v36 }
 0x7d8   :  { %v4913_v12 = vadd.f32 %v4912_v35, %v4873_v17 }
 0x7da   :  { %v4922_v49 = vadd.f32 %v4921_v22, %v4913_v12  ;;  %v4930_v52 = vmul.f32 %v4913_v12, %v4913_v12 }
 0x7dc   :  { %4923 = vadd.xlane.f32.xlu0 %v4922_v49  ;;  %v4935_v11 = vadd.f32 %v4934_v15, %v4930_v52 }
 0x7de   :  { %4936 = vadd.xlane.f32.xlu1 %v4935_v11 }
 0x869   :  { %v4924_v63 = vpop.xlane.xlu0 %4923 }
 0x86a   :  { %v4939_v4 = vmul.f32 0.0025510204, %v4924_v63 }
 0x86b   :  { %v4937_v34 = vpop.xlane.xlu1 %4936 }
 0x86c   :  { %v4941_v0 = vmul.f32 %v4939_v4, %v4939_v4  ;;  %v4940_v7 = vmul.f32 0.0025510204, %v4937_v34 }
 0x86e   :  { %v4942_v9 = vsub.f32 %v4940_v7, %v4941_v0 }
 0x870   :  { %v4943_v46 = vmax.f32 %v4942_v9, 0.0 }
 0x872   :  { %v4944_v30 = vadd.f32 1e-05, %v4943_v46 }
 0x874   :  { %9960 = vrsqrt.f32 %v4944_v30 }
 0x87e   :  { %v9961_v59 = vpop.eup %9960 }
 0x87f   :  { %v4946_v27 = vmul.f32 %v14064_v10, %v9961_v59 }
 0x881   :  { %4955 = vperm.xlu1 %9680, %v4946_v27   ;;  %v4947_v18 = vmul.f32 %v4946_v27, %v4939_v4 }
 0x883   :  { %4949 = vrot.lane.b32.xlu0 %v4947_v18, %s10143_s18 }
 0x8f5   :  { %v4950_v32 = vpop.permute.xlu0 %4949 }
 0x8f6   :  { %v4952_v6 = vsub.f32 %v14064_v10, %v4950_v32 }
 0x8f8   :  { %4978 = vperm.xlu0 %9681, %v4952_v6  }
 0x900   :  { %v4956_v54 = vpop.permute.xlu1 %4955 }
 0x901   :  { %v4958_v55 = vmul.f32 %v4956_v54, %v13900_v37  ;;  %v4960_v61 = vmul.f32 %v4956_v54, %v13904_v31  ;;  %v4959_v3 = vmul.f32 %v4956_v54, %v13906_v41  ;;  %v4962_v35 = vmul.f32 %v4956_v54, %v4753_v8 }
 0x902   :  { %v4961_v37 = vmul.f32 %v4956_v54, %v14055_v24  ;;  %v4963_v22 = vmul.f32 %v4956_v54, %v4913_v12 }
 0x977   :  { %v4979_v43 = vpop.permute.xlu0 %4978 }
 0x978   :  { %v4981_v29 = vmul.f32 %v4979_v43, %v14076_v36  ;;  %v4982_v21 = vmul.f32 %v4979_v43, %v14079_v2  ;;  %v4983_v56 = vmul.f32 %v4979_v43, %v14082_v38 }
 0x97a   :  { %v4984_v51 = vadd.f32 %v4981_v29, %v4958_v55  ;;  %v4986_v1 = vadd.f32 %v4983_v56, %v4960_v61  ;;  %v4985_v58 = vadd.f32 %v4982_v21, %v4959_v3  ;;  %v4988_v5 = vadd.f32 %v4982_v21, %v4962_v35 }
 0x97b   :  { %v4987_v31 = vadd.f32 %v4981_v29, %v4961_v37  ;;  %v4989_v26 = vadd.f32 %v4983_v56, %v4963_v22 }
 0x97c   :  { %v4992_v19 = vpack.c.bf16 %v4986_v1, %v4986_v1  ;;  %v4990_v48 = vpack.c.bf16 %v4984_v51, %v4984_v51  ;;  %v4994_v50 = vpack.c.bf16 %v4988_v5, %v4988_v5  ;;  %v4991_v62 = vpack.c.bf16 %v4985_v58, %v4985_v58 }
 0x97d   :  { %v4993_v41 = vpack.c.bf16 %v4987_v31, %v4987_v31  ;;  %v4995_v8 = vpack.c.bf16 %v4989_v26, %v4989_v26 }
 0x97e   :  { %5006 = vrot.lane.b32.xlu0 %v4992_v19, %s10144_s20  ;;  %5002 = vrot.lane.b32.xlu1 %v4990_v48, %s10144_s20 }
 0x982   :  { %5010 = vrot.lane.b32.xlu0 %v4994_v50, %s10144_s20  ;;  %5004 = vrot.lane.b32.xlu1 %v4991_v62, %s10144_s20 }
 0x986   :  { %5008 = vrot.lane.b32.xlu1 %v4993_v41, %s10144_s20 }
 0x98a   :  { %5012 = vrot.lane.b32.xlu1 %v4995_v8, %s10144_s20 }
 0x9f0   :  { %v5003_v16 = vpop.permute.xlu1 %5002  ;;  %v5007_v15 = vpop.permute.xlu0 %5006 }
 0x9f1   :  { %v14109_v33 = vsel %vm5014_vm2, 0, %v5003_v16 }
 0x9f2   :  { %v14220_v25 = vrot.slane %v14109_v33, 4 }
 0x9f4   :  { %v5005_v13 = vpop.permute.xlu1 %5004  ;;  %v5011_v17 = vpop.permute.xlu0 %5010 }
 0x9f5   :  { %v14092_v24 = vsel %vm5014_vm2, %v5003_v16, %v5005_v13  ;;  %v14095_v42 = vsel %vm5014_vm2, %v5005_v13, %v5007_v15 }
 0x9f6   :  { %5058 = vrot.lane.b32.xlu1 %v14095_v42, %s10124_s23  ;;  %5056 = vrot.lane.b32.xlu0 %v14092_v24, %s10124_s23  ;;  %v14213_v11 = vrot.slane %v14095_v42, 4  ;;  %v14227_v63 = vrot.slane %v14092_v24, 4 }
 0x9f8   :  { %v5009_v53 = vpop.permute.xlu1 %5008 }
 0x9f9   :  { %v14102_v60 = vsel %vm5014_vm2, %v5007_v15, %v5009_v53  ;;  %v14143_v49 = vsel %vm5014_vm2, %v5009_v53, %v5011_v17 }
 0x9fa   :  { %5537 = vrot.lane.b32.xlu1 %v14092_v24, %s10145_s21  ;;  %5060 = vrot.lane.b32.xlu0 %v14102_v60, %s10124_s23  ;;  %v14234_v4 = vrot.slane %v14102_v60, 4  ;;  %v14281_v32 = vrot.slane %v14143_v49, 4 }
 0x9fc   :  { %v5013_v57 = vpop.permute.xlu1 %5012 }
 0x9fd   :  { %v14132_v12 = vsel %vm5014_vm2, %v5011_v17, %v5013_v57  ;;  %v14178_v52 = vsel %vm5014_vm2, %v5013_v57, 0  ;;  %vm17027_vm2 = vmmov %vm17020_vm3 }
 0x9fe   :  { %5541 = vrot.lane.b32.xlu1 %v14102_v60, %s10145_s21  ;;  %5054 = vrot.lane.b32.xlu0 %v14109_v33, %s10124_s23  ;;  %v14284_v6 = vrot.slane %v14132_v12, 4  ;;  %v14343_v1 = vrot.slane %v14178_v52, 4 }
 0xa02   :  { %5535 = vrot.lane.b32.xlu1 %v14109_v33, %s10145_s21  ;;  %5539 = vrot.lane.b32.xlu0 %v14095_v42, %s10145_s21 }
 0xa06   :  { %5139 = vrot.lane.b32.xlu1 %v14095_v42, %s10146_s24  ;;  %5137 = vrot.lane.b32.xlu0 %v14092_v24, %s10146_s24 }
 0xa0a   :  { %5179 = vrot.lane.b32.xlu1 %v14092_v24, %s10147_s4  ;;  %5141 = vrot.lane.b32.xlu0 %v14102_v60, %s10146_s24 }
 0xa0e   :  { %5183 = vrot.lane.b32.xlu1 %v14102_v60, %s10147_s4  ;;  %5135 = vrot.lane.b32.xlu0 %v14109_v33, %s10146_s24 }
 0xa12   :  { %5177 = vrot.lane.b32.xlu0 %v14109_v33, %s10147_s4  ;;  %5064 = vrot.lane.b32.xlu1 %v14132_v12, %s10124_s23 }
 0xa16   :  { %5181 = vrot.lane.b32.xlu0 %v14095_v42, %s10147_s4  ;;  %5545 = vrot.lane.b32.xlu1 %v14132_v12, %s10145_s21 }
 0xa1a   :  { %5062 = vrot.lane.b32.xlu0 %v14143_v49, %s10124_s23  ;;  %5145 = vrot.lane.b32.xlu1 %v14132_v12, %s10146_s24 }
 0xa1e   :  { %5543 = vrot.lane.b32.xlu0 %v14143_v49, %s10145_s21  ;;  %5187 = vrot.lane.b32.xlu1 %v14132_v12, %s10147_s4 }
 0xa22   :  { %5143 = vrot.lane.b32.xlu0 %v14143_v49, %s10146_s24  ;;  %5098 = vrot.lane.b32.xlu1 %v14095_v42, %s10128_s27 }
 0xa26   :  { %5185 = vrot.lane.b32.xlu0 %v14143_v49, %s10147_s4  ;;  %5223 = vrot.lane.b32.xlu1 %v14095_v42, %s10133_s9 }
 0xa2a   :  { %5096 = vrot.lane.b32.xlu0 %v14092_v24, %s10128_s27  ;;  %5102 = vrot.lane.b32.xlu1 %v14143_v49, %s10128_s27 }
 0xa2e   :  { %5094 = vrot.lane.b32.xlu0 %v14109_v33, %s10128_s27  ;;  %5264 = vrot.lane.b32.xlu1 %v14095_v42, %s10148_s26 }
 0xa32   :  { %5221 = vrot.lane.b32.xlu0 %v14092_v24, %s10133_s9  ;;  %5260 = vrot.lane.b32.xlu1 %v14109_v33, %s10148_s26 }
 0xa36   :  { %5219 = vrot.lane.b32.xlu0 %v14109_v33, %s10133_s9  ;;  %5304 = vrot.lane.b32.xlu1 %v14092_v24, %s10149_s28 }
 0xa3a   :  { %5100 = vrot.lane.b32.xlu0 %v14102_v60, %s10128_s27  ;;  %5066 = vrot.lane.b32.xlu1 %v14178_v52, %s10124_s23 }
 0xa3e   :  { %5262 = vrot.lane.b32.xlu0 %v14092_v24, %s10148_s26  ;;  %5302 = vrot.lane.b32.xlu1 %v14109_v33, %s10149_s28 }
 0xa42   :  { %5306 = vrot.lane.b32.xlu0 %v14095_v42, %s10149_s28  ;;  %5227 = vrot.lane.b32.xlu1 %v14143_v49, %s10133_s9 }
 0xa46   :  { %5547 = vrot.lane.b32.xlu0 %v14178_v52, %s10145_s21  ;;  %5266 = vrot.lane.b32.xlu1 %v14102_v60, %s10148_s26 }
 0xa4a   :  { %5225 = vrot.lane.b32.xlu0 %v14102_v60, %s10133_s9  ;;  %5189 = vrot.lane.b32.xlu1 %v14178_v52, %s10147_s4 }
 0xa4e   :  { %5147 = vrot.lane.b32.xlu0 %v14178_v52, %s10146_s24  ;;  %5308 = vrot.lane.b32.xlu1 %v14102_v60, %s10149_s28 }
 0xa52   :  { %5268 = vrot.lane.b32.xlu0 %v14143_v49, %s10148_s26  ;;  %5104 = vrot.lane.b32.xlu1 %v14132_v12, %s10128_s27 }
 0xa56   :  { %5310 = vrot.lane.b32.xlu0 %v14143_v49, %s10149_s28  ;;  %5229 = vrot.lane.b32.xlu1 %v14132_v12, %s10133_s9 }
 0xa5a   :  { %5106 = vrot.lane.b32.xlu0 %v14178_v52, %s10128_s27  ;;  %5038 = vrot.lane.b32.xlu1 %v14213_v11, %s10123_s22  ;;  %s10150_s27 = smov 110  }
 0xa5e   :  { %5231 = vrot.lane.b32.xlu0 %v14178_v52, %s10133_s9  ;;  %5034 = vrot.lane.b32.xlu1 %v14220_v25, %s10123_s22 }
 0xa62   :  { %5036 = vrot.lane.b32.xlu0 %v14227_v63, %s10123_s22  ;;  %5076 = vrot.lane.b32.xlu1 %v14227_v63, %s10130_s29 }
 0xa66   :  { %5040 = vrot.lane.b32.xlu0 %v14234_v4, %s10123_s22  ;;  %5080 = vrot.lane.b32.xlu1 %v14234_v4, %s10130_s29 }
 0xa68   :  { %v14240_v34 = vpop.permute.xlu0 %5056  ;;  %v14242_v0 = vpop.permute.xlu1 %5058 }
 0xa6a   :  { %5078 = vrot.lane.b32.xlu0 %v14213_v11, %s10130_s29  ;;  %5074 = vrot.lane.b32.xlu1 %v14220_v25, %s10130_s29 }
 0xa6c   :  { %v14248_v7 = vpop.permute.xlu0 %5060  ;;  %v14250_v9 = vpop.permute.xlu1 %5537 }
 0xa6e   :  { %5116 = vrot.lane.b32.xlu0 %v14227_v63, %s10150_s27  ;;  %5118 = vrot.lane.b32.xlu1 %v14213_v11, %s10150_s27 }
 0xa70   :  { %v14256_v46 = vpop.permute.xlu0 %5054  ;;  %v14258_v30 = vpop.permute.xlu1 %5541 }
 0xa72   :  { %5120 = vrot.lane.b32.xlu0 %v14234_v4, %s10150_s27  ;;  %5158 = vrot.lane.b32.xlu1 %v14227_v63, %s10151_s30 }
 0xa74   :  { %v14264_v40 = vpop.permute.xlu0 %5539  ;;  %v14266_v59 = vpop.permute.xlu1 %5535 }
 0xa76   :  { %5114 = vrot.lane.b32.xlu0 %v14220_v25, %s10150_s27  ;;  %5162 = vrot.lane.b32.xlu1 %v14234_v4, %s10151_s30 }
 0xa78   :  { %v14272_v27 = vpop.permute.xlu0 %5137  ;;  %v14274_v18 = vpop.permute.xlu1 %5139 }
 0xa7a   :  { %5160 = vrot.lane.b32.xlu0 %v14213_v11, %s10151_s30  ;;  %5156 = vrot.lane.b32.xlu1 %v14220_v25, %s10151_s30 }
 0xa7c   :  { %v14286_v20 = vpop.permute.xlu0 %5141  ;;  %v14288_v45 = vpop.permute.xlu1 %5179 }
 0xa7e   :  { %5042 = vrot.lane.b32.xlu0 %v14281_v32, %s10123_s22  ;;  %5044 = vrot.lane.b32.xlu1 %v14284_v6, %s10123_s22 }
 0xa80   :  { %v14294_v28 = vpop.permute.xlu0 %5135  ;;  %v14296_v14 = vpop.permute.xlu1 %5183 }
 0xa82   :  { %5082 = vrot.lane.b32.xlu0 %v14281_v32, %s10130_s29  ;;  %5084 = vrot.lane.b32.xlu1 %v14284_v6, %s10130_s29 }
 0xa84   :  { %v14302_v54 = vpop.permute.xlu0 %5177  ;;  %v14304_v55 = vpop.permute.xlu1 %5064 }
 0xa86   :  { %5122 = vrot.lane.b32.xlu0 %v14281_v32, %s10150_s27  ;;  %5124 = vrot.lane.b32.xlu1 %v14284_v6, %s10150_s27 }
 0xa88   :  { %v14310_v43 = vpop.permute.xlu0 %5181  ;;  %v14312_v61 = vpop.permute.xlu1 %5545 }
 0xa8a   :  { %5164 = vrot.lane.b32.xlu0 %v14281_v32, %s10151_s30  ;;  %5166 = vrot.lane.b32.xlu1 %v14284_v6, %s10151_s30 }
 0xa8c   :  { %v14318_v29 = vpop.permute.xlu0 %5062  ;;  %v14320_v21 = vpop.permute.xlu1 %5145 }
 0xa8e   :  { %5202 = vrot.lane.b32.xlu0 %v14213_v11, %s10152_s8  ;;  %5200 = vrot.lane.b32.xlu1 %v14227_v63, %s10152_s8 }
 0xa90   :  { %v14326_v56 = vpop.permute.xlu0 %5543  ;;  %v14328_v3 = vpop.permute.xlu1 %5187 }
 0xa92   :  { %5241 = vrot.lane.b32.xlu0 %v14227_v63, %s10153_s10  ;;  %5198 = vrot.lane.b32.xlu1 %v14220_v25, %s10152_s8 }
 0xa94   :  { %v14334_v35 = vpop.permute.xlu0 %5143  ;;  %v14336_v51 = vpop.permute.xlu1 %5098 }
 0xa96   :  { %5283 = vrot.lane.b32.xlu0 %v14227_v63, %s10154_s11  ;;  %5243 = vrot.lane.b32.xlu1 %v14213_v11, %s10153_s10 }
 0xa98   :  { %v5186_v58 = vpop.permute.xlu0 %5185  ;;  %v14345_v5 = vpop.permute.xlu1 %5223 }
 0xa99   :  { %v14464_v2 = vsel %vm16228_vm0, %v5186_v58, %v14328_v3 }
 0xa9a   :  { %5046 = vrot.lane.b32.xlu0 %v14343_v1, %s10123_s22  ;;  %5239 = vrot.lane.b32.xlu1 %v14220_v25, %s10153_s10  ;;  %17012 = vst [vmem:[#allocation57_spill] sm:$0xff] %v14464_v2 }
 0xa9c   :  { %v14351_v19 = vpop.permute.xlu0 %5096  ;;  %v14353_v48 = vpop.permute.xlu1 %5102 }
 0xa9e   :  { %5281 = vrot.lane.b32.xlu0 %v14220_v25, %s10154_s11  ;;  %5285 = vrot.lane.b32.xlu1 %v14213_v11, %s10154_s11 }
 0xaa0   :  { %v14359_v37 = vpop.permute.xlu0 %5094  ;;  %v14361_v31 = vpop.permute.xlu1 %5264 }
 0xaa2   :  { %5327 = vrot.lane.b32.xlu0 %v14213_v11, %s10155_s12  ;;  %5325 = vrot.lane.b32.xlu1 %v14227_v63, %s10155_s12 }
 0xaa4   :  { %v14367_v50 = vpop.permute.xlu0 %5221  ;;  %v14369_v62 = vpop.permute.xlu1 %5260 }
 0xaa6   :  { %5086 = vrot.lane.b32.xlu0 %v14343_v1, %s10130_s29  ;;  %5204 = vrot.lane.b32.xlu1 %v14234_v4, %s10152_s8  ;;  %s10156_s29 = smov 73  }
 0xaa8   :  { %v14375_v22 = vpop.permute.xlu0 %5219  ;;  %v14377_v26 = vpop.permute.xlu1 %5304 }
 0xaaa   :  { %5323 = vrot.lane.b32.xlu0 %v14220_v25, %s10155_s12  ;;  %5126 = vrot.lane.b32.xlu1 %v14343_v1, %s10150_s27 }
 0xaac   :  { %v14383_v41 = vpop.permute.xlu0 %5100  ;;  %v14385_v8 = vpop.permute.xlu1 %5066 }
 0xaae   :  { %5206 = vrot.lane.b32.xlu0 %v14281_v32, %s10152_s8  ;;  %5247 = vrot.lane.b32.xlu1 %v14281_v32, %s10153_s10 }
 0xab0   :  { %v14391_v16 = vpop.permute.xlu0 %5262  ;;  %v14393_v15 = vpop.permute.xlu1 %5302 }
 0xab2   :  { %5245 = vrot.lane.b32.xlu0 %v14234_v4, %s10153_s10  ;;  %5168 = vrot.lane.b32.xlu1 %v14343_v1, %s10151_s30 }
 0xab4   :  { %v14399_v13 = vpop.permute.xlu0 %5306  ;;  %v14401_v53 = vpop.permute.xlu1 %5227 }
 0xab6   :  { %5289 = vrot.lane.b32.xlu0 %v14281_v32, %s10154_s11  ;;  %5287 = vrot.lane.b32.xlu1 %v14234_v4, %s10154_s11 }
 0xab8   :  { %v14407_v57 = vpop.permute.xlu0 %5547  ;;  %v14409_v17 = vpop.permute.xlu1 %5266 }
 0xaba   :  { %5331 = vrot.lane.b32.xlu0 %v14281_v32, %s10155_s12  ;;  %5329 = vrot.lane.b32.xlu1 %v14234_v4, %s10155_s12  ;;  %v14430_v32 = vsel %vm16228_vm0, %v14302_v54, %v14288_v45  ;;  %v14435_v4 = vsel %vm16228_vm0, %v14288_v45, %v14310_v43  ;;  %v14447_v54 = vsel %vm16228_vm0, %v14296_v14, %v5186_v58 }
 0xabb   :  { %v14452_v45 = vsel %vm16228_vm0, %v14310_v43, %v14296_v14 }
 0xabc   :  { %v14415_v11 = vpop.permute.xlu0 %5225  ;;  %v14417_v25 = vpop.permute.xlu1 %5189 }
 0xabd   :  { %17007 = vst [vmem:[#allocation50_spill] sm:$0xff] %v14417_v25 }
 0xabe   :  { %5210 = vrot.lane.b32.xlu0 %v14343_v1, %s10152_s8  ;;  %5208 = vrot.lane.b32.xlu1 %v14284_v6, %s10152_s8  ;;  %s10164_s8 = smov 118  }
 0xac0   :  { %v14423_v63 = vpop.permute.xlu0 %5147  ;;  %v14425_v23 = vpop.permute.xlu1 %5308 }
 0xac1   :  { %17008 = vst [vmem:[#allocation23_spill] sm:$0xff] %v14425_v23 }
 0xac2   :  { %5665 = vrot.lane.b32.xlu1 %v14435_v4, %s10156_s29  ;;  %5663 = vrot.lane.b32.xlu0 %v14430_v32, %s10156_s29 }
 0xac4   :  { %v14441_v39 = vpop.permute.xlu0 %5268  ;;  %v14443_v44 = vpop.permute.xlu1 %5104 }
 0xac5   :  { %17009 = vst [vmem:[#allocation25_spill] sm:$0xff] %v14443_v44 }
 0xac6   :  { %5669 = vrot.lane.b32.xlu1 %v14447_v54, %s10156_s29  ;;  %5667 = vrot.lane.b32.xlu0 %v14452_v45, %s10156_s29 }
 0xac8   :  { %v14458_v47 = vpop.permute.xlu0 %5310  ;;  %v14460_v38 = vpop.permute.xlu1 %5229 }
 0xac9   :  { %17010 = vst [vmem:[#allocation26_spill] sm:$0xff] %v14458_v47  ;;  %17011 = vst [vmem:[#allocation54_spill] sm:$0xff] %v14460_v38 }
 0xaca   :  { %5671 = vrot.lane.b32.xlu0 %v14464_v2, %s10156_s29 }
 0xacc   :  { %v14468_v36 = vpop.permute.xlu0 %5106  ;;  %v5039_v14 = vpop.permute.xlu1 %5038 }
 0xacd   :  { %17013 = vst [vmem:[#allocation27_spill] sm:$0xff] %v14468_v36 }
 0xad0   :  { %v14470_v43 = vpop.permute.xlu0 %5231  ;;  %v5035_v44 = vpop.permute.xlu1 %5034 }
 0xad1   :  { %17014 = vst [vmem:[#allocation59_spill] sm:$0xff] %v14470_v43 }
 0xad4   :  { %v5037_v10 = vpop.permute.xlu0 %5036  ;;  %v5077_v23 = vpop.permute.xlu1 %5076 }
 0xad5   :  { %v5048_v25 = vsel %vm17015_vm5, %v5035_v44, %v5037_v10  ;;  %v5049_v47 = vsel %vm17016_vm10, %v5037_v10, %v5039_v14  ;;  %v5070_v44 = vsel %vm17022_vm15, %v14242_v0, %v14248_v7  ;;  %vm17028_vm5 = vmmov %vm17027_vm2  ;;  %vm5149_vm15 = vcmask 891904  }
 0xad6   :  { %v5349_v38 = vsel %vm17017_vm12, %v14092_v24, %v5049_v47  ;;  %v5345_v58 = vsel %vm17018_vm8, %v14109_v33, %v5048_v25  ;;  %v5069_v47 = vsel %vm17021_vm1, %v14240_v34, %v14242_v0  ;;  %vm17029_vm10 = vmmov %vm17027_vm2  ;;  %vm5128_vm12 = vcmask 900096  }
 0xad7   :  { %5609 = vrot.lane.b32.xlu1 %v5349_v38, %s10156_s29  ;;  %5772 = vmatprep.subr.bf16.mxu0 %v5349_v38  ;;  %vm17030_vm8 = vcmask 1014784   ;;  %vm17033_vm1 = vmmov %vm17027_vm2 }
 0xad8   :  { %v14479_v2 = vpop.permute.xlu0 %5040  ;;  %5773 = vmatpush1.bf16.msra.mxu0 %v5345_v58  ;;  %v14481_v43 = vpop.permute.xlu1 %5080 }
 0xad9   :  { %v5050_v36 = vsel %vm17019_vm11, %v5039_v14, %v14479_v2  ;;  %vm17031_vm11 = vmmov %vm17027_vm2 }
 0xada   :  { %v14487_v10 = vsel %vm17020_vm3, %v14095_v42, %v5050_v36  ;;  %v5068_v36 = vsel %vm17023_vm4, %v14256_v46, %v14240_v34  ;;  %vm17032_vm3 = vmmov %vm17027_vm2 }
 0xadb   :  { %5611 = vrot.lane.b32.xlu0 %v14487_v10, %s10156_s29  ;;  %5607 = vrot.lane.b32.xlu1 %v5345_v58, %s10156_s29  ;;  %vm17034_vm4 = vmmov %vm17030_vm8 }
 0xadc   :  { %v5079_v38 = vpop.permute.xlu0 %5078  ;;  %v5075_v24 = vpop.permute.xlu1 %5074 }
 0xadd   :  { %v5089_v42 = vsel %vm17024_vm14, %v5077_v23, %v5079_v38  ;;  %v5090_v33 = vsel %vm17025_vm7, %v5079_v38, %v14481_v43  ;;  %v5088_v25 = vsel %vm17026_vm9, %v5075_v24, %v5077_v23  ;;  %v5551_v23 = vsel %vm5549_vm13, %v14250_v9, %v14264_v40  ;;  %vm17035_vm14 = vmmov %vm17033_vm1 }
 0xade   :  { %v5373_v14 = vsel %vm17027_vm2, %v5069_v47, %v5089_v42  ;;  %v14507_v58 = vsel %vm17028_vm5, %v5070_v44, %v5090_v33  ;;  %v5369_v0 = vsel %vm17029_vm10, %v5068_v36, %v5088_v25  ;;  %v5109_v47 = vsel %vm17030_vm8, %v14351_v19, %v14336_v51  ;;  %vm17036_vm7 = vmmov %vm17033_vm1 }
 0xadf   :  { %5623 = vrot.lane.b32.xlu0 %v5373_v14, %s10156_s29  ;;  %5774 = vmatprep.subr.bf16.mxu0 %v5373_v14  ;;  %v5552_v33 = vsel %vm5549_vm13, %v14264_v40, %v14258_v30  ;;  %v5108_v40 = vsel %vm17034_vm4, %v14359_v37, %v14351_v19  ;;  %vm5170_vm9 = vcmask 883712   ;;  %vm16227_vm2 = vcmask 588800   ;;  %vm17037_vm5 = vmmov %vm17033_vm1 }
 0xae0   :  { %5625 = vrot.lane.b32.xlu1 %v14507_v58, %s10156_s29  ;;  %v5117_v34 = vpop.permute.xlu0 %5116  ;;  %5775 = vmatpush1.bf16.msra.mxu0 %v5369_v0  ;;  %v5119_v46 = vpop.permute.xlu1 %5118  ;;  %vm17038_vm10 = vmmov %vm17033_vm1  ;;  %vm17043_vm4 = vcmask 1031168  }
 0xae1   :  { %v5130_v44 = vsel %vm5128_vm12, %v5117_v34, %v5119_v46  ;;  %vm17039_vm8 = vmmov %vm17033_vm1 }
 0xae2   :  { %v5564_v38 = vsel %vm17031_vm11, %v5551_v23, %v5130_v44  ;;  %v5397_v24 = vsel %vm17032_vm3, %v5109_v47, %v5130_v44  ;;  %v5550_v47 = vsel %vm5549_vm13, %v14266_v59, %v14250_v9  ;;  %v5152_v9 = vsel %vm5149_vm15, %v14274_v18, %v14286_v20  ;;  %vm17041_vm3 = vmmov %vm17033_vm1 }
 0xae3   :  { %5621 = vrot.lane.b32.xlu0 %v5369_v0, %s10156_s29  ;;  %5776 = vmatprep.subr.bf16.mxu0 %v5397_v24  ;;  %v5151_v24 = vsel %vm5149_vm15, %v14272_v27, %v14274_v18  ;;  %v5150_v59 = vsel %vm5149_vm15, %v14294_v28, %v14272_v27  ;;  %vm17040_vm11 = vcmask 1039360  }
 0xae4   :  { %5637 = vrot.lane.b32.xlu1 %v5564_v38, %s10156_s29  ;;  %v14524_v36 = vpop.permute.xlu0 %5120  ;;  %v5159_v42 = vpop.permute.xlu1 %5158 }
 0xae5   :  { %v14531_v25 = vsel %vm5128_vm12, %v5119_v46, %v14524_v36 }
 0xae6   :  { %v5566_v14 = vsel %vm17033_vm1, %v5552_v33, %v14531_v25  ;;  %v72_v33 = vld [vmem:[#allocation2 + $0x24] sm:$0xff]  ;;  %vm17042_vm1 = vmmov %vm17040_vm11 }
 0xae7   :  { %5639 = vrot.lane.b32.xlu0 %v5566_v14, %s10156_s29 }
 0xae8   :  { %v5115_v0 = vpop.permute.xlu0 %5114  ;;  %v14536_v23 = vpop.permute.xlu1 %5162 }
 0xae9   :  { %v5129_v46 = vsel %vm5128_vm12, %v5115_v0, %v5117_v34  ;;  %v71_v34 = vld [vmem:[#allocation2 + $0x4] sm:$0xff] }
 0xaea   :  { %v5562_v44 = vsel %vm17035_vm14, %v5550_v47, %v5129_v46  ;;  %v5393_v38 = vsel %vm17036_vm7, %v5108_v40, %v5129_v46  ;;  %v14561_v40 = vcombine.high %v71_v34, %v72_v33  ;;  %v14566_v28 = vcombine.low %v71_v34, %v72_v33  ;;  %vm17044_vm14 = vmmov %vm17043_vm4 }
 0xaeb   :  { %5635 = vrot.lane.b32.xlu0 %v5562_v44, %s10156_s29  ;;  %5777 = vmatpush1.bf16.msra.mxu0 %v5393_v38  ;;  %vm17045_vm7 = vcmask 1022976  }
 0xaec   :  { %v5161_v19 = vpop.permute.xlu0 %5160  ;;  %v5157_v37 = vpop.permute.xlu1 %5156  ;;  %8874 = vmatprep.mubr.msk.bf16.mxu0 %vm16227_vm2, %v14561_v40  ;;  %8876 = vmatprep.mubr.msk.bf16.mxu1 %vm16227_vm2, %v14561_v40 }
 0xaed   :  { %v5172_v14 = vsel %vm5170_vm9, %v5159_v42, %v5161_v19  ;;  %v5173_v0 = vsel %vm5170_vm9, %v5161_v19, %v14536_v23  ;;  %v5171_v47 = vsel %vm5170_vm9, %v5157_v37, %v5159_v42  ;;  %v5071_v19 = vsel %vm17043_vm4, %v14248_v7, %v14318_v29 }
 0xaee   :  { %v5421_v18 = vsel %vm17037_vm5, %v5151_v24, %v5172_v14  ;;  %v5425_v46 = vsel %vm17038_vm10, %v5152_v9, %v5173_v0  ;;  %v5417_v27 = vsel %vm17039_vm8, %v5150_v59, %v5171_v47  ;;  %vm17046_vm5 = vmmov %vm17045_vm7 }
 0xaef   :  { %5651 = vrot.lane.b32.xlu1 %v5421_v18, %s10156_s29  ;;  %5778 = vmatprep.subr.bf16.mxu0 %v5421_v18  ;;  %vm17047_vm10 = vmmov %vm17041_vm3 }
 0xaf0   :  { %5653 = vrot.lane.b32.xlu0 %v5425_v46, %s10156_s29  ;;  %v5043_v44 = vpop.permute.xlu0 %5042  ;;  %5779 = vmatpush1.bf16.msra.mxu0 %v5417_v27  ;;  %v14570_v38 = vpop.permute.xlu1 %5044  ;;  %vm17048_vm8 = vmmov %vm17041_vm3 }
 0xaf1   :  { %v5051_v42 = vsel %vm17040_vm11, %v14479_v2, %v5043_v44  ;;  %v5052_v9 = vsel %vm17042_vm1, %v5043_v44, %v14570_v38  ;;  %vm17049_vm11 = vmmov %vm17041_vm3 }
 0xaf2   :  { %v5357_v24 = vsel %vm17041_vm3, %v14102_v60, %v5051_v42  ;;  %v5072_v60 = vsel %vm17044_vm14, %v14318_v29, %v14304_v55  ;;  %vm17050_vm3 = vcmask 1014784   ;;  %vm17052_vm4 = vmmov %vm17048_vm8 }
 0xaf3   :  { %5815 = vmatprep.subr.bf16.mxu1 %v5357_v24  ;;  %5649 = vrot.lane.b32.xlu1 %v5417_v27, %s10156_s29  ;;  %vm17051_vm1 = vmmov %vm17050_vm3 }
 0xaf4   :  { %5613 = vrot.lane.b32.xlu0 %v5357_v24, %s10156_s29  ;;  %v5083_v59 = vpop.permute.xlu0 %5082  ;;  %5816 = vmatpush1.bf16.msra.mxu1 %v14487_v10  ;;  %v14585_v2 = vpop.permute.xlu1 %5084  ;;  %v14600_v10 = vsel %vm17048_vm8, %v14143_v49, %v5052_v9  ;;  %v5554_v49 = vsel %vm5549_vm13, %v14326_v56, %v14312_v61  ;;  %vm17053_vm14 = vmmov %vm17052_vm4  ;;  %v5154_v24 = vsel %vm5149_vm15, %v14334_v35, %v14320_v21 }
 0xaf5   :  { %v5091_v37 = vsel %vm17045_vm7, %v14481_v43, %v5083_v59  ;;  %v5092_v34 = vsel %vm17046_vm5, %v5083_v59, %v14585_v2  ;;  %v5111_v43 = vsel %vm17050_vm3, %v14383_v41, %v14353_v48  ;;  %vm17054_vm7 = vmmov %vm17052_vm4 }
 0xaf6   :  { %v5381_v33 = vsel %vm17047_vm10, %v5071_v19, %v5091_v37  ;;  %v14603_v14 = vsel %vm17049_vm11, %v5072_v60, %v5092_v34  ;;  %vm17055_vm5 = vmmov %vm17052_vm4  ;;  %vm5212_vm11 = vcmask 867328  }
 0xaf7   :  { %5817 = vmatprep.subr.bf16.mxu1 %v5381_v33  ;;  %5615 = vrot.lane.b32.xlu1 %v14600_v10, %s10156_s29  ;;  %vm17056_vm10 = vmmov %vm17052_vm4 }
 0xaf8   :  { %5629 = vrot.lane.b32.xlu0 %v14603_v14, %s10156_s29  ;;  %v5123_v7 = vpop.permute.xlu0 %5122  ;;  %5818 = vmatpush1.bf16.msra.mxu1 %v14507_v58  ;;  %v14610_v29 = vpop.permute.xlu1 %5124  ;;  %v5110_v58 = vsel %vm17051_vm1, %v14336_v51, %v14383_v41  ;;  %v5153_v41 = vsel %vm5149_vm15, %v14286_v20, %v14334_v35  ;;  %vm17057_vm8 = vmmov %vm17052_vm4 }
 0xaf9   :  { %v5132_v0 = vsel %vm5128_vm12, %v14524_v36, %v5123_v7  ;;  %v14622_v47 = vsel %vm5128_vm12, %v5123_v7, %v14610_v29  ;;  %v5401_v44 = vsel %vm17054_vm7, %v5110_v58, %v14531_v25  ;;  %v5553_v36 = vsel %vm5549_vm13, %v14258_v30, %v14326_v56  ;;  %vm17058_vm3 = vmmov %vm17052_vm4 }
 0xafa   :  { %v5405_v18 = vsel %vm17052_vm4, %v5111_v43, %v5132_v0  ;;  %v5570_v27 = vsel %vm17053_vm14, %v5554_v49, %v14622_v47  ;;  %v5568_v9 = vsel %vm17056_vm10, %v5553_v36, %v5132_v0  ;;  %vm17059_vm1 = vmmov %vm17058_vm3  ;;  %vm5253_vm4 = vcmask 744448  }
 0xafb   :  { %5819 = vmatprep.subr.bf16.mxu1 %v5405_v18  ;;  %5627 = vrot.lane.b32.xlu1 %v5381_v33, %s10156_s29  ;;  %vm17060_vm14 = vcmask 752640   ;;  %vm17061_vm7 = vmmov %vm17059_vm1  ;;  %vm5274_vm10 = vcmask 736256  }
 0xafc   :  { %5643 = vrot.lane.b32.xlu0 %v5570_v27, %s10156_s29  ;;  %v5165_v42 = vpop.permute.xlu0 %5164  ;;  %5820 = vmatpush1.bf16.msra.mxu1 %v5401_v44  ;;  %v14637_v51 = vpop.permute.xlu1 %5166  ;;  %v5234_v7 = vsel %vm17060_vm14, %v14367_v50, %v14345_v5 }
 0xafd   :  { %v5174_v25 = vsel %vm5170_vm9, %v14536_v23, %v5165_v42  ;;  %v5175_v30 = vsel %vm5170_vm9, %v5165_v42, %v14637_v51 }
 0xafe   :  { %v5429_v56 = vsel %vm17055_vm5, %v5153_v41, %v5174_v25  ;;  %v14652_v59 = vsel %vm17057_vm8, %v5154_v24, %v5175_v30  ;;  %vm17062_vm5 = vmmov %vm17060_vm14 }
 0xaff   :  { %5821 = vmatprep.subr.bf16.mxu1 %v5429_v56  ;;  %5641 = vrot.lane.b32.xlu1 %v5568_v9, %s10156_s29  ;;  %v5233_v58 = vsel %vm17062_vm5, %v14375_v22, %v14367_v50  ;;  %vm17063_vm8 = vmmov %vm17059_vm1  ;;  %v5275_v50 = vsel %vm5274_vm10, %v14369_v62, %v14391_v16  ;;  %v5276_v22 = vsel %vm5274_vm10, %v14391_v16, %v14361_v31  ;;  %vm5316_vm5 = vcmask 719872  }
 0xb00   :  { %5657 = vrot.lane.b32.xlu0 %v14652_v59, %s10156_s29  ;;  %v14657_v20 = vpop.permute.xlu0 %5202  ;;  %5822 = vmatpush1.bf16.msra.mxu1 %v5425_v46  ;;  %v5201_v35 = vpop.permute.xlu1 %5200  ;;  %vm17064_vm14 = vmmov %vm17059_vm1  ;;  %v5318_v30 = vsel %vm5316_vm5, %v14377_v26, %v14399_v13 }
 0xb01   :  { %v5214_v23 = vsel %vm5212_vm11, %v5201_v35, %v14657_v20 }
 0xb02   :  { %v5445_v19 = vsel %vm17058_vm3, %v14435_v4, %v5214_v23  ;;  %vm5295_vm3 = vcmask 728064  }
 0xb03   :  { %5655 = vrot.lane.b32.xlu1 %v5429_v56, %s10156_s29  ;;  %5780 = vmatprep.subr.bf16.mxu0 %v5445_v19 }
 0xb04   :  { %5251 = vrot.lane.b32.xlu0 %v14343_v1, %s10153_s10  ;;  %v5242_v60 = vpop.permute.xlu0 %5241  ;;  %v5199_v37 = vpop.permute.xlu1 %5198 }
 0xb05   :  { %v5213_v34 = vsel %vm5212_vm11, %v5199_v37, %v5201_v35 }
 0xb06   :  { %v5441_v46 = vsel %vm17059_vm1, %v14430_v32, %v5213_v34 }
 0xb07   :  { %5249 = vrot.lane.b32.xlu1 %v14284_v6, %s10153_s10  ;;  %5781 = vmatpush1.bf16.msra.mxu0 %v5441_v46  ;;  %v5317_v46 = vsel %vm5316_vm5, %v14393_v15, %v14377_v26  ;;  %v5555_v15 = vsel %vm5549_vm13, %v14312_v61, %v14407_v57 }
 0xb08   :  { %5272 = vrot.lane.b32.xlu0 %v14178_v52, %s10148_s26  ;;  %v5284_v4 = vpop.permute.xlu0 %5283  ;;  %v14673_v33 = vpop.permute.xlu1 %5243 }
 0xb09   :  { %v5255_v49 = vsel %vm5253_vm4, %v5242_v60, %v14673_v33 }
 0xb0a   :  { %v5469_v32 = vsel %vm17061_vm7, %v5234_v7, %v5255_v49  ;;  %vm5337_vm7 = vcmask 605184  }
 0xb0b   :  { %5270 = vrot.lane.b32.xlu1 %v14132_v12, %s10148_s26  ;;  %5782 = vmatprep.subr.bf16.mxu0 %v5469_v32 }
 0xb0c   :  { %5293 = vrot.lane.b32.xlu0 %v14343_v1, %s10154_s11  ;;  %v5047_v43 = vpop.permute.xlu0 %5046  ;;  %v5240_v0 = vpop.permute.xlu1 %5239 }
 0xb0d   :  { %v5254_v18 = vsel %vm5253_vm4, %v5240_v0, %v5242_v60 }
 0xb0e   :  { %v5465_v27 = vsel %vm17063_vm8, %v5233_v58, %v5254_v18  ;;  %vm17065_vm8 = vmmov %vm17059_vm1 }
 0xb0f   :  { %5291 = vrot.lane.b32.xlu1 %v14284_v6, %s10154_s11  ;;  %5783 = vmatpush1.bf16.msra.mxu0 %v5465_v27  ;;  %vm17068_vm2 = vmmov %vm17065_vm8 }
 0xb10   :  { %5314 = vrot.lane.b32.xlu0 %v14178_v52, %s10149_s28  ;;  %v5282_v44 = vpop.permute.xlu0 %5281  ;;  %v14694_v36 = vpop.permute.xlu1 %5285  ;;  %vm17069_vm0 = vmmov %vm17068_vm2 }
 0xb11   :  { %v5296_v42 = vsel %vm5295_vm3, %v5282_v44, %v5284_v4  ;;  %v5297_v41 = vsel %vm5295_vm3, %v5284_v4, %v14694_v36 }
 0xb12   :  { %v5493_v24 = vsel %vm17059_vm1, %v5276_v22, %v5297_v41  ;;  %v5489_v25 = vsel %vm17064_vm14, %v5275_v50, %v5296_v42  ;;  %vm17066_vm1 = vcmask 1039360   ;;  %vm17067_vm14 = vmmov %vm17065_vm8  ;;  %v5278_v22 = vsel %vm5274_vm10, %v14409_v17, %v14441_v39 }
 0xb13   :  { %5312 = vrot.lane.b32.xlu1 %v14132_v12, %s10149_s28  ;;  %5784 = vmatprep.subr.bf16.mxu0 %v5493_v24  ;;  %v5053_v35 = vsel %vm17066_vm1, %v14570_v38, %v5047_v43  ;;  %vm17071_vm1 = vcmask 1031168   ;;  %v17081_v24 = vld [vmem:[#allocation50_spill] sm:$0xff]  ;;  %s10163_s28 = smov 119  }
 0xb14   :  { %5335 = vrot.lane.b32.xlu0 %v14343_v1, %s10155_s12  ;;  %v14711_v62 = vpop.permute.xlu0 %5327  ;;  %5785 = vmatpush1.bf16.msra.mxu0 %v5489_v25  ;;  %v5326_v16 = vpop.permute.xlu1 %5325  ;;  %v5557_v1 = vsel %vm17067_vm14, %v14178_v52, %v5047_v43  ;;  %v14730_v37 = vsel %vm17069_vm0, %v14132_v12, %v5053_v35  ;;  %v5073_v34 = vsel %vm17071_vm1, %v14304_v55, %v14385_v8  ;;  %vm17073_vm14 = vmmov %vm17069_vm0 }
 0xb15   :  { %v5339_v56 = vsel %vm5337_vm7, %v5326_v16, %v14711_v62  ;;  %vm17075_vm1 = vmmov %vm17069_vm0 }
 0xb16   :  { %v5517_v9 = vsel %vm17065_vm8, %v5318_v30, %v5339_v56  ;;  %vm17070_vm8 = vcmask 1022976   ;;  %v17085_v56 = vld [vmem:[#allocation23_spill] sm:$0xff] }
 0xb17   :  { %5333 = vrot.lane.b32.xlu1 %v14284_v6, %s10155_s12  ;;  %5786 = vmatprep.subr.bf16.mxu0 %v5517_v9  ;;  %v17086_v9 = vld [vmem:[#allocation26_spill] sm:$0xff] }
 0xb18   :  { %5619 = vrot.lane.b32.xlu0 %v5557_v1, %s10156_s29  ;;  %v5087_v23 = vpop.permute.xlu0 %5086  ;;  %v5205_v19 = vpop.permute.xlu1 %5204  ;;  %v5320_v35 = vsel %vm5316_vm5, %v17085_v56, %v17086_v9 }
 0xb19   :  { %v5560_v60 = vsel %vm17068_vm2, %v14385_v8, %v5087_v23  ;;  %v5093_v38 = vsel %vm17070_vm8, %v14585_v2, %v5087_v23  ;;  %vm17072_vm2 = vmmov %vm17069_vm0  ;;  %v5215_v55 = vsel %vm5212_vm11, %v14657_v20, %v5205_v19 }
 0xb1a   :  { %v14747_v4 = vsel %vm17072_vm2, %v5073_v34, %v5093_v38  ;;  %vm17074_vm8 = vmmov %vm17069_vm0  ;;  %v5449_v20 = vsel %vm17069_vm0, %v14452_v45, %v5215_v55  ;;  %vm17076_vm2 = vcmask 752640   ;;  %v17089_v38 = vld [vmem:[#allocation34_spill] sm:$0xff] }
 0xb1b   :  { %5617 = vrot.lane.b32.xlu1 %v14730_v37, %s10156_s29  ;;  %v5235_v0 = vsel %vm17076_vm2, %v14345_v5, %v14415_v11  ;;  %vm17077_vm13 = vmmov %vm17076_vm2  ;;  %vm17082_vm2 = vcmask 875520  }
 0xb1c   :  { %5633 = vrot.lane.b32.xlu0 %v5560_v60, %s10156_s29  ;;  %v5324_v52 = vpop.permute.xlu0 %5323  ;;  %v5127_v6 = vpop.permute.xlu1 %5126  ;;  %v5236_v61 = vsel %vm17077_vm13, %v14415_v11, %v14401_v53  ;;  %v10157_v11 = vmov 1   ;;  %v5197_v25 = vsel %vm17082_vm2, %v14328_v3, %v17081_v24  ;;  %vm17083_vm13 = vmmov %vm17069_vm0  ;;  %v5319_v3 = vsel %vm5316_vm5, %v14399_v13, %v17085_v56 }
 0xb1d   :  { %v5338_v12 = vsel %vm5337_vm7, %v5324_v52, %v5326_v16  ;;  %v5575_v2 = vsel %vm17069_vm0, %v14407_v57, %v5127_v6  ;;  %v14752_v49 = vsel %vm5128_vm12, %v14610_v29, %v5127_v6  ;;  %v5155_v57 = vsel %vm5149_vm15, %v14320_v21, %v14423_v63  ;;  %9682 = vset.pattern.permute.xlu1 %v10157_v11 }
 0xb1e   :  { %v5513_v7 = vsel %vm17073_vm14, %v5317_v46, %v5338_v12  ;;  %v5572_v43 = vsel %vm17075_vm1, %v5555_v15, %v14752_v49  ;;  %vm17078_vm14 = vmmov %vm17069_vm0  ;;  %9683 = vset.pattern.permute.xlu0 %v10157_v11  ;;  %vm5677_vm2 = vcmask 596992  }
 0xb1f   :  { %5631 = vrot.lane.b32.xlu1 %v14747_v4, %s10156_s29  ;;  %5787 = vmatpush1.bf16.msra.mxu0 %v5513_v7  ;;  %vm17080_vm1 = vmmov %vm17069_vm0 }
 0xb20   :  { %5647 = vrot.lane.b32.xlu0 %v5575_v2, %s10156_s29  ;;  %v14759_v26 = vpop.permute.xlu0 %5206  ;;  %v14761_v8 = vpop.permute.xlu1 %5247 }
 0xb21   :  { %v5216_v29 = vsel %vm5212_vm11, %v5205_v19, %v14759_v26 }
 0xb22   :  { %v5453_v32 = vsel %vm17074_vm8, %v14447_v54, %v5216_v29  ;;  %vm17079_vm8 = vmmov %vm17069_vm0 }
 0xb23   :  { %5823 = vmatprep.subr.bf16.mxu1 %v5453_v32  ;;  %5645 = vrot.lane.b32.xlu1 %v5572_v43, %s10156_s29 }
 0xb24   :  { %v5246_v54 = vpop.permute.xlu0 %5245  ;;  %5824 = vmatpush1.bf16.msra.mxu1 %v5449_v20  ;;  %v5169_v58 = vpop.permute.xlu1 %5168 }
 0xb25   :  { %v5256_v18 = vsel %vm5253_vm4, %v14673_v33, %v5246_v54  ;;  %v5257_v45 = vsel %vm5253_vm4, %v5246_v54, %v14761_v8  ;;  %v5176_v5 = vsel %vm5170_vm9, %v14637_v51, %v5169_v58  ;;  %v5578_v27 = vsel %vm17078_vm14, %v14423_v63, %v5169_v58  ;;  %vm17084_vm14 = vmmov %vm17069_vm0 }
 0xb26   :  { %5661 = vrot.lane.b32.xlu0 %v5578_v27, %s10156_s29  ;;  %v5477_v21 = vsel %vm17079_vm8, %v5236_v61, %v5257_v45  ;;  %v14795_v44 = vsel %vm17080_vm1, %v5155_v57, %v5176_v5  ;;  %v5473_v33 = vsel %vm17069_vm0, %v5235_v0, %v5256_v18  ;;  %v5277_v63 = vsel %vm5274_vm10, %v14361_v31, %v14409_v17  ;;  %v14823_v17 = vld [vmem:[%s15965_s2 + $0x8] sm:$0xff]  ;;  %vm17087_vm8 = vmmov %vm17069_vm0 }
 0xb27   :  { %5825 = vmatprep.subr.bf16.mxu1 %v5477_v21  ;;  %5659 = vrot.lane.b32.xlu1 %v14795_v44, %s10156_s29  ;;  %vm17088_vm1 = vmmov %vm17069_vm0 }
 0xb28   :  { %v14800_v50 = vpop.permute.xlu0 %5289  ;;  %5826 = vmatpush1.bf16.msra.mxu1 %v5473_v33  ;;  %v5288_v51 = vpop.permute.xlu1 %5287 }
 0xb29   :  { %v5298_v42 = vsel %vm5295_vm3, %v14694_v36, %v5288_v51  ;;  %v5299_v41 = vsel %vm5295_vm3, %v5288_v51, %v14800_v50 }
 0xb2a   :  { %5675 = vrot.lane.b32.xlu0 %v17081_v24, %s10156_s29  ;;  %v5501_v16 = vsel %vm17083_vm13, %v5278_v22, %v5299_v41  ;;  %v5497_v31 = vsel %vm17084_vm14, %v5277_v63, %v5298_v42  ;;  %vm17090_vm13 = vmmov %vm17069_vm0 }
 0xb2b   :  { %5673 = vrot.lane.b32.xlu1 %v5197_v25, %s10156_s29  ;;  %5827 = vmatprep.subr.bf16.mxu1 %v5501_v16  ;;  %vm17091_vm14 = vmmov %vm17069_vm0 }
 0xb2c   :  { %v14825_v36 = vpop.permute.xlu0 %5331  ;;  %5828 = vmatpush1.bf16.msra.mxu1 %v5497_v31  ;;  %v5330_v30 = vpop.permute.xlu1 %5329 }
 0xb2d   :  { %v5340_v1 = vsel %vm5337_vm7, %v14711_v62, %v5330_v30  ;;  %v5341_v23 = vsel %vm5337_vm7, %v5330_v30, %v14825_v36 }
 0xb2e   :  { %v5525_v19 = vsel %vm17087_vm8, %v5320_v35, %v5341_v23  ;;  %v5521_v60 = vsel %vm17088_vm1, %v5319_v3, %v5340_v1  ;;  %5738 = vperm.xlu0 %9683, %v14823_v17   ;;  %vm17092_vm8 = vcmask 588800   ;;  %vm17095_vm1 = vcmask 1014784  }
 0xb2f   :  { %5829 = vmatprep.subr.bf16.mxu1 %v5525_v19  ;;  %5733 = vperm.xlu1 %9682, %v17089_v38   ;;  %v17094_v19 = vld [vmem:[#allocation25_spill] sm:$0xff] }
 0xb30   :  { %v5211_v13 = vpop.permute.xlu0 %5210  ;;  %5830 = vmatpush1.bf16.msra.mxu1 %v5521_v60  ;;  %v14841_v52 = vpop.permute.xlu1 %5208 }
 0xb31   :  { %v5218_v6 = vsel %vm5212_vm11, %v14841_v52, %v5211_v13 }
 0xb32   :  { %v14846_v62 = vsel %vm17069_vm0, %v5197_v25, %v5218_v6 }
 0xb34   :  { %v5664_v34 = vpop.permute.xlu0 %5663  ;;  %v5666_v46 = vpop.permute.xlu1 %5665 }
 0xb35   :  { %v5702_v42 = vsel %vm5677_vm2, %v5664_v34, %v5666_v46 }
 0xb36   :  { %v5755_v16 = vsel %vm17091_vm14, %v5702_v42, 0  ;;  %vm17097_vm14 = vmmov %vm17069_vm0 }
 0xb38   :  { %v14848_v12 = vpop.permute.xlu0 %5667  ;;  %v14850_v2 = vpop.permute.xlu1 %5669 }
 0xb39   :  { %v5703_v41 = vsel %vm5677_vm2, %v5666_v46, %v14848_v12 }
 0xb3c   :  { %v14852_v7 = vpop.permute.xlu0 %5671 }
 0xb49   :  { %v5610_v55 = vpop.permute.xlu1 %5609 }
 0xb4d   :  { %v5612_v15 = vpop.permute.xlu0 %5611  ;;  %v5608_v29 = vpop.permute.xlu1 %5607 }
 0xb4e   :  { %v5678_v32 = vsel %vm5677_vm2, %v5608_v29, %v5610_v55  ;;  %v5679_v43 = vsel %vm5677_vm2, %v5610_v55, %v5612_v15 }
 0xb4f   :  { %5788 = vmatprep.subr.bf16.mxu0 %v5679_v43  ;;  %v17100_v43 = vld [vmem:[#allocation59_spill] sm:$0xff] }
 0xb50   :  { %5789 = vmatpush1.bf16.msra.mxu0 %v5678_v32 }
 0xb51   :  { %v5624_v20 = vpop.permute.xlu0 %5623 }
 0xb52   :  { %v5626_v0 = vpop.permute.xlu1 %5625 }
 0xb53   :  { %v5685_v61 = vsel %vm5677_vm2, %v5624_v20, %v5626_v0 }
 0xb54   :  { %5790 = vmatprep.subr.bf16.mxu0 %v5685_v61  ;;  %v17103_v61 = vld [vmem:[#allocation57_spill] sm:$0xff] }
 0xb55   :  { %v5622_v57 = vpop.permute.xlu0 %5621 }
 0xb56   :  { %v5684_v54 = vsel %vm5677_vm2, %v5622_v57, %v5624_v20  ;;  %v5638_v58 = vpop.permute.xlu1 %5637 }
 0xb57   :  { %5791 = vmatpush1.bf16.msra.mxu0 %v5684_v54 }
 0xb59   :  { %v5640_v18 = vpop.permute.xlu0 %5639 }
 0xb5a   :  { %v5691_v45 = vsel %vm5677_vm2, %v5638_v58, %v5640_v18 }
 0xb5b   :  { %5792 = vmatprep.subr.bf16.mxu0 %v5691_v45 }
 0xb5d   :  { %v5636_v5 = vpop.permute.xlu0 %5635 }
 0xb5e   :  { %v5690_v27 = vsel %vm5677_vm2, %v5636_v5, %v5638_v58 }
 0xb5f   :  { %5793 = vmatpush1.bf16.msra.mxu0 %v5690_v27 }
 0xb61   :  { %v5652_v11 = vpop.permute.xlu1 %5651 }
 0xb62   :  { %v5654_v21 = vpop.permute.xlu0 %5653 }
 0xb63   :  { %v5697_v33 = vsel %vm5677_vm2, %v5652_v11, %v5654_v21 }
 0xb64   :  { %5794 = vmatprep.subr.bf16.mxu0 %v5697_v33 }
 0xb65   :  { %v5650_v51 = vpop.permute.xlu1 %5649 }
 0xb66   :  { %v5614_v63 = vpop.permute.xlu0 %5613  ;;  %v5696_v22 = vsel %vm5677_vm2, %v5650_v51, %v5652_v11 }
 0xb67   :  { %5795 = vmatpush1.bf16.msra.mxu0 %v5696_v22  ;;  %v5680_v30 = vsel %vm5677_vm2, %v5612_v15, %v5614_v63 }
 0xb68   :  { %8873 = vmatprep.subr.msk.bf16.mxu0 %vm17090_vm13, %v5703_v41  ;;  %vm17096_vm13 = vmmov %vm17095_vm1 }
 0xb69   :  { %v14866_v24 = vpop.permute.xlu1 %5615 }
 0xb6a   :  { %v14868_v25 = vpop.permute.xlu0 %5629  ;;  %v5681_v31 = vsel %vm5677_vm2, %v5614_v63, %v14866_v24 }
 0xb6b   :  { %5797 = vmatpush1.bf16.msra.mxu0 %v5755_v16  ;;  %5831 = vmatprep.subr.bf16.mxu1 %v5681_v31 }
 0xb6c   :  { %5832 = vmatpush1.bf16.msra.mxu1 %v5680_v30  ;;  %5858 = vmatprep.subr.bf16.mxu0 %v14730_v37  ;;  %v17093_v37 = vld [vmem:[#allocation27_spill] sm:$0xff] }
 0xb6d   :  { %v5628_v56 = vpop.permute.xlu1 %5627  ;;  %v5113_v60 = vsel %vm17095_vm1, %v17094_v19, %v17093_v37  ;;  %vm17099_vm1 = vmmov %vm17069_vm0 }
 0xb6e   :  { %v14875_v3 = vpop.permute.xlu0 %5643  ;;  %5805 = vmatmul.mubr.bf16.vlgmr.msra.gmra.mrb[32].mxu0 %v14566_v28  ;;  %v5687_v35 = vsel %vm5677_vm2, %v5628_v56, %v14868_v25  ;;  %v5686_v1 = vsel %vm5677_vm2, %v5626_v0, %v5628_v56 }
 0xb6f   :  { %5833 = vmatprep.subr.bf16.mxu1 %v5687_v35  ;;  %5859 = vmatpush1.bf16.msra.mxu0 %v14600_v10  ;;  %v5413_v10 = vsel %vm17069_vm0, %v5113_v60, %v14752_v49 }
 0xb70   :  { %5834 = vmatpush1.bf16.msra.mxu1 %v5686_v1  ;;  %5860 = vmatprep.subr.bf16.mxu0 %v14747_v4 }
 0xb71   :  { %v5642_v23 = vpop.permute.xlu1 %5641  ;;  %8878 = vmatprep.mubr.msk.bf16.mxu0 %vm17092_vm8, %v14561_v40  ;;  %v5112_v40 = vsel %vm17096_vm13, %v14353_v48, %v17094_v19  ;;  %v5705_v48 = vsel %vm5677_vm2, %v14850_v2, %v14852_v7  ;;  %vm17098_vm8 = vmmov %vm17069_vm0  ;;  %vm17102_vm0 = vcmask 752640  }
 0xb72   :  { %v14888_v38 = vpop.permute.xlu0 %5657  ;;  %v5693_v13 = vsel %vm5677_vm2, %v5642_v23, %v14875_v3  ;;  %v5692_v6 = vsel %vm5677_vm2, %v5640_v18, %v5642_v23  ;;  %v5409_v55 = vsel %vm17097_vm14, %v5112_v40, %v14622_v47  ;;  %v5217_v47 = vsel %vm5212_vm11, %v14759_v26, %v14841_v52  ;;  %vm17104_vm13 = vmmov %vm17099_vm1 }
 0xb73   :  { %5835 = vmatprep.subr.bf16.mxu1 %v5693_v13  ;;  %5861 = vmatpush1.bf16.msra.mxu0 %v14603_v14  ;;  %v5704_v14 = vsel %vm5677_vm2, %v14848_v12, %v14850_v2  ;;  %v17101_v2 = vld [vmem:[#allocation54_spill] sm:$0xff]  ;;  %v5457_v57 = vsel %vm17104_vm13, %v17103_v61, %v5217_v47  ;;  %vm17105_vm11 = vmmov %vm17099_vm1 }
 0xb74   :  { %5836 = vmatpush1.bf16.msra.mxu1 %v5692_v6  ;;  %5862 = vmatprep.subr.bf16.mxu0 %v5413_v10  ;;  %v5761_v32 = vsel %vm17099_vm1, %v5704_v14, 0  ;;  %v5238_v20 = vsel %vm17102_vm0, %v17101_v2, %v17100_v43  ;;  %vm17106_vm14 = vmmov %vm17102_vm0 }
 0xb75   :  { %v5656_v4 = vpop.permute.xlu1 %5655  ;;  %v5237_v52 = vsel %vm17106_vm14, %v14401_v53, %v17101_v2  ;;  %vm17108_vm0 = vmmov %vm17099_vm1  ;;  %vm6212_vm14 = vcmask 130048  }
 0xb76   :  { %v5252_v34 = vpop.permute.xlu0 %5251  ;;  %v5699_v46 = vsel %vm5677_vm2, %v5656_v4, %v14888_v38  ;;  %v5698_v15 = vsel %vm5677_vm2, %v5654_v21, %v5656_v4  ;;  %vm17110_vm13 = vmmov %vm17108_vm0 }
 0xb77   :  { %5837 = vmatprep.subr.bf16.mxu1 %v5699_v46  ;;  %5863 = vmatpush1.bf16.msra.mxu0 %v5409_v55 }
 0xb78   :  { %5838 = vmatpush1.bf16.msra.mxu1 %v5698_v15  ;;  %5864 = vmatprep.subr.bf16.mxu0 %v14795_v44 }
 0xb79   :  { %8875 = vmatprep.subr.msk.bf16.mxu1 %vm17098_vm8, %v5705_v48  ;;  %v5250_v49 = vpop.permute.xlu1 %5249  ;;  %vm17107_vm8 = vmmov %vm17099_vm1 }
 0xb7a   :  { %v5273_v29 = vpop.permute.xlu0 %5272  ;;  %v5259_v12 = vsel %vm5253_vm4, %v5250_v49, %v5252_v34  ;;  %v5258_v26 = vsel %vm5253_vm4, %v14761_v8, %v5250_v49 }
 0xb7b   :  { %5865 = vmatpush1.bf16.msra.mxu0 %v14652_v59  ;;  %v5485_v59 = vsel %vm17105_vm11, %v5238_v20, %v5259_v12  ;;  %v5481_v45 = vsel %vm17107_vm8, %v5237_v52, %v5258_v26  ;;  %v17114_v20 = vld [vmem:[#allocation49_spill] sm:$0xff]  ;;  %vm17116_vm8 = vcmask 1039360  }
 0xb7c   :  { %5840 = vmatpush1.bf16.msra.mxu1 %v5761_v32  ;;  %5866 = vmatprep.subr.bf16.mxu0 %v14846_v62 }
 0xb7d   :  { %v5271_v44 = vpop.permute.xlu1 %5270 }
 0xb7e   :  { %v5294_v0 = vpop.permute.xlu0 %5293  ;;  %v5280_v54 = vsel %vm5274_vm10, %v5271_v44, %v5273_v29  ;;  %v5279_v27 = vsel %vm5274_vm10, %v14441_v39, %v5271_v44  ;;  %v17113_v44 = vld [vmem:[#allocation47_spill] sm:$0xff] }
 0xb7f   :  { %5848 = vmatmul.mubr.bf16.vlgmr.msra.gmra.mrb[40].mxu1 %v14566_v28  ;;  %5867 = vmatpush1.bf16.msra.mxu0 %v5457_v57 }
 0xb80   :  { %5868 = vmatprep.subr.bf16.mxu0 %v5485_v59 }
 0xb81   :  { %v5292_v62 = vpop.permute.xlu1 %5291 }
 0xb82   :  { %v5315_v58 = vpop.permute.xlu0 %5314  ;;  %v5301_v18 = vsel %vm5295_vm3, %v5292_v62, %v5294_v0  ;;  %v5300_v8 = vsel %vm5295_vm3, %v14800_v50, %v5292_v62  ;;  %vm17109_vm3 = vmmov %vm17108_vm0 }
 0xb83   :  { %5869 = vmatpush1.bf16.msra.mxu0 %v5481_v45  ;;  %v5509_v5 = vsel %vm17099_vm1, %v5280_v54, %v5301_v18  ;;  %v5505_v21 = vsel %vm17108_vm0, %v5279_v27, %v5300_v8  ;;  %vm17117_vm1 = vmmov %vm17116_vm8 }
 0xb84   :  { %5870 = vmatprep.subr.bf16.mxu0 %v5509_v5 }
 0xb85   :  { %v5313_v11 = vpop.permute.xlu1 %5312 }
 0xb86   :  { %v5336_v53 = vpop.permute.xlu0 %5335  ;;  %v5321_v51 = vsel %vm5316_vm5, %v17086_v9, %v5313_v11  ;;  %v5322_v63 = vsel %vm5316_vm5, %v5313_v11, %v5315_v58  ;;  %vm17112_vm5 = vmmov %vm17108_vm0 }
 0xb87   :  { %5871 = vmatpush1.bf16.msra.mxu0 %v5505_v21  ;;  %v17115_v21 = vld [vmem:[#allocation20_spill] sm:$0xff] }
 0xb89   :  { %v5334_v33 = vpop.permute.xlu1 %5333 }
 0xb8a   :  { %v5620_v22 = vpop.permute.xlu0 %5619  ;;  %v5342_v50 = vsel %vm5337_vm7, %v14825_v36, %v5334_v33  ;;  %v5343_v42 = vsel %vm5337_vm7, %v5334_v33, %v5336_v53  ;;  %vm17111_vm7 = vmmov %vm17108_vm0  ;;  %vm17118_vm0 = vcmask 1031168  }
 0xb8b   :  { %v5533_v41 = vsel %vm17109_vm3, %v5322_v63, %v5343_v42  ;;  %v5529_v39 = vsel %vm17110_vm13, %v5321_v51, %v5342_v50  ;;  %vm17119_vm3 = vmmov %vm17118_vm0  ;;  %vm17120_vm13 = vcmask 752640  }
 0xb8c   :  { %5872 = vmatprep.subr.bf16.mxu0 %v5533_v41 }
 0xb8d   :  { %5873 = vmatpush1.bf16.msra.mxu0 %v5529_v39  ;;  %v5618_v16 = vpop.permute.xlu1 %5617 }
 0xb8e   :  { %v5634_v31 = vpop.permute.xlu0 %5633  ;;  %v5683_v30 = vsel %vm5677_vm2, %v5618_v16, %v5620_v22  ;;  %v5682_v9 = vsel %vm5677_vm2, %v14866_v24, %v5618_v16 }
 0xb8f   :  { %5874 = vmatprep.subr.bf16.mxu0 %v5683_v30 }
 0xb91   :  { %5875 = vmatpush1.bf16.msra.mxu0 %v5682_v9  ;;  %v5632_v56 = vpop.permute.xlu1 %5631 }
 0xb92   :  { %v5689_v36 = vsel %vm5677_vm2, %v5632_v56, %v5634_v31  ;;  %v5648_v35 = vpop.permute.xlu0 %5647  ;;  %v5688_v1 = vsel %vm5677_vm2, %v14868_v25, %v5632_v56 }
 0xb93   :  { %5876 = vmatprep.subr.bf16.mxu0 %v5689_v36 }
 0xb95   :  { %5877 = vmatpush1.bf16.msra.mxu0 %v5688_v1  ;;  %v5646_v23 = vpop.permute.xlu1 %5645 }
 0xb96   :  { %v5695_v37 = vsel %vm5677_vm2, %v5646_v23, %v5648_v35  ;;  %v5694_v60 = vsel %vm5677_vm2, %v14875_v3, %v5646_v23 }
 0xb97   :  { %5878 = vmatprep.subr.bf16.mxu0 %v5695_v37 }
 0xb98   :  { %v5662_v19 = vpop.permute.xlu0 %5661 }
 0xb99   :  { %5879 = vmatpush1.bf16.msra.mxu0 %v5694_v60  ;;  %v5660_v24 = vpop.permute.xlu1 %5659 }
 0xb9a   :  { %v5701_v13 = vsel %vm5677_vm2, %v5660_v24, %v5662_v19  ;;  %v5700_v10 = vsel %vm5677_vm2, %v14888_v38, %v5660_v24 }
 0xb9b   :  { %5880 = vmatprep.subr.bf16.mxu0 %v5701_v13 }
 0xb9c   :  { %v5676_v6 = vpop.permute.xlu0 %5675 }
 0xb9d   :  { %5881 = vmatpush1.bf16.msra.mxu0 %v5700_v10  ;;  %v5674_v25 = vpop.permute.xlu1 %5673 }
 0xb9e   :  { %v5706_v40 = vsel %vm5677_vm2, %v14852_v7, %v5674_v25  ;;  %v5707_v4 = vsel %vm5677_vm2, %v5674_v25, %v5676_v6  ;;  %vm5949_vm2 = vcmask 154624  }
 0xb9f   :  { %8877 = vmatprep.subr.msk.bf16.mxu0 %vm17111_vm7, %v5707_v4  ;;  %v5767_v3 = vsel %vm17112_vm5, %v5706_v40, 0  ;;  %vm8883_vm11 = vmneg %vm5949_vm2 }
 0xba0   :  { %vm17121_vm7 = vmmov %vm17120_vm13 }
 0xba1   :  { %5883 = vmatpush1.bf16.msra.mxu0 %v5767_v3  ;;  %vm17122_vm5 = vmmov %vm17117_vm1 }
 0xba4   :  { %5891 = vmatmul.mubr.bf16.vlgmr.msra.gmra.mrb[36].mxu0 %v14566_v28 }
 0xbad   :  { %v5739_v55 = vpop.permute.xlu0 %5738 }
 0xbae   :  { %v5734_v34 = vpop.permute.xlu1 %5733 }
 0xc41   :  { %v5806_v46 = vpop.f32.mrb[32].mxu0 }
 0xc42   :  { %v5808_v15 = vpop.f32.mrb[33].mxu0  ;;  %v5807_v14 = vadd.f32 %v5806_v46, %v5734_v34 }
 0xc43   :  { %v5810_v38 = vpop.f32.mrb[34].mxu0  ;;  %v5809_v48 = vadd.f32 %v5808_v15, %v5734_v34  ;;  %v75_v15 = vld [vmem:[#allocation2 + $0x2c] sm:$0xff] }
 0xc44   :  { %v5811_v49 = vadd.f32 %v5810_v38, %v5739_v55  ;;  %v5812_v29 = vpop.f32.mrb[35].mxu0  ;;  %v5901_v47 = vmax.f32 %v5807_v14, 0.0 }
 0xc45   :  { %v5813_v7 = vadd.f32 %v5812_v29, %v5739_v55  ;;  %v5902_v32 = vmax.f32 %v5809_v48, 0.0 }
 0xc46   :  { %v5907_v12 = vmax.f32 %v5811_v49, 0.0  ;;  %v5913_v43 = vmul.f32 %v5901_v47, %v17113_v44 }
 0xc47   :  { %v5908_v2 = vmax.f32 %v5813_v7, 0.0  ;;  %v5914_v0 = vmul.f32 %v5902_v32, %v17114_v20 }
 0xc48   :  { %v5919_v28 = vmul.f32 %v5907_v12, %v17113_v44 }
 0xc49   :  { %v5920_v61 = vmul.f32 %v5908_v2, %v17114_v20  ;;  %v10159_v2 = vmov 2  }
 0xc4a   :  { %v5925_v57 = vpack.c.bf16 %v5919_v28, %v5913_v43  ;;  %9684 = vset.pattern.permute.xlu0 %v10159_v2  ;;  %9685 = vset.pattern.permute.xlu1 %v10159_v2 }
 0xc4b   :  { %v5926_v26 = vpack.c.bf16 %v5920_v61, %v5914_v0  ;;  %v79_v0 = vld [vmem:[%s15965_s2 + $0x18] sm:$0xff] }
 0xc4c   :  { %5937 = vrot.lane.b32.xlu1 %v5925_v57, %s10158_s1  ;;  %v78_v57 = vld [vmem:[%s15965_s2 + $0x10] sm:$0xff] }
 0xc50   :  { %5939 = vrot.lane.b32.xlu1 %v5926_v26, %s10158_s1 }
 0xc52   :  { %v5849_v59 = vpop.f32.mrb[40].mxu1 }
 0xc53   :  { %v5850_v52 = vadd.f32 %v5849_v59, %v5734_v34  ;;  %v5851_v62 = vpop.f32.mrb[41].mxu1 }
 0xc54   :  { %v5852_v54 = vadd.f32 %v5851_v62, %v5734_v34  ;;  %v5853_v58 = vpop.f32.mrb[42].mxu1 }
 0xc55   :  { %v5903_v18 = vmax.f32 %v5850_v52, 0.0  ;;  %v5854_v45 = vadd.f32 %v5853_v58, %v5739_v55  ;;  %v5855_v8 = vpop.f32.mrb[43].mxu1 }
 0xc56   :  { %v5904_v5 = vmax.f32 %v5852_v54, 0.0  ;;  %v5856_v27 = vadd.f32 %v5855_v8, %v5739_v55 }
 0xc57   :  { %v5909_v11 = vmax.f32 %v5854_v45, 0.0  ;;  %v5915_v33 = vmul.f32 %v5903_v18, %v17115_v21 }
 0xc58   :  { %v5910_v53 = vmax.f32 %v5856_v27, 0.0  ;;  %v5916_v63 = vmul.f32 %v5904_v5, %v17113_v44 }
 0xc59   :  { %v5921_v51 = vmul.f32 %v5909_v11, %v17115_v21 }
 0xc5a   :  { %v5922_v22 = vmul.f32 %v5910_v53, %v17113_v44 }
 0xc5b   :  { %v5927_v50 = vpack.c.bf16 %v5921_v51, %v5915_v33 }
 0xc5c   :  { %v5928_v42 = vpack.c.bf16 %v5922_v22, %v5916_v63 }
 0xc5d   :  { %5941 = vrot.lane.b32.xlu0 %v5927_v50, %s10158_s1 }
 0xc5e   :  { %5943 = vrot.lane.b32.xlu1 %v5928_v42, %s10158_s1 }
 0xc77   :  { %v5892_v41 = vpop.f32.mrb[36].mxu0 }
 0xc78   :  { %v5893_v39 = vadd.f32 %v5892_v41, %v5734_v34  ;;  %v5894_v16 = vpop.f32.mrb[37].mxu0 }
 0xc79   :  { %v5895_v31 = vadd.f32 %v5894_v16, %v5734_v34  ;;  %v5896_v30 = vpop.f32.mrb[38].mxu0 }
 0xc7a   :  { %v5905_v9 = vmax.f32 %v5893_v39, 0.0  ;;  %v5897_v56 = vadd.f32 %v5896_v30, %v5739_v55  ;;  %v5898_v36 = vpop.f32.mrb[39].mxu0 }
 0xc7b   :  { %v5906_v35 = vmax.f32 %v5895_v31, 0.0  ;;  %v5899_v1 = vadd.f32 %v5898_v36, %v5739_v55  ;;  %v74_v55 = vld [vmem:[#allocation2 + $0xc] sm:$0xff] }
 0xc7c   :  { %v5911_v23 = vmax.f32 %v5897_v56, 0.0  ;;  %v5917_v19 = vmul.f32 %v5905_v9, %v17114_v20  ;;  %v15015_v14 = vcombine.high %v74_v55, %v75_v15  ;;  %v15020_v38 = vcombine.low %v74_v55, %v75_v15 }
 0xc7d   :  { %v5912_v37 = vmax.f32 %v5899_v1, 0.0  ;;  %v5918_v24 = vmul.f32 %v5906_v35, %v17115_v21 }
 0xc7e   :  { %v5923_v60 = vmul.f32 %v5911_v23, %v17114_v20  ;;  %8885 = vmatprep.mubr.msk.bf16.mxu1 %vm6212_vm14, %v15015_v14  ;;  %8889 = vmatprep.mubr.msk.bf16.mxu0 %vm6212_vm14, %v15015_v14  ;;  %v10014_v20 = vld [vmem:[%s15965_s2] sm:$0xff] }
 0xc7f   :  { %v5924_v13 = vmul.f32 %v5912_v37, %v17115_v21 }
 0xc80   :  { %v5929_v6 = vpack.c.bf16 %v5923_v60, %v5917_v19  ;;  %v76_v60 = vld [vmem:[#allocation2 + $0x4c] sm:$0xff] }
 0xc81   :  { %v5930_v10 = vpack.c.bf16 %v5924_v13, %v5918_v24  ;;  %v77_v24 = vld [vmem:[#allocation2 + $0x6c] sm:$0xff] }
 0xc82   :  { %5945 = vrot.lane.b32.xlu0 %v5929_v6, %s10158_s1 }
 0xc83   :  { %5947 = vrot.lane.b32.xlu1 %v5930_v10, %s10158_s1 }
 0xcbe   :  { %v5938_v25 = vpop.permute.xlu1 %5937 }
 0xcbf   :  { %v5962_v40 = vsel %vm5949_vm2, 0, %v5938_v25 }
 0xcc0   :  { %5994 = vrot.lane.b32.xlu1 %v5962_v40, %s10124_s23  ;;  %5968 = vrot.lane.b32.xlu0 %v5962_v40, %s10123_s22 }
 0xcc2   :  { %v5940_v4 = vpop.permute.xlu1 %5939 }
 0xcc3   :  { %v5950_v3 = vsel %vm5949_vm2, %v5938_v25, %v5940_v4 }
 0xcc4   :  { %6046 = vrot.lane.b32.xlu1 %v5962_v40, %s10146_s24  ;;  %6020 = vrot.lane.b32.xlu0 %v5962_v40, %s10150_s27 }
 0xcc5   :  { %6219 = vmatprep.subr.bf16.mxu1 %v5950_v3 }
 0xcc6   :  { %8884 = vmatpush1.bf16.msk.msra.mxu1 %vm8883_vm11, %v5938_v25  ;;  %v15123_v25 = vcombine.high %v76_v60, %v77_v24  ;;  %vm17124_vm11 = vmmov %vm17118_vm0 }
 0xcc8   :  { %6098 = vrot.lane.b32.xlu1 %v5962_v40, %s10133_s9  ;;  %6072 = vrot.lane.b32.xlu0 %v5962_v40, %s10151_s30 }
 0xccc   :  { %6150 = vrot.lane.b32.xlu1 %v5962_v40, %s10148_s26  ;;  %6124 = vrot.lane.b32.xlu0 %v5962_v40, %s10153_s10 }
 0xccf   :  { %v5942_v34 = vpop.permute.xlu0 %5941 }
 0xcd0   :  { %v14996_v46 = vsel %vm5949_vm2, %v5940_v4, %v5942_v34  ;;  %5970 = vrot.lane.b32.xlu0 %v5950_v3, %s10123_s22  ;;  %v5944_v48 = vpop.permute.xlu1 %5943 }
 0xcd1   :  { %5972 = vrot.lane.b32.xlu1 %v14996_v46, %s10123_s22  ;;  %v15031_v49 = vsel %vm5949_vm2, %v5942_v34, %v5944_v48  ;;  %v15131_v34 = vcombine.low %v76_v60, %v77_v24 }
 0xcd4   :  { %5998 = vrot.lane.b32.xlu0 %v14996_v46, %s10124_s23 }
 0xcd5   :  { %5996 = vrot.lane.b32.xlu1 %v5950_v3, %s10124_s23 }
 0xcd8   :  { %6022 = vrot.lane.b32.xlu0 %v5950_v3, %s10150_s27 }
 0xcd9   :  { %6024 = vrot.lane.b32.xlu1 %v14996_v46, %s10150_s27 }
 0xcdc   :  { %6050 = vrot.lane.b32.xlu0 %v14996_v46, %s10146_s24 }
 0xcdd   :  { %6048 = vrot.lane.b32.xlu1 %v5950_v3, %s10146_s24 }
 0xce0   :  { %6074 = vrot.lane.b32.xlu0 %v5950_v3, %s10151_s30 }
 0xce1   :  { %6076 = vrot.lane.b32.xlu1 %v14996_v46, %s10151_s30 }
 0xce4   :  { %6102 = vrot.lane.b32.xlu0 %v14996_v46, %s10133_s9 }
 0xce5   :  { %6100 = vrot.lane.b32.xlu1 %v5950_v3, %s10133_s9 }
 0xce8   :  { %6126 = vrot.lane.b32.xlu0 %v5950_v3, %s10153_s10 }
 0xce9   :  { %6128 = vrot.lane.b32.xlu1 %v14996_v46, %s10153_s10 }
 0xcec   :  { %6154 = vrot.lane.b32.xlu0 %v14996_v46, %s10148_s26 }
 0xced   :  { %6152 = vrot.lane.b32.xlu1 %v5950_v3, %s10148_s26 }
 0xcf0   :  { %5974 = vrot.lane.b32.xlu0 %v15031_v49, %s10123_s22 }
 0xcf4   :  { %v5946_v29 = vpop.permute.xlu0 %5945  ;;  %6000 = vrot.lane.b32.xlu0 %v15031_v49, %s10124_s23 }
 0xcf5   :  { %v5953_v47 = vsel %vm5949_vm2, %v5944_v48, %v5946_v29  ;;  %v5948_v7 = vpop.permute.xlu1 %5947 }
 0xcf6   :  { %v5954_v32 = vsel %vm5949_vm2, %v5946_v29, %v5948_v7  ;;  %5976 = vrot.lane.b32.xlu1 %v5953_v47, %s10123_s22  ;;  %v5965_v12 = vsel %vm5949_vm2, %v5948_v7, 0  ;;  %vm17123_vm2 = vmmov %vm17117_vm1 }
 0xcf7   :  { %6325 = vmatprep.subr.bf16.mxu0 %v5954_v32 }
 0xcf8   :  { %6026 = vrot.lane.b32.xlu0 %v15031_v49, %s10150_s27  ;;  %6326 = vmatpush1.bf16.msra.mxu0 %v5953_v47 }
 0xcfa   :  { %6002 = vrot.lane.b32.xlu1 %v5953_v47, %s10124_s23 }
 0xcfc   :  { %6052 = vrot.lane.b32.xlu0 %v15031_v49, %s10146_s24 }
 0xcfe   :  { %6028 = vrot.lane.b32.xlu1 %v5953_v47, %s10150_s27 }
 0xd00   :  { %6078 = vrot.lane.b32.xlu0 %v15031_v49, %s10151_s30 }
 0xd02   :  { %6054 = vrot.lane.b32.xlu1 %v5953_v47, %s10146_s24 }
 0xd04   :  { %6104 = vrot.lane.b32.xlu0 %v15031_v49, %s10133_s9 }
 0xd06   :  { %6080 = vrot.lane.b32.xlu1 %v5953_v47, %s10151_s30 }
 0xd08   :  { %6130 = vrot.lane.b32.xlu0 %v15031_v49, %s10153_s10 }
 0xd0a   :  { %6106 = vrot.lane.b32.xlu1 %v5953_v47, %s10133_s9 }
 0xd0c   :  { %6156 = vrot.lane.b32.xlu0 %v15031_v49, %s10148_s26 }
 0xd0e   :  { %6132 = vrot.lane.b32.xlu1 %v5953_v47, %s10153_s10 }
 0xd10   :  { %5978 = vrot.lane.b32.xlu0 %v5954_v32, %s10123_s22 }
 0xd12   :  { %6158 = vrot.lane.b32.xlu1 %v5953_v47, %s10148_s26 }
 0xd14   :  { %6004 = vrot.lane.b32.xlu0 %v5954_v32, %s10124_s23 }
 0xd16   :  { %5980 = vrot.lane.b32.xlu1 %v5965_v12, %s10123_s22 }
 0xd18   :  { %6030 = vrot.lane.b32.xlu0 %v5954_v32, %s10150_s27 }
 0xd1a   :  { %6006 = vrot.lane.b32.xlu1 %v5965_v12, %s10124_s23 }
 0xd1c   :  { %6056 = vrot.lane.b32.xlu0 %v5954_v32, %s10146_s24 }
 0xd1e   :  { %6032 = vrot.lane.b32.xlu1 %v5965_v12, %s10150_s27 }
 0xd20   :  { %6082 = vrot.lane.b32.xlu0 %v5954_v32, %s10151_s30 }
 0xd22   :  { %6058 = vrot.lane.b32.xlu1 %v5965_v12, %s10146_s24 }
 0xd24   :  { %6108 = vrot.lane.b32.xlu0 %v5954_v32, %s10133_s9 }
 0xd26   :  { %6084 = vrot.lane.b32.xlu1 %v5965_v12, %s10151_s30 }
 0xd28   :  { %6134 = vrot.lane.b32.xlu0 %v5954_v32, %s10153_s10 }
 0xd2a   :  { %6110 = vrot.lane.b32.xlu1 %v5965_v12, %s10133_s9 }
 0xd2c   :  { %6160 = vrot.lane.b32.xlu0 %v5954_v32, %s10148_s26 }
 0xd2e   :  { %6136 = vrot.lane.b32.xlu1 %v5965_v12, %s10153_s10  ;;  %s10165_s10 = smov 117  }
 0xd30   :  { %6177 = vperm.xlu0 %9684, %v10014_v20  }
 0xd32   :  { %v5969_v44 = vpop.permute.xlu0 %5968  ;;  %6162 = vrot.lane.b32.xlu1 %v5965_v12, %s10148_s26  ;;  %v5995_v43 = vpop.permute.xlu1 %5994  ;;  %s10162_s26 = smov 10  }
 0xd34   :  { %6191 = vperm.xlu0 %9684, %v79_v0  }
 0xd36   :  { %v6021_v28 = vpop.permute.xlu0 %6020  ;;  %v6047_v61 = vpop.permute.xlu1 %6046  ;;  %6181 = vperm.xlu1 %9685, %v14823_v17  }
 0xd3a   :  { %v6073_v26 = vpop.permute.xlu0 %6072  ;;  %v6099_v59 = vpop.permute.xlu1 %6098  ;;  %6186 = vperm.xlu1 %9685, %v78_v57  }
 0xd3e   :  { %v6125_v52 = vpop.permute.xlu0 %6124  ;;  %v6151_v62 = vpop.permute.xlu1 %6150 }
 0xd42   :  { %v5971_v54 = vpop.permute.xlu0 %5970 }
 0xd43   :  { %v5973_v58 = vpop.permute.xlu1 %5972  ;;  %v5982_v45 = vsel %vm17117_vm1, %v5969_v44, %v5971_v54  ;;  %vm17126_vm1 = vmmov %vm17121_vm7 }
 0xd44   :  { %v5983_v18 = vsel %vm17116_vm8, %v5971_v54, %v5973_v58  ;;  %vm17125_vm8 = vmmov %vm17118_vm0 }
 0xd45   :  { %6221 = vmatprep.subr.bf16.mxu1 %v5983_v18 }
 0xd46   :  { %v15088_v8 = vpop.permute.xlu0 %5998  ;;  %6222 = vmatpush1.bf16.msra.mxu1 %v5982_v45 }
 0xd47   :  { %v5997_v17 = vpop.permute.xlu1 %5996 }
 0xd48   :  { %v6009_v5 = vsel %vm17118_vm0, %v5997_v17, %v15088_v8  ;;  %v6008_v27 = vsel %vm17119_vm3, %v5995_v43, %v5997_v17  ;;  %vm17127_vm0 = vmmov %vm17126_vm1 }
 0xd49   :  { %6223 = vmatprep.subr.bf16.mxu1 %v6009_v5  ;;  %vm17128_vm3 = vmmov %vm17123_vm2 }
 0xd4a   :  { %v6023_v11 = vpop.permute.xlu0 %6022  ;;  %6224 = vmatpush1.bf16.msra.mxu1 %v6008_v27 }
 0xd4b   :  { %v15093_v53 = vpop.permute.xlu1 %6024  ;;  %v6034_v33 = vsel %vm5128_vm12, %v6021_v28, %v6023_v11 }
 0xd4c   :  { %v6035_v21 = vsel %vm5128_vm12, %v6023_v11, %v15093_v53 }
 0xd4d   :  { %6225 = vmatprep.subr.bf16.mxu1 %v6035_v21 }
 0xd4e   :  { %v15098_v51 = vpop.permute.xlu0 %6050  ;;  %6226 = vmatpush1.bf16.msra.mxu1 %v6034_v33 }
 0xd4f   :  { %v6049_v63 = vpop.permute.xlu1 %6048 }
 0xd50   :  { %v6061_v22 = vsel %vm5149_vm15, %v6049_v63, %v15098_v51  ;;  %v6060_v50 = vsel %vm5149_vm15, %v6047_v61, %v6049_v63 }
 0xd51   :  { %6227 = vmatprep.subr.bf16.mxu1 %v6061_v22 }
 0xd52   :  { %v6075_v42 = vpop.permute.xlu0 %6074  ;;  %6228 = vmatpush1.bf16.msra.mxu1 %v6060_v50 }
 0xd53   :  { %v15103_v41 = vpop.permute.xlu1 %6076  ;;  %v6086_v16 = vsel %vm5170_vm9, %v6073_v26, %v6075_v42 }
 0xd54   :  { %v6087_v39 = vsel %vm5170_vm9, %v6075_v42, %v15103_v41 }
 0xd55   :  { %6229 = vmatprep.subr.bf16.mxu1 %v6087_v39 }
 0xd56   :  { %v15108_v31 = vpop.permute.xlu0 %6102  ;;  %6230 = vmatpush1.bf16.msra.mxu1 %v6086_v16 }
 0xd57   :  { %v6101_v30 = vpop.permute.xlu1 %6100 }
 0xd58   :  { %v6113_v9 = vsel %vm17120_vm13, %v6101_v30, %v15108_v31  ;;  %v6112_v56 = vsel %vm17121_vm7, %v6099_v59, %v6101_v30  ;;  %vm17129_vm13 = vmmov %vm17123_vm2 }
 0xd59   :  { %6231 = vmatprep.subr.bf16.mxu1 %v6113_v9  ;;  %vm17130_vm7 = vmmov %vm17125_vm8 }
 0xd5a   :  { %v6127_v36 = vpop.permute.xlu0 %6126  ;;  %6232 = vmatpush1.bf16.msra.mxu1 %v6112_v56 }
 0xd5b   :  { %v15113_v35 = vpop.permute.xlu1 %6128  ;;  %v6138_v23 = vsel %vm5253_vm4, %v6125_v52, %v6127_v36 }
 0xd5c   :  { %v6139_v1 = vsel %vm5253_vm4, %v6127_v36, %v15113_v35 }
 0xd5d   :  { %6233 = vmatprep.subr.bf16.mxu1 %v6139_v1 }
 0xd5e   :  { %v15118_v37 = vpop.permute.xlu0 %6154  ;;  %6234 = vmatpush1.bf16.msra.mxu1 %v6138_v23 }
 0xd5f   :  { %v6153_v19 = vpop.permute.xlu1 %6152 }
 0xd60   :  { %v6165_v13 = vsel %vm5274_vm10, %v6153_v19, %v15118_v37  ;;  %v6164_v6 = vsel %vm5274_vm10, %v6151_v62, %v6153_v19 }
 0xd61   :  { %6235 = vmatprep.subr.bf16.mxu1 %v6165_v13 }
 0xd62   :  { %v5975_v10 = vpop.permute.xlu0 %5974  ;;  %6236 = vmatpush1.bf16.msra.mxu1 %v6164_v6 }
 0xd63   :  { %6272 = vmatprep.subr.bf16.mxu1 %v15031_v49  ;;  %v5984_v15 = vsel %vm17123_vm2, %v5973_v58, %v5975_v10  ;;  %vm17132_vm2 = vmmov %vm17127_vm0 }
 0xd65   :  { %6252 = vmatmul.mubr.bf16.vlgmr.msra.gmra.mrb[44].mxu1 %v15020_v38 }
 0xd66   :  { %v6001_v40 = vpop.permute.xlu0 %6000  ;;  %6273 = vmatpush1.bf16.msra.mxu1 %v14996_v46  ;;  %8886 = vmatprep.mubr.msk.bf16.mxu1 %vm6212_vm14, %v15123_v25 }
 0xd67   :  { %v6010_v46 = vsel %vm17125_vm8, %v15088_v8, %v6001_v40  ;;  %vm17138_vm8 = vmmov %vm17128_vm3 }
 0xd68   :  { %v5977_v4 = vpop.permute.xlu1 %5976 }
 0xd69   :  { %v5985_v3 = vsel %vm17122_vm5, %v5975_v10, %v5977_v4  ;;  %vm17131_vm5 = vmmov %vm17130_vm7 }
 0xd6a   :  { %v6027_v55 = vpop.permute.xlu0 %6026  ;;  %6274 = vmatprep.subr.bf16.mxu1 %v5985_v3 }
 0xd6b   :  { %6275 = vmatpush1.bf16.msra.mxu1 %v5984_v15  ;;  %v6036_v12 = vsel %vm5128_vm12, %v15093_v53, %v6027_v55 }
 0xd6c   :  { %v6003_v48 = vpop.permute.xlu1 %6002 }
 0xd6d   :  { %v6011_v49 = vsel %vm17124_vm11, %v6001_v40, %v6003_v48  ;;  %6262 = vmatmul.mubr.bf16.gmra.mrb[48].mxu1 %v15131_v34  ;;  %vm17133_vm11 = vmmov %vm17127_vm0 }
 0xd6e   :  { %v6053_v29 = vpop.permute.xlu0 %6052  ;;  %6276 = vmatprep.subr.bf16.mxu1 %v6011_v49  ;;  %8887 = vmatprep.mubr.msk.bf16.mxu1 %vm6212_vm14, %v15015_v14 }
 0xd6f   :  { %6277 = vmatpush1.bf16.msra.mxu1 %v6010_v46  ;;  %v6062_v20 = vsel %vm5149_vm15, %v15098_v51, %v6053_v29 }
 0xd70   :  { %v6029_v47 = vpop.permute.xlu1 %6028 }
 0xd71   :  { %v6037_v7 = vsel %vm5128_vm12, %v6027_v55, %v6029_v47 }
 0xd72   :  { %v6079_v32 = vpop.permute.xlu0 %6078  ;;  %6278 = vmatprep.subr.bf16.mxu1 %v6037_v7 }
 0xd73   :  { %6279 = vmatpush1.bf16.msra.mxu1 %v6036_v12  ;;  %v6088_v61 = vsel %vm5170_vm9, %v15103_v41, %v6079_v32 }
 0xd74   :  { %v6055_v44 = vpop.permute.xlu1 %6054 }
 0xd75   :  { %v6063_v43 = vsel %vm5149_vm15, %v6053_v29, %v6055_v44 }
 0xd76   :  { %v6105_v2 = vpop.permute.xlu0 %6104  ;;  %6280 = vmatprep.subr.bf16.mxu1 %v6063_v43 }
 0xd77   :  { %6281 = vmatpush1.bf16.msra.mxu1 %v6062_v20  ;;  %v6114_v52 = vsel %vm17127_vm0, %v15108_v31, %v6105_v2 }
 0xd78   :  { %v6081_v14 = vpop.permute.xlu1 %6080 }
 0xd79   :  { %v6089_v0 = vsel %vm5170_vm9, %v6079_v32, %v6081_v14 }
 0xd7a   :  { %v6131_v28 = vpop.permute.xlu0 %6130  ;;  %6282 = vmatprep.subr.bf16.mxu1 %v6089_v0 }
 0xd7b   :  { %6283 = vmatpush1.bf16.msra.mxu1 %v6088_v61  ;;  %v6140_v18 = vsel %vm5253_vm4, %v15113_v35, %v6131_v28 }
 0xd7c   :  { %v6107_v57 = vpop.permute.xlu1 %6106 }
 0xd7d   :  { %v6115_v26 = vsel %vm17126_vm1, %v6105_v2, %v6107_v57  ;;  %vm17139_vm1 = vmmov %vm17128_vm3 }
 0xd7e   :  { %v6157_v59 = vpop.permute.xlu0 %6156  ;;  %6284 = vmatprep.subr.bf16.mxu1 %v6115_v26  ;;  %vm17140_vm0 = vmmov %vm17139_vm1 }
 0xd7f   :  { %6285 = vmatpush1.bf16.msra.mxu1 %v6114_v52  ;;  %v6166_v5 = vsel %vm5274_vm10, %v15118_v37, %v6157_v59 }
 0xd80   :  { %v6133_v62 = vpop.permute.xlu1 %6132 }
 0xd81   :  { %v6141_v54 = vsel %vm5253_vm4, %v6131_v28, %v6133_v62 }
 0xd82   :  { %v5979_v58 = vpop.permute.xlu0 %5978  ;;  %6286 = vmatprep.subr.bf16.mxu1 %v6141_v54 }
 0xd83   :  { %6287 = vmatpush1.bf16.msra.mxu1 %v6140_v18  ;;  %v5986_v21 = vsel %vm17129_vm13, %v5977_v4, %v5979_v58  ;;  %vm17142_vm13 = vmmov %vm17140_vm0 }
 0xd84   :  { %v6159_v45 = vpop.permute.xlu1 %6158 }
 0xd85   :  { %v6167_v8 = vsel %vm5274_vm10, %v6157_v59, %v6159_v45 }
 0xd86   :  { %v6005_v17 = vpop.permute.xlu0 %6004  ;;  %6288 = vmatprep.subr.bf16.mxu1 %v6167_v8 }
 0xd87   :  { %6289 = vmatpush1.bf16.msra.mxu1 %v6166_v5  ;;  %v6012_v22 = vsel %vm17131_vm5, %v6003_v48, %v6005_v17  ;;  %vm17144_vm5 = vmmov %vm17140_vm0 }
 0xd88   :  { %v5981_v27 = vpop.permute.xlu1 %5980 }
 0xd89   :  { %v5987_v11 = vsel %vm17128_vm3, %v5979_v58, %v5981_v27 }
 0xd8a   :  { %v6031_v53 = vpop.permute.xlu0 %6030  ;;  %6305 = vmatmul.mubr.bf16.vlgmr.msra.gmra.mrb[52].mxu1 %v15020_v38  ;;  %6327 = vmatprep.subr.bf16.mxu0 %v5987_v11 }
 0xd8b   :  { %6328 = vmatpush1.bf16.msra.mxu0 %v5986_v21  ;;  %8888 = vmatprep.mubr.msk.bf16.mxu1 %vm6212_vm14, %v15123_v25  ;;  %v6038_v39 = vsel %vm5128_vm12, %v6029_v47, %v6031_v53 }
 0xd8c   :  { %v6007_v33 = vpop.permute.xlu1 %6006 }
 0xd8d   :  { %v6013_v51 = vsel %vm17130_vm7, %v6005_v17, %v6007_v33  ;;  %vm17143_vm7 = vmmov %vm17140_vm0 }
 0xd8e   :  { %v6057_v63 = vpop.permute.xlu0 %6056  ;;  %6329 = vmatprep.subr.bf16.mxu0 %v6013_v51 }
 0xd8f   :  { %6330 = vmatpush1.bf16.msra.mxu0 %v6012_v22  ;;  %v6064_v30 = vsel %vm5149_vm15, %v6055_v44, %v6057_v63 }
 0xd90   :  { %v6033_v50 = vpop.permute.xlu1 %6032 }
 0xd91   :  { %v6039_v42 = vsel %vm5128_vm12, %v6031_v53, %v6033_v50 }
 0xd92   :  { %v6083_v41 = vpop.permute.xlu0 %6082  ;;  %6331 = vmatprep.subr.bf16.mxu0 %v6039_v42  ;;  %6315 = vmatmul.mubr.bf16.gmra.mrb[56].mxu1 %v15131_v34 }
 0xd93   :  { %6332 = vmatpush1.bf16.msra.mxu0 %v6038_v39  ;;  %v6090_v35 = vsel %vm5170_vm9, %v6081_v14, %v6083_v41 }
 0xd94   :  { %v6059_v16 = vpop.permute.xlu1 %6058 }
 0xd95   :  { %v6065_v31 = vsel %vm5149_vm15, %v6057_v63, %v6059_v16 }
 0xd96   :  { %6333 = vmatprep.subr.bf16.mxu0 %v6065_v31  ;;  %v6109_v9 = vpop.permute.xlu0 %6108 }
 0xd97   :  { %6334 = vmatpush1.bf16.msra.mxu0 %v6064_v30  ;;  %v6116_v19 = vsel %vm17133_vm11, %v6107_v57, %v6109_v9  ;;  %vm6710_vm11 = vcmask 400384  }
 0xd98   :  { %v6085_v56 = vpop.permute.xlu1 %6084 }
 0xd99   :  { %v6091_v36 = vsel %vm5170_vm9, %v6083_v41, %v6085_v56 }
 0xd9a   :  { %6335 = vmatprep.subr.bf16.mxu0 %v6091_v36  ;;  %v6135_v23 = vpop.permute.xlu0 %6134 }
 0xd9b   :  { %6336 = vmatpush1.bf16.msra.mxu0 %v6090_v35  ;;  %v6142_v13 = vsel %vm5253_vm4, %v6133_v62, %v6135_v23 }
 0xd9c   :  { %v6111_v1 = vpop.permute.xlu1 %6110 }
 0xd9d   :  { %v6117_v37 = vsel %vm17132_vm2, %v6109_v9, %v6111_v1  ;;  %vm17145_vm2 = vmmov %vm17140_vm0 }
 0xd9e   :  { %6337 = vmatprep.subr.bf16.mxu0 %v6117_v37  ;;  %v6161_v6 = vpop.permute.xlu0 %6160 }
 0xd9f   :  { %6338 = vmatpush1.bf16.msra.mxu0 %v6116_v19  ;;  %v6168_v4 = vsel %vm5274_vm10, %v6159_v45, %v6161_v6 }
 0xda0   :  { %v6137_v60 = vpop.permute.xlu1 %6136 }
 0xda1   :  { %v6143_v24 = vsel %vm5253_vm4, %v6135_v23, %v6137_v60  ;;  %vm17134_vm4 = vmmov %vm17128_vm3 }
 0xda2   :  { %6339 = vmatprep.subr.bf16.mxu0 %v6143_v24 }
 0xda3   :  { %6340 = vmatpush1.bf16.msra.mxu0 %v6142_v13 }
 0xda4   :  { %v6163_v10 = vpop.permute.xlu1 %6162 }
 0xda5   :  { %v6169_v40 = vsel %vm5274_vm10, %v6161_v6, %v6163_v10  ;;  %vm17136_vm10 = vcmask 1040384  }
 0xda6   :  { %6341 = vmatprep.subr.bf16.mxu0 %v6169_v40 }
 0xda7   :  { %6342 = vmatpush1.bf16.msra.mxu0 %v6168_v4 }
 0xdaa   :  { %6358 = vmatmul.mubr.bf16.vlgmr.msra.gmra.mrb[40].mxu0 %v15020_v38 }
 0xdab   :  { %8890 = vmatprep.mubr.msk.bf16.mxu0 %vm6212_vm14, %v15123_v25  ;;  %vm17137_vm14 = vmmov %vm17128_vm3 }
 0xdac   :  { %vm17141_vm3 = vmmov %vm17140_vm0 }
 0xdaf   :  { %v15182_v3 = vpop.permute.xlu0 %6177 }
 0xdb2   :  { %6368 = vmatmul.mubr.bf16.gmra.mrb[44].mxu0 %v15131_v34 }
 0xdb3   :  { %v15194_v20 = vpop.permute.xlu0 %6191 }
 0xdb5   :  { %v15184_v15 = vpop.permute.xlu1 %6181 }
 0xdb9   :  { %v15190_v34 = vpop.permute.xlu1 %6186 }
 0xe38   :  { %v6253_v55 = vpop.f32.mrb[44].mxu1 }
 0xe39   :  { %v6255_v48 = vpop.f32.mrb[45].mxu1  ;;  %v6254_v49 = vadd.f32 %v6253_v55, %v15182_v3 }
 0xe3a   :  { %v6257_v29 = vpop.f32.mrb[46].mxu1  ;;  %v6256_v46 = vadd.f32 %v6255_v48, %v15182_v3 }
 0xe3b   :  { %v6259_v47 = vpop.f32.mrb[47].mxu1  ;;  %v6258_v7 = vadd.f32 %v6257_v29, %v15184_v15  ;;  %v6378_v38 = vmax.f32 %v6254_v49, 0.0 }
 0xe3c   :  { %v6260_v32 = vadd.f32 %v6259_v47, %v15184_v15  ;;  %v6379_v25 = vmax.f32 %v6256_v46, 0.0 }
 0xe3d   :  { %v6384_v12 = vmax.f32 %v6258_v7, 0.0 }
 0xe3e   :  { %v6385_v44 = vmax.f32 %v6260_v32, 0.0 }
 0xe3f   :  { %v15192_v43 = vpack.c.bf16 %v6384_v12, %v6378_v38 }
 0xe40   :  { %v6263_v2 = vpop.f32.mrb[48].mxu1  ;;  %v15196_v14 = vpack.c.bf16 %v6385_v44, %v6379_v25 }
 0xe41   :  { %v6265_v0 = vpop.f32.mrb[49].mxu1  ;;  %v6264_v28 = vadd.f32 %v6263_v2, %v15190_v34 }
 0xe42   :  { %v6267_v61 = vpop.f32.mrb[50].mxu1  ;;  %v6266_v57 = vadd.f32 %v6265_v0, %v15190_v34 }
 0xe43   :  { %v6269_v26 = vpop.f32.mrb[51].mxu1  ;;  %v6268_v59 = vadd.f32 %v6267_v61, %v15194_v20  ;;  %v6390_v52 = vmax.f32 %v6264_v28, 0.0 }
 0xe44   :  { %v6270_v62 = vadd.f32 %v6269_v26, %v15194_v20  ;;  %v6391_v54 = vmax.f32 %v6266_v57, 0.0 }
 0xe45   :  { %v6396_v58 = vmax.f32 %v6268_v59, 0.0 }
 0xe46   :  { %v6397_v18 = vmax.f32 %v6270_v62, 0.0 }
 0xe47   :  { %v15202_v45 = vpack.c.bf16 %v6396_v58, %v6390_v52  ;;  %v15273_v58 = vld [vmem:[%s15968_s5 + $0x48] sm:$0xff]  }
 0xe48   :  { %v15204_v8 = vpack.c.bf16 %v6397_v18, %v6391_v54  ;;  %v15278_v18 = vld [vmem:[%s15968_s5 + $0x80] sm:$0xff]  }
 0xe49   :  { %9169 = vmatprep.subr.bf16.mxu0 %v15278_v18 }
 0xe4a   :  { %9170 = vmatpush3.bf16.msra.mxu0 %v15278_v18 }
 0xe5d   :  { %v6306_v17 = vpop.f32.mrb[52].mxu1 }
 0xe5e   :  { %v6307_v5 = vadd.f32 %v6306_v17, %v15182_v3  ;;  %v6308_v27 = vpop.f32.mrb[53].mxu1  ;;  %v15284_v17 = vld [vmem:[%s15968_s5 + $0x8] sm:$0xff]  }
 0xe5f   :  { %v6309_v11 = vadd.f32 %v6308_v27, %v15182_v3  ;;  %v6310_v53 = vpop.f32.mrb[54].mxu1  ;;  %v15295_v27 = vld [vmem:[%s15968_s5 + $0x50] sm:$0xff]  }
 0xe60   :  { %v6380_v21 = vmax.f32 %v6307_v5, 0.0  ;;  %v6311_v33 = vadd.f32 %v6310_v53, %v15184_v15  ;;  %v6312_v51 = vpop.f32.mrb[55].mxu1  ;;  %v15289_v5 = vld [vmem:[%s15968_s5 + $0x88] sm:$0xff]   ;;  %v15310_v53 = vld [vmem:[%s15968_s5 + $0x58] sm:$0xff]  }
 0xe61   :  { %v6381_v63 = vmax.f32 %v6309_v11, 0.0  ;;  %v6313_v22 = vadd.f32 %v6312_v51, %v15184_v15  ;;  %9171 = vmatprep.subr.bf16.mxu0 %v15289_v5  ;;  %v15304_v11 = vld [vmem:[%s15968_s5 + $0x10] sm:$0xff]  }
 0xe62   :  { %v6386_v50 = vmax.f32 %v6311_v33, 0.0  ;;  %9172 = vmatpush3.bf16.msra.mxu0 %v15289_v5 }
 0xe63   :  { %v6387_v42 = vmax.f32 %v6313_v22, 0.0 }
 0xe64   :  { %v15210_v41 = vpack.c.bf16 %v6386_v50, %v6380_v21  ;;  %v15327_v50 = vld [vmem:[%s15968_s5 + $0x60] sm:$0xff]  }
 0xe65   :  { %v15212_v39 = vpack.c.bf16 %v6387_v42, %v6381_v63  ;;  %v6316_v16 = vpop.f32.mrb[56].mxu1  ;;  %v15318_v63 = vld [vmem:[%s15968_s5 + $0x18] sm:$0xff]   ;;  %v15336_v42 = vld [vmem:[%s15968_s5 + $0x20] sm:$0xff]  }
 0xe66   :  { %6469 = vrot.lane.b32.xlu1 %v15210_v41, %s10123_s22  ;;  %v6317_v31 = vadd.f32 %v6316_v16, %v15190_v34  ;;  %v6318_v30 = vpop.f32.mrb[57].mxu1  ;;  %v15346_v16 = vld [vmem:[%s15968_s5 + $0x68] sm:$0xff]  }
 0xe67   :  { %6471 = vrot.lane.b32.xlu0 %v15212_v39, %s10123_s22  ;;  %v6319_v9 = vadd.f32 %v6318_v30, %v15190_v34  ;;  %v6320_v56 = vpop.f32.mrb[58].mxu1  ;;  %v9955_v30 = vld [vmem:[%s15968_s5 + $0x98] ss:$0 sps:$4 sm:$0x11]  }
 0xe68   :  { %v6392_v36 = vmax.f32 %v6317_v31, 0.0  ;;  %v6321_v35 = vadd.f32 %v6320_v56, %v15194_v20  ;;  %v6322_v1 = vpop.f32.mrb[59].mxu1  ;;  %v15353_v31 = vld [vmem:[%s15968_s5 + $0x28] sm:$0xff]  }
 0xe69   :  { %v6393_v23 = vmax.f32 %v6319_v9, 0.0  ;;  %v6323_v37 = vadd.f32 %v6322_v1, %v15194_v20  ;;  %v17135_v9 = vmov 0  }
 0xe6a   :  { %v6398_v19 = vmax.f32 %v6321_v35, 0.0  ;;  %v6718_v56 = vsel %vm17136_vm10, 65535, %v17135_v9 }
 0xe6b   :  { %v6399_v60 = vmax.f32 %v6323_v37, 0.0  ;;  %v15367_v35 = vand.u32 %v9955_v30, %v6718_v56  ;;  %v15381_v37 = vld [vmem:[%s15968_s5 + $0x78] sm:$0xff]  }
 0xe6c   :  { %v15222_v24 = vpack.c.bf16 %v6398_v19, %v6392_v36  ;;  %v15365_v36 = vld [vmem:[%s15968_s5 + $0x70] sm:$0xff]  }
 0xe6d   :  { %v15224_v13 = vpack.c.bf16 %v6399_v60, %v6393_v23  ;;  %v15376_v23 = vld [vmem:[%s15968_s5 + $0x30] sm:$0xff]  }
 0xe6e   :  { %6481 = vrot.lane.b32.xlu0 %v15222_v24, %s10123_s22 }
 0xe7d   :  { %v6359_v6 = vpop.f32.mrb[40].mxu0 }
 0xe7e   :  { %v6360_v10 = vadd.f32 %v6359_v6, %v15182_v3  ;;  %v6361_v40 = vpop.f32.mrb[41].mxu0 }
 0xe7f   :  { %v6362_v4 = vadd.f32 %v6361_v40, %v15182_v3  ;;  %v6363_v55 = vpop.f32.mrb[42].mxu0  ;;  %v15394_v40 = vld [vmem:[%s15968_s5 + $0x38] sm:$0xff]  }
 0xe80   :  { %v6364_v48 = vadd.f32 %v6363_v55, %v15184_v15  ;;  %v6365_v49 = vpop.f32.mrb[43].mxu0  ;;  %v6382_v46 = vmax.f32 %v6360_v10, 0.0 }
 0xe81   :  { %v6366_v29 = vadd.f32 %v6365_v49, %v15184_v15  ;;  %v6383_v7 = vmax.f32 %v6362_v4, 0.0 }
 0xe82   :  { %v6388_v47 = vmax.f32 %v6364_v48, 0.0 }
 0xe83   :  { %v6389_v38 = vmax.f32 %v6366_v29, 0.0 }
 0xe84   :  { %v15232_v32 = vpack.c.bf16 %v6388_v47, %v6382_v46 }
 0xe85   :  { %v15234_v25 = vpack.c.bf16 %v6389_v38, %v6383_v7  ;;  %v6369_v12 = vpop.f32.mrb[44].mxu0 }
 0xe86   :  { %v6370_v44 = vadd.f32 %v6369_v12, %v15190_v34  ;;  %v6371_v2 = vpop.f32.mrb[45].mxu0  ;;  %6473 = vrot.lane.b32.xlu1 %v15232_v32, %s10123_s22 }
 0xe87   :  { %v6372_v3 = vadd.f32 %v6371_v2, %v15190_v34  ;;  %v6373_v0 = vpop.f32.mrb[46].mxu0  ;;  %v9940_v34 = vld [vmem:[%s15968_s5 + $0x40] sm:$0xff]  }
 0xe88   :  { %v6374_v15 = vadd.f32 %v6373_v0, %v15194_v20  ;;  %v6375_v28 = vpop.f32.mrb[47].mxu0  ;;  %v6394_v57 = vmax.f32 %v6370_v44, 0.0  ;;  %9101 = vmatprep.subr.bf16.mxu1 %v9940_v34 }
 0xe89   :  { %v6376_v61 = vadd.f32 %v6375_v28, %v15194_v20  ;;  %v6395_v59 = vmax.f32 %v6372_v3, 0.0  ;;  %v15268_v20 = vld [vmem:[%s15968_s5] sm:$0xff]  }
 0xe8a   :  { %v6400_v26 = vmax.f32 %v6374_v15, 0.0  ;;  %6483 = vrot.lane.b32.xlu1 %v15224_v13, %s10123_s22  ;;  %9102 = vmatpush3.bf16.msra.mxu1 %v15268_v20 }
 0xe8b   :  { %v6401_v52 = vmax.f32 %v6376_v61, 0.0  ;;  %9103 = vmatprep.subr.bf16.mxu1 %v15273_v58 }
 0xe8c   :  { %v15244_v62 = vpack.c.bf16 %v6400_v26, %v6394_v57 }
 0xe8d   :  { %v15246_v54 = vpack.c.bf16 %v6401_v52, %v6395_v59 }
 0xe8e   :  { %6467 = vrot.lane.b32.xlu1 %v15196_v14, %s10123_s22  ;;  %6485 = vrot.lane.b32.xlu0 %v15244_v62, %s10123_s22 }
 0xe8f   :  { %9104 = vmatpush3.bf16.msra.mxu1 %v15284_v17 }
 0xe90   :  { %9105 = vmatprep.subr.bf16.mxu1 %v15295_v27 }
 0xe92   :  { %6465 = vrot.lane.b32.xlu0 %v15192_v43, %s10123_s22  ;;  %6479 = vrot.lane.b32.xlu1 %v15204_v8, %s10123_s22 }
 0xe93   :  { %9106 = vmatpush3.bf16.msra.mxu1 %v15304_v11 }
 0xe94   :  { %9107 = vmatprep.subr.bf16.mxu1 %v15310_v53 }
 0xe96   :  { %6475 = vrot.lane.b32.xlu1 %v15234_v25, %s10123_s22  ;;  %6477 = vrot.lane.b32.xlu0 %v15202_v45, %s10123_s22 }
 0xe97   :  { %9108 = vmatpush3.bf16.msra.mxu1 %v15318_v63 }
 0xe98   :  { %9109 = vmatprep.subr.bf16.mxu1 %v15327_v50 }
 0xe9a   :  { %6487 = vrot.lane.b32.xlu0 %v15246_v54, %s10123_s22 }
 0xe9b   :  { %9110 = vmatpush3.bf16.msra.mxu1 %v15336_v42 }
 0xe9c   :  { %9111 = vmatprep.subr.bf16.mxu1 %v15346_v16 }
 0xe9f   :  { %9112 = vmatpush3.bf16.msra.mxu1 %v15353_v31 }
 0xea0   :  { %9113 = vmatprep.subr.bf16.mxu1 %v15365_v36 }
 0xea3   :  { %9114 = vmatpush3.bf16.msra.mxu1 %v15376_v23 }
 0xea4   :  { %9115 = vmatprep.subr.bf16.mxu1 %v15381_v37 }
 0xea7   :  { %9116 = vmatpush3.bf16.msra.mxu1 %v15394_v40 }
 0xea8   :  { %9181 = vmatprep.subr.bf16.mxu1 %v15278_v18 }
 0xed8   :  { %v6470_v21 = vpop.permute.xlu1 %6469 }
 0xed9   :  { %v6472_v33 = vpop.permute.xlu0 %6471 }
 0xeda   :  { %v6491_v51 = vsel %vm17134_vm4, %v6470_v21, %v6472_v33  ;;  %vm7093_vm4 = vcmask 80896  }
 0xedb   :  { %v15321_v22 = vmax.bf16 %v6491_v51, %v15210_v41  ;;  %v15341_v41 = vld [vmem:[%s15968_s5 + $0x90] sm:$0xff]   ;;  %vm8922_vm10 = vmneg %vm7093_vm4 }
 0xedc   :  { %9173 = vmatprep.subr.bf16.mxu0 %v15341_v41 }
 0xedd   :  { %6539 = vrot.lane.b32.xlu1 %v15321_v22, %s10150_s27  ;;  %9174 = vmatpush3.bf16.msra.mxu0 %v15341_v41 }
 0xede   :  { %9175 = vmatprep.subr.bf16.mxu0 %v15367_v35 }
 0xee0   :  { %v6482_v6 = vpop.permute.xlu0 %6481 }
 0xee1   :  { %9176 = vmatpush3.bf16.msra.mxu0 %v15367_v35 }
 0xee2   :  { %9135 = vmatprep.subr.bf16.mxu0 %v9940_v34 }
 0xef8   :  { %v6474_v1 = vpop.permute.xlu1 %6473 }
 0xef9   :  { %v6492_v19 = vsel %vm17137_vm14, %v6472_v33, %v6474_v1  ;;  %vm17146_vm14 = vmmov %vm17140_vm0 }
 0xefa   :  { %v15385_v60 = vmax.bf16 %v6492_v19, %v15212_v39 }
 0xefc   :  { %6541 = vrot.lane.b32.xlu0 %v15385_v60, %s10150_s27  ;;  %v6484_v10 = vpop.permute.xlu1 %6483 }
 0xefd   :  { %v6496_v4 = vsel %vm17138_vm8, %v6482_v6, %v6484_v10  ;;  %vm17147_vm8 = vmmov %vm17140_vm0 }
 0xefe   :  { %v6519_v55 = vmax.bf16 %v6496_v4, %v15222_v24 }
 0xf00   :  { %v6486_v39 = vpop.permute.xlu0 %6485  ;;  %6551 = vrot.lane.b32.xlu1 %v6519_v55, %s10150_s27  ;;  %v6468_v48 = vpop.permute.xlu1 %6467 }
 0xf01   :  { %v6497_v49 = vsel %vm17139_vm1, %v6484_v10, %v6486_v39  ;;  %v6490_v29 = vsel %vm17140_vm0, %v6468_v48, %v6470_v21  ;;  %vm17148_vm1 = vmmov %vm17140_vm0 }
 0xf02   :  { %v15404_v46 = vmax.bf16 %v6497_v49, %v15224_v13  ;;  %v6512_v47 = vmax.bf16 %v6490_v29, %v15196_v14 }
 0xf04   :  { %v6466_v7 = vpop.permute.xlu0 %6465  ;;  %6553 = vrot.lane.b32.xlu0 %v15404_v46, %s10150_s27  ;;  %6537 = vrot.lane.b32.xlu1 %v6512_v47, %s10150_s27  ;;  %v6480_v24 = vpop.permute.xlu1 %6479 }
 0xf05   :  { %v6489_v38 = vsel %vm17141_vm3, %v6466_v7, %v6468_v48  ;;  %v6495_v12 = vsel %vm17142_vm13, %v6480_v24, %v6482_v6  ;;  %vm17149_vm3 = vcmask 1031168  }
 0xf06   :  { %v6511_v44 = vmax.bf16 %v6489_v38, %v15192_v43  ;;  %v6518_v2 = vmax.bf16 %v6495_v12, %v15204_v8  ;;  %vm17150_vm13 = vmmov %vm17149_vm3 }
 0xf08   :  { %v6478_v3 = vpop.permute.xlu0 %6477  ;;  %6535 = vrot.lane.b32.xlu0 %v6511_v44, %s10150_s27  ;;  %6549 = vrot.lane.b32.xlu1 %v6518_v2, %s10150_s27  ;;  %v6476_v14 = vpop.permute.xlu1 %6475 }
 0xf09   :  { %v6494_v13 = vsel %vm17143_vm7, %v6478_v3, %v6480_v24  ;;  %v6493_v0 = vsel %vm17144_vm5, %v6474_v1, %v6476_v14  ;;  %v6516_v8 = vmax.bf16 %v6476_v14, %v15234_v25  ;;  %vm7165_vm7 = vcmask 973824   ;;  %vm17151_vm5 = vmmov %vm17149_vm3 }
 0xf0a   :  { %v6517_v15 = vmax.bf16 %v6494_v13, %v15202_v45  ;;  %v6515_v28 = vmax.bf16 %v6493_v0, %v15232_v32 }
 0xf0c   :  { %v6488_v61 = vpop.permute.xlu0 %6487  ;;  %6547 = vrot.lane.b32.xlu0 %v6517_v15, %s10150_s27  ;;  %6543 = vrot.lane.b32.xlu1 %v6515_v28, %s10150_s27 }
 0xf0d   :  { %v6498_v43 = vsel %vm17145_vm2, %v6486_v39, %v6488_v61  ;;  %v6522_v45 = vmax.bf16 %v6488_v61, %v15246_v54  ;;  %vm17152_vm2 = vmmov %vm17149_vm3 }
 0xf0e   :  { %v15425_v57 = vmax.bf16 %v6498_v43, %v15244_v62 }
 0xf10   :  { %6545 = vrot.lane.b32.xlu0 %v6516_v8, %s10150_s27  ;;  %6555 = vrot.lane.b32.xlu1 %v15425_v57, %s10150_s27 }
 0xf14   :  { %6557 = vrot.lane.b32.xlu0 %v6522_v45, %s10150_s27 }
 0xf4f   :  { %v6540_v32 = vpop.permute.xlu1 %6539 }
 0xf6e   :  { %v6542_v26 = vpop.permute.xlu0 %6541 }
 0xf6f   :  { %v6561_v59 = vsel %vm5128_vm12, %v6540_v32, %v6542_v26 }
 0xf70   :  { %v6583_v52 = vmax.bf16 %v6561_v59, %v15321_v22 }
 0xf72   :  { %9177 = vmatprep.mubr.msk.bf16.mxu0 %vm6710_vm11, %v6583_v52  ;;  %v6552_v25 = vpop.permute.xlu1 %6551 }
 0xf76   :  { %v6554_v62 = vpop.permute.xlu0 %6553  ;;  %v6538_v34 = vpop.permute.xlu1 %6537 }
 0xf77   :  { %v6566_v21 = vsel %vm5128_vm12, %v6552_v25, %v6554_v62  ;;  %v6560_v33 = vsel %vm5128_vm12, %v6538_v34, %v6540_v32 }
 0xf78   :  { %v6589_v51 = vmax.bf16 %v6566_v21, %v6519_v55  ;;  %v6582_v54 = vmax.bf16 %v6560_v33, %v6512_v47 }
 0xf7a   :  { %v6536_v30 = vpop.permute.xlu0 %6535  ;;  %6754 = vmatprep.mubr.bf16.mxu1 %v6582_v54  ;;  %9178 = vmatmul.mubr.msk.bf16.vlgmr.msra.gmra.mrb[48].mxu0 %vm6710_vm11, %v6589_v51  ;;  %v6550_v56 = vpop.permute.xlu1 %6549 }
 0xf7b   :  { %v6559_v1 = vsel %vm5128_vm12, %v6536_v30, %v6538_v34  ;;  %9136 = vmatpush3.bf16.msra.mxu0 %v15268_v20  ;;  %v6565_v22 = vsel %vm5128_vm12, %v6550_v56, %v6552_v25 }
 0xf7c   :  { %v6581_v19 = vmax.bf16 %v6559_v1, %v6511_v44  ;;  %v6588_v6 = vmax.bf16 %v6565_v22, %v6518_v2  ;;  %9137 = vmatprep.subr.bf16.mxu0 %v15273_v58 }
 0xf7e   :  { %v6548_v10 = vpop.permute.xlu0 %6547  ;;  %6755 = vmatmul.mubr.bf16.vlgmr.msra.gmra.mrb[60].mxu1 %v6581_v19  ;;  %v6544_v20 = vpop.permute.xlu1 %6543 }
 0xf7f   :  { %9138 = vmatpush3.bf16.msra.mxu0 %v15284_v17  ;;  %6762 = vmatprep.mubr.bf16.mxu1 %v6588_v6  ;;  %v6564_v4 = vsel %vm5128_vm12, %v6548_v10, %v6550_v56 }
 0xf80   :  { %9182 = vmatpush3.bf16.msra.mxu1 %v15278_v18  ;;  %9139 = vmatprep.subr.bf16.mxu0 %v15295_v27  ;;  %v6587_v58 = vmax.bf16 %v6564_v4, %v6517_v15  ;;  %v6562_v27 = vsel %vm5128_vm12, %v6542_v26, %v6544_v20 }
 0xf81   :  { %9183 = vmatprep.subr.bf16.mxu1 %v15289_v5 }
 0xf82   :  { %v6546_v55 = vpop.permute.xlu0 %6545 }
 0xf83   :  { %v6563_v39 = vsel %vm5128_vm12, %v6544_v20, %v6546_v55  ;;  %9140 = vmatpush3.bf16.msra.mxu0 %v15304_v11  ;;  %v6586_v17 = vmax.bf16 %v6546_v55, %v6516_v8  ;;  %v6556_v11 = vpop.permute.xlu1 %6555 }
 0xf84   :  { %v6585_v48 = vmax.bf16 %v6563_v39, %v6515_v28  ;;  %9184 = vmatpush3.bf16.msra.mxu1 %v15289_v5  ;;  %9141 = vmatprep.subr.bf16.mxu0 %v15310_v53 }
 0xf85   :  { %9185 = vmatprep.subr.bf16.mxu1 %v15341_v41 }
 0xf86   :  { %6763 = vmatmul.mubr.bf16.gmra.mrb[64].mxu1 %v6587_v58  ;;  %6858 = vmatprep.mubr.bf16.mxu0 %v6585_v48  ;;  %v6558_v18 = vpop.permute.xlu0 %6557 }
 0xf87   :  { %9142 = vmatpush3.bf16.msra.mxu0 %v15318_v63  ;;  %9189 = vmatprep.mubr.msk.bf16.mxu1 %vm6710_vm11, %v6586_v17  ;;  %v6592_v5 = vmax.bf16 %v6558_v18, %v6522_v45  ;;  %v6568_v53 = vsel %vm5128_vm12, %v6556_v11, %v6558_v18  ;;  %v6584_v63 = vmax.bf16 %v6562_v27, %v15385_v60  ;;  %v10160_v27 = vmov 6  }
 0xf88   :  { %9186 = vmatpush3.bf16.msra.mxu1 %v15341_v41  ;;  %9143 = vmatprep.subr.bf16.mxu0 %v15327_v50  ;;  %v6591_v50 = vmax.bf16 %v6568_v53, %v15425_v57 }
 0xf89   :  { %9187 = vmatprep.subr.bf16.mxu1 %v15367_v35  ;;  %9686 = vset.pattern.permute.xlu1 %v10160_v27 }
 0xf8a   :  { %9687 = vset.pattern.permute.xlu0 %v10160_v27 }
 0xf8b   :  { %9144 = vmatpush3.bf16.msra.mxu0 %v15336_v42  ;;  %v6567_v42 = vsel %vm5128_vm12, %v6554_v62, %v6556_v11 }
 0xf8c   :  { %9188 = vmatpush3.bf16.msra.mxu1 %v15367_v35  ;;  %9145 = vmatprep.subr.bf16.mxu0 %v15346_v16  ;;  %v6590_v41 = vmax.bf16 %v6567_v42, %v15404_v46 }
 0xf8f   :  { %9146 = vmatpush3.bf16.msra.mxu0 %v15353_v31  ;;  %9190 = vmatmul.mubr.msk.bf16.vlgmr.msra.gmra.mrb[68].mxu1 %vm6710_vm11, %v6592_v5  ;;  %vm7186_vm11 = vcmask 965632  }
 0xf90   :  { %9147 = vmatprep.subr.bf16.mxu0 %v15365_v36 }
 0xf93   :  { %9148 = vmatpush3.bf16.msra.mxu0 %v15376_v23 }
 0xf94   :  { %9149 = vmatprep.subr.bf16.mxu0 %v15381_v37 }
 0xf97   :  { %9150 = vmatpush3.bf16.msra.mxu0 %v15394_v40 }
 0xf9a   :  { %6859 = vmatmul.mubr.bf16.vlgmr.msra.gmra.mrb[52].mxu0 %v6584_v63 }
 0xf9b   :  { %6866 = vmatprep.mubr.bf16.mxu0 %v6591_v50 }
 0xfa2   :  { %6867 = vmatmul.mubr.bf16.gmra.mrb[56].mxu0 %v6590_v41 }
0x104d   :  { %v9179_v16 = vpop.f32.mrb[48].mxu0 }
0x104e   :  { %v6805_v31 = vpop.f32.mrb[49].mxu0 }
0x104f   :  { %v9180_v36 = vpop.f32.mrb[50].mxu0 }
0x1050   :  { %v6808_v35 = vpop.f32.mrb[51].mxu0 }
0x1051   :  { %v9117_v23 = vpop.f32.mrb[60].mxu1 }
0x1052   :  { %v9118_v37 = vpop.f32.mrb[61].mxu1 }
0x1053   :  { %v9119_v49 = vadd.f32 %v9118_v37, %v9117_v23  ;;  %v9120_v29 = vpop.f32.mrb[62].mxu1 }
0x1054   :  { %v9121_v40 = vpop.f32.mrb[63].mxu1 }
0x1055   :  { %v15472_v47 = vadd.f32 %v9119_v49, %v6805_v31  ;;  %v9122_v60 = vadd.f32 %v9121_v40, %v9120_v29 }
0x1057   :  { %v15474_v7 = vadd.f32 %v9122_v60, %v6808_v35  ;;  %v6936_v1 = vmul.f32 %v15472_v47, %v15472_v47 }
0x1059   :  { %v9123_v24 = vpop.f32.mrb[64].mxu1  ;;  %v6938_v34 = vmul.f32 %v15474_v7, %v15474_v7 }
0x105a   :  { %v9124_v38 = vpop.f32.mrb[65].mxu1 }
0x105b   :  { %v9125_v12 = vadd.f32 %v9124_v38, %v9123_v24  ;;  %v9126_v44 = vpop.f32.mrb[66].mxu1 }
0x105c   :  { %v9127_v46 = vpop.f32.mrb[67].mxu1 }
0x105d   :  { %v15476_v2 = vadd.f32 %v9179_v16, %v9125_v12  ;;  %v9128_v3 = vadd.f32 %v9127_v46, %v9126_v44 }
0x105f   :  { %v15478_v14 = vadd.f32 %v9180_v36, %v9128_v3  ;;  %v6940_v17 = vmul.f32 %v15476_v2, %v15476_v2 }
0x1061   :  { %v6942_v48 = vmul.f32 %v15478_v14, %v15478_v14 }
0x1062   :  { %v9191_v13 = vpop.f32.mrb[68].mxu1 }
0x1063   :  { %v6909_v0 = vpop.f32.mrb[69].mxu1 }
0x1064   :  { %v9192_v15 = vpop.f32.mrb[70].mxu1 }
0x1065   :  { %v6912_v28 = vpop.f32.mrb[71].mxu1 }
0x106d   :  { %v9151_v61 = vpop.f32.mrb[52].mxu0 }
0x106e   :  { %v9152_v43 = vpop.f32.mrb[53].mxu0 }
0x106f   :  { %v9153_v8 = vadd.f32 %v9152_v43, %v9151_v61  ;;  %v9154_v57 = vpop.f32.mrb[54].mxu0 }
0x1070   :  { %v9155_v45 = vpop.f32.mrb[55].mxu0 }
0x1071   :  { %v15480_v32 = vadd.f32 %v9153_v8, %v6909_v0  ;;  %v9156_v26 = vadd.f32 %v9155_v45, %v9154_v57 }
0x1073   :  { %v15482_v59 = vadd.f32 %v9156_v26, %v6912_v28  ;;  %v6924_v52 = vadd.f32 %v15480_v32, %v15472_v47  ;;  %v6937_v33 = vmul.f32 %v15480_v32, %v15480_v32 }
0x1075   :  { %6925 = vadd.xlane.f32.xlu1 %v6924_v52  ;;  %v9157_v25 = vpop.f32.mrb[56].mxu0  ;;  %v6927_v62 = vadd.f32 %v15482_v59, %v15474_v7  ;;  %v6939_v21 = vmul.f32 %v15482_v59, %v15482_v59  ;;  %v6944_v10 = vadd.f32 %v6937_v33, %v6936_v1  ;;  %v15521_v33 = vld [vmem:[%s15965_s2] sm:$0xff]  ;;  %v15529_v1 = vld [vmem:[%s15965_s2 + $0x10] sm:$0xff] }
0x1076   :  { %v9158_v51 = vpop.f32.mrb[57].mxu0 }
0x1077   :  { %v9159_v54 = vadd.f32 %v9158_v51, %v9157_v25  ;;  %6928 = vadd.xlane.f32.xlu0 %v6927_v62  ;;  %v9160_v30 = vpop.f32.mrb[58].mxu0  ;;  %v6947_v56 = vadd.f32 %v6939_v21, %v6938_v34  ;;  %v15515_v25 = vld [vmem:[%s15965_s2 + $0x8] sm:$0xff] }
0x1078   :  { %v9161_v22 = vpop.f32.mrb[59].mxu0 }
0x1079   :  { %v15496_v19 = vadd.f32 %v9191_v13, %v9159_v54  ;;  %v9162_v6 = vadd.f32 %v9161_v22, %v9160_v30  ;;  %6948 = vadd.xlane.f32.xlu1 %v6947_v56 }
0x107b   :  { %v15498_v4 = vadd.f32 %v9192_v15, %v9162_v6  ;;  %6945 = vadd.xlane.f32.xlu0 %v6944_v10  ;;  %v6930_v55 = vadd.f32 %v15496_v19, %v15476_v2  ;;  %v6941_v58 = vmul.f32 %v15496_v19, %v15496_v19  ;;  %v15535_v6 = vld [vmem:[%s15965_s2 + $0x18] sm:$0xff] }
0x107d   :  { %v6933_v20 = vadd.f32 %v15498_v4, %v15478_v14  ;;  %v6943_v39 = vmul.f32 %v15498_v4, %v15498_v4  ;;  %v6950_v5 = vadd.f32 %v6941_v58, %v6940_v17 }
0x107f   :  { %6934 = vadd.xlane.f32.xlu1 %v6933_v20  ;;  %6931 = vadd.xlane.f32.xlu0 %v6930_v55  ;;  %v6953_v18 = vadd.f32 %v6943_v39, %v6942_v48  ;;  %v10161_v39 = vmov 7  }
0x1083   :  { %6954 = vadd.xlane.f32.xlu1 %v6953_v18  ;;  %6951 = vadd.xlane.f32.xlu0 %v6950_v5 }
0x1102   :  { %v6926_v11 = vpop.xlane.xlu1 %6925 }
0x1103   :  { %v6957_v63 = vmul.f32 0.010204081, %v6926_v11 }
0x1104   :  { %v6929_v53 = vpop.xlane.xlu0 %6928 }
0x1105   :  { %v6958_v50 = vmul.f32 0.010204081, %v6929_v53  ;;  %v6965_v36 = vmul.f32 %v6957_v63, %v6957_v63 }
0x1106   :  { %v6949_v42 = vpop.xlane.xlu1 %6948 }
0x1107   :  { %v6966_v41 = vmul.f32 %v6958_v50, %v6958_v50  ;;  %v6962_v16 = vmul.f32 0.010204081, %v6949_v42 }
0x1108   :  { %v6946_v31 = vpop.xlane.xlu0 %6945 }
0x1109   :  { %v6970_v35 = vsub.f32 %v6962_v16, %v6966_v41  ;;  %v6961_v23 = vmul.f32 0.010204081, %v6946_v31  ;;  %v8915_v41 = vld [vmem:[%s15966_s3 + $0x1] ss:$0 sm:$0xff] }
0x110b   :  { %v6974_v37 = vmax.f32 %v6970_v35, 0.0  ;;  %v6969_v49 = vsub.f32 %v6961_v23, %v6965_v36 }
0x110c   :  { %v6932_v29 = vpop.xlane.xlu0 %6931  ;;  %v6935_v40 = vpop.xlane.xlu1 %6934 }
0x110d   :  { %v6978_v60 = vadd.f32 1e-05, %v6974_v37  ;;  %v6973_v24 = vmax.f32 %v6969_v49, 0.0  ;;  %v6959_v38 = vmul.f32 0.010204081, %v6932_v29 }
0x110e   :  { %v6960_v12 = vmul.f32 0.010204081, %v6935_v40 }
0x110f   :  { %9962 = vrsqrt.f32 %v6978_v60  ;;  %v6977_v44 = vadd.f32 1e-05, %v6973_v24  ;;  %v6967_v46 = vmul.f32 %v6959_v38, %v6959_v38 }
0x1110   :  { %v6952_v3 = vpop.xlane.xlu0 %6951  ;;  %v6955_v13 = vpop.xlane.xlu1 %6954  ;;  %v6968_v0 = vmul.f32 %v6960_v12, %v6960_v12 }
0x1111   :  { %9964 = vrsqrt.f32 %v6977_v44  ;;  %v6963_v15 = vmul.f32 0.010204081, %v6952_v3  ;;  %v6964_v28 = vmul.f32 0.010204081, %v6955_v13 }
0x1113   :  { %v6971_v61 = vsub.f32 %v6963_v15, %v6967_v46  ;;  %v6972_v43 = vsub.f32 %v6964_v28, %v6968_v0 }
0x1115   :  { %v6975_v8 = vmax.f32 %v6971_v61, 0.0  ;;  %v6976_v57 = vmax.f32 %v6972_v43, 0.0 }
0x1117   :  { %v6979_v45 = vadd.f32 1e-05, %v6975_v8  ;;  %v6980_v26 = vadd.f32 1e-05, %v6976_v57 }
0x1119   :  { %v9963_v52 = vpop.eup %9962  ;;  %9966 = vrsqrt.f32 %v6979_v45 }
0x111a   :  { %9968 = vrsqrt.f32 %v6980_v26  ;;  %v6986_v62 = vmul.f32 %v15515_v25, %v9963_v52 }
0x111b   :  { %v9965_v34 = vpop.eup %9964 }
0x111c   :  { %v6990_v21 = vmul.f32 %v6986_v62, %v6958_v50  ;;  %v6985_v51 = vmul.f32 %v15521_v33, %v9965_v34 }
0x111e   :  { %6999 = vrot.lane.b32.xlu1 %v6990_v21, %s10143_s18  ;;  %v6989_v54 = vmul.f32 %v6985_v51, %v6957_v63 }
0x1120   :  { %6997 = vrot.lane.b32.xlu0 %v6989_v54, %s10143_s18  ;;  %v15589_v54 = vld [vmem:[#allocation2 + $0x14] sm:$0xff] }
0x1123   :  { %v9967_v30 = vpop.eup %9966 }
0x1124   :  { %v9969_v56 = vpop.eup %9968  ;;  %v6987_v22 = vmul.f32 %v15529_v1, %v9967_v30  ;;  %v15591_v30 = vld [vmem:[#allocation2 + $0x34] sm:$0xff] }
0x1125   :  { %v6988_v10 = vmul.f32 %v15535_v6, %v9969_v56  ;;  %v8916_v56 = vcombine.low %v15589_v54, %v15591_v30 }
0x1126   :  { %v6991_v20 = vmul.f32 %v6987_v22, %v6959_v38 }
0x1127   :  { %v6992_v55 = vmul.f32 %v6988_v10, %v6960_v12 }
0x1128   :  { %7001 = vrot.lane.b32.xlu1 %v6991_v20, %s10143_s18  ;;  %v7819_v20 = vld [vmem:[#allocation7] sm:$0xff] }
0x1129   :  { %7003 = vrot.lane.b32.xlu0 %v6992_v55, %s10143_s18  ;;  %v7835_v55 = vld [vmem:[#allocation7 + $0x80] sm:$0x11] }
0x112c   :  { %7015 = vperm.xlu1 %9686, %v6985_v51  }
0x112d   :  { %7020 = vperm.xlu0 %9687, %v6986_v62  }
0x1130   :  { %7030 = vperm.xlu1 %9686, %v6988_v10   ;;  %v10166_v10 = vmov 3  }
0x1131   :  { %7025 = vperm.xlu0 %9687, %v6987_v22   ;;  %v8917_v22 = vcombine.high %v15589_v54, %v15591_v30  ;;  %v81_v54 = vld [vmem:[#allocation2 + $0x1c] sm:$0xf] }
0x1132   :  { %v83_v30 = vld [vmem:[#allocation2 + $0x3c] sm:$0xf] }
0x1133   :  { %7361 = vmatprep.mubr.bf16.mxu1 %v8917_v22 }
0x1134   :  { %9688 = vset.pattern.permute.xlu1 %v10161_v39 }
0x1135   :  { %9689 = vset.pattern.permute.xlu0 %v10161_v39  ;;  %v8937_v39 = vcombine.low %v7819_v20, %v7835_v55 }
0x1190   :  { %v7000_v17 = vpop.permute.xlu1 %6999 }
0x1191   :  { %v7010_v18 = vsub.f32 %v15515_v25, %v7000_v17 }
0x1192   :  { %v6998_v58 = vpop.permute.xlu0 %6997 }
0x1193   :  { %v7009_v48 = vsub.f32 %v15521_v33, %v6998_v58  ;;  %v8938_v58 = vcombine.high %v7819_v20, %v7835_v55 }
0x1195   :  { %7047 = vperm.xlu1 %9688, %v7009_v48   ;;  %8015 = vmatprep.subr.bf16.mxu0 %v8938_v58 }
0x1196   :  { %8016 = vmatpush1.bf16.xpose.msra.mxu0 %v8937_v39 }
0x1199   :  { %7052 = vperm.xlu1 %9688, %v7010_v18  }
0x119a   :  { %v7002_v5 = vpop.permute.xlu1 %7001 }
0x119b   :  { %v7004_v27 = vpop.permute.xlu0 %7003  ;;  %v7011_v11 = vsub.f32 %v15529_v1, %v7002_v5 }
0x119c   :  { %v7012_v53 = vsub.f32 %v15535_v6, %v7004_v27 }
0x119d   :  { %7057 = vperm.xlu0 %9689, %v7011_v11  }
0x119e   :  { %7062 = vperm.xlu1 %9688, %v7012_v53  }
0x11a1   :  { %9691 = vset.pattern.permute.xlu0 %v10166_v10 }
0x11a2   :  { %9690 = vset.pattern.permute.xlu1 %v10166_v10 }
0x11ab   :  { %v7016_v63 = vpop.permute.xlu1 %7015 }
0x11ac   :  { %v7021_v42 = vpop.permute.xlu0 %7020  ;;  %v7033_v36 = vmul.f32 %v7016_v63, %v15472_v47  ;;  %v7034_v29 = vmul.f32 %v7016_v63, %v15480_v32 }
0x11ad   :  { %v7035_v37 = vmul.f32 %v7021_v42, %v15474_v7  ;;  %v7036_v49 = vmul.f32 %v7021_v42, %v15482_v59 }
0x11af   :  { %v7031_v50 = vpop.permute.xlu1 %7030 }
0x11b0   :  { %v7026_v35 = vpop.permute.xlu0 %7025  ;;  %v7039_v7 = vmul.f32 %v7031_v50, %v15478_v14  ;;  %v7040_v59 = vmul.f32 %v7031_v50, %v15498_v4 }
0x11b1   :  { %v7037_v44 = vmul.f32 %v7026_v35, %v15476_v2  ;;  %v7038_v3 = vmul.f32 %v7026_v35, %v15496_v19 }
0x1214   :  { %v7048_v16 = vpop.permute.xlu1 %7047 }
0x1215   :  { %v7065_v31 = vmul.f32 %v8915_v41, %v7048_v16 }
0x1217   :  { %v7069_v60 = vadd.f32 %v7065_v31, %v7033_v36  ;;  %v7070_v24 = vadd.f32 %v7065_v31, %v7034_v29 }
0x1218   :  { %v7053_v23 = vpop.permute.xlu1 %7052 }
0x1219   :  { %v7066_v40 = vmul.f32 %v8915_v41, %v7053_v23 }
0x121b   :  { %v7071_v38 = vadd.f32 %v7066_v40, %v7035_v37  ;;  %v7072_v12 = vadd.f32 %v7066_v40, %v7036_v49 }
0x121c   :  { %v7058_v46 = vpop.permute.xlu0 %7057 }
0x121d   :  { %v7077_v13 = vpack.c.bf16 %v7071_v38, %v7069_v60  ;;  %v7078_v47 = vpack.c.bf16 %v7072_v12, %v7070_v24  ;;  %v7067_v0 = vmul.f32 %v8915_v41, %v7058_v46  ;;  %v7063_v15 = vpop.permute.xlu1 %7062 }
0x121e   :  { %v7068_v28 = vmul.f32 %v8915_v41, %v7063_v15 }
0x121f   :  { %v7073_v32 = vadd.f32 %v7067_v0, %v7037_v44  ;;  %v7074_v61 = vadd.f32 %v7067_v0, %v7038_v3  ;;  %7087 = vrot.lane.b32.xlu0 %v7078_v47, %s10162_s26  ;;  %7085 = vrot.lane.b32.xlu1 %v7077_v13, %s10162_s26 }
0x1220   :  { %v7075_v43 = vadd.f32 %v7068_v28, %v7039_v7  ;;  %v7076_v8 = vadd.f32 %v7068_v28, %v7040_v59 }
0x1222   :  { %v7079_v2 = vpack.c.bf16 %v7075_v43, %v7073_v32  ;;  %v7080_v57 = vpack.c.bf16 %v7076_v8, %v7074_v61 }
0x1224   :  { %7091 = vrot.lane.b32.xlu0 %v7080_v57, %s10162_s26  ;;  %7089 = vrot.lane.b32.xlu1 %v7079_v2, %s10162_s26 }
0x1291   :  { %v7088_v19 = vpop.permute.xlu0 %7087  ;;  %v7086_v45 = vpop.permute.xlu1 %7085 }
0x1292   :  { %v15556_v26 = vsel %vm7093_vm4, %v7088_v19, 0  ;;  %v7094_v14 = vsel %vm7093_vm4, %v7086_v45, %v7088_v19  ;;  %v7100_v4 = vsel %vm7093_vm4, 0, %v7086_v45 }
0x1293   :  { %7117 = vrot.lane.b32.xlu0 %v15556_v26, %s10123_s22  ;;  %7115 = vrot.lane.b32.xlu1 %v7094_v14, %s10123_s22 }
0x1294   :  { %7329 = vmatprep.subr.bf16.mxu1 %v7094_v14 }
0x1295   :  { %8923 = vmatpush1.bf16.msk.msra.mxu1 %vm8922_vm10, %v7086_v45 }
0x1296   :  { %v7092_v52 = vpop.permute.xlu0 %7091  ;;  %v7090_v62 = vpop.permute.xlu1 %7089 }
0x1297   :  { %v7095_v34 = vsel %vm7093_vm4, %v7090_v62, %v7092_v52  ;;  %7137 = vrot.lane.b32.xlu0 %v15556_v26, %s10124_s23  ;;  %7113 = vrot.lane.b32.xlu1 %v7100_v4, %s10123_s22  ;;  %v7103_v21 = vsel %vm7093_vm4, 0, %v7090_v62  ;;  %v7108_v51 = vsel %vm7093_vm4, %v7092_v52, 0  ;;  %vm7207_vm4 = vcmask 957440  }
0x1298   :  { %7331 = vmatprep.subr.bf16.mxu1 %v7095_v34 }
0x1299   :  { %8925 = vmatpush1.bf16.msk.msra.mxu1 %vm8922_vm10, %v7090_v62 }
0x129b   :  { %7157 = vrot.lane.b32.xlu0 %v15556_v26, %s10163_s28  ;;  %7135 = vrot.lane.b32.xlu1 %v7094_v14, %s10124_s23 }
0x129f   :  { %7178 = vrot.lane.b32.xlu0 %v15556_v26, %s10164_s8  ;;  %7133 = vrot.lane.b32.xlu1 %v7100_v4, %s10124_s23 }
0x12a3   :  { %7155 = vrot.lane.b32.xlu1 %v7094_v14, %s10163_s28  ;;  %7121 = vrot.lane.b32.xlu0 %v7095_v34, %s10123_s22 }
0x12a7   :  { %7153 = vrot.lane.b32.xlu1 %v7100_v4, %s10163_s28  ;;  %7199 = vrot.lane.b32.xlu0 %v15556_v26, %s10165_s10 }
0x12ab   :  { %7176 = vrot.lane.b32.xlu1 %v7094_v14, %s10164_s8  ;;  %7119 = vrot.lane.b32.xlu0 %v7103_v21, %s10123_s22 }
0x12af   :  { %7174 = vrot.lane.b32.xlu1 %v7100_v4, %s10164_s8  ;;  %7141 = vrot.lane.b32.xlu0 %v7095_v34, %s10124_s23 }
0x12b3   :  { %7123 = vrot.lane.b32.xlu1 %v7108_v51, %s10123_s22  ;;  %7139 = vrot.lane.b32.xlu0 %v7103_v21, %s10124_s23 }
0x12b7   :  { %7197 = vrot.lane.b32.xlu1 %v7094_v14, %s10165_s10  ;;  %7161 = vrot.lane.b32.xlu0 %v7095_v34, %s10163_s28 }
0x12bb   :  { %7143 = vrot.lane.b32.xlu1 %v7108_v51, %s10124_s23  ;;  %7220 = vrot.lane.b32.xlu0 %v15556_v26, %s10150_s27 }
0x12bf   :  { %7195 = vrot.lane.b32.xlu1 %v7100_v4, %s10165_s10  ;;  %7159 = vrot.lane.b32.xlu0 %v7103_v21, %s10163_s28 }
0x12c3   :  { %7163 = vrot.lane.b32.xlu1 %v7108_v51, %s10163_s28  ;;  %7182 = vrot.lane.b32.xlu0 %v7095_v34, %s10164_s8 }
0x12c7   :  { %7218 = vrot.lane.b32.xlu1 %v7094_v14, %s10150_s27  ;;  %7180 = vrot.lane.b32.xlu0 %v7103_v21, %s10164_s8 }
0x12cb   :  { %7184 = vrot.lane.b32.xlu1 %v7108_v51, %s10164_s8  ;;  %7203 = vrot.lane.b32.xlu0 %v7095_v34, %s10165_s10 }
0x12cf   :  { %7216 = vrot.lane.b32.xlu1 %v7100_v4, %s10150_s27  ;;  %7240 = vrot.lane.b32.xlu0 %v15556_v26, %s10146_s24 }
0x12d3   :  { %7205 = vrot.lane.b32.xlu1 %v7108_v51, %s10165_s10  ;;  %7201 = vrot.lane.b32.xlu0 %v7103_v21, %s10165_s10 }
0x12d7   :  { %7238 = vrot.lane.b32.xlu1 %v7094_v14, %s10146_s24  ;;  %7224 = vrot.lane.b32.xlu0 %v7095_v34, %s10150_s27 }
0x12db   :  { %7226 = vrot.lane.b32.xlu1 %v7108_v51, %s10150_s27  ;;  %7222 = vrot.lane.b32.xlu0 %v7103_v21, %s10150_s27 }
0x12df   :  { %7236 = vrot.lane.b32.xlu1 %v7100_v4, %s10146_s24  ;;  %7244 = vrot.lane.b32.xlu0 %v7095_v34, %s10146_s24 }
0x12e3   :  { %7246 = vrot.lane.b32.xlu1 %v7108_v51, %s10146_s24  ;;  %7242 = vrot.lane.b32.xlu0 %v7103_v21, %s10146_s24  ;;  %s10167_s24 = smov [#allocation8]  }
0x12e4   :  { %s8663_s27 = sshll.u32 %s10167_s24, 4  ;;  %s8664_s27 = int_to_ptr.vmem [resolvable:$true] %s8663_s27 }
0x12e5   :  { %p10090_p11 = scmp.lt.s32.totalorder %s8664_s27, %s8664_s27 }
0x12e7   :  { %7258 = vrot.lane.b32.xlu1 %v7094_v14, %s10151_s30  ;;  %7260 = vrot.lane.b32.xlu0 %v15556_v26, %s10151_s30 }
0x12eb   :  { %7256 = vrot.lane.b32.xlu1 %v7100_v4, %s10151_s30  ;;  %7264 = vrot.lane.b32.xlu0 %v7095_v34, %s10151_s30 }
0x12ef   :  { %7266 = vrot.lane.b32.xlu1 %v7108_v51, %s10151_s30  ;;  %7262 = vrot.lane.b32.xlu0 %v7103_v21, %s10151_s30  ;;  %s10085_s30 = scalar_lea.vmem %s8664_s27, 32 }
0x12f0   :  { %p10086_p10 = scmp.ne.s32.totalorder %s8664_s27, %s10085_s30  ;;  %p10091_p12 = scmp.lt.s32.totalorder %s10085_s30, %s10085_s30 }
0x12f2   :  { %p10092_p13 = por %p10091_p12, %p10090_p11 }
0x12f3   :  { %7277 = vperm.xlu1 %9690, %v15521_v33   ;;  %7281 = vperm.xlu0 %9691, %v15515_v25  }
0x12f4   :  { %p10093_p0 = pnand %p10092_p13, %p10086_p10 }
0x12f7   :  { %7285 = vperm.xlu1 %9690, %v15529_v1  }
0x12fb   :  { %7289 = vperm.xlu1 %9690, %v15535_v6  }
0x1305   :  { %v7118_v48 = vpop.permute.xlu0 %7117  ;;  %v7116_v17 = vpop.permute.xlu1 %7115 }
0x1306   :  { %v7126_v18 = vsel %vm17146_vm14, %v7116_v17, %v7118_v48 }
0x1307   :  { %7333 = vmatprep.subr.bf16.mxu1 %v7126_v18 }
0x1309   :  { %v7138_v5 = vpop.permute.xlu0 %7137  ;;  %v7114_v27 = vpop.permute.xlu1 %7113 }
0x130a   :  { %v7125_v11 = vsel %vm17147_vm8, %v7114_v27, %v7116_v17 }
0x130b   :  { %7334 = vmatpush1.bf16.msra.mxu1 %v7125_v11 }
0x130d   :  { %v7158_v33 = vpop.permute.xlu0 %7157  ;;  %v7136_v25 = vpop.permute.xlu1 %7135 }
0x130e   :  { %v7146_v29 = vsel %vm17149_vm3, %v7136_v25, %v7138_v5 }
0x1311   :  { %v7179_v53 = vpop.permute.xlu0 %7178  ;;  %v7134_v63 = vpop.permute.xlu1 %7133 }
0x1312   :  { %v7145_v24 = vsel %vm17150_vm13, %v7134_v63, %v7136_v25  ;;  %v86_v63 = vld [vmem:[#allocation2 + $0x74] sm:$0xff] }
0x1315   :  { %v7122_v50 = vpop.permute.xlu0 %7121  ;;  %v7156_v42 = vpop.permute.xlu1 %7155 }
0x1316   :  { %v7167_v3 = vsel %vm7165_vm7, %v7156_v42, %v7158_v33 }
0x1319   :  { %v7200_v41 = vpop.permute.xlu0 %7199  ;;  %v7154_v1 = vpop.permute.xlu1 %7153 }
0x131a   :  { %v7166_v0 = vsel %vm7165_vm7, %v7154_v1, %v7156_v42 }
0x131d   :  { %v7120_v16 = vpop.permute.xlu0 %7119  ;;  %v7177_v6 = vpop.permute.xlu1 %7176 }
0x131e   :  { %v7127_v49 = vsel %vm17140_vm0, %v7120_v16, %v7122_v50  ;;  %v7188_v32 = vsel %vm7186_vm11, %v7177_v6, %v7179_v53  ;;  %v84_v53 = vld [vmem:[#allocation2 + $0x54] sm:$0xff] }
0x1321   :  { %v7142_v31 = vpop.permute.xlu0 %7141  ;;  %v7175_v36 = vpop.permute.xlu1 %7174 }
0x1322   :  { %v7187_v8 = vsel %vm7186_vm11, %v7175_v36, %v7177_v6 }
0x1325   :  { %v7140_v35 = vpop.permute.xlu0 %7139  ;;  %v7124_v23 = vpop.permute.xlu1 %7123 }
0x1326   :  { %v7128_v37 = vsel %vm17148_vm1, %v7122_v50, %v7124_v23  ;;  %v7147_v46 = vsel %vm17152_vm2, %v7140_v35, %v7142_v31  ;;  %v8919_v23 = vcombine.low %v84_v53, %v86_v63 }
0x1327   :  { %7335 = vmatprep.subr.bf16.mxu1 %v7128_v37 }
0x1328   :  { %7336 = vmatpush1.bf16.msra.mxu1 %v7127_v49 }
0x1329   :  { %v7162_v40 = vpop.permute.xlu0 %7161  ;;  %7337 = vmatprep.subr.bf16.mxu1 %v7146_v29  ;;  %v7198_v60 = vpop.permute.xlu1 %7197 }
0x132a   :  { %v7209_v26 = vsel %vm7207_vm4, %v7198_v60, %v7200_v41  ;;  %v8920_v41 = vcombine.high %v84_v53, %v86_v63  ;;  %v17158_v53 = vld [vmem:[#allocation12_spill] sm:$0xff] }
0x132c   :  { %7338 = vmatpush1.bf16.msra.mxu1 %v7145_v24  ;;  %v87_v24 = vld [vmem:[#allocation2 + $0x7c] sm:$0xf] }
0x132d   :  { %v7221_v38 = vpop.permute.xlu0 %7220  ;;  %v7144_v12 = vpop.permute.xlu1 %7143 }
0x132e   :  { %v7148_v44 = vsel %vm17151_vm5, %v7142_v31, %v7144_v12  ;;  %v15653_v12 = vld [vmem:[#allocation7 + $0x8] sm:$0xff] }
0x132f   :  { %7339 = vmatprep.subr.bf16.mxu1 %v7148_v44  ;;  %v7836_v44 = vld [vmem:[#allocation7 + $0x88] sm:$0x11] }
0x1330   :  { %7340 = vmatpush1.bf16.msra.mxu1 %v7147_v46  ;;  %v8939_v46 = vcombine.low %v15653_v12, %v7836_v44 }
0x1331   :  { %v7160_v13 = vpop.permute.xlu0 %7159  ;;  %7341 = vmatprep.subr.bf16.mxu1 %v7167_v3  ;;  %v7196_v47 = vpop.permute.xlu1 %7195  ;;  %v8940_v3 = vcombine.high %v15653_v12, %v7836_v44 }
0x1332   :  { %v7168_v28 = vsel %vm7165_vm7, %v7160_v13, %v7162_v40  ;;  %v7208_v52 = vsel %vm7207_vm4, %v7196_v47, %v7198_v60  ;;  %v85_v60 = vld [vmem:[#allocation2 + $0x5c] sm:$0xf] }
0x1333   :  { %8055 = vmatprep.subr.bf16.mxu0 %v8940_v3 }
0x1334   :  { %7342 = vmatpush1.bf16.msra.mxu1 %v7166_v0 }
0x1335   :  { %v7183_v15 = vpop.permute.xlu0 %7182  ;;  %v7164_v7 = vpop.permute.xlu1 %7163 }
0x1336   :  { %v7169_v59 = vsel %vm7165_vm7, %v7162_v40, %v7164_v7 }
0x1337   :  { %7343 = vmatprep.subr.bf16.mxu1 %v7169_v59 }
0x1338   :  { %7344 = vmatpush1.bf16.msra.mxu1 %v7168_v28  ;;  %v15657_v28 = vld [vmem:[#allocation7 + $0x10] sm:$0xff] }
0x1339   :  { %v7181_v61 = vpop.permute.xlu0 %7180  ;;  %7345 = vmatprep.subr.bf16.mxu1 %v7188_v32  ;;  %v7219_v43 = vpop.permute.xlu1 %7218  ;;  %v15659_v32 = vld [vmem:[#allocation7 + $0x90] sm:$0x11] }
0x133a   :  { %v7189_v45 = vsel %vm7186_vm11, %v7181_v61, %v7183_v15  ;;  %v7229_v22 = vsel %vm5128_vm12, %v7219_v43, %v7221_v38  ;;  %v8921_v38 = vcombine.low %v85_v60, %v87_v24  ;;  %v17161_v60 = vld [vmem:[#allocation17_spill] sm:$0xff] }
0x133c   :  { %7346 = vmatpush1.bf16.msra.mxu1 %v7187_v8 }
0x133d   :  { %v7204_v2 = vpop.permute.xlu0 %7203  ;;  %v7185_v57 = vpop.permute.xlu1 %7184 }
0x133e   :  { %v7190_v19 = vsel %vm7186_vm11, %v7183_v15, %v7185_v57  ;;  %v15663_v57 = vld [vmem:[#allocation7 + $0x98] sm:$0x11] }
0x133f   :  { %7347 = vmatprep.subr.bf16.mxu1 %v7190_v19 }
0x1340   :  { %7348 = vmatpush1.bf16.msra.mxu1 %v7189_v45 }
0x1341   :  { %v7241_v14 = vpop.permute.xlu0 %7240  ;;  %7349 = vmatprep.subr.bf16.mxu1 %v7209_v26  ;;  %v7217_v4 = vpop.permute.xlu1 %7216 }
0x1342   :  { %v7228_v55 = vsel %vm5128_vm12, %v7217_v4, %v7219_v43 }
0x1344   :  { %7350 = vmatpush1.bf16.msra.mxu1 %v7208_v52  ;;  %v8941_v52 = vcombine.low %v15657_v28, %v15659_v32 }
0x1345   :  { %v7202_v62 = vpop.permute.xlu0 %7201  ;;  %v7206_v34 = vpop.permute.xlu1 %7205 }
0x1346   :  { %v7210_v21 = vsel %vm7207_vm4, %v7202_v62, %v7204_v2  ;;  %v7211_v51 = vsel %vm7207_vm4, %v7204_v2, %v7206_v34  ;;  %v15661_v2 = vld [vmem:[#allocation7 + $0x18] sm:$0xff] }
0x1347   :  { %7351 = vmatprep.subr.bf16.mxu1 %v7211_v51  ;;  %v8944_v51 = vcombine.high %v15661_v2, %v15663_v57 }
0x1348   :  { %7352 = vmatpush1.bf16.msra.mxu1 %v7210_v21  ;;  %v8942_v21 = vcombine.high %v15657_v28, %v15659_v32 }
0x1349   :  { %v7225_v10 = vpop.permute.xlu0 %7224  ;;  %7353 = vmatprep.subr.bf16.mxu1 %v7229_v22  ;;  %v7239_v20 = vpop.permute.xlu1 %7238 }
0x134a   :  { %v7249_v18 = vsel %vm5149_vm15, %v7239_v20, %v7241_v14 }
0x134c   :  { %7354 = vmatpush1.bf16.msra.mxu1 %v7228_v55  ;;  %v17156_v55 = vld [vmem:[#allocation13_spill] sm:$0xff] }
0x134d   :  { %v7223_v39 = vpop.permute.xlu0 %7222  ;;  %v7227_v58 = vpop.permute.xlu1 %7226 }
0x134e   :  { %v7230_v48 = vsel %vm5128_vm12, %v7223_v39, %v7225_v10  ;;  %v7231_v17 = vsel %vm5128_vm12, %v7225_v10, %v7227_v58  ;;  %vm17153_vm12 = vcmask 261120   ;;  %v17155_v10 = vld [vmem:[#allocation15_spill] sm:$0xff]  ;;  %v17157_v58 = vld [vmem:[#allocation14_spill] sm:$0xff] }
0x134f   :  { %7355 = vmatprep.subr.bf16.mxu1 %v7231_v17 }
0x1350   :  { %7356 = vmatpush1.bf16.msra.mxu1 %v7230_v48 }
0x1351   :  { %v7245_v5 = vpop.permute.xlu0 %7244  ;;  %7357 = vmatprep.subr.bf16.mxu1 %v7249_v18  ;;  %v7237_v27 = vpop.permute.xlu1 %7236 }
0x1352   :  { %v7248_v11 = vsel %vm5149_vm15, %v7237_v27, %v7239_v20 }
0x1354   :  { %7358 = vmatpush1.bf16.msra.mxu1 %v7248_v11 }
0x1355   :  { %v7243_v33 = vpop.permute.xlu0 %7242  ;;  %v7247_v25 = vpop.permute.xlu1 %7246 }
0x1356   :  { %v7250_v50 = vsel %vm5149_vm15, %v7243_v33, %v7245_v5  ;;  %v7251_v42 = vsel %vm5149_vm15, %v7245_v5, %v7247_v25  ;;  %vm17154_vm15 = vmmov %vm17153_vm12 }
0x1357   :  { %7359 = vmatprep.subr.bf16.mxu1 %v7251_v42  ;;  %v17159_v42 = vld [vmem:[#allocation16_spill] sm:$0xff] }
0x1358   :  { %7360 = vmatpush1.bf16.msra.mxu1 %v7250_v50 }
0x1359   :  { %v7261_v1 = vpop.permute.xlu0 %7260  ;;  %v7259_v16 = vpop.permute.xlu1 %7258 }
0x135a   :  { %v7269_v6 = vsel %vm5170_vm9, %v7259_v16, %v7261_v1 }
0x135b   :  { %7362 = vmatmul.mubr.bf16.vlgmr.msra.gmra.mrb[72].mxu1 %v8916_v56  ;;  %7382 = vmatprep.subr.bf16.mxu1 %v7269_v6  ;;  %v8918_v56 = vcombine.low %v81_v54, %v83_v30 }
0x135c   :  { %7371 = vmatprep.mubr.bf16.mxu1 %v8920_v41 }
0x135d   :  { %v7265_v31 = vpop.permute.xlu0 %7264  ;;  %v7257_v36 = vpop.permute.xlu1 %7256 }
0x135e   :  { %v7268_v35 = vsel %vm5170_vm9, %v7257_v36, %v7259_v16 }
0x135f   :  { %7383 = vmatpush1.bf16.msra.mxu1 %v7268_v35 }
0x1361   :  { %v7263_v37 = vpop.permute.xlu0 %7262  ;;  %v7267_v49 = vpop.permute.xlu1 %7266 }
0x1362   :  { %v7270_v29 = vsel %vm5170_vm9, %v7263_v37, %v7265_v31  ;;  %v7271_v40 = vsel %vm5170_vm9, %v7265_v31, %v7267_v49 }
0x1363   :  { %7372 = vmatmul.mubr.bf16.gmra.mrb[76].mxu1 %v8919_v23  ;;  %7384 = vmatprep.subr.bf16.mxu1 %v7271_v40 }
0x1364   :  { %7385 = vmatpush1.bf16.msra.mxu1 %v7270_v29  ;;  %7414 = vmatprep.mubr.bf16.mxu1 %v17135_v9 }
0x136b   :  { %8926 = vmatmul.mubr.msk.bf16.vlgmr.msra.gmra.mrb[72].mxu1 %vm17153_vm12, %v8918_v56 }
0x136c   :  { %7424 = vmatprep.mubr.bf16.mxu1 %v17135_v9 }
0x1372   :  { %v7278_v13 = vpop.permute.xlu1 %7277  ;;  %v7282_v0 = vpop.permute.xlu0 %7281 }
0x1373   :  { %8927 = vmatmul.mubr.msk.bf16.gmra.mrb[76].mxu1 %vm17154_vm15, %v8921_v38 }
0x1376   :  { %v7286_v45 = vpop.permute.xlu1 %7285 }
0x137a   :  { %v7290_v1 = vpop.permute.xlu1 %7289 }
0x143e   :  { %v7416_v47 = vpop.f32.mrb[72].mxu1 }
0x143f   :  { %v9193_v15 = vadd.f32 %v7416_v47, %v7278_v13  ;;  %v7418_v7 = vpop.f32.mrb[73].mxu1 }
0x1440   :  { %v9194_v59 = vadd.f32 %v7418_v7, %v7278_v13  ;;  %v7420_v9 = vpop.f32.mrb[74].mxu1  ;;  %v17162_v13 = vld [vmem:[#allocation18_spill] sm:$0xff] }
0x1441   :  { %v7435_v61 = vmax.f32 %v9193_v15, 0.0  ;;  %v9195_v43 = vadd.f32 %v7420_v9, %v7282_v0  ;;  %v7422_v8 = vpop.f32.mrb[75].mxu1 }
0x1442   :  { %v7436_v19 = vmax.f32 %v9194_v59, 0.0  ;;  %v9196_v26 = vadd.f32 %v7422_v8, %v7282_v0 }
0x1443   :  { %v8928_v14 = vpack.i.bf16 %v7435_v61, %v7435_v61  ;;  %v7437_v4 = vmax.f32 %v9195_v43, 0.0  ;;  %v17163_v61 = vld [vmem:[#allocation19_spill] sm:$0xff] }
0x1444   :  { %v8932_v62 = vpack.i.bf16 %v7436_v19, %v7436_v19  ;;  %v7438_v34 = vmax.f32 %v9196_v26, 0.0 }
0x1445   :  { %v15671_v22 = vpack.i.bf16 %v7437_v4, %v7437_v4  ;;  %v7464_v20 = vrot.slane %v8928_v14, %v17155_v10  ;;  %v7460_v39 = vrot.slane %v8928_v14, %v17156_v55  ;;  %v7472_v48 = vrot.slane %v8928_v14, %v17157_v58 }
0x1446   :  { %v15676_v17 = vpack.i.bf16 %v7438_v34, %v7438_v34  ;;  %v7426_v18 = vpop.f32.mrb[76].mxu1  ;;  %v7634_v5 = vrot.slane %v8932_v62, %v17155_v10  ;;  %v7630_v27 = vrot.slane %v8932_v62, %v17156_v55  ;;  %v7642_v11 = vrot.slane %v8932_v62, %v17157_v58 }
0x1447   :  { %v9197_v33 = vadd.f32 %v7426_v18, %v7286_v45  ;;  %v7428_v25 = vpop.f32.mrb[77].mxu1  ;;  %v7468_v63 = vrot.slane %v8928_v14, %v17158_v53  ;;  %v7638_v50 = vrot.slane %v8932_v62, %v17158_v53  ;;  %v7480_v41 = vrot.slane %v8928_v14, %v17159_v42 }
0x1448   :  { %v9198_v16 = vadd.f32 %v7428_v25, %v7286_v45  ;;  %v7430_v6 = vpop.f32.mrb[78].mxu1  ;;  %v7788_v36 = vsel %vm10806_vm6, %v7464_v20, %v7634_v5  ;;  %v7787_v35 = vsel %vm10806_vm6, %v7460_v39, %v7630_v27  ;;  %v7790_v23 = vsel %vm10806_vm6, %v7472_v48, %v7642_v11 }
0x1449   :  { %v7439_v37 = vmax.f32 %v9197_v33, 0.0  ;;  %v9199_v49 = vadd.f32 %v7430_v6, %v7290_v1  ;;  %v7432_v29 = vpop.f32.mrb[79].mxu1  ;;  %8047 = vmatprep.mubr.bf16.mxu0 %v7788_v36  ;;  %v7789_v40 = vsel %vm10806_vm6, %v7468_v63, %v7638_v50  ;;  %v7650_v54 = vrot.slane %v8932_v62, %v17159_v42 }
0x144a   :  { %v7440_v30 = vmax.f32 %v9198_v16, 0.0  ;;  %v9200_v56 = vadd.f32 %v7432_v29, %v7290_v1  ;;  %8048 = vmatmul.mubr.bf16.vlgmr.msra.gmra.mrb[60].mxu0 %v7787_v35  ;;  %v7476_v24 = vrot.slane %v8928_v14, %v17161_v60  ;;  %v7646_v38 = vrot.slane %v8932_v62, %v17161_v60 }
0x144b   :  { %v15695_v12 = vpack.i.bf16 %v7439_v37, %v7439_v37  ;;  %v7441_v44 = vmax.f32 %v9199_v49, 0.0  ;;  %8087 = vmatprep.mubr.bf16.mxu0 %v7790_v23  ;;  %8056 = vmatpush1.bf16.xpose.msra.mxu0 %v8939_v46  ;;  %v7792_v3 = vsel %vm10806_vm6, %v7480_v41, %v7650_v54  ;;  %v7488_v47 = vrot.slane %v8928_v14, %v17162_v13 }
0x144c   :  { %v15700_v0 = vpack.i.bf16 %v7440_v30, %v7440_v30  ;;  %v7442_v15 = vmax.f32 %v9200_v56, 0.0  ;;  %8095 = vmatprep.subr.bf16.mxu0 %v8942_v21  ;;  %v15704_v7 = vsel %vm10806_vm6, %v7476_v24, %v7646_v38  ;;  %v7658_v59 = vrot.slane %v8932_v62, %v17162_v13 }
0x144d   :  { %v15707_v9 = vpack.i.bf16 %v7441_v44, %v7441_v44  ;;  %v7484_v43 = vrot.slane %v8928_v14, %v17163_v61  ;;  %v7654_v46 = vrot.slane %v8932_v62, %v17163_v61  ;;  %v7496_v8 = vrot.slane %v15671_v22, %v17155_v10 }
0x144e   :  { %v15713_v19 = vpack.i.bf16 %v7442_v15, %v7442_v15  ;;  %v15717_v45 = vsel %vm10806_vm6, %v7488_v47, %v7658_v59  ;;  %v7666_v26 = vrot.slane %v15676_v17, %v17155_v10  ;;  %v7492_v4 = vrot.slane %v15671_v22, %v17156_v55 }
0x144f   :  { %v15725_v14 = vsel %vm10806_vm6, %v7484_v43, %v7654_v46  ;;  %v7662_v62 = vrot.slane %v15676_v17, %v17156_v55  ;;  %v7504_v34 = vrot.slane %v15671_v22, %v17157_v58  ;;  %v7674_v21 = vrot.slane %v15676_v17, %v17157_v58  ;;  %v7823_v46 = vld [vmem:[#allocation7 + $0x20] sm:$0xff] }
0x1450   :  { %v15735_v20 = vsel %vm10806_vm6, %v7496_v8, %v7666_v26  ;;  %v7500_v39 = vrot.slane %v15671_v22, %v17158_v53  ;;  %v7670_v48 = vrot.slane %v15676_v17, %v17158_v53  ;;  %v7512_v18 = vrot.slane %v15671_v22, %v17159_v42  ;;  %v7839_v8 = vld [vmem:[#allocation7 + $0xa0] sm:$0x11] }
0x1451   :  { %v15745_v5 = vsel %vm10806_vm6, %v7492_v4, %v7662_v62  ;;  %v15749_v27 = vsel %vm10806_vm6, %v7504_v34, %v7674_v21  ;;  %v7682_v11 = vrot.slane %v15676_v17, %v17159_v42  ;;  %v7508_v33 = vrot.slane %v15671_v22, %v17161_v60 }
0x1452   :  { %v15757_v25 = vsel %vm10806_vm6, %v7500_v39, %v7670_v48  ;;  %v7678_v63 = vrot.slane %v15676_v17, %v17161_v60  ;;  %v7520_v50 = vrot.slane %v15671_v22, %v17162_v13  ;;  %v7690_v41 = vrot.slane %v15676_v17, %v17162_v13 }
0x1453   :  { %v15767_v1 = vsel %vm10806_vm6, %v7512_v18, %v7682_v11  ;;  %v7516_v16 = vrot.slane %v15671_v22, %v17163_v61  ;;  %v7686_v6 = vrot.slane %v15676_v17, %v17163_v61  ;;  %v7528_v36 = vrot.slane %v15695_v12, %v17155_v10 }
0x1454   :  { %v15777_v35 = vsel %vm10806_vm6, %v7508_v33, %v7678_v63  ;;  %v15781_v23 = vsel %vm10806_vm6, %v7520_v50, %v7690_v41  ;;  %v7698_v37 = vrot.slane %v15700_v0, %v17155_v10  ;;  %v7524_v22 = vrot.slane %v15695_v12, %v17156_v55 }
0x1455   :  { %v15789_v17 = vsel %vm10806_vm6, %v7516_v16, %v7686_v6  ;;  %v7694_v49 = vrot.slane %v15700_v0, %v17156_v55  ;;  %v7536_v29 = vrot.slane %v15695_v12, %v17157_v58  ;;  %v7706_v54 = vrot.slane %v15700_v0, %v17157_v58 }
0x1456   :  { %8088 = vmatmul.mubr.bf16.vlgmr.msra.gmra.mrb[60].mxu0 %v7789_v40  ;;  %v15799_v30 = vsel %vm10806_vm6, %v7528_v36, %v7698_v37  ;;  %v7532_v56 = vrot.slane %v15695_v12, %v17158_v53  ;;  %v7702_v24 = vrot.slane %v15700_v0, %v17158_v53  ;;  %v7544_v38 = vrot.slane %v15695_v12, %v17159_v42 }
0x1457   :  { %8127 = vmatprep.mubr.bf16.mxu0 %v7792_v3  ;;  %8096 = vmatpush1.bf16.xpose.msra.mxu0 %v8941_v52  ;;  %v15812_v40 = vsel %vm10806_vm6, %v7524_v22, %v7694_v49  ;;  %v15816_v44 = vsel %vm10806_vm6, %v7536_v29, %v7706_v54  ;;  %v7714_v47 = vrot.slane %v15700_v0, %v17159_v42  ;;  %v7841_v29 = vld [vmem:[#allocation7 + $0xb0] sm:$0x11] }
0x1458   :  { %8135 = vmatprep.subr.bf16.mxu0 %v8944_v51  ;;  %v15825_v3 = vsel %vm10806_vm6, %v7532_v56, %v7702_v24  ;;  %v7540_v28 = vrot.slane %v15695_v12, %v17161_v60  ;;  %v7710_v32 = vrot.slane %v15700_v0, %v17161_v60  ;;  %v7552_v52 = vrot.slane %v15695_v12, %v17162_v13  ;;  %v7842_v56 = vld [vmem:[#allocation7 + $0xb8] sm:$0x11] }
0x1459   :  { %v15835_v15 = vsel %vm10806_vm6, %v7544_v38, %v7714_v47  ;;  %v7722_v51 = vrot.slane %v15700_v0, %v17162_v13  ;;  %v7548_v59 = vrot.slane %v15695_v12, %v17163_v61  ;;  %v7718_v43 = vrot.slane %v15700_v0, %v17163_v61 }
0x145a   :  { %v15845_v26 = vsel %vm10806_vm6, %v7540_v28, %v7710_v32  ;;  %v7560_v4 = vrot.slane %v15707_v9, %v17155_v10  ;;  %v7730_v62 = vrot.slane %v15713_v19, %v17155_v10  ;;  %v7556_v0 = vrot.slane %v15707_v9, %v17156_v55 }
0x145b   :  { %v15853_v34 = vsel %vm10806_vm6, %v7552_v52, %v7722_v51  ;;  %v15857_v12 = vsel %vm10806_vm6, %v7548_v59, %v7718_v43  ;;  %v7726_v39 = vrot.slane %v15713_v19, %v17156_v55  ;;  %v7568_v10 = vrot.slane %v15707_v9, %v17157_v58 }
0x145c   :  { %v15863_v21 = vsel %vm10806_vm6, %v7560_v4, %v7730_v62  ;;  %v7738_v48 = vrot.slane %v15713_v19, %v17157_v58  ;;  %v8943_v18 = vcombine.low %v15661_v2, %v15663_v57  ;;  %v8946_v11 = vcombine.high %v7823_v46, %v7839_v8 }
0x145d   :  { %v7564_v33 = vrot.slane %v15707_v9, %v17158_v53  ;;  %v7734_v63 = vrot.slane %v15713_v19, %v17158_v53  ;;  %v15879_v50 = vsel %vm10806_vm6, %v7556_v0, %v7726_v39  ;;  %v7576_v58 = vrot.slane %v15707_v9, %v17159_v42 }
0x145e   :  { %v15883_v55 = vsel %vm10806_vm6, %v7568_v10, %v7738_v48  ;;  %v7746_v2 = vrot.slane %v15713_v19, %v17159_v42  ;;  %v7572_v53 = vrot.slane %v15707_v9, %v17161_v60  ;;  %v7742_v41 = vrot.slane %v15713_v19, %v17161_v60 }
0x145f   :  { %v15891_v57 = vsel %vm10806_vm6, %v7564_v33, %v7734_v63  ;;  %v7584_v16 = vrot.slane %v15707_v9, %v17162_v13  ;;  %v7754_v42 = vrot.slane %v15713_v19, %v17162_v13  ;;  %v7580_v36 = vrot.slane %v15707_v9, %v17163_v61  ;;  %v7824_v13 = vld [vmem:[#allocation7 + $0x28] sm:$0xff] }
0x1460   :  { %v15901_v6 = vsel %vm10806_vm6, %v7576_v58, %v7746_v2  ;;  %v7750_v37 = vrot.slane %v15713_v19, %v17163_v61  ;;  %v15911_v22 = vsel %vm10806_vm6, %v7572_v53, %v7742_v41  ;;  %v7840_v9 = vld [vmem:[#allocation7 + $0xa8] sm:$0x11]  ;;  %v8945_v61 = vcombine.low %v7823_v46, %v7839_v8 }
0x1461   :  { %v15916_v60 = vsel %vm10806_vm6, %v7584_v16, %v7754_v42  ;;  %v8948_v19 = vcombine.high %v7824_v13, %v7840_v9  ;;  %v8947_v54 = vcombine.low %v7824_v13, %v7840_v9 }
0x1462   :  { %8128 = vmatmul.mubr.bf16.vlgmr.msra.gmra.mrb[60].mxu0 %v15704_v7  ;;  %v15920_v49 = vsel %vm10806_vm6, %v7580_v36, %v7750_v37  ;;  %v7825_v7 = vld [vmem:[#allocation7 + $0x30] sm:$0xff]  ;;  %vm8655_vm6 = vcmask 74752  }
0x1463   :  { %8167 = vmatprep.mubr.bf16.mxu0 %v15717_v45  ;;  %8136 = vmatpush1.bf16.xpose.msra.mxu0 %v8943_v18  ;;  %v8950_v31 = vcombine.high %v7825_v7, %v7841_v29  ;;  %v7826_v45 = vld [vmem:[#allocation7 + $0x38] sm:$0xff]  ;;  %v8949_v24 = vcombine.low %v7825_v7, %v7841_v29 }
0x1464   :  { %8175 = vmatprep.subr.bf16.mxu0 %v8946_v11  ;;  %v8952_v38 = vcombine.high %v7826_v45, %v7842_v56  ;;  %v8951_v47 = vcombine.low %v7826_v45, %v7842_v56 }
0x146e   :  { %8168 = vmatmul.mubr.bf16.vlgmr.msra.gmra.mrb[60].mxu0 %v15725_v14  ;;  %v7827_v14 = vld [vmem:[#allocation7 + $0x40] sm:$0xff] }
0x146f   :  { %8207 = vmatprep.mubr.bf16.mxu0 %v15735_v20  ;;  %8176 = vmatpush1.bf16.xpose.msra.mxu0 %v8945_v61  ;;  %v7843_v20 = vld [vmem:[#allocation7 + $0xc0] sm:$0x11] }
0x1470   :  { %8215 = vmatprep.subr.bf16.mxu0 %v8948_v19  ;;  %v8954_v28 = vcombine.high %v7827_v14, %v7843_v20  ;;  %v8953_v32 = vcombine.low %v7827_v14, %v7843_v20 }
0x147a   :  { %8208 = vmatmul.mubr.bf16.vlgmr.msra.gmra.mrb[60].mxu0 %v15745_v5  ;;  %v7828_v5 = vld [vmem:[#allocation7 + $0x48] sm:$0xff] }
0x147b   :  { %8247 = vmatprep.mubr.bf16.mxu0 %v15749_v27  ;;  %8216 = vmatpush1.bf16.xpose.msra.mxu0 %v8947_v54  ;;  %v7844_v27 = vld [vmem:[#allocation7 + $0xc8] sm:$0x11] }
0x147c   :  { %8255 = vmatprep.subr.bf16.mxu0 %v8950_v31  ;;  %v8956_v52 = vcombine.high %v7828_v5, %v7844_v27  ;;  %v8955_v51 = vcombine.low %v7828_v5, %v7844_v27 }
0x1486   :  { %8248 = vmatmul.mubr.bf16.vlgmr.msra.gmra.mrb[60].mxu0 %v15757_v25  ;;  %v7829_v25 = vld [vmem:[#allocation7 + $0x50] sm:$0xff] }
0x1487   :  { %8287 = vmatprep.mubr.bf16.mxu0 %v15767_v1  ;;  %8256 = vmatpush1.bf16.xpose.msra.mxu0 %v8949_v24  ;;  %v7845_v1 = vld [vmem:[#allocation7 + $0xd0] sm:$0x11] }
0x1488   :  { %8295 = vmatprep.subr.bf16.mxu0 %v8952_v38  ;;  %v8958_v59 = vcombine.high %v7829_v25, %v7845_v1  ;;  %v8957_v43 = vcombine.low %v7829_v25, %v7845_v1 }
0x1492   :  { %8288 = vmatmul.mubr.bf16.vlgmr.msra.gmra.mrb[60].mxu0 %v15777_v35  ;;  %v7830_v35 = vld [vmem:[#allocation7 + $0x58] sm:$0xff] }
0x1493   :  { %8327 = vmatprep.mubr.bf16.mxu0 %v15781_v23  ;;  %8296 = vmatpush1.bf16.xpose.msra.mxu0 %v8951_v47  ;;  %v7846_v23 = vld [vmem:[#allocation7 + $0xd8] sm:$0x11] }
0x1494   :  { %8335 = vmatprep.subr.bf16.mxu0 %v8954_v28  ;;  %v8960_v46 = vcombine.high %v7830_v35, %v7846_v23  ;;  %v8959_v8 = vcombine.low %v7830_v35, %v7846_v23 }
0x149e   :  { %8328 = vmatmul.mubr.bf16.vlgmr.msra.gmra.mrb[60].mxu0 %v15789_v17  ;;  %v7831_v17 = vld [vmem:[#allocation7 + $0x60] sm:$0xff] }
0x149f   :  { %8367 = vmatprep.mubr.bf16.mxu0 %v15799_v30  ;;  %8336 = vmatpush1.bf16.xpose.msra.mxu0 %v8953_v32  ;;  %v7847_v30 = vld [vmem:[#allocation7 + $0xe0] sm:$0x11] }
0x14a0   :  { %8375 = vmatprep.subr.bf16.mxu0 %v8956_v52  ;;  %v8962_v4 = vcombine.high %v7831_v17, %v7847_v30  ;;  %v8961_v62 = vcombine.low %v7831_v17, %v7847_v30 }
0x14aa   :  { %8368 = vmatmul.mubr.bf16.vlgmr.msra.gmra.mrb[60].mxu0 %v15812_v40  ;;  %v7832_v40 = vld [vmem:[#allocation7 + $0x68] sm:$0xff] }
0x14ab   :  { %8407 = vmatprep.mubr.bf16.mxu0 %v15816_v44  ;;  %8376 = vmatpush1.bf16.xpose.msra.mxu0 %v8955_v51  ;;  %v7848_v44 = vld [vmem:[#allocation7 + $0xe8] sm:$0x11] }
0x14ac   :  { %8415 = vmatprep.subr.bf16.mxu0 %v8958_v59  ;;  %v8964_v0 = vcombine.high %v7832_v40, %v7848_v44  ;;  %v8963_v39 = vcombine.low %v7832_v40, %v7848_v44 }
0x14b6   :  { %8408 = vmatmul.mubr.bf16.vlgmr.msra.gmra.mrb[60].mxu0 %v15825_v3  ;;  %v7833_v3 = vld [vmem:[#allocation7 + $0x70] sm:$0xff] }
0x14b7   :  { %8447 = vmatprep.mubr.bf16.mxu0 %v15835_v15  ;;  %8416 = vmatpush1.bf16.xpose.msra.mxu0 %v8957_v43  ;;  %v7849_v15 = vld [vmem:[#allocation7 + $0xf0] sm:$0x11] }
0x14b8   :  { %8455 = vmatprep.subr.bf16.mxu0 %v8960_v46  ;;  %v8966_v10 = vcombine.high %v7833_v3, %v7849_v15  ;;  %v8965_v48 = vcombine.low %v7833_v3, %v7849_v15 }
0x14c2   :  { %8448 = vmatmul.mubr.bf16.vlgmr.msra.gmra.mrb[60].mxu0 %v15845_v26  ;;  %v7834_v26 = vld [vmem:[#allocation7 + $0x78] sm:$0xff] }
0x14c3   :  { %8487 = vmatprep.mubr.bf16.mxu0 %v15853_v34  ;;  %8456 = vmatpush1.bf16.xpose.msra.mxu0 %v8959_v8  ;;  %v7850_v34 = vld [vmem:[#allocation7 + $0xf8] sm:$0x11] }
0x14c4   :  { %8495 = vmatprep.subr.bf16.mxu0 %v8962_v4  ;;  %v8968_v18 = vcombine.high %v7834_v26, %v7850_v34 }
0x14ce   :  { %8488 = vmatmul.mubr.bf16.vlgmr.msra.gmra.mrb[60].mxu0 %v15857_v12  ;;  %v8967_v12 = vcombine.low %v7834_v26, %v7850_v34 }
0x14cf   :  { %8527 = vmatprep.mubr.bf16.mxu0 %v15863_v21  ;;  %8496 = vmatpush1.bf16.xpose.msra.mxu0 %v8961_v62  ;;  %v8936_v21 = vld [vmem:[%s15966_s3 + $0x2] ss:$0 sm:$0xff] }
0x14d0   :  { %8535 = vmatprep.subr.bf16.mxu0 %v8964_v0 }
0x14da   :  { %8528 = vmatmul.mubr.bf16.vlgmr.msra.gmra.mrb[60].mxu0 %v15879_v50 }
0x14db   :  { %8567 = vmatprep.mubr.bf16.mxu0 %v15883_v55  ;;  %8536 = vmatpush1.bf16.xpose.msra.mxu0 %v8963_v39 }
0x14dc   :  { %8575 = vmatprep.subr.bf16.mxu0 %v8966_v10 }
0x14e6   :  { %8568 = vmatmul.mubr.bf16.vlgmr.msra.gmra.mrb[60].mxu0 %v15891_v57 }
0x14e7   :  { %8607 = vmatprep.mubr.bf16.mxu0 %v15901_v6  ;;  %8576 = vmatpush1.bf16.xpose.msra.mxu0 %v8965_v48 }
0x14e8   :  { %8615 = vmatprep.subr.bf16.mxu0 %v8968_v18 }
0x14f2   :  { %8608 = vmatmul.mubr.bf16.vlgmr.msra.gmra.mrb[60].mxu0 %v15911_v22 }
0x14f3   :  { %8647 = vmatprep.mubr.bf16.mxu0 %v15916_v60  ;;  %8616 = vmatpush1.bf16.xpose.msra.mxu0 %v8967_v12 }
0x14fe   :  { %8648 = vmatmul.mubr.bf16.vlgmr.msra.gmra.mrb[60].mxu0 %v15920_v49 }
0x15d1   :  { %v8649_v11 = vpop.f32.mrb[60].mxu0 }
0x15d2   :  { %v9201_v33 = vadd.f32 %v8936_v21, %v8649_v11  ;;  %v8651_v63 = vpop.f32.mrb[61].mxu0 }
0x15d3   :  { %v8652_v50 = vpop.f32.mrb[62].mxu0 }
0x15d4   :  { %v8653_v55 = vpop.f32.mrb[63].mxu0  ;;  %8656 = vst.msk [vmem:[#allocation8] sm:$0x3] %vm8655_vm6, %v9201_v33 }
0x15d5   :  { %10096 = shalt.err (!%p10093_p0)
}
0x15d6   :  { %s10097_s3 = scalar_lea.hbm %s15970_s7, 32 }
0x15d7   :  { %p10098_p1 = scmp.ne.s32.totalorder %s15970_s7, %s10097_s3  ;;  %p10101_p2 = scmp.lt.u32.totalorder %s10097_s3, %s15970_s7 }
0x15d9   :  { %p10103_p3 = pnand %p10101_p2, %p10098_p1 }
0x15db   :  { %10106 = shalt.err (!%p10103_p3)
}
0x15dc   :  { %8666 = dma.vmem_to_hbm [thread:$0]  %s8664_s27, 32, %s15970_s7, [#allocation4]  }
0x15dd   :  { %10111 = dma.done.wait [#allocation4], 32  }
0x15de   :  { %10112 = vsyncadd [#allocation4], 4294967264 }
0x15df   :  { %8670 = vsyncpa [#allocation3], 1 }
0x15e0   :  { %8671 = vsyncpa [#allocation6], 1 }
0x15e1   :  { %8672 = vsyncpa [#allocation4], 1 }

</bundles_post_ra>
